<compile_context>
chip_gen: v6e
topology: v6e:2x2x1
jax: 0.10.0
libtpu: 0.0.40
codegen_flags: <defaults>
</compile_context>

<pallas_src>
import functools
import numpy as np
import jax
import jax.numpy as jnp
from jax.experimental import pallas as pl
from jax.experimental.pallas import tpu as pltpu

EPS = 1e-5                       # torch nn.LayerNorm default
INV_SQRT2 = 0.7071067811865476   # 1/sqrt(2) for exact GELU


# ----------------------------- Pallas kernels -----------------------------

def _win_attn_kernel(x_ref, g1_ref, b1_ref, bias_ref, wqkv_ref, bqkv_ref,
                     wproj_ref, bproj_ref, *rest,
                     num_heads, head_dim, has_mask, fused):
    """One image's nW windows per step: LN + W-MSA + proj (+ residual)."""
    if has_mask:
        mask_ref, o_ref = rest
    else:
        (o_ref,) = rest
        mask_ref = None

    x = x_ref[...].astype(jnp.float32)                  # (nW, N, C)
    nW, N, C = x.shape

    if fused:
        # LayerNorm fused in (f32 statistics)
        mu = jnp.mean(x, axis=-1, keepdims=True)
        var = jnp.mean((x - mu) ** 2, axis=-1, keepdims=True)
        xn = (x - mu) * jax.lax.rsqrt(var + EPS) * g1_ref[...] + b1_ref[...]
    else:
        xn = x                                           # already normalized

    # QKV projection: one bf16 matmul over all windows, f32 accumulate.
    x2d = xn.reshape(nW * N, C).astype(jnp.bfloat16)
    qkv = jnp.dot(x2d, wqkv_ref[...].astype(jnp.bfloat16),
                  preferred_element_type=jnp.float32) + bqkv_ref[...]  # (nW*N, 3C)

    scale = jnp.float32(head_dim ** -0.5)
    if has_mask:
        mask = mask_ref[...].astype(jnp.float32)         # (nW, N, N)
    wproj = wproj_ref[...].astype(jnp.bfloat16)

    acc = jnp.zeros((nW * N, C), jnp.float32)
    for h in range(num_heads):                           # unrolled, no concat
        q = qkv[:, h * head_dim:(h + 1) * head_dim].reshape(nW, N, head_dim)
        k = qkv[:, C + h * head_dim:C + (h + 1) * head_dim].reshape(nW, N, head_dim)
        v = qkv[:, 2 * C + h * head_dim:2 * C + (h + 1) * head_dim].reshape(nW, N, head_dim)

        s = jnp.einsum('wnd,wmd->wnm',
                       q.astype(jnp.bfloat16), k.astype(jnp.bfloat16),
                       preferred_element_type=jnp.float32) * scale
        s = s + bias_ref[h].astype(jnp.float32)
        if has_mask:
            s = s + mask
        p_attn = jax.nn.softmax(s, axis=-1)              # f32 softmax

        oh = jnp.einsum('wnm,wmd->wnd',
                        p_attn.astype(jnp.bfloat16), v.astype(jnp.bfloat16),
                        preferred_element_type=jnp.float32)
        # fold the output projection per head: out += oh @ wproj[h*hd:(h+1)*hd]
        acc = acc + jnp.dot(oh.reshape(nW * N, head_dim).astype(jnp.bfloat16),
                            wproj[h * head_dim:(h + 1) * head_dim, :],
                            preferred_element_type=jnp.float32)

    out = (acc + bproj_ref[...]).reshape(nW, N, C)
    if fused:
        out = out + x                                    # shortcut residual
    o_ref[...] = out.astype(o_ref.dtype)


def window_attention(win, rel_bias, p, num_heads, nW, mask, fused):
    B_, N, C = win.shape
    kernel = functools.partial(_win_attn_kernel, num_heads=num_heads,
                               head_dim=C // num_heads,
                               has_mask=mask is not None, fused=fused)
    in_specs = [pl.BlockSpec((nW, N, C), lambda b: (b, 0, 0)),
                pl.BlockSpec((1, C), lambda b: (0, 0)),
                pl.BlockSpec((1, C), lambda b: (0, 0)),
                pl.BlockSpec((num_heads, N, N), lambda b: (0, 0, 0)),
                pl.BlockSpec((C, 3 * C), lambda b: (0, 0)),
                pl.BlockSpec((1, 3 * C), lambda b: (0, 0)),
                pl.BlockSpec((C, C), lambda b: (0, 0)),
                pl.BlockSpec((1, C), lambda b: (0, 0))]
    args = [win, p["g1"].reshape(1, C), p["b1"].reshape(1, C), rel_bias,
            p["wqkv"], p["bqkv"].reshape(1, -1), p["wproj"],
            p["bproj"].reshape(1, -1)]
    if mask is not None:
        in_specs.append(pl.BlockSpec((nW, N, N), lambda b: (0, 0, 0)))
        args.append(mask)
    return pl.pallas_call(
        kernel,
        out_shape=jax.ShapeDtypeStruct((B_, N, C), win.dtype),
        grid=(B_ // nW,),
        in_specs=in_specs,
        out_specs=pl.BlockSpec((nW, N, C), lambda b: (b, 0, 0)),
        compiler_params=pltpu.CompilerParams(
            dimension_semantics=("parallel",)),
    )(*args)


def _mlp_kernel(x_ref, g_ref, b_ref, w1_ref, b1_ref, w2_ref, b2_ref, o_ref):
    # fused: out = x + fc2(gelu(fc1(layernorm(x)))) on a row tile
    x = x_ref[...].astype(jnp.float32)
    mu = jnp.mean(x, axis=-1, keepdims=True)
    var = jnp.mean((x - mu) ** 2, axis=-1, keepdims=True)
    xn = (x - mu) * jax.lax.rsqrt(var + EPS) * g_ref[...] + b_ref[...]
    h = jnp.dot(xn.astype(jnp.bfloat16), w1_ref[...].astype(jnp.bfloat16),
                preferred_element_type=jnp.float32) + b1_ref[...]
    h = 0.5 * h * (1.0 + jax.lax.erf(h * INV_SQRT2))     # exact GELU (torch)
    y = jnp.dot(h.astype(jnp.bfloat16), w2_ref[...].astype(jnp.bfloat16),
                preferred_element_type=jnp.float32) + b2_ref[...]
    o_ref[...] = (x + y).astype(o_ref.dtype)


def _pick_row_tile(rows, target=512):
    if rows <= target or rows % 8 != 0:
        return rows
    return target          # multiple of 8; partial last block handled by Pallas


def mlp_block(x2d, p):
    R, C = x2d.shape
    Hd = p["w1"].shape[1]
    TR = _pick_row_tile(R)
    return pl.pallas_call(
        _mlp_kernel,
        out_shape=jax.ShapeDtypeStruct((R, C), x2d.dtype),
        grid=(pl.cdiv(R, TR),),
        in_specs=[pl.BlockSpec((TR, C), lambda i: (i, 0)),
                  pl.BlockSpec((1, C), lambda i: (0, 0)),
                  pl.BlockSpec((1, C), lambda i: (0, 0)),
                  pl.BlockSpec((C, Hd), lambda i: (0, 0)),
                  pl.BlockSpec((1, Hd), lambda i: (0, 0)),
                  pl.BlockSpec((Hd, C), lambda i: (0, 0)),
                  pl.BlockSpec((1, C), lambda i: (0, 0))],
        out_specs=pl.BlockSpec((TR, C), lambda i: (i, 0)),
        compiler_params=pltpu.CompilerParams(
            dimension_semantics=("parallel",)),
    )(x2d, p["g2"].reshape(1, C), p["b2"].reshape(1, C), p["w1"],
      p["bb1"].reshape(1, Hd), p["w2"], p["bb2"].reshape(1, C))


def _patch_expand_kernel(x_ref, w_ref, g_ref, b_ref, o_ref, *, H, W):
    # fused: expand linear + per-output-token LayerNorm; output layout chosen
    # so the 2x2 pixel shuffle becomes a free reshape outside the kernel.
    x = x_ref[0].astype(jnp.bfloat16)                    # (L=H*W, C)
    L, C = x.shape
    c = C // 2
    y = jnp.dot(x, w_ref[...].astype(jnp.bfloat16),
                preferred_element_type=jnp.float32)      # (L, 2C)
    # group LayerNorm over each c-sized chunk (one chunk = one output token)
    groups = []
    for gi in range(4):
        seg = y[:, gi * c:(gi + 1) * c]
        mu = jnp.mean(seg, axis=-1, keepdims=True)
        var = jnp.mean((seg - mu) ** 2, axis=-1, keepdims=True)
        groups.append((seg - mu) * jax.lax.rsqrt(var + EPS)
                      * g_ref[...] + b_ref[...])
    yn = jnp.concatenate(groups, axis=-1)                # (L, 2C)
    half0 = yn[:, :C].reshape(H, W, C)                   # p1 = 0 rows
    half1 = yn[:, C:].reshape(H, W, C)                   # p1 = 1 rows
    o_ref[0, :, 0, :, :] = half0.astype(o_ref.dtype)
    o_ref[0, :, 1, :, :] = half1.astype(o_ref.dtype)


def patch_expand_forward(x, H, W, up):
    B, L, C = x.shape
    c = C // 2
    kernel = functools.partial(_patch_expand_kernel, H=H, W=W)
    out = pl.pallas_call(
        kernel,
        out_shape=jax.ShapeDtypeStruct((B, H, 2, W, C), x.dtype),
        grid=(B,),
        in_specs=[pl.BlockSpec((1, L, C), lambda b: (b, 0, 0)),
                  pl.BlockSpec((C, 2 * C), lambda b: (0, 0)),
                  pl.BlockSpec((1, c), lambda b: (0, 0)),
                  pl.BlockSpec((1, c), lambda b: (0, 0))],
        out_specs=pl.BlockSpec((1, H, 2, W, C), lambda b: (b, 0, 0, 0, 0)),
        compiler_params=pltpu.CompilerParams(
            dimension_semantics=("parallel",)),
    )(x, up["w"], up["g"].reshape(1, c), up["b"].reshape(1, c))
    # (B, H, 2, W, C) flattens as (b, h, p1, w, p2, c) -> pure (free) reshape
    out = out.reshape(B, 4 * L, c)
    return out, 2 * H, 2 * W


# ------------------------------- glue (JAX) -------------------------------

def window_partition(x, ws):
    B, H, W, C = x.shape
    x = x.reshape(B, H // ws, ws, W // ws, ws, C)
    return x.transpose(0, 1, 3, 2, 4, 5).reshape(-1, ws, ws, C)


def window_reverse(windows, ws, H, W):
    B = windows.shape[0] // ((H // ws) * (W // ws))
    x = windows.reshape(B, H // ws, W // ws, ws, ws, -1)
    return x.transpose(0, 1, 3, 2, 4, 5).reshape(B, H, W, -1)


def create_mask_np(H, W, ws, shift):
    Hp = int(np.ceil(H / ws)) * ws
    Wp = int(np.ceil(W / ws)) * ws
    img_mask = np.zeros((1, Hp, Wp, 1), np.float32)
    h_slices = (slice(0, -ws), slice(-ws, -shift), slice(-shift, None))
    w_slices = (slice(0, -ws), slice(-ws, -shift), slice(-shift, None))
    cnt = 0
    for h in h_slices:
        for w in w_slices:
            img_mask[:, h, w, :] = cnt
            cnt += 1
    B, Hm, Wm, C = img_mask.shape
    mw = img_mask.reshape(B, Hm // ws, ws, Wm // ws, ws, C)
    mw = mw.transpose(0, 1, 3, 2, 4, 5).reshape(-1, ws * ws)
    attn_mask = mw[:, None, :] - mw[:, :, None]
    return np.where(attn_mask != 0, -100.0, 0.0).astype(np.float32)  # (nW,N,N)


def relative_position_index_np(ws):
    coords = np.stack(np.meshgrid(np.arange(ws), np.arange(ws), indexing='ij'))
    coords_flat = coords.reshape(2, -1)
    rel = coords_flat[:, :, None] - coords_flat[:, None, :]
    rel = rel.transpose(1, 2, 0).astype(np.int64)
    rel[:, :, 0] += ws - 1
    rel[:, :, 1] += ws - 1
    rel[:, :, 0] *= 2 * ws - 1
    return rel.sum(-1)  # (N, N)


def _ln_xla(x, g, b):
    mu = jnp.mean(x, axis=-1, keepdims=True)
    var = jnp.mean((x - mu) ** 2, axis=-1, keepdims=True)
    return (x - mu) * jax.lax.rsqrt(var + EPS) * g + b


def swin_block_forward(x, p, rel_bias, H, W, ws, shift, num_heads, attn_mask):
    B, L, C = x.shape
    N = ws * ws
    pad_r = (ws - W % ws) % ws
    pad_b = (ws - H % ws) % ws
    fused = (pad_r == 0 and pad_b == 0)   # LN+residual fused into the kernel

    if fused:
        src = x.reshape(B, H, W, C)
    else:
        # TODO(synk): rare padded path — LN must precede zero padding to match
        # torch; done in XLA here, attention kernel runs in non-fused mode.
        src = _ln_xla(x, p["g1"], p["b1"]).reshape(B, H, W, C)
        src = jnp.pad(src, ((0, 0), (0, pad_b), (0, pad_r), (0, 0)))
    Hp, Wp = H + pad_b, W + pad_r

    if shift > 0:
        src = jnp.roll(src, (-shift, -shift), axis=(1, 2))

    win = window_partition(src, ws).reshape(-1, N, C)
    nW = (Hp // ws) * (Wp // ws)
    mask = attn_mask if shift > 0 else None     # no zero-mask DMA for shift==0

    attn_win = window_attention(win, rel_bias, p, num_heads, nW, mask, fused)

    out = window_reverse(attn_win.reshape(-1, ws, ws, C), ws, Hp, Wp)
    if shift > 0:
        out = jnp.roll(out, (shift, shift), axis=(1, 2))
    out = out[:, :H, :W, :].reshape(B, L, C)

    x = out if fused else x + out               # fused kernel added residual
    x = mlp_block(x.reshape(-1, C), p).reshape(B, L, C)
    return x


@functools.partial(jax.jit, static_argnums=(1, 2, 4, 5, 6))
def _basic_layer_up(x, H, W, params, depth, ws, num_heads):
    shift = ws // 2
    attn_mask = jnp.asarray(create_mask_np(H, W, ws, shift))
    N = ws * ws
    for i in range(depth):
        p = params["blocks"][i]
        # hoisted relative-position-bias construction (once per block)
        rel_bias = p["rel_table"][p["rel_index"].reshape(-1)]
        rel_bias = rel_bias.reshape(N, N, num_heads).transpose(2, 0, 1)
        ss = 0 if i % 2 == 0 else shift
        x = swin_block_forward(x, p, rel_bias, H, W, ws, ss, num_heads,
                               attn_mask)
    if params["upsample"] is not None:
        x, _, _ = patch_expand_forward(x, H, W, params["upsample"])
    return x


def basic_layer_up_forward(x, H, W, params, depth, ws, num_heads):
    out = _basic_layer_up(x, H, W, params, depth, ws, num_heads)
    if params["upsample"] is not None:
        return out, 2 * H, 2 * W
    return out, H, W


# ------------------------------ param init --------------------------------

def init_params(key, dim, depth, num_heads, ws, mlp_ratio):
    hidden = int(dim * mlp_ratio)
    rel_index = jnp.asarray(relative_position_index_np(ws))
    blocks = []
    for _ in range(depth):
        keys = jax.random.split(key, 8)
        key = keys[-1]
        blk = {
            "g1": jnp.ones((dim,), jnp.float32),
            "b1": jnp.zeros((dim,), jnp.float32),
            "wqkv": 0.02 * jax.random.normal(keys[0], (dim, 3 * dim), jnp.float32),
            "bqkv": jnp.zeros((3 * dim,), jnp.float32),
            "wproj": 0.02 * jax.random.normal(keys[1], (dim, dim), jnp.float32),
            "bproj": jnp.zeros((dim,), jnp.float32),
            "rel_table": 0.02 * jax.random.normal(
                keys[2], ((2 * ws - 1) * (2 * ws - 1), num_heads), jnp.float32),
            "rel_index": rel_index,
            "g2": jnp.ones((dim,), jnp.float32),
            "b2": jnp.zeros((dim,), jnp.float32),
            "w1": 0.02 * jax.random.normal(keys[3], (dim, hidden), jnp.float32),
            "bb1": jnp.zeros((hidden,), jnp.float32),
            "w2": 0.02 * jax.random.normal(keys[4], (hidden, dim), jnp.float32),
            "bb2": jnp.zeros((dim,), jnp.float32),
        }
        blocks.append(blk)
    kup = jax.random.split(key, 2)
    upsample = {
        "w": 0.02 * jax.random.normal(kup[0], (dim, 2 * dim), jnp.float32),
        "g": jnp.ones((dim // 2,), jnp.float32),
        "b": jnp.zeros((dim // 2,), jnp.float32),
    }
    return {"blocks": blocks, "upsample": upsample}


# --------------------------------- main ------------------------------------

if __name__ == "__main__":
    B, H, W = 2, 8, 8
    dim, depth, num_heads, window_size, mlp_ratio = 32, 2, 4, 4, 4.0
    L = H * W

    key = jax.random.PRNGKey(0)
    kx, kp = jax.random.split(key)
    x = jax.random.normal(kx, (B, L, dim), jnp.float32)
    params = init_params(kp, dim, depth, num_heads, window_size, mlp_ratio)

    out, Ho, Wo = basic_layer_up_forward(x, H, W, params, depth,
                                         window_size, num_heads)
    out = jax.block_until_ready(out)
    assert out.shape == (B, 4 * L, dim // 2), out.shape
    assert (Ho, Wo) == (2 * H, 2 * W)
    assert bool(jnp.all(jnp.isfinite(out)))
    print("KERNEL_OK")
</pallas_src>

<mosaic_0001>
module attributes {stable_mosaic.version = 11 : i64} {
  func.func @_win_attn_kernel(%arg0: i32, %arg1: memref<4x16x32xf32, #tpu.memory_space<vmem>>, %arg2: memref<1x32xf32, #tpu.memory_space<vmem>>, %arg3: memref<1x32xf32, #tpu.memory_space<vmem>>, %arg4: memref<4x16x16xf32, #tpu.memory_space<vmem>>, %arg5: memref<32x96xf32, #tpu.memory_space<vmem>>, %arg6: memref<1x96xf32, #tpu.memory_space<vmem>>, %arg7: memref<32x32xf32, #tpu.memory_space<vmem>>, %arg8: memref<1x32xf32, #tpu.memory_space<vmem>>, %arg9: memref<4x16x32xf32, #tpu.memory_space<vmem>>) attributes {dimension_semantics = [#tpu.dimension_semantics<parallel>], iteration_bounds = array<i64: 2>, scalar_prefetch = 0 : i64, scratch_operands = 0 : i64, tpu.core_type = #tpu.core_type<tc>, window_params = [{transform_indices = @transform_0, window_bounds = array<i64: 4, 16, 32>}, {pipeline_mode = #tpu.pipeline_mode<synchronous>, transform_indices = @transform_1, window_bounds = array<i64: 1, 32>}, {pipeline_mode = #tpu.pipeline_mode<synchronous>, transform_indices = @transform_2, window_bounds = array<i64: 1, 32>}, {pipeline_mode = #tpu.pipeline_mode<synchronous>, transform_indices = @transform_3, window_bounds = array<i64: 4, 16, 16>}, {pipeline_mode = #tpu.pipeline_mode<synchronous>, transform_indices = @transform_4, window_bounds = array<i64: 32, 96>}, {pipeline_mode = #tpu.pipeline_mode<synchronous>, transform_indices = @transform_5, window_bounds = array<i64: 1, 96>}, {pipeline_mode = #tpu.pipeline_mode<synchronous>, transform_indices = @transform_6, window_bounds = array<i64: 32, 32>}, {pipeline_mode = #tpu.pipeline_mode<synchronous>, transform_indices = @transform_7, window_bounds = array<i64: 1, 32>}, {transform_indices = @transform_8, window_bounds = array<i64: 4, 16, 32>}]} {
    %c0 = arith.constant 0 : index
    %c0_0 = arith.constant 0 : index
    %c0_1 = arith.constant 0 : index
    %0 = vector.load %arg1[%c0, %c0_0, %c0_1] : memref<4x16x32xf32, #tpu.memory_space<vmem>>, vector<4x16x32xf32>
    %cst = arith.constant dense<0.000000e+00> : vector<4x16xf32>
    %1 = vector.multi_reduction <add>, %0, %cst [2] : vector<4x16x32xf32> to vector<4x16xf32>
    %2 = vector.shape_cast %1 : vector<4x16xf32> to vector<4x16x1xf32>
    %cst_2 = arith.constant 3.200000e+01 : f32
    %3 = vector.broadcast %cst_2 : f32 to vector<4x16x1xf32>
    %4 = arith.divf %2, %3 : vector<4x16x1xf32>
    %5 = vector.broadcast %4 : vector<4x16x1xf32> to vector<4x16x32xf32>
    %6 = arith.subf %0, %5 : vector<4x16x32xf32>
    %7 = arith.mulf %6, %6 : vector<4x16x32xf32>
    %cst_3 = arith.constant dense<0.000000e+00> : vector<4x16xf32>
    %8 = vector.multi_reduction <add>, %7, %cst_3 [2] : vector<4x16x32xf32> to vector<4x16xf32>
    %9 = vector.shape_cast %8 : vector<4x16xf32> to vector<4x16x1xf32>
    %cst_4 = arith.constant 3.200000e+01 : f32
    %10 = vector.broadcast %cst_4 : f32 to vector<4x16x1xf32>
    %11 = arith.divf %9, %10 : vector<4x16x1xf32>
    %12 = vector.broadcast %4 : vector<4x16x1xf32> to vector<4x16x32xf32>
    %13 = arith.subf %0, %12 : vector<4x16x32xf32>
    %cst_5 = arith.constant 9.99999974E-6 : f32
    %14 = vector.broadcast %cst_5 : f32 to vector<4x16x1xf32>
    %15 = arith.addf %11, %14 : vector<4x16x1xf32>
    %16 = math.rsqrt %15 : vector<4x16x1xf32>
    %17 = vector.broadcast %16 : vector<4x16x1xf32> to vector<4x16x32xf32>
    %18 = arith.mulf %13, %17 : vector<4x16x32xf32>
    %c0_6 = arith.constant 0 : index
    %c0_7 = arith.constant 0 : index
    %19 = vector.load %arg2[%c0_6, %c0_7] : memref<1x32xf32, #tpu.memory_space<vmem>>, vector<1x32xf32>
    %20 = vector.shape_cast %19 : vector<1x32xf32> to vector<1x1x32xf32>
    %21 = vector.broadcast %20 : vector<1x1x32xf32> to vector<4x16x32xf32>
    %22 = arith.mulf %18, %21 : vector<4x16x32xf32>
    %c0_8 = arith.constant 0 : index
    %c0_9 = arith.constant 0 : index
    %23 = vector.load %arg3[%c0_8, %c0_9] : memref<1x32xf32, #tpu.memory_space<vmem>>, vector<1x32xf32>
    %24 = vector.shape_cast %23 : vector<1x32xf32> to vector<1x1x32xf32>
    %25 = vector.broadcast %24 : vector<1x1x32xf32> to vector<4x16x32xf32>
    %26 = arith.addf %22, %25 : vector<4x16x32xf32>
    %27 = vector.shape_cast %26 : vector<4x16x32xf32> to vector<64x32xf32>
    %28 = arith.truncf %27 : vector<64x32xf32> to vector<64x32xbf16>
    %c0_10 = arith.constant 0 : index
    %c0_11 = arith.constant 0 : index
    %29 = vector.load %arg5[%c0_10, %c0_11] : memref<32x96xf32, #tpu.memory_space<vmem>>, vector<32x96xf32>
    %30 = arith.truncf %29 : vector<32x96xf32> to vector<32x96xbf16>
    %cst_12 = arith.constant dense<0.000000e+00> : vector<64x96xf32>
    %31 = tpu.matmul %28, %30, %cst_12 {dimension_numbers = #tpu.dot_dimension_numbers<[1], [0], [0], [1], [0, 0, 1, 1], [], []>} : vector<64x32xbf16>, vector<32x96xbf16>, vector<64x96xf32> -> vector<64x96xf32>
    %c0_13 = arith.constant 0 : index
    %c0_14 = arith.constant 0 : index
    %32 = vector.load %arg6[%c0_13, %c0_14] : memref<1x96xf32, #tpu.memory_space<vmem>>, vector<1x96xf32>
    %33 = vector.broadcast %32 : vector<1x96xf32> to vector<64x96xf32>
    %34 = arith.addf %31, %33 : vector<64x96xf32>
    %c0_15 = arith.constant 0 : index
    %c0_16 = arith.constant 0 : index
    %35 = vector.load %arg7[%c0_15, %c0_16] : memref<32x32xf32, #tpu.memory_space<vmem>>, vector<32x32xf32>
    %36 = arith.truncf %35 : vector<32x32xf32> to vector<32x32xbf16>
    %cst_17 = arith.constant 0.000000e+00 : f32
    %37 = vector.broadcast %cst_17 : f32 to vector<64x32xf32>
    %38 = vector.extract_strided_slice %34 {offsets = [0, 0], sizes = [64, 8], strides = [1, 1]} : vector<64x96xf32> to vector<64x8xf32>
    %39 = vector.shape_cast %38 : vector<64x8xf32> to vector<4x16x8xf32>
    %40 = vector.extract_strided_slice %34 {offsets = [0, 32], sizes = [64, 8], strides = [1, 1]} : vector<64x96xf32> to vector<64x8xf32>
    %41 = vector.shape_cast %40 : vector<64x8xf32> to vector<4x16x8xf32>
    %42 = vector.extract_strided_slice %34 {offsets = [0, 64], sizes = [64, 8], strides = [1, 1]} : vector<64x96xf32> to vector<64x8xf32>
    %43 = vector.shape_cast %42 : vector<64x8xf32> to vector<4x16x8xf32>
    %44 = arith.truncf %39 : vector<4x16x8xf32> to vector<4x16x8xbf16>
    %45 = arith.truncf %41 : vector<4x16x8xf32> to vector<4x16x8xbf16>
    "tpu.trace_start"() <{level = 10 : i32, message = "wnd,wmd->wnm"}> : () -> ()
    %cst_18 = arith.constant dense<0.000000e+00> : vector<4x16x16xf32>
    %46 = tpu.matmul %44, %45, %cst_18 {dimension_numbers = #tpu.dot_dimension_numbers<[2], [2], [1], [1], [0, 0, 0, 1, 1, 1], [0], [0]>} : vector<4x16x8xbf16>, vector<4x16x8xbf16>, vector<4x16x16xf32> -> vector<4x16x16xf32>
    "tpu.trace_stop"() : () -> ()
    %cst_19 = arith.constant 0.353553385 : f32
    %47 = vector.broadcast %cst_19 : f32 to vector<4x16x16xf32>
    %48 = arith.mulf %46, %47 : vector<4x16x16xf32>
    %c0_20 = arith.constant 0 : index
    %c0_21 = arith.constant 0 : index
    %c0_22 = arith.constant 0 : index
    %49 = vector.load %arg4[%c0_20, %c0_21, %c0_22] : memref<4x16x16xf32, #tpu.memory_space<vmem>>, vector<1x16x16xf32>
    %50 = vector.shape_cast %49 : vector<1x16x16xf32> to vector<16x16xf32>
    %51 = vector.shape_cast %50 : vector<16x16xf32> to vector<1x16x16xf32>
    %52 = vector.broadcast %51 : vector<1x16x16xf32> to vector<4x16x16xf32>
    %53 = arith.addf %48, %52 : vector<4x16x16xf32>
    %cst_23 = arith.constant dense<0xFF800000> : vector<4x16xf32>
    %54 = vector.multi_reduction <maximumf>, %53, %cst_23 [2] : vector<4x16x16xf32> to vector<4x16xf32>
    %cst_24 = arith.constant 0xFF800000 : f32
    %55 = vector.broadcast %cst_24 : f32 to vector<4x16xf32>
    %56 = arith.maximumf %55, %54 : vector<4x16xf32>
    %57 = vector.shape_cast %56 : vector<4x16xf32> to vector<4x16x1xf32>
    %58 = vector.broadcast %57 : vector<4x16x1xf32> to vector<4x16x16xf32>
    %59 = arith.subf %53, %58 : vector<4x16x16xf32>
    %60 = math.exp %59 : vector<4x16x16xf32>
    %cst_25 = arith.constant dense<0.000000e+00> : vector<4x16xf32>
    %61 = vector.multi_reduction <add>, %60, %cst_25 [2] : vector<4x16x16xf32> to vector<4x16xf32>
    %62 = vector.shape_cast %61 : vector<4x16xf32> to vector<4x16x1xf32>
    %63 = vector.broadcast %62 : vector<4x16x1xf32> to vector<4x16x16xf32>
    %64 = arith.divf %60, %63 : vector<4x16x16xf32>
    %65 = arith.truncf %64 : vector<4x16x16xf32> to vector<4x16x16xbf16>
    %66 = arith.truncf %43 : vector<4x16x8xf32> to vector<4x16x8xbf16>
    "tpu.trace_start"() <{level = 10 : i32, message = "wnm,wmd->wnd"}> : () -> ()
    %cst_26 = arith.constant dense<0.000000e+00> : vector<4x16x8xf32>
    %67 = tpu.matmul %65, %66, %cst_26 {dimension_numbers = #tpu.dot_dimension_numbers<[2], [1], [1], [2], [0, 0, 0, 1, 1, 2], [0], [0]>} : vector<4x16x16xbf16>, vector<4x16x8xbf16>, vector<4x16x8xf32> -> vector<4x16x8xf32>
    "tpu.trace_stop"() : () -> ()
    %68 = vector.shape_cast %67 : vector<4x16x8xf32> to vector<64x8xf32>
    %69 = arith.truncf %68 : vector<64x8xf32> to vector<64x8xbf16>
    %70 = vector.extract_strided_slice %36 {offsets = [0, 0], sizes = [8, 32], strides = [1, 1]} : vector<32x32xbf16> to vector<8x32xbf16>
    %cst_27 = arith.constant dense<0.000000e+00> : vector<64x32xf32>
    %71 = tpu.matmul %69, %70, %cst_27 {dimension_numbers = #tpu.dot_dimension_numbers<[1], [0], [0], [1], [0, 0, 1, 1], [], []>} : vector<64x8xbf16>, vector<8x32xbf16>, vector<64x32xf32> -> vector<64x32xf32>
    %72 = arith.addf %37, %71 : vector<64x32xf32>
    %73 = vector.extract_strided_slice %34 {offsets = [0, 8], sizes = [64, 8], strides = [1, 1]} : vector<64x96xf32> to vector<64x8xf32>
    %74 = vector.shape_cast %73 : vector<64x8xf32> to vector<4x16x8xf32>
    %75 = vector.extract_strided_slice %34 {offsets = [0, 40], sizes = [64, 8], strides = [1, 1]} : vector<64x96xf32> to vector<64x8xf32>
    %76 = vector.shape_cast %75 : vector<64x8xf32> to vector<4x16x8xf32>
    %77 = vector.extract_strided_slice %34 {offsets = [0, 72], sizes = [64, 8], strides = [1, 1]} : vector<64x96xf32> to vector<64x8xf32>
    %78 = vector.shape_cast %77 : vector<64x8xf32> to vector<4x16x8xf32>
    %79 = arith.truncf %74 : vector<4x16x8xf32> to vector<4x16x8xbf16>
    %80 = arith.truncf %76 : vector<4x16x8xf32> to vector<4x16x8xbf16>
    "tpu.trace_start"() <{level = 10 : i32, message = "wnd,wmd->wnm"}> : () -> ()
    %cst_28 = arith.constant dense<0.000000e+00> : vector<4x16x16xf32>
    %81 = tpu.matmul %79, %80, %cst_28 {dimension_numbers = #tpu.dot_dimension_numbers<[2], [2], [1], [1], [0, 0, 0, 1, 1, 1], [0], [0]>} : vector<4x16x8xbf16>, vector<4x16x8xbf16>, vector<4x16x16xf32> -> vector<4x16x16xf32>
    "tpu.trace_stop"() : () -> ()
    %cst_29 = arith.constant 0.353553385 : f32
    %82 = vector.broadcast %cst_29 : f32 to vector<4x16x16xf32>
    %83 = arith.mulf %81, %82 : vector<4x16x16xf32>
    %c1 = arith.constant 1 : index
    %c0_30 = arith.constant 0 : index
    %c0_31 = arith.constant 0 : index
    %84 = vector.load %arg4[%c1, %c0_30, %c0_31] : memref<4x16x16xf32, #tpu.memory_space<vmem>>, vector<1x16x16xf32>
    %85 = vector.shape_cast %84 : vector<1x16x16xf32> to vector<16x16xf32>
    %86 = vector.shape_cast %85 : vector<16x16xf32> to vector<1x16x16xf32>
    %87 = vector.broadcast %86 : vector<1x16x16xf32> to vector<4x16x16xf32>
    %88 = arith.addf %83, %87 : vector<4x16x16xf32>
    %cst_32 = arith.constant dense<0xFF800000> : vector<4x16xf32>
    %89 = vector.multi_reduction <maximumf>, %88, %cst_32 [2] : vector<4x16x16xf32> to vector<4x16xf32>
    %cst_33 = arith.constant 0xFF800000 : f32
    %90 = vector.broadcast %cst_33 : f32 to vector<4x16xf32>
    %91 = arith.maximumf %90, %89 : vector<4x16xf32>
    %92 = vector.shape_cast %91 : vector<4x16xf32> to vector<4x16x1xf32>
    %93 = vector.broadcast %92 : vector<4x16x1xf32> to vector<4x16x16xf32>
    %94 = arith.subf %88, %93 : vector<4x16x16xf32>
    %95 = math.exp %94 : vector<4x16x16xf32>
    %cst_34 = arith.constant dense<0.000000e+00> : vector<4x16xf32>
    %96 = vector.multi_reduction <add>, %95, %cst_34 [2] : vector<4x16x16xf32> to vector<4x16xf32>
    %97 = vector.shape_cast %96 : vector<4x16xf32> to vector<4x16x1xf32>
    %98 = vector.broadcast %97 : vector<4x16x1xf32> to vector<4x16x16xf32>
    %99 = arith.divf %95, %98 : vector<4x16x16xf32>
    %100 = arith.truncf %99 : vector<4x16x16xf32> to vector<4x16x16xbf16>
    %101 = arith.truncf %78 : vector<4x16x8xf32> to vector<4x16x8xbf16>
    "tpu.trace_start"() <{level = 10 : i32, message = "wnm,wmd->wnd"}> : () -> ()
    %cst_35 = arith.constant dense<0.000000e+00> : vector<4x16x8xf32>
    %102 = tpu.matmul %100, %101, %cst_35 {dimension_numbers = #tpu.dot_dimension_numbers<[2], [1], [1], [2], [0, 0, 0, 1, 1, 2], [0], [0]>} : vector<4x16x16xbf16>, vector<4x16x8xbf16>, vector<4x16x8xf32> -> vector<4x16x8xf32>
    "tpu.trace_stop"() : () -> ()
    %103 = vector.shape_cast %102 : vector<4x16x8xf32> to vector<64x8xf32>
    %104 = arith.truncf %103 : vector<64x8xf32> to vector<64x8xbf16>
    %105 = vector.extract_strided_slice %36 {offsets = [8, 0], sizes = [8, 32], strides = [1, 1]} : vector<32x32xbf16> to vector<8x32xbf16>
    %cst_36 = arith.constant dense<0.000000e+00> : vector<64x32xf32>
    %106 = tpu.matmul %104, %105, %cst_36 {dimension_numbers = #tpu.dot_dimension_numbers<[1], [0], [0], [1], [0, 0, 1, 1], [], []>} : vector<64x8xbf16>, vector<8x32xbf16>, vector<64x32xf32> -> vector<64x32xf32>
    %107 = arith.addf %72, %106 : vector<64x32xf32>
    %108 = vector.extract_strided_slice %34 {offsets = [0, 16], sizes = [64, 8], strides = [1, 1]} : vector<64x96xf32> to vector<64x8xf32>
    %109 = vector.shape_cast %108 : vector<64x8xf32> to vector<4x16x8xf32>
    %110 = vector.extract_strided_slice %34 {offsets = [0, 48], sizes = [64, 8], strides = [1, 1]} : vector<64x96xf32> to vector<64x8xf32>
    %111 = vector.shape_cast %110 : vector<64x8xf32> to vector<4x16x8xf32>
    %112 = vector.extract_strided_slice %34 {offsets = [0, 80], sizes = [64, 8], strides = [1, 1]} : vector<64x96xf32> to vector<64x8xf32>
    %113 = vector.shape_cast %112 : vector<64x8xf32> to vector<4x16x8xf32>
    %114 = arith.truncf %109 : vector<4x16x8xf32> to vector<4x16x8xbf16>
    %115 = arith.truncf %111 : vector<4x16x8xf32> to vector<4x16x8xbf16>
    "tpu.trace_start"() <{level = 10 : i32, message = "wnd,wmd->wnm"}> : () -> ()
    %cst_37 = arith.constant dense<0.000000e+00> : vector<4x16x16xf32>
    %116 = tpu.matmul %114, %115, %cst_37 {dimension_numbers = #tpu.dot_dimension_numbers<[2], [2], [1], [1], [0, 0, 0, 1, 1, 1], [0], [0]>} : vector<4x16x8xbf16>, vector<4x16x8xbf16>, vector<4x16x16xf32> -> vector<4x16x16xf32>
    "tpu.trace_stop"() : () -> ()
    %cst_38 = arith.constant 0.353553385 : f32
    %117 = vector.broadcast %cst_38 : f32 to vector<4x16x16xf32>
    %118 = arith.mulf %116, %117 : vector<4x16x16xf32>
    %c2 = arith.constant 2 : index
    %c0_39 = arith.constant 0 : index
    %c0_40 = arith.constant 0 : index
    %119 = vector.load %arg4[%c2, %c0_39, %c0_40] : memref<4x16x16xf32, #tpu.memory_space<vmem>>, vector<1x16x16xf32>
    %120 = vector.shape_cast %119 : vector<1x16x16xf32> to vector<16x16xf32>
    %121 = vector.shape_cast %120 : vector<16x16xf32> to vector<1x16x16xf32>
    %122 = vector.broadcast %121 : vector<1x16x16xf32> to vector<4x16x16xf32>
    %123 = arith.addf %118, %122 : vector<4x16x16xf32>
    %cst_41 = arith.constant dense<0xFF800000> : vector<4x16xf32>
    %124 = vector.multi_reduction <maximumf>, %123, %cst_41 [2] : vector<4x16x16xf32> to vector<4x16xf32>
    %cst_42 = arith.constant 0xFF800000 : f32
    %125 = vector.broadcast %cst_42 : f32 to vector<4x16xf32>
    %126 = arith.maximumf %125, %124 : vector<4x16xf32>
    %127 = vector.shape_cast %126 : vector<4x16xf32> to vector<4x16x1xf32>
    %128 = vector.broadcast %127 : vector<4x16x1xf32> to vector<4x16x16xf32>
    %129 = arith.subf %123, %128 : vector<4x16x16xf32>
    %130 = math.exp %129 : vector<4x16x16xf32>
    %cst_43 = arith.constant dense<0.000000e+00> : vector<4x16xf32>
    %131 = vector.multi_reduction <add>, %130, %cst_43 [2] : vector<4x16x16xf32> to vector<4x16xf32>
    %132 = vector.shape_cast %131 : vector<4x16xf32> to vector<4x16x1xf32>
    %133 = vector.broadcast %132 : vector<4x16x1xf32> to vector<4x16x16xf32>
    %134 = arith.divf %130, %133 : vector<4x16x16xf32>
    %135 = arith.truncf %134 : vector<4x16x16xf32> to vector<4x16x16xbf16>
    %136 = arith.truncf %113 : vector<4x16x8xf32> to vector<4x16x8xbf16>
    "tpu.trace_start"() <{level = 10 : i32, message = "wnm,wmd->wnd"}> : () -> ()
    %cst_44 = arith.constant dense<0.000000e+00> : vector<4x16x8xf32>
    %137 = tpu.matmul %135, %136, %cst_44 {dimension_numbers = #tpu.dot_dimension_numbers<[2], [1], [1], [2], [0, 0, 0, 1, 1, 2], [0], [0]>} : vector<4x16x16xbf16>, vector<4x16x8xbf16>, vector<4x16x8xf32> -> vector<4x16x8xf32>
    "tpu.trace_stop"() : () -> ()
    %138 = vector.shape_cast %137 : vector<4x16x8xf32> to vector<64x8xf32>
    %139 = arith.truncf %138 : vector<64x8xf32> to vector<64x8xbf16>
    %140 = vector.extract_strided_slice %36 {offsets = [16, 0], sizes = [8, 32], strides = [1, 1]} : vector<32x32xbf16> to vector<8x32xbf16>
    %cst_45 = arith.constant dense<0.000000e+00> : vector<64x32xf32>
    %141 = tpu.matmul %139, %140, %cst_45 {dimension_numbers = #tpu.dot_dimension_numbers<[1], [0], [0], [1], [0, 0, 1, 1], [], []>} : vector<64x8xbf16>, vector<8x32xbf16>, vector<64x32xf32> -> vector<64x32xf32>
    %142 = arith.addf %107, %141 : vector<64x32xf32>
    %143 = vector.extract_strided_slice %34 {offsets = [0, 24], sizes = [64, 8], strides = [1, 1]} : vector<64x96xf32> to vector<64x8xf32>
    %144 = vector.shape_cast %143 : vector<64x8xf32> to vector<4x16x8xf32>
    %145 = vector.extract_strided_slice %34 {offsets = [0, 56], sizes = [64, 8], strides = [1, 1]} : vector<64x96xf32> to vector<64x8xf32>
    %146 = vector.shape_cast %145 : vector<64x8xf32> to vector<4x16x8xf32>
    %147 = vector.extract_strided_slice %34 {offsets = [0, 88], sizes = [64, 8], strides = [1, 1]} : vector<64x96xf32> to vector<64x8xf32>
    %148 = vector.shape_cast %147 : vector<64x8xf32> to vector<4x16x8xf32>
    %149 = arith.truncf %144 : vector<4x16x8xf32> to vector<4x16x8xbf16>
    %150 = arith.truncf %146 : vector<4x16x8xf32> to vector<4x16x8xbf16>
    "tpu.trace_start"() <{level = 10 : i32, message = "wnd,wmd->wnm"}> : () -> ()
    %cst_46 = arith.constant dense<0.000000e+00> : vector<4x16x16xf32>
    %151 = tpu.matmul %149, %150, %cst_46 {dimension_numbers = #tpu.dot_dimension_numbers<[2], [2], [1], [1], [0, 0, 0, 1, 1, 1], [0], [0]>} : vector<4x16x8xbf16>, vector<4x16x8xbf16>, vector<4x16x16xf32> -> vector<4x16x16xf32>
    "tpu.trace_stop"() : () -> ()
    %cst_47 = arith.constant 0.353553385 : f32
    %152 = vector.broadcast %cst_47 : f32 to vector<4x16x16xf32>
    %153 = arith.mulf %151, %152 : vector<4x16x16xf32>
    %c3 = arith.constant 3 : index
    %c0_48 = arith.constant 0 : index
    %c0_49 = arith.constant 0 : index
    %154 = vector.load %arg4[%c3, %c0_48, %c0_49] : memref<4x16x16xf32, #tpu.memory_space<vmem>>, vector<1x16x16xf32>
    %155 = vector.shape_cast %154 : vector<1x16x16xf32> to vector<16x16xf32>
    %156 = vector.shape_cast %155 : vector<16x16xf32> to vector<1x16x16xf32>
    %157 = vector.broadcast %156 : vector<1x16x16xf32> to vector<4x16x16xf32>
    %158 = arith.addf %153, %157 : vector<4x16x16xf32>
    %cst_50 = arith.constant dense<0xFF800000> : vector<4x16xf32>
    %159 = vector.multi_reduction <maximumf>, %158, %cst_50 [2] : vector<4x16x16xf32> to vector<4x16xf32>
    %cst_51 = arith.constant 0xFF800000 : f32
    %160 = vector.broadcast %cst_51 : f32 to vector<4x16xf32>
    %161 = arith.maximumf %160, %159 : vector<4x16xf32>
    %162 = vector.shape_cast %161 : vector<4x16xf32> to vector<4x16x1xf32>
    %163 = vector.broadcast %162 : vector<4x16x1xf32> to vector<4x16x16xf32>
    %164 = arith.subf %158, %163 : vector<4x16x16xf32>
    %165 = math.exp %164 : vector<4x16x16xf32>
    %cst_52 = arith.constant dense<0.000000e+00> : vector<4x16xf32>
    %166 = vector.multi_reduction <add>, %165, %cst_52 [2] : vector<4x16x16xf32> to vector<4x16xf32>
    %167 = vector.shape_cast %166 : vector<4x16xf32> to vector<4x16x1xf32>
    %168 = vector.broadcast %167 : vector<4x16x1xf32> to vector<4x16x16xf32>
    %169 = arith.divf %165, %168 : vector<4x16x16xf32>
    %170 = arith.truncf %169 : vector<4x16x16xf32> to vector<4x16x16xbf16>
    %171 = arith.truncf %148 : vector<4x16x8xf32> to vector<4x16x8xbf16>
    "tpu.trace_start"() <{level = 10 : i32, message = "wnm,wmd->wnd"}> : () -> ()
    %cst_53 = arith.constant dense<0.000000e+00> : vector<4x16x8xf32>
    %172 = tpu.matmul %170, %171, %cst_53 {dimension_numbers = #tpu.dot_dimension_numbers<[2], [1], [1], [2], [0, 0, 0, 1, 1, 2], [0], [0]>} : vector<4x16x16xbf16>, vector<4x16x8xbf16>, vector<4x16x8xf32> -> vector<4x16x8xf32>
    "tpu.trace_stop"() : () -> ()
    %173 = vector.shape_cast %172 : vector<4x16x8xf32> to vector<64x8xf32>
    %174 = arith.truncf %173 : vector<64x8xf32> to vector<64x8xbf16>
    %175 = vector.extract_strided_slice %36 {offsets = [24, 0], sizes = [8, 32], strides = [1, 1]} : vector<32x32xbf16> to vector<8x32xbf16>
    %cst_54 = arith.constant dense<0.000000e+00> : vector<64x32xf32>
    %176 = tpu.matmul %174, %175, %cst_54 {dimension_numbers = #tpu.dot_dimension_numbers<[1], [0], [0], [1], [0, 0, 1, 1], [], []>} : vector<64x8xbf16>, vector<8x32xbf16>, vector<64x32xf32> -> vector<64x32xf32>
    %177 = arith.addf %142, %176 : vector<64x32xf32>
    %c0_55 = arith.constant 0 : index
    %c0_56 = arith.constant 0 : index
    %178 = vector.load %arg8[%c0_55, %c0_56] : memref<1x32xf32, #tpu.memory_space<vmem>>, vector<1x32xf32>
    %179 = vector.broadcast %178 : vector<1x32xf32> to vector<64x32xf32>
    %180 = arith.addf %177, %179 : vector<64x32xf32>
    %181 = vector.shape_cast %180 : vector<64x32xf32> to vector<4x16x32xf32>
    %182 = arith.addf %181, %0 : vector<4x16x32xf32>
    %c0_57 = arith.constant 0 : index
    %c0_58 = arith.constant 0 : index
    %c0_59 = arith.constant 0 : index
    %183 = vector.load %arg9[%c0_57, %c0_58, %c0_59] : memref<4x16x32xf32, #tpu.memory_space<vmem>>, vector<4x16x32xf32>
    tpu.vector_store %arg9[%c0_57, %c0_58, %c0_59], %182 {strides = array<i32>} : memref<4x16x32xf32, #tpu.memory_space<vmem>>, vector<4x16x32xf32>,
    return
  }
  func.func @transform_0(%arg0: i32) -> (i32, i32, i32) {
    %c0_i32 = arith.constant 0 : i32
    %c0_i32_0 = arith.constant 0 : i32
    %c0_i32_1 = arith.constant 0 : i32
    return %arg0, %c0_i32, %c0_i32_0 : i32, i32, i32
  }
  func.func @transform_1(%arg0: i32) -> (i32, i32) {
    %c0_i32 = arith.constant 0 : i32
    %c0_i32_0 = arith.constant 0 : i32
    %c0_i32_1 = arith.constant 0 : i32
    return %c0_i32, %c0_i32_0 : i32, i32
  }
  func.func @transform_2(%arg0: i32) -> (i32, i32) {
    %c0_i32 = arith.constant 0 : i32
    %c0_i32_0 = arith.constant 0 : i32
    %c0_i32_1 = arith.constant 0 : i32
    return %c0_i32, %c0_i32_0 : i32, i32
  }
  func.func @transform_3(%arg0: i32) -> (i32, i32, i32) {
    %c0_i32 = arith.constant 0 : i32
    %c0_i32_0 = arith.constant 0 : i32
    %c0_i32_1 = arith.constant 0 : i32
    %c0_i32_2 = arith.constant 0 : i32
    return %c0_i32, %c0_i32_0, %c0_i32_1 : i32, i32, i32
  }
  func.func @transform_4(%arg0: i32) -> (i32, i32) {
    %c0_i32 = arith.constant 0 : i32
    %c0_i32_0 = arith.constant 0 : i32
    %c0_i32_1 = arith.constant 0 : i32
    return %c0_i32, %c0_i32_0 : i32, i32
  }
  func.func @transform_5(%arg0: i32) -> (i32, i32) {
    %c0_i32 = arith.constant 0 : i32
    %c0_i32_0 = arith.constant 0 : i32
    %c0_i32_1 = arith.constant 0 : i32
    return %c0_i32, %c0_i32_0 : i32, i32
  }
  func.func @transform_6(%arg0: i32) -> (i32, i32) {
    %c0_i32 = arith.constant 0 : i32
    %c0_i32_0 = arith.constant 0 : i32
    %c0_i32_1 = arith.constant 0 : i32
    return %c0_i32, %c0_i32_0 : i32, i32
  }
  func.func @transform_7(%arg0: i32) -> (i32, i32) {
    %c0_i32 = arith.constant 0 : i32
    %c0_i32_0 = arith.constant 0 : i32
    %c0_i32_1 = arith.constant 0 : i32
    return %c0_i32, %c0_i32_0 : i32, i32
  }
  func.func @transform_8(%arg0: i32) -> (i32, i32, i32) {
    %c0_i32 = arith.constant 0 : i32
    %c0_i32_0 = arith.constant 0 : i32
    %c0_i32_1 = arith.constant 0 : i32
    return %arg0, %c0_i32, %c0_i32_0 : i32, i32, i32
  }
}

module attributes {stable_mosaic.version = 11 : i64} {
  func.func @_mlp_kernel(%arg0: i32, %arg1: memref<128x32xf32, #tpu.memory_space<vmem>>, %arg2: memref<1x32xf32, #tpu.memory_space<vmem>>, %arg3: memref<1x32xf32, #tpu.memory_space<vmem>>, %arg4: memref<32x128xf32, #tpu.memory_space<vmem>>, %arg5: memref<1x128xf32, #tpu.memory_space<vmem>>, %arg6: memref<128x32xf32, #tpu.memory_space<vmem>>, %arg7: memref<1x32xf32, #tpu.memory_space<vmem>>, %arg8: memref<128x32xf32, #tpu.memory_space<vmem>>) attributes {dimension_semantics = [#tpu.dimension_semantics<parallel>], iteration_bounds = array<i64: 1>, scalar_prefetch = 0 : i64, scratch_operands = 0 : i64, tpu.core_type = #tpu.core_type<tc>, window_params = [{transform_indices = @transform_0, window_bounds = array<i64: 128, 32>}, {pipeline_mode = #tpu.pipeline_mode<synchronous>, transform_indices = @transform_1, window_bounds = array<i64: 1, 32>}, {pipeline_mode = #tpu.pipeline_mode<synchronous>, transform_indices = @transform_2, window_bounds = array<i64: 1, 32>}, {pipeline_mode = #tpu.pipeline_mode<synchronous>, transform_indices = @transform_3, window_bounds = array<i64: 32, 128>}, {pipeline_mode = #tpu.pipeline_mode<synchronous>, transform_indices = @transform_4, window_bounds = array<i64: 1, 128>}, {pipeline_mode = #tpu.pipeline_mode<synchronous>, transform_indices = @transform_5, window_bounds = array<i64: 128, 32>}, {pipeline_mode = #tpu.pipeline_mode<synchronous>, transform_indices = @transform_6, window_bounds = array<i64: 1, 32>}, {transform_indices = @transform_7, window_bounds = array<i64: 128, 32>}]} {
    %c0 = arith.constant 0 : index
    %c0_0 = arith.constant 0 : index
    %0 = vector.load %arg1[%c0, %c0_0] : memref<128x32xf32, #tpu.memory_space<vmem>>, vector<128x32xf32>
    %cst = arith.constant dense<0.000000e+00> : vector<128xf32>
    %1 = vector.multi_reduction <add>, %0, %cst [1] : vector<128x32xf32> to vector<128xf32>
    %2 = vector.shape_cast %1 : vector<128xf32> to vector<128x1xf32>
    %cst_1 = arith.constant 3.200000e+01 : f32
    %3 = vector.broadcast %cst_1 : f32 to vector<128x1xf32>
    %4 = arith.divf %2, %3 : vector<128x1xf32>
    %5 = vector.broadcast %4 : vector<128x1xf32> to vector<128x32xf32>
    %6 = arith.subf %0, %5 : vector<128x32xf32>
    %7 = arith.mulf %6, %6 : vector<128x32xf32>
    %cst_2 = arith.constant dense<0.000000e+00> : vector<128xf32>
    %8 = vector.multi_reduction <add>, %7, %cst_2 [1] : vector<128x32xf32> to vector<128xf32>
    %9 = vector.shape_cast %8 : vector<128xf32> to vector<128x1xf32>
    %cst_3 = arith.constant 3.200000e+01 : f32
    %10 = vector.broadcast %cst_3 : f32 to vector<128x1xf32>
    %11 = arith.divf %9, %10 : vector<128x1xf32>
    %12 = vector.broadcast %4 : vector<128x1xf32> to vector<128x32xf32>
    %13 = arith.subf %0, %12 : vector<128x32xf32>
    %cst_4 = arith.constant 9.99999974E-6 : f32
    %14 = vector.broadcast %cst_4 : f32 to vector<128x1xf32>
    %15 = arith.addf %11, %14 : vector<128x1xf32>
    %16 = math.rsqrt %15 : vector<128x1xf32>
    %17 = vector.broadcast %16 : vector<128x1xf32> to vector<128x32xf32>
    %18 = arith.mulf %13, %17 : vector<128x32xf32>
    %c0_5 = arith.constant 0 : index
    %c0_6 = arith.constant 0 : index
    %19 = vector.load %arg2[%c0_5, %c0_6] : memref<1x32xf32, #tpu.memory_space<vmem>>, vector<1x32xf32>
    %20 = vector.broadcast %19 : vector<1x32xf32> to vector<128x32xf32>
    %21 = arith.mulf %18, %20 : vector<128x32xf32>
    %c0_7 = arith.constant 0 : index
    %c0_8 = arith.constant 0 : index
    %22 = vector.load %arg3[%c0_7, %c0_8] : memref<1x32xf32, #tpu.memory_space<vmem>>, vector<1x32xf32>
    %23 = vector.broadcast %22 : vector<1x32xf32> to vector<128x32xf32>
    %24 = arith.addf %21, %23 : vector<128x32xf32>
    %25 = arith.truncf %24 : vector<128x32xf32> to vector<128x32xbf16>
    %c0_9 = arith.constant 0 : index
    %c0_10 = arith.constant 0 : index
    %26 = vector.load %arg4[%c0_9, %c0_10] : memref<32x128xf32, #tpu.memory_space<vmem>>, vector<32x128xf32>
    %27 = arith.truncf %26 : vector<32x128xf32> to vector<32x128xbf16>
    %cst_11 = arith.constant dense<0.000000e+00> : vector<128x128xf32>
    %28 = tpu.matmul %25, %27, %cst_11 {dimension_numbers = #tpu.dot_dimension_numbers<[1], [0], [0], [1], [0, 0, 1, 1], [], []>} : vector<128x32xbf16>, vector<32x128xbf16>, vector<128x128xf32> -> vector<128x128xf32>
    %c0_12 = arith.constant 0 : index
    %c0_13 = arith.constant 0 : index
    %29 = vector.load %arg5[%c0_12, %c0_13] : memref<1x128xf32, #tpu.memory_space<vmem>>, vector<1x128xf32>
    %30 = vector.broadcast %29 : vector<1x128xf32> to vector<128x128xf32>
    %31 = arith.addf %28, %30 : vector<128x128xf32>
    %cst_14 = arith.constant 5.000000e-01 : f32
    %32 = vector.broadcast %cst_14 : f32 to vector<128x128xf32>
    %33 = arith.mulf %32, %31 : vector<128x128xf32>
    %cst_15 = arith.constant 0.707106769 : f32
    %34 = vector.broadcast %cst_15 : f32 to vector<128x128xf32>
    %35 = arith.mulf %31, %34 : vector<128x128xf32>
    %36 = math.erf %35 : vector<128x128xf32>
    %cst_16 = arith.constant 1.000000e+00 : f32
    %37 = vector.broadcast %cst_16 : f32 to vector<128x128xf32>
    %38 = arith.addf %37, %36 : vector<128x128xf32>
    %39 = arith.mulf %33, %38 : vector<128x128xf32>
    %40 = arith.truncf %39 : vector<128x128xf32> to vector<128x128xbf16>
    %c0_17 = arith.constant 0 : index
    %c0_18 = arith.constant 0 : index
    %41 = vector.load %arg6[%c0_17, %c0_18] : memref<128x32xf32, #tpu.memory_space<vmem>>, vector<128x32xf32>
    %42 = arith.truncf %41 : vector<128x32xf32> to vector<128x32xbf16>
    %cst_19 = arith.constant dense<0.000000e+00> : vector<128x32xf32>
    %43 = tpu.matmul %40, %42, %cst_19 {dimension_numbers = #tpu.dot_dimension_numbers<[1], [0], [0], [1], [0, 0, 1, 1], [], []>} : vector<128x128xbf16>, vector<128x32xbf16>, vector<128x32xf32> -> vector<128x32xf32>
    %c0_20 = arith.constant 0 : index
    %c0_21 = arith.constant 0 : index
    %44 = vector.load %arg7[%c0_20, %c0_21] : memref<1x32xf32, #tpu.memory_space<vmem>>, vector<1x32xf32>
    %45 = vector.broadcast %44 : vector<1x32xf32> to vector<128x32xf32>
    %46 = arith.addf %43, %45 : vector<128x32xf32>
    %47 = arith.addf %0, %46 : vector<128x32xf32>
    %c0_22 = arith.constant 0 : index
    %c0_23 = arith.constant 0 : index
    %48 = vector.load %arg8[%c0_22, %c0_23] : memref<128x32xf32, #tpu.memory_space<vmem>>, vector<128x32xf32>
    tpu.vector_store %arg8[%c0_22, %c0_23], %47 {strides = array<i32>} : memref<128x32xf32, #tpu.memory_space<vmem>>, vector<128x32xf32>,
    return
  }
  func.func @transform_0(%arg0: i32) -> (i32, i32) {
    %c0_i32 = arith.constant 0 : i32
    %c0_i32_0 = arith.constant 0 : i32
    return %arg0, %c0_i32 : i32, i32
  }
  func.func @transform_1(%arg0: i32) -> (i32, i32) {
    %c0_i32 = arith.constant 0 : i32
    %c0_i32_0 = arith.constant 0 : i32
    %c0_i32_1 = arith.constant 0 : i32
    return %c0_i32, %c0_i32_0 : i32, i32
  }
  func.func @transform_2(%arg0: i32) -> (i32, i32) {
    %c0_i32 = arith.constant 0 : i32
    %c0_i32_0 = arith.constant 0 : i32
    %c0_i32_1 = arith.constant 0 : i32
    return %c0_i32, %c0_i32_0 : i32, i32
  }
  func.func @transform_3(%arg0: i32) -> (i32, i32) {
    %c0_i32 = arith.constant 0 : i32
    %c0_i32_0 = arith.constant 0 : i32
    %c0_i32_1 = arith.constant 0 : i32
    return %c0_i32, %c0_i32_0 : i32, i32
  }
  func.func @transform_4(%arg0: i32) -> (i32, i32) {
    %c0_i32 = arith.constant 0 : i32
    %c0_i32_0 = arith.constant 0 : i32
    %c0_i32_1 = arith.constant 0 : i32
    return %c0_i32, %c0_i32_0 : i32, i32
  }
  func.func @transform_5(%arg0: i32) -> (i32, i32) {
    %c0_i32 = arith.constant 0 : i32
    %c0_i32_0 = arith.constant 0 : i32
    %c0_i32_1 = arith.constant 0 : i32
    return %c0_i32, %c0_i32_0 : i32, i32
  }
  func.func @transform_6(%arg0: i32) -> (i32, i32) {
    %c0_i32 = arith.constant 0 : i32
    %c0_i32_0 = arith.constant 0 : i32
    %c0_i32_1 = arith.constant 0 : i32
    return %c0_i32, %c0_i32_0 : i32, i32
  }
  func.func @transform_7(%arg0: i32) -> (i32, i32) {
    %c0_i32 = arith.constant 0 : i32
    %c0_i32_0 = arith.constant 0 : i32
    return %arg0, %c0_i32 : i32, i32
  }
}

module attributes {stable_mosaic.version = 11 : i64} {
  func.func @_win_attn_kernel(%arg0: i32, %arg1: memref<4x16x32xf32, #tpu.memory_space<vmem>>, %arg2: memref<1x32xf32, #tpu.memory_space<vmem>>, %arg3: memref<1x32xf32, #tpu.memory_space<vmem>>, %arg4: memref<4x16x16xf32, #tpu.memory_space<vmem>>, %arg5: memref<32x96xf32, #tpu.memory_space<vmem>>, %arg6: memref<1x96xf32, #tpu.memory_space<vmem>>, %arg7: memref<32x32xf32, #tpu.memory_space<vmem>>, %arg8: memref<1x32xf32, #tpu.memory_space<vmem>>, %arg9: memref<4x16x16xf32, #tpu.memory_space<vmem>>, %arg10: memref<4x16x32xf32, #tpu.memory_space<vmem>>) attributes {dimension_semantics = [#tpu.dimension_semantics<parallel>], iteration_bounds = array<i64: 2>, scalar_prefetch = 0 : i64, scratch_operands = 0 : i64, tpu.core_type = #tpu.core_type<tc>, window_params = [{transform_indices = @transform_0, window_bounds = array<i64: 4, 16, 32>}, {pipeline_mode = #tpu.pipeline_mode<synchronous>, transform_indices = @transform_1, window_bounds = array<i64: 1, 32>}, {pipeline_mode = #tpu.pipeline_mode<synchronous>, transform_indices = @transform_2, window_bounds = array<i64: 1, 32>}, {pipeline_mode = #tpu.pipeline_mode<synchronous>, transform_indices = @transform_3, window_bounds = array<i64: 4, 16, 16>}, {pipeline_mode = #tpu.pipeline_mode<synchronous>, transform_indices = @transform_4, window_bounds = array<i64: 32, 96>}, {pipeline_mode = #tpu.pipeline_mode<synchronous>, transform_indices = @transform_5, window_bounds = array<i64: 1, 96>}, {pipeline_mode = #tpu.pipeline_mode<synchronous>, transform_indices = @transform_6, window_bounds = array<i64: 32, 32>}, {pipeline_mode = #tpu.pipeline_mode<synchronous>, transform_indices = @transform_7, window_bounds = array<i64: 1, 32>}, {pipeline_mode = #tpu.pipeline_mode<synchronous>, transform_indices = @transform_8, window_bounds = array<i64: 4, 16, 16>}, {transform_indices = @transform_9, window_bounds = array<i64: 4, 16, 32>}]} {
    %c0 = arith.constant 0 : index
    %c0_0 = arith.constant 0 : index
    %c0_1 = arith.constant 0 : index
    %0 = vector.load %arg1[%c0, %c0_0, %c0_1] : memref<4x16x32xf32, #tpu.memory_space<vmem>>, vector<4x16x32xf32>
    %cst = arith.constant dense<0.000000e+00> : vector<4x16xf32>
    %1 = vector.multi_reduction <add>, %0, %cst [2] : vector<4x16x32xf32> to vector<4x16xf32>
    %2 = vector.shape_cast %1 : vector<4x16xf32> to vector<4x16x1xf32>
    %cst_2 = arith.constant 3.200000e+01 : f32
    %3 = vector.broadcast %cst_2 : f32 to vector<4x16x1xf32>
    %4 = arith.divf %2, %3 : vector<4x16x1xf32>
    %5 = vector.broadcast %4 : vector<4x16x1xf32> to vector<4x16x32xf32>
    %6 = arith.subf %0, %5 : vector<4x16x32xf32>
    %7 = arith.mulf %6, %6 : vector<4x16x32xf32>
    %cst_3 = arith.constant dense<0.000000e+00> : vector<4x16xf32>
    %8 = vector.multi_reduction <add>, %7, %cst_3 [2] : vector<4x16x32xf32> to vector<4x16xf32>
    %9 = vector.shape_cast %8 : vector<4x16xf32> to vector<4x16x1xf32>
    %cst_4 = arith.constant 3.200000e+01 : f32
    %10 = vector.broadcast %cst_4 : f32 to vector<4x16x1xf32>
    %11 = arith.divf %9, %10 : vector<4x16x1xf32>
    %12 = vector.broadcast %4 : vector<4x16x1xf32> to vector<4x16x32xf32>
    %13 = arith.subf %0, %12 : vector<4x16x32xf32>
    %cst_5 = arith.constant 9.99999974E-6 : f32
    %14 = vector.broadcast %cst_5 : f32 to vector<4x16x1xf32>
    %15 = arith.addf %11, %14 : vector<4x16x1xf32>
    %16 = math.rsqrt %15 : vector<4x16x1xf32>
    %17 = vector.broadcast %16 : vector<4x16x1xf32> to vector<4x16x32xf32>
    %18 = arith.mulf %13, %17 : vector<4x16x32xf32>
    %c0_6 = arith.constant 0 : index
    %c0_7 = arith.constant 0 : index
    %19 = vector.load %arg2[%c0_6, %c0_7] : memref<1x32xf32, #tpu.memory_space<vmem>>, vector<1x32xf32>
    %20 = vector.shape_cast %19 : vector<1x32xf32> to vector<1x1x32xf32>
    %21 = vector.broadcast %20 : vector<1x1x32xf32> to vector<4x16x32xf32>
    %22 = arith.mulf %18, %21 : vector<4x16x32xf32>
    %c0_8 = arith.constant 0 : index
    %c0_9 = arith.constant 0 : index
    %23 = vector.load %arg3[%c0_8, %c0_9] : memref<1x32xf32, #tpu.memory_space<vmem>>, vector<1x32xf32>
    %24 = vector.shape_cast %23 : vector<1x32xf32> to vector<1x1x32xf32>
    %25 = vector.broadcast %24 : vector<1x1x32xf32> to vector<4x16x32xf32>
    %26 = arith.addf %22, %25 : vector<4x16x32xf32>
    %27 = vector.shape_cast %26 : vector<4x16x32xf32> to vector<64x32xf32>
    %28 = arith.truncf %27 : vector<64x32xf32> to vector<64x32xbf16>
    %c0_10 = arith.constant 0 : index
    %c0_11 = arith.constant 0 : index
    %29 = vector.load %arg5[%c0_10, %c0_11] : memref<32x96xf32, #tpu.memory_space<vmem>>, vector<32x96xf32>
    %30 = arith.truncf %29 : vector<32x96xf32> to vector<32x96xbf16>
    %cst_12 = arith.constant dense<0.000000e+00> : vector<64x96xf32>
    %31 = tpu.matmul %28, %30, %cst_12 {dimension_numbers = #tpu.dot_dimension_numbers<[1], [0], [0], [1], [0, 0, 1, 1], [], []>} : vector<64x32xbf16>, vector<32x96xbf16>, vector<64x96xf32> -> vector<64x96xf32>
    %c0_13 = arith.constant 0 : index
    %c0_14 = arith.constant 0 : index
    %32 = vector.load %arg6[%c0_13, %c0_14] : memref<1x96xf32, #tpu.memory_space<vmem>>, vector<1x96xf32>
    %33 = vector.broadcast %32 : vector<1x96xf32> to vector<64x96xf32>
    %34 = arith.addf %31, %33 : vector<64x96xf32>
    %c0_15 = arith.constant 0 : index
    %c0_16 = arith.constant 0 : index
    %c0_17 = arith.constant 0 : index
    %35 = vector.load %arg9[%c0_15, %c0_16, %c0_17] : memref<4x16x16xf32, #tpu.memory_space<vmem>>, vector<4x16x16xf32>
    %c0_18 = arith.constant 0 : index
    %c0_19 = arith.constant 0 : index
    %36 = vector.load %arg7[%c0_18, %c0_19] : memref<32x32xf32, #tpu.memory_space<vmem>>, vector<32x32xf32>
    %37 = arith.truncf %36 : vector<32x32xf32> to vector<32x32xbf16>
    %cst_20 = arith.constant 0.000000e+00 : f32
    %38 = vector.broadcast %cst_20 : f32 to vector<64x32xf32>
    %39 = vector.extract_strided_slice %34 {offsets = [0, 0], sizes = [64, 8], strides = [1, 1]} : vector<64x96xf32> to vector<64x8xf32>
    %40 = vector.shape_cast %39 : vector<64x8xf32> to vector<4x16x8xf32>
    %41 = vector.extract_strided_slice %34 {offsets = [0, 32], sizes = [64, 8], strides = [1, 1]} : vector<64x96xf32> to vector<64x8xf32>
    %42 = vector.shape_cast %41 : vector<64x8xf32> to vector<4x16x8xf32>
    %43 = vector.extract_strided_slice %34 {offsets = [0, 64], sizes = [64, 8], strides = [1, 1]} : vector<64x96xf32> to vector<64x8xf32>
    %44 = vector.shape_cast %43 : vector<64x8xf32> to vector<4x16x8xf32>
    %45 = arith.truncf %40 : vector<4x16x8xf32> to vector<4x16x8xbf16>
    %46 = arith.truncf %42 : vector<4x16x8xf32> to vector<4x16x8xbf16>
    "tpu.trace_start"() <{level = 10 : i32, message = "wnd,wmd->wnm"}> : () -> ()
    %cst_21 = arith.constant dense<0.000000e+00> : vector<4x16x16xf32>
    %47 = tpu.matmul %45, %46, %cst_21 {dimension_numbers = #tpu.dot_dimension_numbers<[2], [2], [1], [1], [0, 0, 0, 1, 1, 1], [0], [0]>} : vector<4x16x8xbf16>, vector<4x16x8xbf16>, vector<4x16x16xf32> -> vector<4x16x16xf32>
    "tpu.trace_stop"() : () -> ()
    %cst_22 = arith.constant 0.353553385 : f32
    %48 = vector.broadcast %cst_22 : f32 to vector<4x16x16xf32>
    %49 = arith.mulf %47, %48 : vector<4x16x16xf32>
    %c0_23 = arith.constant 0 : index
    %c0_24 = arith.constant 0 : index
    %c0_25 = arith.constant 0 : index
    %50 = vector.load %arg4[%c0_23, %c0_24, %c0_25] : memref<4x16x16xf32, #tpu.memory_space<vmem>>, vector<1x16x16xf32>
    %51 = vector.shape_cast %50 : vector<1x16x16xf32> to vector<16x16xf32>
    %52 = vector.shape_cast %51 : vector<16x16xf32> to vector<1x16x16xf32>
    %53 = vector.broadcast %52 : vector<1x16x16xf32> to vector<4x16x16xf32>
    %54 = arith.addf %49, %53 : vector<4x16x16xf32>
    %55 = arith.addf %54, %35 : vector<4x16x16xf32>
    %cst_26 = arith.constant dense<0xFF800000> : vector<4x16xf32>
    %56 = vector.multi_reduction <maximumf>, %55, %cst_26 [2] : vector<4x16x16xf32> to vector<4x16xf32>
    %cst_27 = arith.constant 0xFF800000 : f32
    %57 = vector.broadcast %cst_27 : f32 to vector<4x16xf32>
    %58 = arith.maximumf %57, %56 : vector<4x16xf32>
    %59 = vector.shape_cast %58 : vector<4x16xf32> to vector<4x16x1xf32>
    %60 = vector.broadcast %59 : vector<4x16x1xf32> to vector<4x16x16xf32>
    %61 = arith.subf %55, %60 : vector<4x16x16xf32>
    %62 = math.exp %61 : vector<4x16x16xf32>
    %cst_28 = arith.constant dense<0.000000e+00> : vector<4x16xf32>
    %63 = vector.multi_reduction <add>, %62, %cst_28 [2] : vector<4x16x16xf32> to vector<4x16xf32>
    %64 = vector.shape_cast %63 : vector<4x16xf32> to vector<4x16x1xf32>
    %65 = vector.broadcast %64 : vector<4x16x1xf32> to vector<4x16x16xf32>
    %66 = arith.divf %62, %65 : vector<4x16x16xf32>
    %67 = arith.truncf %66 : vector<4x16x16xf32> to vector<4x16x16xbf16>
    %68 = arith.truncf %44 : vector<4x16x8xf32> to vector<4x16x8xbf16>
    "tpu.trace_start"() <{level = 10 : i32, message = "wnm,wmd->wnd"}> : () -> ()
    %cst_29 = arith.constant dense<0.000000e+00> : vector<4x16x8xf32>
    %69 = tpu.matmul %67, %68, %cst_29 {dimension_numbers = #tpu.dot_dimension_numbers<[2], [1], [1], [2], [0, 0, 0, 1, 1, 2], [0], [0]>} : vector<4x16x16xbf16>, vector<4x16x8xbf16>, vector<4x16x8xf32> -> vector<4x16x8xf32>
    "tpu.trace_stop"() : () -> ()
    %70 = vector.shape_cast %69 : vector<4x16x8xf32> to vector<64x8xf32>
    %71 = arith.truncf %70 : vector<64x8xf32> to vector<64x8xbf16>
    %72 = vector.extract_strided_slice %37 {offsets = [0, 0], sizes = [8, 32], strides = [1, 1]} : vector<32x32xbf16> to vector<8x32xbf16>
    %cst_30 = arith.constant dense<0.000000e+00> : vector<64x32xf32>
    %73 = tpu.matmul %71, %72, %cst_30 {dimension_numbers = #tpu.dot_dimension_numbers<[1], [0], [0], [1], [0, 0, 1, 1], [], []>} : vector<64x8xbf16>, vector<8x32xbf16>, vector<64x32xf32> -> vector<64x32xf32>
    %74 = arith.addf %38, %73 : vector<64x32xf32>
    %75 = vector.extract_strided_slice %34 {offsets = [0, 8], sizes = [64, 8], strides = [1, 1]} : vector<64x96xf32> to vector<64x8xf32>
    %76 = vector.shape_cast %75 : vector<64x8xf32> to vector<4x16x8xf32>
    %77 = vector.extract_strided_slice %34 {offsets = [0, 40], sizes = [64, 8], strides = [1, 1]} : vector<64x96xf32> to vector<64x8xf32>
    %78 = vector.shape_cast %77 : vector<64x8xf32> to vector<4x16x8xf32>
    %79 = vector.extract_strided_slice %34 {offsets = [0, 72], sizes = [64, 8], strides = [1, 1]} : vector<64x96xf32> to vector<64x8xf32>
    %80 = vector.shape_cast %79 : vector<64x8xf32> to vector<4x16x8xf32>
    %81 = arith.truncf %76 : vector<4x16x8xf32> to vector<4x16x8xbf16>
    %82 = arith.truncf %78 : vector<4x16x8xf32> to vector<4x16x8xbf16>
    "tpu.trace_start"() <{level = 10 : i32, message = "wnd,wmd->wnm"}> : () -> ()
    %cst_31 = arith.constant dense<0.000000e+00> : vector<4x16x16xf32>
    %83 = tpu.matmul %81, %82, %cst_31 {dimension_numbers = #tpu.dot_dimension_numbers<[2], [2], [1], [1], [0, 0, 0, 1, 1, 1], [0], [0]>} : vector<4x16x8xbf16>, vector<4x16x8xbf16>, vector<4x16x16xf32> -> vector<4x16x16xf32>
    "tpu.trace_stop"() : () -> ()
    %cst_32 = arith.constant 0.353553385 : f32
    %84 = vector.broadcast %cst_32 : f32 to vector<4x16x16xf32>
    %85 = arith.mulf %83, %84 : vector<4x16x16xf32>
    %c1 = arith.constant 1 : index
    %c0_33 = arith.constant 0 : index
    %c0_34 = arith.constant 0 : index
    %86 = vector.load %arg4[%c1, %c0_33, %c0_34] : memref<4x16x16xf32, #tpu.memory_space<vmem>>, vector<1x16x16xf32>
    %87 = vector.shape_cast %86 : vector<1x16x16xf32> to vector<16x16xf32>
    %88 = vector.shape_cast %87 : vector<16x16xf32> to vector<1x16x16xf32>
    %89 = vector.broadcast %88 : vector<1x16x16xf32> to vector<4x16x16xf32>
    %90 = arith.addf %85, %89 : vector<4x16x16xf32>
    %91 = arith.addf %90, %35 : vector<4x16x16xf32>
    %cst_35 = arith.constant dense<0xFF800000> : vector<4x16xf32>
    %92 = vector.multi_reduction <maximumf>, %91, %cst_35 [2] : vector<4x16x16xf32> to vector<4x16xf32>
    %cst_36 = arith.constant 0xFF800000 : f32
    %93 = vector.broadcast %cst_36 : f32 to vector<4x16xf32>
    %94 = arith.maximumf %93, %92 : vector<4x16xf32>
    %95 = vector.shape_cast %94 : vector<4x16xf32> to vector<4x16x1xf32>
    %96 = vector.broadcast %95 : vector<4x16x1xf32> to vector<4x16x16xf32>
    %97 = arith.subf %91, %96 : vector<4x16x16xf32>
    %98 = math.exp %97 : vector<4x16x16xf32>
    %cst_37 = arith.constant dense<0.000000e+00> : vector<4x16xf32>
    %99 = vector.multi_reduction <add>, %98, %cst_37 [2] : vector<4x16x16xf32> to vector<4x16xf32>
    %100 = vector.shape_cast %99 : vector<4x16xf32> to vector<4x16x1xf32>
    %101 = vector.broadcast %100 : vector<4x16x1xf32> to vector<4x16x16xf32>
    %102 = arith.divf %98, %101 : vector<4x16x16xf32>
    %103 = arith.truncf %102 : vector<4x16x16xf32> to vector<4x16x16xbf16>
    %104 = arith.truncf %80 : vector<4x16x8xf32> to vector<4x16x8xbf16>
    "tpu.trace_start"() <{level = 10 : i32, message = "wnm,wmd->wnd"}> : () -> ()
    %cst_38 = arith.constant dense<0.000000e+00> : vector<4x16x8xf32>
    %105 = tpu.matmul %103, %104, %cst_38 {dimension_numbers = #tpu.dot_dimension_numbers<[2], [1], [1], [2], [0, 0, 0, 1, 1, 2], [0], [0]>} : vector<4x16x16xbf16>, vector<4x16x8xbf16>, vector<4x16x8xf32> -> vector<4x16x8xf32>
    "tpu.trace_stop"() : () -> ()
    %106 = vector.shape_cast %105 : vector<4x16x8xf32> to vector<64x8xf32>
    %107 = arith.truncf %106 : vector<64x8xf32> to vector<64x8xbf16>
    %108 = vector.extract_strided_slice %37 {offsets = [8, 0], sizes = [8, 32], strides = [1, 1]} : vector<32x32xbf16> to vector<8x32xbf16>
    %cst_39 = arith.constant dense<0.000000e+00> : vector<64x32xf32>
    %109 = tpu.matmul %107, %108, %cst_39 {dimension_numbers = #tpu.dot_dimension_numbers<[1], [0], [0], [1], [0, 0, 1, 1], [], []>} : vector<64x8xbf16>, vector<8x32xbf16>, vector<64x32xf32> -> vector<64x32xf32>
    %110 = arith.addf %74, %109 : vector<64x32xf32>
    %111 = vector.extract_strided_slice %34 {offsets = [0, 16], sizes = [64, 8], strides = [1, 1]} : vector<64x96xf32> to vector<64x8xf32>
    %112 = vector.shape_cast %111 : vector<64x8xf32> to vector<4x16x8xf32>
    %113 = vector.extract_strided_slice %34 {offsets = [0, 48], sizes = [64, 8], strides = [1, 1]} : vector<64x96xf32> to vector<64x8xf32>
    %114 = vector.shape_cast %113 : vector<64x8xf32> to vector<4x16x8xf32>
    %115 = vector.extract_strided_slice %34 {offsets = [0, 80], sizes = [64, 8], strides = [1, 1]} : vector<64x96xf32> to vector<64x8xf32>
    %116 = vector.shape_cast %115 : vector<64x8xf32> to vector<4x16x8xf32>
    %117 = arith.truncf %112 : vector<4x16x8xf32> to vector<4x16x8xbf16>
    %118 = arith.truncf %114 : vector<4x16x8xf32> to vector<4x16x8xbf16>
    "tpu.trace_start"() <{level = 10 : i32, message = "wnd,wmd->wnm"}> : () -> ()
    %cst_40 = arith.constant dense<0.000000e+00> : vector<4x16x16xf32>
    %119 = tpu.matmul %117, %118, %cst_40 {dimension_numbers = #tpu.dot_dimension_numbers<[2], [2], [1], [1], [0, 0, 0, 1, 1, 1], [0], [0]>} : vector<4x16x8xbf16>, vector<4x16x8xbf16>, vector<4x16x16xf32> -> vector<4x16x16xf32>
    "tpu.trace_stop"() : () -> ()
    %cst_41 = arith.constant 0.353553385 : f32
    %120 = vector.broadcast %cst_41 : f32 to vector<4x16x16xf32>
    %121 = arith.mulf %119, %120 : vector<4x16x16xf32>
    %c2 = arith.constant 2 : index
    %c0_42 = arith.constant 0 : index
    %c0_43 = arith.constant 0 : index
    %122 = vector.load %arg4[%c2, %c0_42, %c0_43] : memref<4x16x16xf32, #tpu.memory_space<vmem>>, vector<1x16x16xf32>
    %123 = vector.shape_cast %122 : vector<1x16x16xf32> to vector<16x16xf32>
    %124 = vector.shape_cast %123 : vector<16x16xf32> to vector<1x16x16xf32>
    %125 = vector.broadcast %124 : vector<1x16x16xf32> to vector<4x16x16xf32>
    %126 = arith.addf %121, %125 : vector<4x16x16xf32>
    %127 = arith.addf %126, %35 : vector<4x16x16xf32>
    %cst_44 = arith.constant dense<0xFF800000> : vector<4x16xf32>
    %128 = vector.multi_reduction <maximumf>, %127, %cst_44 [2] : vector<4x16x16xf32> to vector<4x16xf32>
    %cst_45 = arith.constant 0xFF800000 : f32
    %129 = vector.broadcast %cst_45 : f32 to vector<4x16xf32>
    %130 = arith.maximumf %129, %128 : vector<4x16xf32>
    %131 = vector.shape_cast %130 : vector<4x16xf32> to vector<4x16x1xf32>
    %132 = vector.broadcast %131 : vector<4x16x1xf32> to vector<4x16x16xf32>
    %133 = arith.subf %127, %132 : vector<4x16x16xf32>
    %134 = math.exp %133 : vector<4x16x16xf32>
    %cst_46 = arith.constant dense<0.000000e+00> : vector<4x16xf32>
    %135 = vector.multi_reduction <add>, %134, %cst_46 [2] : vector<4x16x16xf32> to vector<4x16xf32>
    %136 = vector.shape_cast %135 : vector<4x16xf32> to vector<4x16x1xf32>
    %137 = vector.broadcast %136 : vector<4x16x1xf32> to vector<4x16x16xf32>
    %138 = arith.divf %134, %137 : vector<4x16x16xf32>
    %139 = arith.truncf %138 : vector<4x16x16xf32> to vector<4x16x16xbf16>
    %140 = arith.truncf %116 : vector<4x16x8xf32> to vector<4x16x8xbf16>
    "tpu.trace_start"() <{level = 10 : i32, message = "wnm,wmd->wnd"}> : () -> ()
    %cst_47 = arith.constant dense<0.000000e+00> : vector<4x16x8xf32>
    %141 = tpu.matmul %139, %140, %cst_47 {dimension_numbers = #tpu.dot_dimension_numbers<[2], [1], [1], [2], [0, 0, 0, 1, 1, 2], [0], [0]>} : vector<4x16x16xbf16>, vector<4x16x8xbf16>, vector<4x16x8xf32> -> vector<4x16x8xf32>
    "tpu.trace_stop"() : () -> ()
    %142 = vector.shape_cast %141 : vector<4x16x8xf32> to vector<64x8xf32>
    %143 = arith.truncf %142 : vector<64x8xf32> to vector<64x8xbf16>
    %144 = vector.extract_strided_slice %37 {offsets = [16, 0], sizes = [8, 32], strides = [1, 1]} : vector<32x32xbf16> to vector<8x32xbf16>
    %cst_48 = arith.constant dense<0.000000e+00> : vector<64x32xf32>
    %145 = tpu.matmul %143, %144, %cst_48 {dimension_numbers = #tpu.dot_dimension_numbers<[1], [0], [0], [1], [0, 0, 1, 1], [], []>} : vector<64x8xbf16>, vector<8x32xbf16>, vector<64x32xf32> -> vector<64x32xf32>
    %146 = arith.addf %110, %145 : vector<64x32xf32>
    %147 = vector.extract_strided_slice %34 {offsets = [0, 24], sizes = [64, 8], strides = [1, 1]} : vector<64x96xf32> to vector<64x8xf32>
    %148 = vector.shape_cast %147 : vector<64x8xf32> to vector<4x16x8xf32>
    %149 = vector.extract_strided_slice %34 {offsets = [0, 56], sizes = [64, 8], strides = [1, 1]} : vector<64x96xf32> to vector<64x8xf32>
    %150 = vector.shape_cast %149 : vector<64x8xf32> to vector<4x16x8xf32>
    %151 = vector.extract_strided_slice %34 {offsets = [0, 88], sizes = [64, 8], strides = [1, 1]} : vector<64x96xf32> to vector<64x8xf32>
    %152 = vector.shape_cast %151 : vector<64x8xf32> to vector<4x16x8xf32>
    %153 = arith.truncf %148 : vector<4x16x8xf32> to vector<4x16x8xbf16>
    %154 = arith.truncf %150 : vector<4x16x8xf32> to vector<4x16x8xbf16>
    "tpu.trace_start"() <{level = 10 : i32, message = "wnd,wmd->wnm"}> : () -> ()
    %cst_49 = arith.constant dense<0.000000e+00> : vector<4x16x16xf32>
    %155 = tpu.matmul %153, %154, %cst_49 {dimension_numbers = #tpu.dot_dimension_numbers<[2], [2], [1], [1], [0, 0, 0, 1, 1, 1], [0], [0]>} : vector<4x16x8xbf16>, vector<4x16x8xbf16>, vector<4x16x16xf32> -> vector<4x16x16xf32>
    "tpu.trace_stop"() : () -> ()
    %cst_50 = arith.constant 0.353553385 : f32
    %156 = vector.broadcast %cst_50 : f32 to vector<4x16x16xf32>
    %157 = arith.mulf %155, %156 : vector<4x16x16xf32>
    %c3 = arith.constant 3 : index
    %c0_51 = arith.constant 0 : index
    %c0_52 = arith.constant 0 : index
    %158 = vector.load %arg4[%c3, %c0_51, %c0_52] : memref<4x16x16xf32, #tpu.memory_space<vmem>>, vector<1x16x16xf32>
    %159 = vector.shape_cast %158 : vector<1x16x16xf32> to vector<16x16xf32>
    %160 = vector.shape_cast %159 : vector<16x16xf32> to vector<1x16x16xf32>
    %161 = vector.broadcast %160 : vector<1x16x16xf32> to vector<4x16x16xf32>
    %162 = arith.addf %157, %161 : vector<4x16x16xf32>
    %163 = arith.addf %162, %35 : vector<4x16x16xf32>
    %cst_53 = arith.constant dense<0xFF800000> : vector<4x16xf32>
    %164 = vector.multi_reduction <maximumf>, %163, %cst_53 [2] : vector<4x16x16xf32> to vector<4x16xf32>
    %cst_54 = arith.constant 0xFF800000 : f32
    %165 = vector.broadcast %cst_54 : f32 to vector<4x16xf32>
    %166 = arith.maximumf %165, %164 : vector<4x16xf32>
    %167 = vector.shape_cast %166 : vector<4x16xf32> to vector<4x16x1xf32>
    %168 = vector.broadcast %167 : vector<4x16x1xf32> to vector<4x16x16xf32>
    %169 = arith.subf %163, %168 : vector<4x16x16xf32>
    %170 = math.exp %169 : vector<4x16x16xf32>
    %cst_55 = arith.constant dense<0.000000e+00> : vector<4x16xf32>
    %171 = vector.multi_reduction <add>, %170, %cst_55 [2] : vector<4x16x16xf32> to vector<4x16xf32>
    %172 = vector.shape_cast %171 : vector<4x16xf32> to vector<4x16x1xf32>
    %173 = vector.broadcast %172 : vector<4x16x1xf32> to vector<4x16x16xf32>
    %174 = arith.divf %170, %173 : vector<4x16x16xf32>
    %175 = arith.truncf %174 : vector<4x16x16xf32> to vector<4x16x16xbf16>
    %176 = arith.truncf %152 : vector<4x16x8xf32> to vector<4x16x8xbf16>
    "tpu.trace_start"() <{level = 10 : i32, message = "wnm,wmd->wnd"}> : () -> ()
    %cst_56 = arith.constant dense<0.000000e+00> : vector<4x16x8xf32>
    %177 = tpu.matmul %175, %176, %cst_56 {dimension_numbers = #tpu.dot_dimension_numbers<[2], [1], [1], [2], [0, 0, 0, 1, 1, 2], [0], [0]>} : vector<4x16x16xbf16>, vector<4x16x8xbf16>, vector<4x16x8xf32> -> vector<4x16x8xf32>
    "tpu.trace_stop"() : () -> ()
    %178 = vector.shape_cast %177 : vector<4x16x8xf32> to vector<64x8xf32>
    %179 = arith.truncf %178 : vector<64x8xf32> to vector<64x8xbf16>
    %180 = vector.extract_strided_slice %37 {offsets = [24, 0], sizes = [8, 32], strides = [1, 1]} : vector<32x32xbf16> to vector<8x32xbf16>
    %cst_57 = arith.constant dense<0.000000e+00> : vector<64x32xf32>
    %181 = tpu.matmul %179, %180, %cst_57 {dimension_numbers = #tpu.dot_dimension_numbers<[1], [0], [0], [1], [0, 0, 1, 1], [], []>} : vector<64x8xbf16>, vector<8x32xbf16>, vector<64x32xf32> -> vector<64x32xf32>
    %182 = arith.addf %146, %181 : vector<64x32xf32>
    %c0_58 = arith.constant 0 : index
    %c0_59 = arith.constant 0 : index
    %183 = vector.load %arg8[%c0_58, %c0_59] : memref<1x32xf32, #tpu.memory_space<vmem>>, vector<1x32xf32>
    %184 = vector.broadcast %183 : vector<1x32xf32> to vector<64x32xf32>
    %185 = arith.addf %182, %184 : vector<64x32xf32>
    %186 = vector.shape_cast %185 : vector<64x32xf32> to vector<4x16x32xf32>
    %187 = arith.addf %186, %0 : vector<4x16x32xf32>
    %c0_60 = arith.constant 0 : index
    %c0_61 = arith.constant 0 : index
    %c0_62 = arith.constant 0 : index
    %188 = vector.load %arg10[%c0_60, %c0_61, %c0_62] : memref<4x16x32xf32, #tpu.memory_space<vmem>>, vector<4x16x32xf32>
    tpu.vector_store %arg10[%c0_60, %c0_61, %c0_62], %187 {strides = array<i32>} : memref<4x16x32xf32, #tpu.memory_space<vmem>>, vector<4x16x32xf32>,
    return
  }
  func.func @transform_0(%arg0: i32) -> (i32, i32, i32) {
    %c0_i32 = arith.constant 0 : i32
    %c0_i32_0 = arith.constant 0 : i32
    %c0_i32_1 = arith.constant 0 : i32
    return %arg0, %c0_i32, %c0_i32_0 : i32, i32, i32
  }
  func.func @transform_1(%arg0: i32) -> (i32, i32) {
    %c0_i32 = arith.constant 0 : i32
    %c0_i32_0 = arith.constant 0 : i32
    %c0_i32_1 = arith.constant 0 : i32
    return %c0_i32, %c0_i32_0 : i32, i32
  }
  func.func @transform_2(%arg0: i32) -> (i32, i32) {
    %c0_i32 = arith.constant 0 : i32
    %c0_i32_0 = arith.constant 0 : i32
    %c0_i32_1 = arith.constant 0 : i32
    return %c0_i32, %c0_i32_0 : i32, i32
  }
  func.func @transform_3(%arg0: i32) -> (i32, i32, i32) {
    %c0_i32 = arith.constant 0 : i32
    %c0_i32_0 = arith.constant 0 : i32
    %c0_i32_1 = arith.constant 0 : i32
    %c0_i32_2 = arith.constant 0 : i32
    return %c0_i32, %c0_i32_0, %c0_i32_1 : i32, i32, i32
  }
  func.func @transform_4(%arg0: i32) -> (i32, i32) {
    %c0_i32 = arith.constant 0 : i32
    %c0_i32_0 = arith.constant 0 : i32
    %c0_i32_1 = arith.constant 0 : i32
    return %c0_i32, %c0_i32_0 : i32, i32
  }
  func.func @transform_5(%arg0: i32) -> (i32, i32) {
    %c0_i32 = arith.constant 0 : i32
    %c0_i32_0 = arith.constant 0 : i32
    %c0_i32_1 = arith.constant 0 : i32
    return %c0_i32, %c0_i32_0 : i32, i32
  }
  func.func @transform_6(%arg0: i32) -> (i32, i32) {
    %c0_i32 = arith.constant 0 : i32
    %c0_i32_0 = arith.constant 0 : i32
    %c0_i32_1 = arith.constant 0 : i32
    return %c0_i32, %c0_i32_0 : i32, i32
  }
  func.func @transform_7(%arg0: i32) -> (i32, i32) {
    %c0_i32 = arith.constant 0 : i32
    %c0_i32_0 = arith.constant 0 : i32
    %c0_i32_1 = arith.constant 0 : i32
    return %c0_i32, %c0_i32_0 : i32, i32
  }
  func.func @transform_8(%arg0: i32) -> (i32, i32, i32) {
    %c0_i32 = arith.constant 0 : i32
    %c0_i32_0 = arith.constant 0 : i32
    %c0_i32_1 = arith.constant 0 : i32
    %c0_i32_2 = arith.constant 0 : i32
    return %c0_i32, %c0_i32_0, %c0_i32_1 : i32, i32, i32
  }
  func.func @transform_9(%arg0: i32) -> (i32, i32, i32) {
    %c0_i32 = arith.constant 0 : i32
    %c0_i32_0 = arith.constant 0 : i32
    %c0_i32_1 = arith.constant 0 : i32
    return %arg0, %c0_i32, %c0_i32_0 : i32, i32, i32
  }
}

module attributes {stable_mosaic.version = 11 : i64} {
  func.func @_patch_expand_kernel(%arg0: i32, %arg1: memref<1x64x32xf32, #tpu.memory_space<vmem>>, %arg2: memref<32x64xf32, #tpu.memory_space<vmem>>, %arg3: memref<1x16xf32, #tpu.memory_space<vmem>>, %arg4: memref<1x16xf32, #tpu.memory_space<vmem>>, %arg5: memref<1x8x2x8x32xf32, #tpu.memory_space<vmem>>) attributes {dimension_semantics = [#tpu.dimension_semantics<parallel>], iteration_bounds = array<i64: 2>, scalar_prefetch = 0 : i64, scratch_operands = 0 : i64, tpu.core_type = #tpu.core_type<tc>, window_params = [{transform_indices = @transform_0, window_bounds = array<i64: 1, 64, 32>}, {pipeline_mode = #tpu.pipeline_mode<synchronous>, transform_indices = @transform_1, window_bounds = array<i64: 32, 64>}, {pipeline_mode = #tpu.pipeline_mode<synchronous>, transform_indices = @transform_2, window_bounds = array<i64: 1, 16>}, {pipeline_mode = #tpu.pipeline_mode<synchronous>, transform_indices = @transform_3, window_bounds = array<i64: 1, 16>}, {transform_indices = @transform_4, window_bounds = array<i64: 1, 8, 2, 8, 32>}]} {
    %c0 = arith.constant 0 : index
    %c0_0 = arith.constant 0 : index
    %c0_1 = arith.constant 0 : index
    %0 = vector.load %arg1[%c0, %c0_0, %c0_1] : memref<1x64x32xf32, #tpu.memory_space<vmem>>, vector<1x64x32xf32>
    %1 = vector.shape_cast %0 : vector<1x64x32xf32> to vector<64x32xf32>
    %2 = arith.truncf %1 : vector<64x32xf32> to vector<64x32xbf16>
    %c0_2 = arith.constant 0 : index
    %c0_3 = arith.constant 0 : index
    %3 = vector.load %arg2[%c0_2, %c0_3] : memref<32x64xf32, #tpu.memory_space<vmem>>, vector<32x64xf32>
    %4 = arith.truncf %3 : vector<32x64xf32> to vector<32x64xbf16>
    %cst = arith.constant dense<0.000000e+00> : vector<64x64xf32>
    %5 = tpu.matmul %2, %4, %cst {dimension_numbers = #tpu.dot_dimension_numbers<[1], [0], [0], [1], [0, 0, 1, 1], [], []>} : vector<64x32xbf16>, vector<32x64xbf16>, vector<64x64xf32> -> vector<64x64xf32>
    %6 = vector.extract_strided_slice %5 {offsets = [0, 0], sizes = [64, 16], strides = [1, 1]} : vector<64x64xf32> to vector<64x16xf32>
    %cst_4 = arith.constant dense<0.000000e+00> : vector<64xf32>
    %7 = vector.multi_reduction <add>, %6, %cst_4 [1] : vector<64x16xf32> to vector<64xf32>
    %8 = vector.shape_cast %7 : vector<64xf32> to vector<64x1xf32>
    %cst_5 = arith.constant 1.600000e+01 : f32
    %9 = vector.broadcast %cst_5 : f32 to vector<64x1xf32>
    %10 = arith.divf %8, %9 : vector<64x1xf32>
    %11 = vector.broadcast %10 : vector<64x1xf32> to vector<64x16xf32>
    %12 = arith.subf %6, %11 : vector<64x16xf32>
    %13 = arith.mulf %12, %12 : vector<64x16xf32>
    %cst_6 = arith.constant dense<0.000000e+00> : vector<64xf32>
    %14 = vector.multi_reduction <add>, %13, %cst_6 [1] : vector<64x16xf32> to vector<64xf32>
    %15 = vector.shape_cast %14 : vector<64xf32> to vector<64x1xf32>
    %cst_7 = arith.constant 1.600000e+01 : f32
    %16 = vector.broadcast %cst_7 : f32 to vector<64x1xf32>
    %17 = arith.divf %15, %16 : vector<64x1xf32>
    %18 = vector.broadcast %10 : vector<64x1xf32> to vector<64x16xf32>
    %19 = arith.subf %6, %18 : vector<64x16xf32>
    %cst_8 = arith.constant 9.99999974E-6 : f32
    %20 = vector.broadcast %cst_8 : f32 to vector<64x1xf32>
    %21 = arith.addf %17, %20 : vector<64x1xf32>
    %22 = math.rsqrt %21 : vector<64x1xf32>
    %23 = vector.broadcast %22 : vector<64x1xf32> to vector<64x16xf32>
    %24 = arith.mulf %19, %23 : vector<64x16xf32>
    %c0_9 = arith.constant 0 : index
    %c0_10 = arith.constant 0 : index
    %25 = vector.load %arg3[%c0_9, %c0_10] : memref<1x16xf32, #tpu.memory_space<vmem>>, vector<1x16xf32>
    %26 = vector.broadcast %25 : vector<1x16xf32> to vector<64x16xf32>
    %27 = arith.mulf %24, %26 : vector<64x16xf32>
    %c0_11 = arith.constant 0 : index
    %c0_12 = arith.constant 0 : index
    %28 = vector.load %arg4[%c0_11, %c0_12] : memref<1x16xf32, #tpu.memory_space<vmem>>, vector<1x16xf32>
    %29 = vector.broadcast %28 : vector<1x16xf32> to vector<64x16xf32>
    %30 = arith.addf %27, %29 : vector<64x16xf32>
    %31 = vector.extract_strided_slice %5 {offsets = [0, 16], sizes = [64, 16], strides = [1, 1]} : vector<64x64xf32> to vector<64x16xf32>
    %cst_13 = arith.constant dense<0.000000e+00> : vector<64xf32>
    %32 = vector.multi_reduction <add>, %31, %cst_13 [1] : vector<64x16xf32> to vector<64xf32>
    %33 = vector.shape_cast %32 : vector<64xf32> to vector<64x1xf32>
    %cst_14 = arith.constant 1.600000e+01 : f32
    %34 = vector.broadcast %cst_14 : f32 to vector<64x1xf32>
    %35 = arith.divf %33, %34 : vector<64x1xf32>
    %36 = vector.broadcast %35 : vector<64x1xf32> to vector<64x16xf32>
    %37 = arith.subf %31, %36 : vector<64x16xf32>
    %38 = arith.mulf %37, %37 : vector<64x16xf32>
    %cst_15 = arith.constant dense<0.000000e+00> : vector<64xf32>
    %39 = vector.multi_reduction <add>, %38, %cst_15 [1] : vector<64x16xf32> to vector<64xf32>
    %40 = vector.shape_cast %39 : vector<64xf32> to vector<64x1xf32>
    %cst_16 = arith.constant 1.600000e+01 : f32
    %41 = vector.broadcast %cst_16 : f32 to vector<64x1xf32>
    %42 = arith.divf %40, %41 : vector<64x1xf32>
    %43 = vector.broadcast %35 : vector<64x1xf32> to vector<64x16xf32>
    %44 = arith.subf %31, %43 : vector<64x16xf32>
    %cst_17 = arith.constant 9.99999974E-6 : f32
    %45 = vector.broadcast %cst_17 : f32 to vector<64x1xf32>
    %46 = arith.addf %42, %45 : vector<64x1xf32>
    %47 = math.rsqrt %46 : vector<64x1xf32>
    %48 = vector.broadcast %47 : vector<64x1xf32> to vector<64x16xf32>
    %49 = arith.mulf %44, %48 : vector<64x16xf32>
    %c0_18 = arith.constant 0 : index
    %c0_19 = arith.constant 0 : index
    %50 = vector.load %arg3[%c0_18, %c0_19] : memref<1x16xf32, #tpu.memory_space<vmem>>, vector<1x16xf32>
    %51 = vector.broadcast %50 : vector<1x16xf32> to vector<64x16xf32>
    %52 = arith.mulf %49, %51 : vector<64x16xf32>
    %c0_20 = arith.constant 0 : index
    %c0_21 = arith.constant 0 : index
    %53 = vector.load %arg4[%c0_20, %c0_21] : memref<1x16xf32, #tpu.memory_space<vmem>>, vector<1x16xf32>
    %54 = vector.broadcast %53 : vector<1x16xf32> to vector<64x16xf32>
    %55 = arith.addf %52, %54 : vector<64x16xf32>
    %56 = vector.extract_strided_slice %5 {offsets = [0, 32], sizes = [64, 16], strides = [1, 1]} : vector<64x64xf32> to vector<64x16xf32>
    %cst_22 = arith.constant dense<0.000000e+00> : vector<64xf32>
    %57 = vector.multi_reduction <add>, %56, %cst_22 [1] : vector<64x16xf32> to vector<64xf32>
    %58 = vector.shape_cast %57 : vector<64xf32> to vector<64x1xf32>
    %cst_23 = arith.constant 1.600000e+01 : f32
    %59 = vector.broadcast %cst_23 : f32 to vector<64x1xf32>
    %60 = arith.divf %58, %59 : vector<64x1xf32>
    %61 = vector.broadcast %60 : vector<64x1xf32> to vector<64x16xf32>
    %62 = arith.subf %56, %61 : vector<64x16xf32>
    %63 = arith.mulf %62, %62 : vector<64x16xf32>
    %cst_24 = arith.constant dense<0.000000e+00> : vector<64xf32>
    %64 = vector.multi_reduction <add>, %63, %cst_24 [1] : vector<64x16xf32> to vector<64xf32>
    %65 = vector.shape_cast %64 : vector<64xf32> to vector<64x1xf32>
    %cst_25 = arith.constant 1.600000e+01 : f32
    %66 = vector.broadcast %cst_25 : f32 to vector<64x1xf32>
    %67 = arith.divf %65, %66 : vector<64x1xf32>
    %68 = vector.broadcast %60 : vector<64x1xf32> to vector<64x16xf32>
    %69 = arith.subf %56, %68 : vector<64x16xf32>
    %cst_26 = arith.constant 9.99999974E-6 : f32
    %70 = vector.broadcast %cst_26 : f32 to vector<64x1xf32>
    %71 = arith.addf %67, %70 : vector<64x1xf32>
    %72 = math.rsqrt %71 : vector<64x1xf32>
    %73 = vector.broadcast %72 : vector<64x1xf32> to vector<64x16xf32>
    %74 = arith.mulf %69, %73 : vector<64x16xf32>
    %c0_27 = arith.constant 0 : index
    %c0_28 = arith.constant 0 : index
    %75 = vector.load %arg3[%c0_27, %c0_28] : memref<1x16xf32, #tpu.memory_space<vmem>>, vector<1x16xf32>
    %76 = vector.broadcast %75 : vector<1x16xf32> to vector<64x16xf32>
    %77 = arith.mulf %74, %76 : vector<64x16xf32>
    %c0_29 = arith.constant 0 : index
    %c0_30 = arith.constant 0 : index
    %78 = vector.load %arg4[%c0_29, %c0_30] : memref<1x16xf32, #tpu.memory_space<vmem>>, vector<1x16xf32>
    %79 = vector.broadcast %78 : vector<1x16xf32> to vector<64x16xf32>
    %80 = arith.addf %77, %79 : vector<64x16xf32>
    %81 = vector.extract_strided_slice %5 {offsets = [0, 48], sizes = [64, 16], strides = [1, 1]} : vector<64x64xf32> to vector<64x16xf32>
    %cst_31 = arith.constant dense<0.000000e+00> : vector<64xf32>
    %82 = vector.multi_reduction <add>, %81, %cst_31 [1] : vector<64x16xf32> to vector<64xf32>
    %83 = vector.shape_cast %82 : vector<64xf32> to vector<64x1xf32>
    %cst_32 = arith.constant 1.600000e+01 : f32
    %84 = vector.broadcast %cst_32 : f32 to vector<64x1xf32>
    %85 = arith.divf %83, %84 : vector<64x1xf32>
    %86 = vector.broadcast %85 : vector<64x1xf32> to vector<64x16xf32>
    %87 = arith.subf %81, %86 : vector<64x16xf32>
    %88 = arith.mulf %87, %87 : vector<64x16xf32>
    %cst_33 = arith.constant dense<0.000000e+00> : vector<64xf32>
    %89 = vector.multi_reduction <add>, %88, %cst_33 [1] : vector<64x16xf32> to vector<64xf32>
    %90 = vector.shape_cast %89 : vector<64xf32> to vector<64x1xf32>
    %cst_34 = arith.constant 1.600000e+01 : f32
    %91 = vector.broadcast %cst_34 : f32 to vector<64x1xf32>
    %92 = arith.divf %90, %91 : vector<64x1xf32>
    %93 = vector.broadcast %85 : vector<64x1xf32> to vector<64x16xf32>
    %94 = arith.subf %81, %93 : vector<64x16xf32>
    %cst_35 = arith.constant 9.99999974E-6 : f32
    %95 = vector.broadcast %cst_35 : f32 to vector<64x1xf32>
    %96 = arith.addf %92, %95 : vector<64x1xf32>
    %97 = math.rsqrt %96 : vector<64x1xf32>
    %98 = vector.broadcast %97 : vector<64x1xf32> to vector<64x16xf32>
    %99 = arith.mulf %94, %98 : vector<64x16xf32>
    %c0_36 = arith.constant 0 : index
    %c0_37 = arith.constant 0 : index
    %100 = vector.load %arg3[%c0_36, %c0_37] : memref<1x16xf32, #tpu.memory_space<vmem>>, vector<1x16xf32>
    %101 = vector.broadcast %100 : vector<1x16xf32> to vector<64x16xf32>
    %102 = arith.mulf %99, %101 : vector<64x16xf32>
    %c0_38 = arith.constant 0 : index
    %c0_39 = arith.constant 0 : index
    %103 = vector.load %arg4[%c0_38, %c0_39] : memref<1x16xf32, #tpu.memory_space<vmem>>, vector<1x16xf32>
    %104 = vector.broadcast %103 : vector<1x16xf32> to vector<64x16xf32>
    %105 = arith.addf %102, %104 : vector<64x16xf32>
    %106 = tpu.concatenate %30, %55, %80, %105 in 1 : vector<64x16xf32>, vector<64x16xf32>, vector<64x16xf32>, vector<64x16xf32> -> vector<64x64xf32>
    %107 = vector.extract_strided_slice %106 {offsets = [0, 0], sizes = [64, 32], strides = [1, 1]} : vector<64x64xf32> to vector<64x32xf32>
    %108 = vector.shape_cast %107 : vector<64x32xf32> to vector<8x8x32xf32>
    %109 = vector.extract_strided_slice %106 {offsets = [0, 32], sizes = [64, 32], strides = [1, 1]} : vector<64x64xf32> to vector<64x32xf32>
    %110 = vector.shape_cast %109 : vector<64x32xf32> to vector<8x8x32xf32>
    %c0_40 = arith.constant 0 : index
    %c0_41 = arith.constant 0 : index
    %c0_42 = arith.constant 0 : index
    %c0_43 = arith.constant 0 : index
    %c0_44 = arith.constant 0 : index
    %111 = vector.load %arg5[%c0_40, %c0_41, %c0_42, %c0_43, %c0_44] : memref<1x8x2x8x32xf32, #tpu.memory_space<vmem>>, vector<1x8x1x8x32xf32>
    %112 = vector.shape_cast %111 : vector<1x8x1x8x32xf32> to vector<8x8x32xf32>
    %113 = vector.shape_cast %108 : vector<8x8x32xf32> to vector<1x8x1x8x32xf32>
    tpu.vector_store %arg5[%c0_40, %c0_41, %c0_42, %c0_43, %c0_44], %113 {strides = array<i32>} : memref<1x8x2x8x32xf32, #tpu.memory_space<vmem>>, vector<1x8x1x8x32xf32>,
    %c0_45 = arith.constant 0 : index
    %c0_46 = arith.constant 0 : index
    %c1 = arith.constant 1 : index
    %c0_47 = arith.constant 0 : index
    %c0_48 = arith.constant 0 : index
    %114 = vector.load %arg5[%c0_45, %c0_46, %c1, %c0_47, %c0_48] : memref<1x8x2x8x32xf32, #tpu.memory_space<vmem>>, vector<1x8x1x8x32xf32>
    %115 = vector.shape_cast %114 : vector<1x8x1x8x32xf32> to vector<8x8x32xf32>
    %116 = vector.shape_cast %110 : vector<8x8x32xf32> to vector<1x8x1x8x32xf32>
    tpu.vector_store %arg5[%c0_45, %c0_46, %c1, %c0_47, %c0_48], %116 {strides = array<i32>} : memref<1x8x2x8x32xf32, #tpu.memory_space<vmem>>, vector<1x8x1x8x32xf32>,
    return
  }
  func.func @transform_0(%arg0: i32) -> (i32, i32, i32) {
    %c0_i32 = arith.constant 0 : i32
    %c0_i32_0 = arith.constant 0 : i32
    %c0_i32_1 = arith.constant 0 : i32
    return %arg0, %c0_i32, %c0_i32_0 : i32, i32, i32
  }
  func.func @transform_1(%arg0: i32) -> (i32, i32) {
    %c0_i32 = arith.constant 0 : i32
    %c0_i32_0 = arith.constant 0 : i32
    %c0_i32_1 = arith.constant 0 : i32
    return %c0_i32, %c0_i32_0 : i32, i32
  }
  func.func @transform_2(%arg0: i32) -> (i32, i32) {
    %c0_i32 = arith.constant 0 : i32
    %c0_i32_0 = arith.constant 0 : i32
    %c0_i32_1 = arith.constant 0 : i32
    return %c0_i32, %c0_i32_0 : i32, i32
  }
  func.func @transform_3(%arg0: i32) -> (i32, i32) {
    %c0_i32 = arith.constant 0 : i32
    %c0_i32_0 = arith.constant 0 : i32
    %c0_i32_1 = arith.constant 0 : i32
    return %c0_i32, %c0_i32_0 : i32, i32
  }
  func.func @transform_4(%arg0: i32) -> (i32, i32, i32, i32, i32) {
    %c0_i32 = arith.constant 0 : i32
    %c0_i32_0 = arith.constant 0 : i32
    %c0_i32_1 = arith.constant 0 : i32
    %c0_i32_2 = arith.constant 0 : i32
    %c0_i32_3 = arith.constant 0 : i32
    return %arg0, %c0_i32, %c0_i32_0, %c0_i32_1, %c0_i32_2 : i32, i32, i32, i32, i32
  }
}

</mosaic_0001>

<bundles_post_ra>
// kernel: _basic_layer_up.6
= control target key start
LH: loop header
LB: loop body
LE: loop exit
PB: predicated region body
PF: predicated region fallthrough
CT: control target
= control target key end

     0   :  { %vm43_vm0 = vcmask 261120   ;;  %s1416_s0 = inlined_call_operand.vmem [shape: f32[128,32], index: 0, kind: input, shape index: {}]   ;;  %s1417_s3 = inlined_call_operand.vmem [shape: f32[32,128], index: 3, kind: input, shape index: {}]   ;;  %s1418_s1 = inlined_call_operand.vmem [shape: f32[1,32], index: 1, kind: input, shape index: {}]   ;;  %s1419_s2 = inlined_call_operand.vmem [shape: f32[1,32], index: 2, kind: input, shape index: {}]   ;;  %s1420_s5 = inlined_call_operand.vmem [shape: f32[128,32], index: 5, kind: input, shape index: {}]   ;;  %s1421_s4 = inlined_call_operand.vmem [shape: f32[1,128], index: 4, kind: input, shape index: {}]   ;;  %s1422_s6 = inlined_call_operand.vmem [shape: f32[1,32], index: 6, kind: input, shape index: {}]   ;;  %s1423_s7 = inlined_call_operand.vmem [shape: f32[128,32], index: 7, kind: output, shape index: {}]  }
   0x1   :  { %v27_v0 = vld [vmem:[%s1416_s0] sm:$0xff]  ;;  %v924_v1 = vld [vmem:[%s1416_s0 + $0x10] sm:$0xff]  ;;  %v28_v2 = vld [vmem:[%s1416_s0 + $0x8] sm:$0xff] }
   0x2   :  { %v44_v3 = vsel %vm43_vm0, %v27_v0, 0.0  ;;  %v50_v4 = vsel %vm43_vm0, %v924_v1, 0.0  ;;  %v30_v5 = vld [vmem:[%s1416_s0 + $0x18] sm:$0xff]  ;;  %v47_v6 = vsel %vm43_vm0, %v28_v2, 0.0  ;;  %v31_v8 = vld [vmem:[%s1416_s0 + $0x20] sm:$0xff]  ;;  %v32_v9 = vld [vmem:[%s1416_s0 + $0x28] sm:$0xff] }
   0x3   :  { %45 = vadd.xlane.f32.xlu0 %v44_v3  ;;  %51 = vadd.xlane.f32.xlu1 %v50_v4  ;;  %v53_v7 = vsel %vm43_vm0, %v30_v5, 0.0  ;;  %v56_v10 = vsel %vm43_vm0, %v31_v8, 0.0  ;;  %v59_v11 = vsel %vm43_vm0, %v32_v9, 0.0  ;;  %v948_v12 = vld [vmem:[%s1416_s0 + $0x30] sm:$0xff]  ;;  %v953_v13 = vld [vmem:[%s1416_s0 + $0x38] sm:$0xff]  ;;  %v962_v16 = vld [vmem:[%s1416_s0 + $0x40] sm:$0xff] }
   0x4   :  { %v62_v14 = vsel %vm43_vm0, %v948_v12, 0.0  ;;  %v65_v15 = vsel %vm43_vm0, %v953_v13, 0.0  ;;  %v967_v17 = vld [vmem:[%s1416_s0 + $0x48] sm:$0xff]  ;;  %v68_v18 = vsel %vm43_vm0, %v962_v16, 0.0  ;;  %v976_v20 = vld [vmem:[%s1416_s0 + $0x50] sm:$0xff]  ;;  %v981_v21 = vld [vmem:[%s1416_s0 + $0x58] sm:$0xff] }
   0x5   :  { %v71_v19 = vsel %vm43_vm0, %v967_v17, 0.0  ;;  %v74_v22 = vsel %vm43_vm0, %v976_v20, 0.0  ;;  %v77_v23 = vsel %vm43_vm0, %v981_v21, 0.0  ;;  %v990_v24 = vld [vmem:[%s1416_s0 + $0x60] sm:$0xff]  ;;  %v995_v25 = vld [vmem:[%s1416_s0 + $0x68] sm:$0xff]  ;;  %v1004_v28 = vld [vmem:[%s1416_s0 + $0x70] sm:$0xff] }
   0x6   :  { %v80_v26 = vsel %vm43_vm0, %v990_v24, 0.0  ;;  %v83_v27 = vsel %vm43_vm0, %v995_v25, 0.0  ;;  %v1009_v29 = vld [vmem:[%s1416_s0 + $0x78] sm:$0xff]  ;;  %v86_v30 = vsel %vm43_vm0, %v1004_v28, 0.0 }
   0x7   :  { %48 = vadd.xlane.f32.xlu0 %v47_v6  ;;  %54 = vadd.xlane.f32.xlu1 %v53_v7  ;;  %v89_v31 = vsel %vm43_vm0, %v1009_v29, 0.0 }
   0xb   :  { %57 = vadd.xlane.f32.xlu0 %v56_v10  ;;  %60 = vadd.xlane.f32.xlu1 %v59_v11 }
   0xf   :  { %63 = vadd.xlane.f32.xlu0 %v62_v14  ;;  %66 = vadd.xlane.f32.xlu1 %v65_v15 }
  0x13   :  { %69 = vadd.xlane.f32.xlu0 %v68_v18  ;;  %72 = vadd.xlane.f32.xlu1 %v71_v19 }
  0x17   :  { %75 = vadd.xlane.f32.xlu0 %v74_v22  ;;  %78 = vadd.xlane.f32.xlu1 %v77_v23 }
  0x1b   :  { %81 = vadd.xlane.f32.xlu0 %v80_v26  ;;  %84 = vadd.xlane.f32.xlu1 %v83_v27 }
  0x1f   :  { %87 = vadd.xlane.f32.xlu0 %v86_v30  ;;  %90 = vadd.xlane.f32.xlu1 %v89_v31 }
  0x8c   :  { %v46_v32 = vpop.xlane.xlu0 %45  ;;  %v52_v33 = vpop.xlane.xlu1 %51 }
  0x8d   :  { %v93_v34 = vmul.f32 0.03125, %v46_v32  ;;  %v95_v35 = vmul.f32 0.03125, %v52_v33 }
  0x8f   :  { %v1015_v36 = vsub.f32 %v27_v0, %v93_v34  ;;  %v1018_v37 = vsub.f32 %v924_v1, %v95_v35 }
  0x90   :  { %v49_v38 = vpop.xlane.xlu0 %48  ;;  %v55_v39 = vpop.xlane.xlu1 %54 }
  0x91   :  { %v94_v40 = vmul.f32 0.03125, %v49_v38  ;;  %v96_v41 = vmul.f32 0.03125, %v55_v39  ;;  %v125_v42 = vmul.f32 %v1015_v36, %v1015_v36  ;;  %v127_v43 = vmul.f32 %v1018_v37, %v1018_v37 }
  0x93   :  { %v1024_v44 = vsub.f32 %v28_v2, %v94_v40  ;;  %v1026_v45 = vsub.f32 %v30_v5, %v96_v41  ;;  %v141_v46 = vsel %vm43_vm0, %v125_v42, 0.0  ;;  %v147_v49 = vsel %vm43_vm0, %v127_v43, 0.0 }
  0x94   :  { %142 = vadd.xlane.f32.xlu0 %v141_v46  ;;  %v58_v47 = vpop.xlane.xlu0 %57  ;;  %v61_v48 = vpop.xlane.xlu1 %60 }
  0x95   :  { %v97_v50 = vmul.f32 0.03125, %v58_v47  ;;  %v98_v51 = vmul.f32 0.03125, %v61_v48  ;;  %v126_v52 = vmul.f32 %v1024_v44, %v1024_v44  ;;  %v128_v53 = vmul.f32 %v1026_v45, %v1026_v45 }
  0x97   :  { %v1034_v54 = vsub.f32 %v31_v8, %v97_v50  ;;  %v1036_v55 = vsub.f32 %v32_v9, %v98_v51  ;;  %v144_v56 = vsel %vm43_vm0, %v126_v52, 0.0  ;;  %v150_v59 = vsel %vm43_vm0, %v128_v53, 0.0 }
  0x98   :  { %148 = vadd.xlane.f32.xlu0 %v147_v49  ;;  %145 = vadd.xlane.f32.xlu1 %v144_v56  ;;  %v64_v57 = vpop.xlane.xlu0 %63  ;;  %v67_v58 = vpop.xlane.xlu1 %66  ;;  %v310_v56 = vld [vmem:[%s1417_s3 + $0x18] sm:$0xff] }
  0x99   :  { %v99_v60 = vmul.f32 0.03125, %v64_v57  ;;  %v100_v61 = vmul.f32 0.03125, %v67_v58  ;;  %v129_v62 = vmul.f32 %v1034_v54, %v1034_v54  ;;  %v130_v63 = vmul.f32 %v1036_v55, %v1036_v55  ;;  %v307_v58 = vld [vmem:[%s1417_s3] sm:$0xff] }
  0x9b   :  { %v1045_v0 = vsub.f32 %v948_v12, %v99_v60  ;;  %v1048_v2 = vsub.f32 %v953_v13, %v100_v61  ;;  %v153_v3 = vsel %vm43_vm0, %v129_v62, 0.0  ;;  %v156_v6 = vsel %vm43_vm0, %v130_v63, 0.0 }
  0x9c   :  { %151 = vadd.xlane.f32.xlu1 %v150_v59  ;;  %154 = vadd.xlane.f32.xlu0 %v153_v3  ;;  %v70_v4 = vpop.xlane.xlu0 %69  ;;  %v73_v5 = vpop.xlane.xlu1 %72  ;;  %v308_v59 = vld [vmem:[%s1417_s3 + $0x8] sm:$0xff] }
  0x9d   :  { %v101_v7 = vmul.f32 0.03125, %v70_v4  ;;  %v102_v8 = vmul.f32 0.03125, %v73_v5  ;;  %v131_v9 = vmul.f32 %v1045_v0, %v1045_v0  ;;  %v132_v10 = vmul.f32 %v1048_v2, %v1048_v2 }
  0x9e   :  { %v311_v60 = vpack.c.bf16 %v308_v59, %v307_v58 }
  0x9f   :  { %v1057_v11 = vsub.f32 %v962_v16, %v101_v7  ;;  %v1060_v12 = vsub.f32 %v967_v17, %v102_v8  ;;  %v159_v13 = vsel %vm43_vm0, %v131_v9, 0.0  ;;  %v162_v18 = vsel %vm43_vm0, %v132_v10, 0.0 }
  0xa0   :  { %157 = vadd.xlane.f32.xlu1 %v156_v6  ;;  %160 = vadd.xlane.f32.xlu0 %v159_v13  ;;  %v76_v14 = vpop.xlane.xlu0 %75  ;;  %v79_v15 = vpop.xlane.xlu1 %78 }
  0xa1   :  { %v103_v19 = vmul.f32 0.03125, %v76_v14  ;;  %v104_v22 = vmul.f32 0.03125, %v79_v15  ;;  %v133_v23 = vmul.f32 %v1057_v11, %v1057_v11  ;;  %v134_v16 = vmul.f32 %v1060_v12, %v1060_v12 }
  0xa3   :  { %v1069_v26 = vsub.f32 %v976_v20, %v103_v19  ;;  %v1072_v17 = vsub.f32 %v981_v21, %v104_v22  ;;  %v165_v27 = vsel %vm43_vm0, %v133_v23, 0.0  ;;  %v168_v32 = vsel %vm43_vm0, %v134_v16, 0.0 }
  0xa4   :  { %163 = vadd.xlane.f32.xlu1 %v162_v18  ;;  %166 = vadd.xlane.f32.xlu0 %v165_v27  ;;  %v82_v30 = vpop.xlane.xlu0 %81  ;;  %v85_v31 = vpop.xlane.xlu1 %84 }
  0xa5   :  { %v105_v33 = vmul.f32 0.03125, %v82_v30  ;;  %v106_v34 = vmul.f32 0.03125, %v85_v31  ;;  %v135_v35 = vmul.f32 %v1069_v26, %v1069_v26  ;;  %v136_v20 = vmul.f32 %v1072_v17, %v1072_v17 }
  0xa7   :  { %v1081_v38 = vsub.f32 %v990_v24, %v105_v33  ;;  %v1084_v21 = vsub.f32 %v995_v25, %v106_v34  ;;  %v171_v39 = vsel %vm43_vm0, %v135_v35, 0.0  ;;  %v174_v42 = vsel %vm43_vm0, %v136_v20, 0.0 }
  0xa8   :  { %169 = vadd.xlane.f32.xlu1 %v168_v32  ;;  %172 = vadd.xlane.f32.xlu0 %v171_v39  ;;  %v88_v40 = vpop.xlane.xlu0 %87  ;;  %v91_v41 = vpop.xlane.xlu1 %90 }
  0xa9   :  { %v107_v43 = vmul.f32 0.03125, %v88_v40  ;;  %v108_v46 = vmul.f32 0.03125, %v91_v41  ;;  %v137_v47 = vmul.f32 %v1081_v38, %v1081_v38  ;;  %v138_v24 = vmul.f32 %v1084_v21, %v1084_v21  ;;  %v1122_v41 = vld [vmem:[%s1418_s1] ss:$0 sm:$0xff] }
  0xab   :  { %v1093_v48 = vsub.f32 %v1004_v28, %v107_v43  ;;  %v1096_v25 = vsub.f32 %v1009_v29, %v108_v46  ;;  %v177_v49 = vsel %vm43_vm0, %v137_v47, 0.0  ;;  %v180_v50 = vsel %vm43_vm0, %v138_v24, 0.0  ;;  %v309_v29 = vld [vmem:[%s1417_s3 + $0x10] sm:$0xff] }
  0xac   :  { %175 = vadd.xlane.f32.xlu1 %v174_v42  ;;  %178 = vadd.xlane.f32.xlu0 %v177_v49  ;;  %v312_v57 = vpack.c.bf16 %v310_v56, %v309_v29 }
  0xad   :  { %v139_v51 = vmul.f32 %v1093_v48, %v1093_v48  ;;  %v140_v52 = vmul.f32 %v1096_v25, %v1096_v25 }
  0xae   :  { %731 = vmatprep.subr.bf16.mxu0 %v312_v57 }
  0xaf   :  { %v183_v53 = vsel %vm43_vm0, %v139_v51, 0.0  ;;  %v186_v28 = vsel %vm43_vm0, %v140_v52, 0.0  ;;  %732 = vmatpush3.bf16.msra.mxu0 %v312_v57 }
  0xb0   :  { %181 = vadd.xlane.f32.xlu1 %v180_v50  ;;  %184 = vadd.xlane.f32.xlu0 %v183_v53 }
  0xb1   :  { %733 = vmatprep.subr.bf16.mxu0 %v311_v60 }
  0xb3   :  { %734 = vmatpush3.bf16.msra.mxu0 %v311_v60 }
  0xb4   :  { %187 = vadd.xlane.f32.xlu1 %v186_v28 }
 0x11d   :  { %v143_v61 = vpop.xlane.xlu0 %142 }
 0x11e   :  { %v189_v62 = vmul.f32 0.03125, %v143_v61 }
 0x120   :  { %v205_v63 = vadd.f32 1e-05, %v189_v62 }
 0x121   :  { %v146_v3 = vpop.xlane.xlu1 %145  ;;  %v149_v4 = vpop.xlane.xlu0 %148 }
 0x122   :  { %799 = vrsqrt.f32 %v205_v63  ;;  %v190_v5 = vmul.f32 0.03125, %v146_v3  ;;  %v191_v6 = vmul.f32 0.03125, %v149_v4 }
 0x124   :  { %v206_v7 = vadd.f32 1e-05, %v190_v5  ;;  %v207_v8 = vadd.f32 1e-05, %v191_v6 }
 0x125   :  { %v152_v9 = vpop.xlane.xlu1 %151  ;;  %v155_v10 = vpop.xlane.xlu0 %154 }
 0x126   :  { %801 = vrsqrt.f32 %v206_v7  ;;  %v192_v13 = vmul.f32 0.03125, %v152_v9  ;;  %v193_v14 = vmul.f32 0.03125, %v155_v10 }
 0x127   :  { %803 = vrsqrt.f32 %v207_v8 }
 0x128   :  { %v208_v15 = vadd.f32 1e-05, %v192_v13  ;;  %v209_v18 = vadd.f32 1e-05, %v193_v14 }
 0x129   :  { %v158_v19 = vpop.xlane.xlu1 %157  ;;  %v161_v22 = vpop.xlane.xlu0 %160 }
 0x12a   :  { %805 = vrsqrt.f32 %v208_v15  ;;  %v194_v23 = vmul.f32 0.03125, %v158_v19  ;;  %v195_v16 = vmul.f32 0.03125, %v161_v22 }
 0x12b   :  { %807 = vrsqrt.f32 %v209_v18 }
 0x12c   :  { %v210_v27 = vadd.f32 1e-05, %v194_v23  ;;  %v211_v30 = vadd.f32 1e-05, %v195_v16 }
 0x12d   :  { %v164_v31 = vpop.xlane.xlu1 %163  ;;  %v167_v32 = vpop.xlane.xlu0 %166 }
 0x12e   :  { %809 = vrsqrt.f32 %v210_v27  ;;  %v196_v33 = vmul.f32 0.03125, %v164_v31  ;;  %v197_v34 = vmul.f32 0.03125, %v167_v32 }
 0x12f   :  { %v800_v35 = vpop.eup %799  ;;  %811 = vrsqrt.f32 %v211_v30 }
 0x130   :  { %v212_v20 = vadd.f32 1e-05, %v196_v33  ;;  %v213_v39 = vadd.f32 1e-05, %v197_v34  ;;  %v237_v40 = vmul.f32 %v800_v35, %v1015_v36  ;;  %v1129_v36 = vld [vmem:[%s1419_s2] ss:$0 sm:$0xff] }
 0x131   :  { %v170_v42 = vpop.xlane.xlu1 %169  ;;  %v173_v43 = vpop.xlane.xlu0 %172 }
 0x132   :  { %813 = vrsqrt.f32 %v212_v20  ;;  %v198_v46 = vmul.f32 0.03125, %v170_v42  ;;  %v199_v47 = vmul.f32 0.03125, %v173_v43  ;;  %v260_v49 = vmul.f32 %v1122_v41, %v237_v40 }
 0x133   :  { %v802_v24 = vpop.eup %801  ;;  %815 = vrsqrt.f32 %v213_v39 }
 0x134   :  { %v804_v50 = vpop.eup %803  ;;  %v214_v51 = vadd.f32 1e-05, %v198_v46  ;;  %v215_v52 = vadd.f32 1e-05, %v199_v47  ;;  %v238_v53 = vmul.f32 %v802_v24, %v1024_v44  ;;  %v283_v61 = vadd.f32 %v1129_v36, %v260_v49 }
 0x135   :  { %v176_v28 = vpop.xlane.xlu1 %175  ;;  %v179_v29 = vpop.xlane.xlu0 %178  ;;  %v239_v56 = vmul.f32 %v804_v50, %v1018_v37 }
 0x136   :  { %817 = vrsqrt.f32 %v214_v51  ;;  %v200_v57 = vmul.f32 0.03125, %v176_v28  ;;  %v201_v58 = vmul.f32 0.03125, %v179_v29  ;;  %v261_v59 = vmul.f32 %v1122_v41, %v238_v53 }
 0x137   :  { %v806_v60 = vpop.eup %805  ;;  %819 = vrsqrt.f32 %v215_v52  ;;  %v262_v37 = vmul.f32 %v1122_v41, %v239_v56 }
 0x138   :  { %v808_v62 = vpop.eup %807  ;;  %v216_v44 = vadd.f32 1e-05, %v200_v57  ;;  %v217_v63 = vadd.f32 1e-05, %v201_v58  ;;  %v284_v3 = vadd.f32 %v1129_v36, %v261_v59  ;;  %v240_v4 = vmul.f32 %v806_v60, %v1026_v45 }
 0x139   :  { %v182_v5 = vpop.xlane.xlu1 %181  ;;  %v185_v6 = vpop.xlane.xlu0 %184  ;;  %v241_v7 = vmul.f32 %v808_v62, %v1034_v54  ;;  %v285_v54 = vadd.f32 %v1129_v36, %v262_v37 }
 0x13a   :  { %821 = vrsqrt.f32 %v216_v44  ;;  %v202_v8 = vmul.f32 0.03125, %v182_v5  ;;  %v203_v9 = vmul.f32 0.03125, %v185_v6  ;;  %v299_v10 = vpack.c.bf16 %v284_v3, %v283_v61 }
 0x13b   :  { %v810_v13 = vpop.eup %809  ;;  %823 = vrsqrt.f32 %v217_v63  ;;  %v263_v14 = vmul.f32 %v1122_v41, %v240_v4  ;;  %v264_v15 = vmul.f32 %v1122_v41, %v241_v7 }
 0x13c   :  { %v812_v18 = vpop.eup %811  ;;  %v218_v19 = vadd.f32 1e-05, %v202_v8  ;;  %v219_v22 = vadd.f32 1e-05, %v203_v9  ;;  %735 = vmatprep.mubr.msk.bf16.mxu0 %vm43_vm0, %v299_v10  ;;  %v242_v45 = vmul.f32 %v810_v13, %v1036_v55 }
 0x13d   :  { %v188_v23 = vpop.xlane.xlu1 %187  ;;  %v286_v16 = vadd.f32 %v1129_v36, %v263_v14  ;;  %v243_v27 = vmul.f32 %v812_v18, %v1045_v0  ;;  %v287_v34 = vadd.f32 %v1129_v36, %v264_v15  ;;  %v544_v14 = vld [vmem:[%s1420_s5 + $0x78] sm:$0xff] }
 0x13e   :  { %825 = vrsqrt.f32 %v218_v19  ;;  %v204_v30 = vmul.f32 0.03125, %v188_v23  ;;  %v265_v31 = vmul.f32 %v1122_v41, %v242_v45  ;;  %v539_v19 = vld [vmem:[%s1420_s5 + $0x50] sm:$0xff]  ;;  %v537_v23 = vld [vmem:[%s1420_s5 + $0x40] sm:$0xff] }
 0x13f   :  { %v814_v32 = vpop.eup %813  ;;  %827 = vrsqrt.f32 %v219_v22  ;;  %v300_v33 = vpack.c.bf16 %v286_v16, %v285_v54  ;;  %v266_v40 = vmul.f32 %v1122_v41, %v243_v27  ;;  %v540_v22 = vld [vmem:[%s1420_s5 + $0x58] sm:$0xff]  ;;  %v538_v54 = vld [vmem:[%s1420_s5 + $0x48] sm:$0xff]  ;;  %v535_v27 = vld [vmem:[%s1420_s5 + $0x30] sm:$0xff] }
 0x140   :  { %v816_v35 = vpop.eup %815  ;;  %v220_v20 = vadd.f32 1e-05, %v204_v30  ;;  %v288_v55 = vadd.f32 %v1129_v36, %v265_v31  ;;  %v244_v39 = vmul.f32 %v814_v32, %v1048_v2  ;;  %v550_v45 = vpack.c.bf16 %v540_v22, %v539_v19  ;;  %v536_v30 = vld [vmem:[%s1420_s5 + $0x38] sm:$0xff]  ;;  %v533_v32 = vld [vmem:[%s1420_s5 + $0x20] sm:$0xff] }
 0x141   :  { %736 = vmatmul.mubr.msk.bf16.vlgmr.msra.gmra.mxu0 %vm43_vm0, %v300_v33  ;;  %v245_v0 = vmul.f32 %v816_v35, %v1057_v11  ;;  %v289_v24 = vadd.f32 %v1129_v36, %v266_v40  ;;  %v549_v16 = vpack.c.bf16 %v538_v54, %v537_v23  ;;  %v548_v31 = vpack.c.bf16 %v536_v30, %v535_v27  ;;  %v534_v33 = vld [vmem:[%s1420_s5 + $0x28] sm:$0xff]  ;;  %v531_v35 = vld [vmem:[%s1420_s5 + $0x10] sm:$0xff] }
 0x142   :  { %829 = vrsqrt.f32 %v220_v20  ;;  %v301_v42 = vpack.c.bf16 %v288_v55, %v287_v34  ;;  %v267_v43 = vmul.f32 %v1122_v41, %v244_v39  ;;  %v547_v34 = vpack.c.bf16 %v534_v33, %v533_v32  ;;  %v532_v20 = vld [vmem:[%s1420_s5 + $0x18] sm:$0xff]  ;;  %v529_v39 = vld [vmem:[%s1420_s5] sm:$0xff]  ;;  %v530_v40 = vld [vmem:[%s1420_s5 + $0x8] sm:$0xff] }
 0x143   :  { %v818_v46 = vpop.eup %817  ;;  %v268_v50 = vmul.f32 %v1122_v41, %v245_v0  ;;  %v546_v55 = vpack.c.bf16 %v532_v20, %v531_v35  ;;  %v545_v0 = vpack.c.bf16 %v530_v40, %v529_v39 }
 0x144   :  { %v820_v47 = vpop.eup %819  ;;  %739 = vmatprep.mubr.msk.bf16.mxu0 %vm43_vm0, %v301_v42  ;;  %v290_v49 = vadd.f32 %v1129_v36, %v267_v43  ;;  %v246_v2 = vmul.f32 %v818_v46, %v1060_v12  ;;  %v1235_v42 = vld [vmem:[%s1421_s4] ss:$0 sm:$0xff] }
 0x145   :  { %v247_v51 = vmul.f32 %v820_v47, %v1069_v26  ;;  %v291_v29 = vadd.f32 %v1129_v36, %v268_v50 }
 0x146   :  { %v302_v52 = vpack.c.bf16 %v290_v49, %v289_v24  ;;  %v269_v11 = vmul.f32 %v1122_v41, %v246_v2 }
 0x147   :  { %v822_v53 = vpop.eup %821  ;;  %v270_v58 = vmul.f32 %v1122_v41, %v247_v51 }
 0x148   :  { %v824_v28 = vpop.eup %823  ;;  %v292_v56 = vadd.f32 %v1129_v36, %v269_v11  ;;  %v248_v57 = vmul.f32 %v822_v53, %v1072_v17 }
 0x149   :  { %740 = vmatmul.mubr.msk.bf16.gmra.mxu0 %vm43_vm0, %v302_v52  ;;  %v249_v12 = vmul.f32 %v824_v28, %v1081_v38  ;;  %v293_v62 = vadd.f32 %v1129_v36, %v270_v58 }
 0x14a   :  { %v303_v59 = vpack.c.bf16 %v292_v56, %v291_v29  ;;  %v271_v26 = vmul.f32 %v1122_v41, %v248_v57 }
 0x14b   :  { %v826_v60 = vpop.eup %825  ;;  %v272_v17 = vmul.f32 %v1122_v41, %v249_v12 }
 0x14c   :  { %v828_v61 = vpop.eup %827  ;;  %743 = vmatprep.mubr.msk.bf16.mxu0 %vm43_vm0, %v303_v59  ;;  %v294_v44 = vadd.f32 %v1129_v36, %v271_v26  ;;  %v250_v63 = vmul.f32 %v826_v60, %v1084_v21 }
 0x14d   :  { %v251_v3 = vmul.f32 %v828_v61, %v1093_v48  ;;  %v295_v6 = vadd.f32 %v1129_v36, %v272_v17 }
 0x14e   :  { %v304_v4 = vpack.c.bf16 %v294_v44, %v293_v62  ;;  %v273_v38 = vmul.f32 %v1122_v41, %v250_v63 }
 0x14f   :  { %v830_v5 = vpop.eup %829  ;;  %v274_v8 = vmul.f32 %v1122_v41, %v251_v3 }
 0x150   :  { %v296_v37 = vadd.f32 %v1129_v36, %v273_v38  ;;  %v252_v7 = vmul.f32 %v830_v5, %v1096_v25  ;;  %v543_v25 = vld [vmem:[%s1420_s5 + $0x70] sm:$0xff] }
 0x151   :  { %744 = vmatmul.mubr.msk.bf16.gmra.mxu0 %vm43_vm0, %v304_v4  ;;  %v297_v48 = vadd.f32 %v1129_v36, %v274_v8  ;;  %v552_v15 = vpack.c.bf16 %v544_v14, %v543_v25 }
 0x152   :  { %v305_v9 = vpack.c.bf16 %v296_v37, %v295_v6  ;;  %v275_v21 = vmul.f32 %v1122_v41, %v252_v7  ;;  %v541_v41 = vld [vmem:[%s1420_s5 + $0x60] sm:$0xff] }
 0x153   :  { %751 = vmatprep.subr.bf16.mxu0 %v552_v15  ;;  %783 = vmatprep.subr.bf16.mxu1 %v552_v15 }
 0x154   :  { %747 = vmatprep.mubr.msk.bf16.mxu0 %vm43_vm0, %v305_v9  ;;  %v298_v10 = vadd.f32 %v1129_v36, %v275_v21  ;;  %752 = vmatpush3.bf16.msra.mxu0 %v552_v15  ;;  %v542_v36 = vld [vmem:[%s1420_s5 + $0x68] sm:$0xff] }
 0x155   :  { %791 = vmatpush3.bf16.msra.mxu1 %v552_v15  ;;  %v551_v18 = vpack.c.bf16 %v542_v36, %v541_v41 }
 0x156   :  { %v306_v13 = vpack.c.bf16 %v298_v10, %v297_v48 }
 0x157   :  { %753 = vmatprep.subr.bf16.mxu0 %v551_v18  ;;  %784 = vmatprep.subr.bf16.mxu1 %v551_v18 }
 0x158   :  { %754 = vmatpush3.bf16.msra.mxu0 %v551_v18 }
 0x159   :  { %748 = vmatmul.mubr.msk.bf16.gmra.mxu0 %vm43_vm0, %v306_v13  ;;  %792 = vmatpush3.bf16.msra.mxu1 %v551_v18 }
 0x15a   :  { %755 = vmatprep.subr.bf16.mxu0 %v550_v45  ;;  %785 = vmatprep.subr.bf16.mxu1 %v550_v45 }
 0x15c   :  { %756 = vmatpush3.bf16.msra.mxu0 %v550_v45 }
 0x15d   :  { %793 = vmatpush3.bf16.msra.mxu1 %v550_v45  ;;  %757 = vmatprep.subr.bf16.mxu0 %v549_v16 }
 0x15e   :  { %786 = vmatprep.subr.bf16.mxu1 %v549_v16 }
 0x160   :  { %758 = vmatpush3.bf16.msra.mxu0 %v549_v16 }
 0x161   :  { %794 = vmatpush3.bf16.msra.mxu1 %v549_v16  ;;  %759 = vmatprep.subr.bf16.mxu0 %v548_v31 }
 0x162   :  { %787 = vmatprep.subr.bf16.mxu1 %v548_v31 }
 0x164   :  { %760 = vmatpush3.bf16.msra.mxu0 %v548_v31 }
 0x165   :  { %795 = vmatpush3.bf16.msra.mxu1 %v548_v31  ;;  %761 = vmatprep.subr.bf16.mxu0 %v547_v34 }
 0x166   :  { %788 = vmatprep.subr.bf16.mxu1 %v547_v34 }
 0x168   :  { %762 = vmatpush3.bf16.msra.mxu0 %v547_v34 }
 0x169   :  { %796 = vmatpush3.bf16.msra.mxu1 %v547_v34  ;;  %763 = vmatprep.subr.bf16.mxu0 %v546_v55 }
 0x16a   :  { %789 = vmatprep.subr.bf16.mxu1 %v546_v55 }
 0x16c   :  { %764 = vmatpush3.bf16.msra.mxu0 %v546_v55 }
 0x16d   :  { %797 = vmatpush3.bf16.msra.mxu1 %v546_v55  ;;  %765 = vmatprep.subr.bf16.mxu0 %v545_v0 }
 0x16e   :  { %790 = vmatprep.subr.bf16.mxu1 %v545_v0 }
 0x170   :  { %766 = vmatpush3.bf16.msra.mxu0 %v545_v0 }
 0x171   :  { %798 = vmatpush3.bf16.msra.mxu1 %v545_v0 }
 0x201   :  { %v737_v43 = vpop.f32.mrf.mxu0 }
 0x202   :  { %v387_v46 = vadd.f32 %v737_v43, %v1235_v42 }
 0x203   :  { %v378_v47 = vpop.f32.mrf.mxu0 }
 0x204   :  { %v379_v24 = vadd.f32 %v1235_v42, %v378_v47  ;;  %v459_v49 = vmul.f32 0.70710677, %v387_v46  ;;  %v443_v54 = vmul.f32 0.5, %v387_v46 }
 0x205   :  { %v738_v2 = vpop.f32.mrf.mxu0 }
 0x206   :  { %v457_v50 = vmul.f32 0.70710677, %v379_v24  ;;  %v390_v51 = vadd.f32 %v738_v2, %v1235_v42  ;;  %v441_v21 = vmul.f32 0.5, %v379_v24 }
 0x207   :  { %v381_v52 = vpop.f32.mrf.mxu0 }
 0x208   :  { %831 = verf.f32 %v457_v50  ;;  %v460_v11 = vmul.f32 0.70710677, %v390_v51  ;;  %v382_v53 = vadd.f32 %v1235_v42, %v381_v52  ;;  %v444_v36 = vmul.f32 0.5, %v390_v51 }
 0x209   :  { %833 = verf.f32 %v459_v49  ;;  %v741_v28 = vpop.f32.mrf.mxu0 }
 0x20a   :  { %835 = verf.f32 %v460_v11  ;;  %v458_v29 = vmul.f32 0.70710677, %v382_v53  ;;  %v1242_v56 = vadd.f32 %v741_v28, %v1235_v42  ;;  %v442_v22 = vmul.f32 0.5, %v382_v53 }
 0x20b   :  { %v394_v57 = vpop.f32.mrf.mxu0 }
 0x20c   :  { %837 = verf.f32 %v458_v29  ;;  %v463_v58 = vmul.f32 0.70710677, %v1242_v56  ;;  %v1246_v12 = vadd.f32 %v1235_v42, %v394_v57 }
 0x20d   :  { %v742_v59 = vpop.f32.mrf.mxu0 }
 0x20e   :  { %v461_v26 = vmul.f32 0.70710677, %v1246_v12  ;;  %v1250_v60 = vadd.f32 %v742_v59, %v1235_v42  ;;  %839 = verf.f32 %v463_v58  ;;  %v445_v29 = vmul.f32 0.5, %v1246_v12 }
 0x20f   :  { %v397_v61 = vpop.f32.mrf.mxu0  ;;  %v447_v59 = vmul.f32 0.5, %v1242_v56 }
 0x210   :  { %v464_v62 = vmul.f32 0.70710677, %v1250_v60  ;;  %v1254_v44 = vadd.f32 %v1235_v42, %v397_v61  ;;  %841 = verf.f32 %v461_v26  ;;  %v448_v53 = vmul.f32 0.5, %v1250_v60 }
 0x211   :  { %v745_v63 = vpop.f32.mrf.mxu0 }
 0x212   :  { %843 = verf.f32 %v464_v62  ;;  %v462_v17 = vmul.f32 0.70710677, %v1254_v44  ;;  %v1258_v3 = vadd.f32 %v745_v63, %v1235_v42  ;;  %v446_v57 = vmul.f32 0.5, %v1254_v44 }
 0x213   :  { %v410_v4 = vpop.f32.mrf.mxu0 }
 0x214   :  { %845 = verf.f32 %v462_v17  ;;  %v467_v38 = vmul.f32 0.70710677, %v1258_v3  ;;  %v1262_v6 = vadd.f32 %v1235_v42, %v410_v4 }
 0x215   :  { %v832_v5 = vpop.eup %831  ;;  %v746_v37 = vpop.f32.mrf.mxu0 }
 0x216   :  { %v834_v7 = vpop.eup %833  ;;  %v1265_v8 = vadd.f32 %v746_v37, %v1235_v42  ;;  %v465_v48 = vmul.f32 0.70710677, %v1262_v6  ;;  %v489_v13 = vadd.f32 1.0, %v832_v5  ;;  %847 = verf.f32 %v467_v38 }
 0x217   :  { %v836_v9 = vpop.eup %835  ;;  %v413_v10 = vpop.f32.mrf.mxu0  ;;  %v491_v41 = vadd.f32 1.0, %v834_v7  ;;  %v449_v56 = vmul.f32 0.5, %v1262_v6 }
 0x218   :  { %v492_v25 = vadd.f32 1.0, %v836_v9  ;;  %v468_v14 = vmul.f32 0.70710677, %v1265_v8  ;;  %849 = verf.f32 %v465_v48  ;;  %v414_v18 = vadd.f32 %v1235_v42, %v413_v10 }
 0x219   :  { %v838_v15 = vpop.eup %837  ;;  %v749_v19 = vpop.f32.mrf.mxu0  ;;  %v505_v31 = vmul.f32 %v489_v13, %v441_v21  ;;  %v507_v34 = vmul.f32 %v491_v41, %v443_v54  ;;  %v452_v44 = vmul.f32 0.5, %v1265_v8  ;;  %v451_v48 = vmul.f32 0.5, %v1258_v3 }
 0x21a   :  { %v490_v45 = vadd.f32 1.0, %v838_v15  ;;  %851 = verf.f32 %v468_v14  ;;  %v1271_v23 = vadd.f32 %v749_v19, %v1235_v42  ;;  %v508_v16 = vmul.f32 %v492_v25, %v444_v36 }
 0x21b   :  { %v466_v27 = vmul.f32 0.70710677, %v414_v18  ;;  %v426_v30 = vpop.f32.mrf.mxu0  ;;  %v840_v33 = vpop.eup %839  ;;  %v450_v9 = vmul.f32 0.5, %v414_v18 }
 0x21c   :  { %v506_v32 = vmul.f32 %v490_v45, %v442_v22  ;;  %v471_v35 = vmul.f32 0.70710677, %v1271_v23  ;;  %v427_v20 = vadd.f32 %v1235_v42, %v426_v30  ;;  %v522_v47 = vpack.c.bf16 %v508_v16, %v507_v34 }
 0x21d   :  { %853 = verf.f32 %v466_v27  ;;  %v750_v55 = vpop.f32.mrf.mxu0  ;;  %v842_v39 = vpop.eup %841  ;;  %v495_v11 = vadd.f32 1.0, %v840_v33  ;;  %v455_v3 = vmul.f32 0.5, %v1271_v23 }
 0x21e   :  { %v438_v40 = vadd.f32 %v750_v55, %v1235_v42  ;;  %v521_v0 = vpack.c.bf16 %v506_v32, %v505_v31  ;;  %v469_v46 = vmul.f32 0.70710677, %v427_v20  ;;  %855 = verf.f32 %v471_v35 }
 0x21f   :  { %v844_v43 = vpop.eup %843  ;;  %v429_v24 = vpop.f32.mrf.mxu0  ;;  %v493_v52 = vadd.f32 1.0, %v842_v39  ;;  %v511_v17 = vmul.f32 %v495_v11, %v447_v59  ;;  %v453_v8 = vmul.f32 0.5, %v427_v20  ;;  %v1288_v20 = vld [vmem:[%s1422_s6] ss:$0 sm:$0xff] }
 0x220   :  { %v496_v49 = vadd.f32 1.0, %v844_v43  ;;  %v472_v2 = vmul.f32 0.70710677, %v438_v40  ;;  %v430_v50 = vadd.f32 %v1235_v42, %v429_v24  ;;  %767 = vmatprep.mubr.bf16.mxu0 %v521_v0  ;;  %857 = verf.f32 %v469_v46  ;;  %v863_v46 = vld [vmem:[%s1416_s0] sm:$0xff] }
 0x221   :  { %v846_v51 = vpop.eup %845  ;;  %768 = vmatmul.mubr.bf16.vlgmr.msra.gmra.mxu0 %v522_v47  ;;  %v509_v61 = vmul.f32 %v493_v52, %v445_v29  ;;  %v456_v6 = vmul.f32 0.5, %v438_v40  ;;  %v865_v52 = vld [vmem:[%s1416_s0 + $0x8] sm:$0xff] }
 0x222   :  { %859 = verf.f32 %v472_v2  ;;  %v470_v28 = vmul.f32 0.70710677, %v430_v50  ;;  %v494_v58 = vadd.f32 1.0, %v846_v51  ;;  %v512_v26 = vmul.f32 %v496_v49, %v448_v53 }
 0x223   :  { %v848_v42 = vpop.eup %847  ;;  %v454_v18 = vmul.f32 0.5, %v430_v50 }
 0x224   :  { %861 = verf.f32 %v470_v28  ;;  %v510_v62 = vmul.f32 %v494_v58, %v446_v57  ;;  %v524_v60 = vpack.c.bf16 %v512_v26, %v511_v17  ;;  %v499_v12 = vadd.f32 1.0, %v848_v42  ;;  %v866_v57 = vld [vmem:[%s1416_s0 + $0x30] sm:$0xff]  ;;  %v867_v42 = vld [vmem:[%s1416_s0 + $0x20] sm:$0xff]  ;;  %v868_v17 = vld [vmem:[%s1416_s0 + $0x38] sm:$0xff] }
 0x225   :  { %v850_v63 = vpop.eup %849 }
 0x226   :  { %v523_v38 = vpack.c.bf16 %v510_v62, %v509_v61  ;;  %v497_v37 = vadd.f32 1.0, %v850_v63  ;;  %v515_v41 = vmul.f32 %v499_v12, %v451_v48  ;;  %v871_v48 = vld [vmem:[%s1416_s0 + $0x40] sm:$0xff] }
 0x227   :  { %v852_v4 = vpop.eup %851 }
 0x228   :  { %v500_v5 = vadd.f32 1.0, %v852_v4  ;;  %771 = vmatprep.mubr.bf16.mxu1 %v523_v38  ;;  %v513_v25 = vmul.f32 %v497_v37, %v449_v56 }
 0x229   :  { %772 = vmatmul.mubr.bf16.vlgmr.msra.gmra.mxu1 %v524_v60  ;;  %v869_v60 = vld [vmem:[%s1416_s0 + $0x28] sm:$0xff] }
 0x22a   :  { %v854_v7 = vpop.eup %853  ;;  %v516_v10 = vmul.f32 %v500_v5, %v452_v44  ;;  %v870_v44 = vld [vmem:[%s1416_s0 + $0x50] sm:$0xff] }
 0x22b   :  { %v498_v21 = vadd.f32 1.0, %v854_v7  ;;  %v856_v13 = vpop.eup %855 }
 0x22c   :  { %v526_v54 = vpack.c.bf16 %v516_v10, %v515_v41  ;;  %v503_v27 = vadd.f32 1.0, %v856_v13 }
 0x22d   :  { %v514_v14 = vmul.f32 %v498_v21, %v450_v9  ;;  %v858_v15 = vpop.eup %857 }
 0x22e   :  { %v501_v22 = vadd.f32 1.0, %v858_v15  ;;  %v519_v34 = vmul.f32 %v503_v27, %v455_v3 }
 0x22f   :  { %v860_v36 = vpop.eup %859  ;;  %v525_v19 = vpack.c.bf16 %v514_v14, %v513_v25  ;;  %v872_v14 = vld [vmem:[%s1416_s0 + $0x58] sm:$0xff] }
 0x230   :  { %v504_v45 = vadd.f32 1.0, %v860_v36  ;;  %v517_v31 = vmul.f32 %v501_v22, %v453_v8 }
 0x231   :  { %v862_v16 = vpop.eup %861  ;;  %775 = vmatprep.mubr.bf16.mxu1 %v525_v19  ;;  %v873_v19 = vld [vmem:[%s1416_s0 + $0x48] sm:$0xff] }
 0x232   :  { %v502_v30 = vadd.f32 1.0, %v862_v16  ;;  %776 = vmatmul.mubr.bf16.gmra.mxu1 %v526_v54  ;;  %v520_v32 = vmul.f32 %v504_v45, %v456_v6  ;;  %v874_v16 = vld [vmem:[%s1416_s0 + $0x70] sm:$0xff] }
 0x234   :  { %v518_v33 = vmul.f32 %v502_v30, %v454_v18  ;;  %v528_v55 = vpack.c.bf16 %v520_v32, %v519_v34  ;;  %v875_v18 = vld [vmem:[%s1416_s0 + $0x60] sm:$0xff]  ;;  %v876_v32 = vld [vmem:[%s1416_s0 + $0x78] sm:$0xff] }
 0x236   :  { %v527_v35 = vpack.c.bf16 %v518_v33, %v517_v31 }
 0x238   :  { %779 = vmatprep.mubr.bf16.mxu1 %v527_v35  ;;  %v877_v35 = vld [vmem:[%s1416_s0 + $0x68] sm:$0xff] }
 0x23a   :  { %780 = vmatmul.mubr.bf16.gmra.mxu1 %v528_v55 }
 0x2e1   :  { %v769_v39 = vpop.f32.mrf.mxu0 }
 0x2e2   :  { %v603_v40 = vadd.f32 %v769_v39, %v1288_v20 }
 0x2e3   :  { %v594_v0 = vpop.f32.mrf.mxu0 }
 0x2e4   :  { %v659_v43 = vadd.f32 %v603_v40, %v924_v1  ;;  %v595_v23 = vadd.f32 %v1288_v20, %v594_v0  ;;  %v864_v1 = vld [vmem:[%s1416_s0 + $0x18] sm:$0xff] }
 0x2e5   :  { %v770_v47 = vpop.f32.mrf.mxu0 }
 0x2e6   :  { %675 = vst.msk [vmem:[%s1423_s7 + $0x10] sm:$0xff] %vm43_vm0, %v659_v43  ;;  %v657_v24 = vadd.f32 %v863_v46, %v595_v23  ;;  %v606_v49 = vadd.f32 %v770_v47, %v1288_v20 }
 0x2e7   :  { %v597_v2 = vpop.f32.mrf.mxu0 }
 0x2e8   :  { %673 = vst.msk [vmem:[%s1423_s7] sm:$0xff] %vm43_vm0, %v657_v24  ;;  %v660_v50 = vadd.f32 %v864_v1, %v606_v49  ;;  %v598_v51 = vadd.f32 %v1288_v20, %v597_v2 }
 0x2e9   :  { %v773_v53 = vpop.f32.mrf.mxu1 }
 0x2ea   :  { %676 = vst.msk [vmem:[%s1423_s7 + $0x18] sm:$0xff] %vm43_vm0, %v660_v50  ;;  %v658_v11 = vadd.f32 %v865_v52, %v598_v51  ;;  %v619_v28 = vadd.f32 %v773_v53, %v1288_v20 }
 0x2eb   :  { %v610_v29 = vpop.f32.mrf.mxu1 }
 0x2ec   :  { %674 = vst.msk [vmem:[%s1423_s7 + $0x8] sm:$0xff] %vm43_vm0, %v658_v11  ;;  %v663_v58 = vadd.f32 %v866_v57, %v619_v28  ;;  %v611_v59 = vadd.f32 %v1288_v20, %v610_v29 }
 0x2ed   :  { %v774_v26 = vpop.f32.mrf.mxu1 }
 0x2ee   :  { %679 = vst.msk [vmem:[%s1423_s7 + $0x30] sm:$0xff] %vm43_vm0, %v663_v58  ;;  %v661_v61 = vadd.f32 %v867_v42, %v611_v59  ;;  %v622_v62 = vadd.f32 %v774_v26, %v1288_v20 }
 0x2ef   :  { %v613_v63 = vpop.f32.mrf.mxu1 }
 0x2f0   :  { %677 = vst.msk [vmem:[%s1423_s7 + $0x20] sm:$0xff] %vm43_vm0, %v661_v61  ;;  %v664_v4 = vadd.f32 %v868_v17, %v622_v62  ;;  %v614_v38 = vadd.f32 %v1288_v20, %v613_v63 }
 0x2f2   :  { %v777_v5 = vpop.f32.mrf.mxu1  ;;  %680 = vst.msk [vmem:[%s1423_s7 + $0x38] sm:$0xff] %vm43_vm0, %v664_v4  ;;  %v662_v37 = vadd.f32 %v869_v60, %v614_v38 }
 0x2f3   :  { %v635_v7 = vadd.f32 %v777_v5, %v1288_v20 }
 0x2f4   :  { %v626_v12 = vpop.f32.mrf.mxu1  ;;  %678 = vst.msk [vmem:[%s1423_s7 + $0x28] sm:$0xff] %vm43_vm0, %v662_v37 }
 0x2f5   :  { %v667_v56 = vadd.f32 %v870_v44, %v635_v7  ;;  %v627_v9 = vadd.f32 %v1288_v20, %v626_v12 }
 0x2f6   :  { %v778_v21 = vpop.f32.mrf.mxu1 }
 0x2f7   :  { %683 = vst.msk [vmem:[%s1423_s7 + $0x50] sm:$0xff] %vm43_vm0, %v667_v56  ;;  %v665_v10 = vadd.f32 %v871_v48, %v627_v9  ;;  %v638_v13 = vadd.f32 %v778_v21, %v1288_v20 }
 0x2f8   :  { %v629_v25 = vpop.f32.mrf.mxu1 }
 0x2f9   :  { %681 = vst.msk [vmem:[%s1423_s7 + $0x40] sm:$0xff] %vm43_vm0, %v665_v10  ;;  %v668_v15 = vadd.f32 %v872_v14, %v638_v13  ;;  %v630_v41 = vadd.f32 %v1288_v20, %v629_v25 }
 0x2fa   :  { %v781_v36 = vpop.f32.mrf.mxu1 }
 0x2fb   :  { %684 = vst.msk [vmem:[%s1423_s7 + $0x58] sm:$0xff] %vm43_vm0, %v668_v15  ;;  %v666_v22 = vadd.f32 %v873_v19, %v630_v41  ;;  %v651_v45 = vadd.f32 %v781_v36, %v1288_v20 }
 0x2fc   :  { %v642_v54 = vpop.f32.mrf.mxu1 }
 0x2fd   :  { %682 = vst.msk [vmem:[%s1423_s7 + $0x48] sm:$0xff] %vm43_vm0, %v666_v22  ;;  %v671_v8 = vadd.f32 %v874_v16, %v651_v45  ;;  %v643_v27 = vadd.f32 %v1288_v20, %v642_v54 }
 0x2fe   :  { %v782_v6 = vpop.f32.mrf.mxu1 }
 0x2ff   :  { %687 = vst.msk [vmem:[%s1423_s7 + $0x70] sm:$0xff] %vm43_vm0, %v671_v8  ;;  %v669_v30 = vadd.f32 %v875_v18, %v643_v27  ;;  %v654_v3 = vadd.f32 %v782_v6, %v1288_v20 }
 0x300   :  { %v645_v31 = vpop.f32.mrf.mxu1 }
 0x301   :  { %685 = vst.msk [vmem:[%s1423_s7 + $0x60] sm:$0xff] %vm43_vm0, %v669_v30  ;;  %v672_v33 = vadd.f32 %v876_v32, %v654_v3  ;;  %v646_v34 = vadd.f32 %v1288_v20, %v645_v31 }
 0x303   :  { %688 = vst.msk [vmem:[%s1423_s7 + $0x78] sm:$0xff] %vm43_vm0, %v672_v33  ;;  %v670_v55 = vadd.f32 %v877_v35, %v646_v34 }
 0x305   :  { %686 = vst.msk [vmem:[%s1423_s7 + $0x68] sm:$0xff] %vm43_vm0, %v670_v55 }

// kernel: _basic_layer_up.5
= control target key start
LH: loop header
LB: loop body
LE: loop exit
PB: predicated region body
PF: predicated region fallthrough
CT: control target
= control target key end

     0   :  { %s3676_s27 = smov 0   ;;  %s4361_s0 = inlined_call_operand.vmem [shape: f32[8,16,32], index: 0, kind: input, shape index: {}]   ;;  %s4362_s1 = inlined_call_operand.vmem [shape: f32[1,32], index: 1, kind: input, shape index: {}]   ;;  %s4363_s2 = inlined_call_operand.vmem [shape: f32[1,32], index: 2, kind: input, shape index: {}]   ;;  %s4364_s3 = inlined_call_operand.vmem [shape: f32[4,16,16], index: 3, kind: input, shape index: {}]   ;;  %s4365_s4 = inlined_call_operand.vmem [shape: f32[32,96], index: 4, kind: input, shape index: {}]   ;;  %s4366_s5 = inlined_call_operand.vmem [shape: f32[1,96], index: 5, kind: input, shape index: {}]   ;;  %s4367_s6 = inlined_call_operand.vmem [shape: f32[32,32], index: 6, kind: input, shape index: {}]   ;;  %s4368_s7 = inlined_call_operand.vmem [shape: f32[1,32], index: 7, kind: input, shape index: {}]   ;;  %s4369_s8 = inlined_call_operand.vmem [shape: f32[8,16,32], index: 8, kind: output, shape index: {}]  }
   0x1 LB: > { %s3018_s28 = sadd.s32 4294967295, %s3616_s27   ;;  %p3022_p0 = scmp.ge.s32.totalorder %s3616_s27, 1  ;;  %s3616_s27 = sphi %s3676_s27, %s18_s27  }
   0x2   : > { %p264_p1 = scmp.lt.s32.totalorder %s3616_s27, 3 }
   0x4   : > { %p265_p2 = pnand %p3022_p0, %p264_p1 }
   0x5   : > { %s3023_s29 = sshll.u32 (!%p265_p2), %s3018_s28, 2  ;;  %s3620_s26 = smov (!%p265_p2), 96  }
   0x6   : > { %268 = sbr.rel (%p265_p2) target bundleno = 3866 (0xf1a), region = 52  ;;  %p301_p3 = scmp.lt.s32.totalorder (!%p265_p2), %s3023_s29, 7 }
   0x7   : > { %s3621_s13 = smov (!%p265_p2), 64   ;;  %s3622_s14 = smov (!%p265_p2), 88  }
   0x8   : > { %s3623_s15 = smov (!%p265_p2), 120   ;;  %s3624_s20 = smov (!%p265_p2), 56  }
   0x9   : > { %s3625_s21 = smov (!%p265_p2), 80   ;;  %s3626_s22 = smov (!%p265_p2), 112  }
   0xa   : > { %s3630_s24 = smov (!%p265_p2), 40  }
   0xb   : > { %s4371_s29 = smov (!%p301_p3, %s3023_s29), 7  ;;  %vm323_vm0 = vcmask 261120   ;;  %v465_v56 = vld [vmem:[%s4365_s4 + $0x10] sm:$0xff]  ;;  %v466_v57 = vld [vmem:[%s4365_s4 + $0x18] sm:$0xff]  ;;  %v463_v58 = vld [vmem:[%s4365_s4] sm:$0xff]  ;;  %vm3619_vm1 = vmmov 0  }
   0xc   : > { %s3093_s30 = sshll.u32 %s4371_s29, 4  ;;  %v468_v59 = vpack.c.bf16 %v466_v57, %v465_v56  ;;  %v464_v60 = vld [vmem:[%s4365_s4 + $0x8] sm:$0xff]  ;;  %vm566_vm2 = vcmask 64512   ;;  %vm782_vm3 = vcmask 130048   ;;  %vm1588_vm4 = vcmask 1043456  }
   0xd   : > { %s3692_s11 = scalar_lea.vmem %s4361_s0, %s3093_s30  ;;  %v467_v61 = vpack.c.bf16 %v464_v60, %v463_v58  ;;  %s4327_s10 = scalar_lea.vmem %s4369_s8, %s3093_s30 }
   0xe   : > { %v315_v0 = vld [vmem:[%s3692_s11] sm:$0xff]  ;;  %v317_v1 = vld [vmem:[%s3692_s11 + $0x10] sm:$0xff]  ;;  %v316_v2 = vld [vmem:[%s3692_s11 + $0x8] sm:$0xff]  ;;  %3185 = vmatprep.subr.bf16.mxu0 %v468_v59  ;;  %3429 = vmatprep.subr.bf16.mxu1 %v468_v59 }
   0xf   : > { %v324_v3 = vsel %vm323_vm0, %v315_v0, 0.0  ;;  %v330_v4 = vsel %vm323_vm0, %v317_v1, 0.0  ;;  %v318_v5 = vld [vmem:[%s3692_s11 + $0x18] sm:$0xff]  ;;  %v327_v6 = vsel %vm323_vm0, %v316_v2, 0.0  ;;  %v319_v8 = vld [vmem:[%s3692_s11 + $0x20] sm:$0xff]  ;;  %v320_v9 = vld [vmem:[%s3692_s11 + $0x28] sm:$0xff]  ;;  %3186 = vmatpush3.bf16.msra.mxu0 %v468_v59  ;;  %3431 = vmatpush3.bf16.msra.mxu1 %v468_v59 }
  0x10   : > { %325 = vadd.xlane.f32.xlu0 %v324_v3  ;;  %331 = vadd.xlane.f32.xlu1 %v330_v4  ;;  %v333_v7 = vsel %vm323_vm0, %v318_v5, 0.0  ;;  %v336_v10 = vsel %vm323_vm0, %v319_v8, 0.0  ;;  %v339_v11 = vsel %vm323_vm0, %v320_v9, 0.0  ;;  %v321_v12 = vld [vmem:[%s3692_s11 + $0x30] sm:$0xff]  ;;  %v322_v13 = vld [vmem:[%s3692_s11 + $0x38] sm:$0xff] }
  0x11   : > { %v342_v14 = vsel %vm323_vm0, %v321_v12, 0.0  ;;  %v345_v15 = vsel %vm323_vm0, %v322_v13, 0.0  ;;  %3187 = vmatprep.subr.bf16.mxu0 %v467_v61  ;;  %3430 = vmatprep.subr.bf16.mxu1 %v467_v61 }
  0x13   : > { %3188 = vmatpush3.bf16.msra.mxu0 %v467_v61  ;;  %3432 = vmatpush3.bf16.msra.mxu1 %v467_v61 }
  0x14   : > { %328 = vadd.xlane.f32.xlu0 %v327_v6  ;;  %334 = vadd.xlane.f32.xlu1 %v333_v7 }
  0x18   : > { %337 = vadd.xlane.f32.xlu0 %v336_v10  ;;  %340 = vadd.xlane.f32.xlu1 %v339_v11 }
  0x1c   : > { %343 = vadd.xlane.f32.xlu0 %v342_v14  ;;  %346 = vadd.xlane.f32.xlu1 %v345_v15 }
  0x99   : > { %v326_v16 = vpop.xlane.xlu0 %325  ;;  %v332_v17 = vpop.xlane.xlu1 %331 }
  0x9a   : > { %v349_v18 = vmul.f32 0.03125, %v326_v16  ;;  %v351_v19 = vmul.f32 0.03125, %v332_v17 }
  0x9c   : > { %v3710_v20 = vsub.f32 %v315_v0, %v349_v18  ;;  %v3712_v21 = vsub.f32 %v317_v1, %v351_v19 }
  0x9d   : > { %v329_v22 = vpop.xlane.xlu0 %328  ;;  %v335_v23 = vpop.xlane.xlu1 %334 }
  0x9e   : > { %v350_v24 = vmul.f32 0.03125, %v329_v22  ;;  %v352_v25 = vmul.f32 0.03125, %v335_v23  ;;  %v365_v26 = vmul.f32 %v3710_v20, %v3710_v20  ;;  %v367_v27 = vmul.f32 %v3712_v21, %v3712_v21 }
  0xa0   : > { %v3718_v28 = vsub.f32 %v316_v2, %v350_v24  ;;  %v3720_v29 = vsub.f32 %v318_v5, %v352_v25  ;;  %v373_v30 = vsel %vm323_vm0, %v365_v26, 0.0  ;;  %v379_v33 = vsel %vm323_vm0, %v367_v27, 0.0  ;;  %v3029_v26 = vld [vmem:[%s4362_s1] ss:$0 sm:$0xff] }
  0xa1   : > { %374 = vadd.xlane.f32.xlu0 %v373_v30  ;;  %v338_v31 = vpop.xlane.xlu0 %337  ;;  %v341_v32 = vpop.xlane.xlu1 %340 }
  0xa2   : > { %v353_v34 = vmul.f32 0.03125, %v338_v31  ;;  %v354_v35 = vmul.f32 0.03125, %v341_v32  ;;  %v366_v36 = vmul.f32 %v3718_v28, %v3718_v28  ;;  %v368_v37 = vmul.f32 %v3720_v29, %v3720_v29 }
  0xa4   : > { %v3728_v38 = vsub.f32 %v319_v8, %v353_v34  ;;  %v3730_v39 = vsub.f32 %v320_v9, %v354_v35  ;;  %v376_v40 = vsel %vm323_vm0, %v366_v36, 0.0  ;;  %v382_v43 = vsel %vm323_vm0, %v368_v37, 0.0 }
  0xa5   : > { %380 = vadd.xlane.f32.xlu0 %v379_v33  ;;  %377 = vadd.xlane.f32.xlu1 %v376_v40  ;;  %v344_v41 = vpop.xlane.xlu0 %343  ;;  %v347_v42 = vpop.xlane.xlu1 %346  ;;  %v3030_v33 = vld [vmem:[%s4363_s2] ss:$0 sm:$0xff] }
  0xa6   : > { %v355_v44 = vmul.f32 0.03125, %v344_v41  ;;  %v356_v45 = vmul.f32 0.03125, %v347_v42  ;;  %v369_v46 = vmul.f32 %v3728_v38, %v3728_v38  ;;  %v370_v47 = vmul.f32 %v3730_v39, %v3730_v39 }
  0xa8   : > { %v3738_v48 = vsub.f32 %v321_v12, %v355_v44  ;;  %v3740_v49 = vsub.f32 %v322_v13, %v356_v45  ;;  %v385_v50 = vsel %vm323_vm0, %v369_v46, 0.0  ;;  %v388_v51 = vsel %vm323_vm0, %v370_v47, 0.0 }
  0xa9   : > { %383 = vadd.xlane.f32.xlu1 %v382_v43  ;;  %386 = vadd.xlane.f32.xlu0 %v385_v50 }
  0xaa   : > { %v371_v52 = vmul.f32 %v3738_v48, %v3738_v48  ;;  %v372_v53 = vmul.f32 %v3740_v49, %v3740_v49 }
  0xac   : > { %v391_v54 = vsel %vm323_vm0, %v371_v52, 0.0  ;;  %v394_v55 = vsel %vm323_vm0, %v372_v53, 0.0 }
  0xad   : > { %389 = vadd.xlane.f32.xlu1 %v388_v51  ;;  %392 = vadd.xlane.f32.xlu0 %v391_v54 }
  0xb1   : > { %395 = vadd.xlane.f32.xlu1 %v394_v55 }
 0x12a   : > { %v375_v62 = vpop.xlane.xlu0 %374 }
 0x12b   : > { %v397_v63 = vmul.f32 0.03125, %v375_v62 }
 0x12d   : > { %v405_v0 = vadd.f32 1e-05, %v397_v63 }
 0x12e   : > { %v378_v1 = vpop.xlane.xlu1 %377  ;;  %v381_v2 = vpop.xlane.xlu0 %380 }
 0x12f   : > { %3458 = vrsqrt.f32 %v405_v0  ;;  %v398_v3 = vmul.f32 0.03125, %v378_v1  ;;  %v399_v4 = vmul.f32 0.03125, %v381_v2 }
 0x131   : > { %v406_v5 = vadd.f32 1e-05, %v398_v3  ;;  %v407_v6 = vadd.f32 1e-05, %v399_v4 }
 0x132   : > { %v384_v7 = vpop.xlane.xlu1 %383  ;;  %v387_v8 = vpop.xlane.xlu0 %386 }
 0x133   : > { %3460 = vrsqrt.f32 %v406_v5  ;;  %v400_v9 = vmul.f32 0.03125, %v384_v7  ;;  %v401_v10 = vmul.f32 0.03125, %v387_v8 }
 0x134   : > { %3462 = vrsqrt.f32 %v407_v6 }
 0x135   : > { %v408_v11 = vadd.f32 1e-05, %v400_v9  ;;  %v409_v12 = vadd.f32 1e-05, %v401_v10 }
 0x136   : > { %v390_v13 = vpop.xlane.xlu1 %389  ;;  %v393_v14 = vpop.xlane.xlu0 %392 }
 0x137   : > { %3464 = vrsqrt.f32 %v408_v11  ;;  %v402_v15 = vmul.f32 0.03125, %v390_v13  ;;  %v403_v16 = vmul.f32 0.03125, %v393_v14 }
 0x138   : > { %3466 = vrsqrt.f32 %v409_v12 }
 0x139   : > { %v410_v17 = vadd.f32 1e-05, %v402_v15  ;;  %v411_v18 = vadd.f32 1e-05, %v403_v16 }
 0x13a   : > { %v396_v19 = vpop.xlane.xlu1 %395 }
 0x13b   : > { %3468 = vrsqrt.f32 %v410_v17  ;;  %v404_v22 = vmul.f32 0.03125, %v396_v19 }
 0x13c   : > { %v3459_v23 = vpop.eup %3458  ;;  %3470 = vrsqrt.f32 %v411_v18 }
 0x13d   : > { %v412_v24 = vadd.f32 1e-05, %v404_v22  ;;  %v421_v25 = vmul.f32 %v3459_v23, %v3710_v20 }
 0x13f   : > { %3472 = vrsqrt.f32 %v412_v24  ;;  %v436_v32 = vmul.f32 %v3029_v26, %v421_v25 }
 0x140   : > { %v3461_v27 = vpop.eup %3460 }
 0x141   : > { %v3463_v30 = vpop.eup %3462  ;;  %v422_v31 = vmul.f32 %v3461_v27, %v3718_v28  ;;  %v451_v20 = vadd.f32 %v3030_v33, %v436_v32 }
 0x142   : > { %v423_v34 = vmul.f32 %v3463_v30, %v3712_v21 }
 0x143   : > { %v437_v35 = vmul.f32 %v3029_v26, %v422_v31  ;;  %v772_v31 = vld [vmem:[%s4364_s3] sm:$0xff] }
 0x144   : > { %v3465_v36 = vpop.eup %3464  ;;  %v438_v42 = vmul.f32 %v3029_v26, %v423_v34 }
 0x145   : > { %v3467_v37 = vpop.eup %3466  ;;  %v452_v40 = vadd.f32 %v3030_v33, %v437_v35  ;;  %v424_v41 = vmul.f32 %v3465_v36, %v3720_v29  ;;  %v773_v36 = vld [vmem:[%s4364_s3 + $0x8] sm:$0xff] }
 0x146   : > { %v425_v43 = vmul.f32 %v3467_v37, %v3728_v38  ;;  %v453_v47 = vadd.f32 %v3030_v33, %v438_v42 }
 0x147   : > { %v459_v44 = vpack.c.bf16 %v452_v40, %v451_v20  ;;  %v439_v45 = vmul.f32 %v3029_v26, %v424_v41 }
 0x148   : > { %v3469_v28 = vpop.eup %3468  ;;  %v440_v51 = vmul.f32 %v3029_v26, %v425_v43 }
 0x149   : > { %v3471_v46 = vpop.eup %3470  ;;  %3189 = vmatprep.mubr.msk.bf16.mxu0 %vm323_vm0, %v459_v44  ;;  %v454_v50 = vadd.f32 %v3030_v33, %v439_v45  ;;  %v426_v21 = vmul.f32 %v3469_v28, %v3730_v39 }
 0x14a   : > { %v427_v52 = vmul.f32 %v3471_v46, %v3738_v48  ;;  %v455_v29 = vadd.f32 %v3030_v33, %v440_v51  ;;  %v3618_v48 = vmov 0.0  }
 0x14b   : > { %v460_v53 = vpack.c.bf16 %v454_v50, %v453_v47  ;;  %v441_v54 = vmul.f32 %v3029_v26, %v426_v21  ;;  %3197 = vmatprep.subr.bf16.mxu1 %v3618_v48  ;;  %3209 = vmatprep.subr.bf16.mxu0 %v3618_v48 }
 0x14c   : > { %v3473_v55 = vpop.eup %3472  ;;  %v442_v57 = vmul.f32 %v3029_v26, %v427_v52 }
 0x14d   : > { %3190 = vmatmul.mubr.msk.bf16.vlgmr.msra.gmra.mxu0 %vm323_vm0, %v460_v53  ;;  %v456_v38 = vadd.f32 %v3030_v33, %v441_v54  ;;  %v428_v56 = vmul.f32 %v3473_v55, %v3740_v49  ;;  %v3031_v49 = vld [vmem:[%s4366_s5] ss:$0 sm:$0xff] }
 0x14e   : > { %v457_v60 = vadd.f32 %v3030_v33, %v442_v57  ;;  %3211 = vmatprep.mubr.msk.bf16.mxu0 %vm3619_vm1, %v3618_v48 }
 0x14f   : > { %v461_v58 = vpack.c.bf16 %v456_v38, %v455_v29  ;;  %v443_v59 = vmul.f32 %v3029_v26, %v428_v56 }
 0x151   : > { %3193 = vmatprep.mubr.msk.bf16.mxu1 %vm323_vm0, %v461_v58  ;;  %v458_v61 = vadd.f32 %v3030_v33, %v443_v59 }
 0x153   : > { %v462_v39 = vpack.c.bf16 %v458_v61, %v457_v60 }
 0x155   : > { %3194 = vmatmul.mubr.msk.bf16.vlgmr.msra.gmra.mxu1 %vm323_vm0, %v462_v39 }
 0x156   : > { %3199 = vmatprep.mubr.msk.bf16.mxu1 %vm3619_vm1, %v3618_v48 }
 0x20d   : > { %v3191_v62 = vpop.f32.mrf.mxu0 }
 0x20e   : > { %v531_v1 = vadd.f32 %v3191_v62, %v3031_v49 }
 0x20f   : > { %v522_v63 = vpop.f32.mrf.mxu0 }
 0x210   : > { %v523_v4 = vadd.f32 %v3031_v49, %v522_v63 }
 0x211   : > { %v3192_v0 = vpop.f32.mrf.mxu0 }
 0x212   : > { %v534_v2 = vadd.f32 %v3192_v0, %v3031_v49 }
 0x213   : > { %v525_v3 = vpop.f32.mrf.mxu0 }
 0x214   : > { %v3789_v5 = vpack.c.bf16 %v534_v2, %v531_v1  ;;  %v526_v6 = vadd.f32 %v3031_v49, %v525_v3 }
 0x215   : > { %v3195_v7 = vpop.f32.mrf.mxu1 }
 0x216   : > { %v3791_v8 = vpack.c.bf16 %v526_v6, %v523_v4  ;;  %615 = vrot.lane.b32.xlu1 %v3789_v5, %s3620_s26  ;;  %v547_v16 = vadd.f32 %v3195_v7, %v3031_v49 }
 0x217   : > { %v538_v9 = vpop.f32.mrf.mxu1 }
 0x218   : > { %564 = vrot.lane.b32.xlu0 %v3791_v8, %s3620_s26  ;;  %v539_v12 = vadd.f32 %v3031_v49, %v538_v9 }
 0x219   : > { %v3196_v10 = vpop.f32.mrf.mxu1 }
 0x21a   : > { %v550_v14 = vadd.f32 %v3196_v10, %v3031_v49 }
 0x21b   : > { %v541_v11 = vpop.f32.mrf.mxu1 }
 0x21c   : > { %v542_v13 = vadd.f32 %v3031_v49, %v541_v11  ;;  %v3798_v17 = vpack.c.bf16 %v550_v14, %v547_v16 }
 0x21e   : > { %v3795_v15 = vpack.c.bf16 %v542_v13, %v539_v12 }
 0x220   : > { %665 = vrot.lane.b32.xlu1 %v3795_v15, %s3620_s26 }
 0x224   : > { %715 = vrot.lane.b32.xlu1 %v3798_v17, %s3620_s26 }
 0x288   : > { %v616_v22 = vpop.permute.xlu1 %615 }
 0x289   : > { %v621_v24 = vsel %vm566_vm2, %v616_v22, 0 }
 0x28a   : > { %v565_v18 = vpop.permute.xlu0 %564 }
 0x28b   : > { %v571_v19 = vsel %vm566_vm2, %v565_v18, 0 }
 0x28c   : > { %3198 = vmatpush3.bf16.xpose.msra.mxu1 %v571_v19 }
 0x28d   : > { %3203 = vmatprep.subr.bf16.mxu1 %v3618_v48 }
 0x292   : > { %v666_v23 = vpop.permute.xlu1 %665 }
 0x293   : > { %v671_v25 = vsel %vm566_vm2, %v666_v23, 0  ;;  %3200 = vmatmul.mubr.msk.bf16.vlgmr.msra.gmra.mxu1 %vm566_vm2, %v3791_v8 }
 0x294   : > { %3204 = vmatpush3.bf16.xpose.msra.mxu1 %v621_v24  ;;  %3210 = vmatpush3.bf16.xpose.msra.mxu0 %v671_v25 }
 0x295   : > { %3205 = vmatprep.mubr.msk.bf16.mxu1 %vm3619_vm1, %v3618_v48  ;;  %3215 = vmatprep.subr.bf16.mxu1 %v3618_v48 }
 0x296   : > { %3221 = vmatprep.subr.bf16.mxu0 %v3618_v48  ;;  %v716_v26 = vpop.permute.xlu1 %715 }
 0x297   : > { %v721_v27 = vsel %vm566_vm2, %v716_v26, 0 }
 0x29b   : > { %3206 = vmatmul.mubr.msk.bf16.vlgmr.msra.gmra.mxu1 %vm566_vm2, %v3789_v5  ;;  %3212 = vmatmul.mubr.msk.bf16.vlgmr.msra.gmra.mxu0 %vm566_vm2, %v3795_v15 }
 0x29c   : > { %3216 = vmatpush3.bf16.xpose.msra.mxu1 %v721_v27  ;;  %3217 = vmatprep.mubr.msk.bf16.mxu1 %vm3619_vm1, %v3618_v48 }
 0x29d   : > { %3227 = vmatprep.subr.bf16.mxu1 %v3618_v48  ;;  %3223 = vmatprep.mubr.msk.bf16.mxu0 %vm3619_vm1, %v3618_v48 }
 0x2a3   : > { %3218 = vmatmul.mubr.msk.bf16.vlgmr.msra.gmra.mxu1 %vm566_vm2, %v3798_v17 }
 0x2a4   : > { %3229 = vmatprep.mubr.msk.bf16.mxu1 %vm3619_vm1, %v3618_v48 }
 0x353   : > { %v607_v30 = vpop.f32.mrf.mxu1 }
 0x354   : > { %v764_v32 = vmul.f32 0.35355338, %v607_v30 }
 0x355   : > { %v3201_v33 = vpop.f32.mrf.mxu1 }
 0x356   : > { %v774_v34 = vadd.f32 %v772_v31, %v764_v32 }
 0x357   : > { %v610_v35 = vpop.f32.mrf.mxu1 }
 0x358   : > { %v765_v37 = vmul.f32 0.35355338, %v610_v35  ;;  %v783_v20 = vsel %vm782_vm3, %v774_v34, -inf }
 0x359   : > { %784 = vmax.xlane.f32.xlu0 %v783_v20  ;;  %v3202_v40 = vpop.f32.mrf.mxu1 }
 0x35a   : > { %v775_v41 = vadd.f32 %v773_v36, %v765_v37 }
 0x35b   : > { %v657_v42 = vpop.f32.mrf.mxu1  ;;  %v707_v43 = vpop.f32.mrf.mxu0 }
 0x35c   : > { %v766_v44 = vmul.f32 0.35355338, %v657_v42  ;;  %v786_v45 = vsel %vm782_vm3, %v775_v41, -inf  ;;  %v768_v50 = vmul.f32 0.35355338, %v707_v43 }
 0x35d   : > { %v3213_v28 = vpop.f32.mrf.mxu0  ;;  %787 = vmax.xlane.f32.xlu1 %v786_v45  ;;  %v3207_v46 = vpop.f32.mrf.mxu1 }
 0x35e   : > { %v776_v47 = vadd.f32 %v772_v31, %v766_v44  ;;  %v778_v61 = vadd.f32 %v772_v31, %v768_v50 }
 0x35f   : > { %v660_v21 = vpop.f32.mrf.mxu1  ;;  %v710_v51 = vpop.f32.mrf.mxu0 }
 0x360   : > { %v767_v52 = vmul.f32 0.35355338, %v660_v21  ;;  %v769_v53 = vmul.f32 0.35355338, %v710_v51  ;;  %v789_v54 = vsel %vm782_vm3, %v776_v47, -inf  ;;  %v795_v63 = vsel %vm782_vm3, %v778_v61, -inf }
 0x361   : > { %v3214_v55 = vpop.f32.mrf.mxu0  ;;  %790 = vmax.xlane.f32.xlu0 %v789_v54  ;;  %v3208_v29 = vpop.f32.mrf.mxu1 }
 0x362   : > { %v779_v38 = vadd.f32 %v773_v36, %v769_v53  ;;  %v3834_v56 = vadd.f32 %v773_v36, %v767_v52 }
 0x363   : > { %v757_v57 = vpop.f32.mrf.mxu1 }
 0x364   : > { %v770_v58 = vmul.f32 0.35355338, %v757_v57  ;;  %v798_v59 = vsel %vm782_vm3, %v779_v38, -inf  ;;  %v792_v60 = vsel %vm782_vm3, %v3834_v56, -inf }
 0x365   : > { %799 = vmax.xlane.f32.xlu1 %v798_v59  ;;  %793 = vmax.xlane.f32.xlu0 %v792_v60  ;;  %v3219_v39 = vpop.f32.mrf.mxu1 }
 0x366   : > { %v780_v0 = vadd.f32 %v772_v31, %v770_v58 }
 0x367   : > { %v760_v62 = vpop.f32.mrf.mxu1 }
 0x368   : > { %v771_v49 = vmul.f32 0.35355338, %v760_v62  ;;  %v801_v3 = vsel %vm782_vm3, %v780_v0, -inf }
 0x369   : > { %796 = vmax.xlane.f32.xlu0 %v795_v63  ;;  %v3220_v1 = vpop.f32.mrf.mxu1 }
 0x36a   : > { %v3840_v2 = vadd.f32 %v773_v36, %v771_v49 }
 0x36c   : > { %v804_v4 = vsel %vm782_vm3, %v3840_v2, -inf }
 0x36d   : > { %802 = vmax.xlane.f32.xlu0 %v801_v3  ;;  %805 = vmax.xlane.f32.xlu1 %v804_v4 }
 0x3e2   : > { %v785_v6 = vpop.xlane.xlu0 %784 }
 0x3e3   : > { %v807_v7 = vsub.f32 %v774_v34, %v785_v6 }
 0x3e5   : > { %v815_v9 = vmul.f32 1.442695, %v807_v7 }
 0x3e6   : > { %v788_v10 = vpop.xlane.xlu1 %787 }
 0x3e7   : > { %3474 = vpow2.f32 %v815_v9  ;;  %v808_v11 = vsub.f32 %v775_v41, %v788_v10 }
 0x3e9   : > { %v817_v12 = vmul.f32 1.442695, %v808_v11 }
 0x3ea   : > { %v791_v13 = vpop.xlane.xlu0 %790 }
 0x3eb   : > { %3476 = vpow2.f32 %v817_v12  ;;  %v809_v19 = vsub.f32 %v776_v47, %v791_v13 }
 0x3ed   : > { %v819_v26 = vmul.f32 1.442695, %v809_v19 }
 0x3ee   : > { %v800_v14 = vpop.xlane.xlu1 %799  ;;  %v794_v16 = vpop.xlane.xlu0 %793 }
 0x3ef   : > { %v812_v18 = vsub.f32 %v779_v38, %v800_v14  ;;  %v810_v41 = vsub.f32 %v3834_v56, %v794_v16 }
 0x3f1   : > { %v825_v22 = vmul.f32 1.442695, %v812_v18  ;;  %v821_v43 = vmul.f32 1.442695, %v810_v41 }
 0x3f2   : > { %v797_v23 = vpop.xlane.xlu0 %796 }
 0x3f3   : > { %3478 = vpow2.f32 %v825_v22  ;;  %v811_v24 = vsub.f32 %v778_v61, %v797_v23 }
 0x3f4   : > { %v3845_v25 = vpop.eup %3474 }
 0x3f5   : > { %v823_v27 = vmul.f32 1.442695, %v811_v24  ;;  %v831_v30 = vsel %vm782_vm3, %v3845_v25, 0.0 }
 0x3f6   : > { %832 = vadd.xlane.f32.xlu0 %v831_v30  ;;  %v803_v40 = vpop.xlane.xlu0 %802  ;;  %v806_v50 = vpop.xlane.xlu1 %805 }
 0x3f7   : > { %3480 = vpow2.f32 %v823_v27  ;;  %v813_v42 = vsub.f32 %v780_v0, %v803_v40  ;;  %v814_v21 = vsub.f32 %v3840_v2, %v806_v50 }
 0x3f8   : > { %v3477_v31 = vpop.eup %3476  ;;  %3482 = vpow2.f32 %v819_v26 }
 0x3f9   : > { %v834_v32 = vsel %vm782_vm3, %v3477_v31, 0.0  ;;  %v827_v44 = vmul.f32 1.442695, %v813_v42  ;;  %3484 = vpow2.f32 %v821_v43  ;;  %v829_v51 = vmul.f32 1.442695, %v814_v21  ;;  %v3048_v21 = vld [vmem:[%s4364_s3 + $0x10] sm:$0xff] }
 0x3fa   : > { %835 = vadd.xlane.f32.xlu1 %v834_v32 }
 0x3fb   : > { %3486 = vpow2.f32 %v827_v44 }
 0x3fc   : > { %3488 = vpow2.f32 %v829_v51 }
 0x400   : > { %v3850_v33 = vpop.eup %3478 }
 0x401   : > { %v846_v34 = vsel %vm782_vm3, %v3850_v33, 0.0 }
 0x402   : > { %847 = vadd.xlane.f32.xlu1 %v846_v34 }
 0x404   : > { %v3854_v35 = vpop.eup %3480 }
 0x405   : > { %v843_v36 = vsel %vm782_vm3, %v3854_v35, 0.0  ;;  %v3858_v37 = vpop.eup %3482 }
 0x406   : > { %844 = vadd.xlane.f32.xlu0 %v843_v36  ;;  %v837_v20 = vsel %vm782_vm3, %v3858_v37, 0.0  ;;  %v3867_v45 = vpop.eup %3484 }
 0x407   : > { %v840_v47 = vsel %vm782_vm3, %v3867_v45, 0.0 }
 0x408   : > { %v3869_v28 = vpop.eup %3486 }
 0x409   : > { %v849_v46 = vsel %vm782_vm3, %v3869_v28, 0.0  ;;  %v3881_v52 = vpop.eup %3488 }
 0x40a   : > { %838 = vadd.xlane.f32.xlu0 %v837_v20  ;;  %v852_v53 = vsel %vm782_vm3, %v3881_v52, 0.0 }
 0x413   : > { %922 = vrot.lane.b32.xlu1 %v3789_v5, %s3621_s13 }
 0x417   : > { %969 = vrot.lane.b32.xlu1 %v3795_v15, %s3621_s13 }
 0x41b   : > { %1016 = vrot.lane.b32.xlu1 %v3798_v17, %s3621_s13 }
 0x420   : > { %875 = vrot.lane.b32.xlu0 %v3791_v8, %s3621_s13  ;;  %s3627_s13 = smov 48  }
 0x43f   : > { %850 = vadd.xlane.f32.xlu0 %v849_v46  ;;  %841 = vadd.xlane.f32.xlu1 %v840_v47 }
 0x450   : > { %1120 = vrot.lane.b32.xlu1 %v3789_v5, %s3622_s14 }
 0x455   : > { %1069 = vrot.lane.b32.xlu0 %v3791_v8, %s3622_s14 }
 0x459   : > { %1067 = vrot.lane.b32.xlu0 %v3791_v8, %s3623_s15 }
 0x45d   : > { %1118 = vrot.lane.b32.xlu0 %v3789_v5, %s3623_s15 }
 0x461   : > { %1169 = vrot.lane.b32.xlu0 %v3795_v15, %s3623_s15 }
 0x474   : > { %853 = vadd.xlane.f32.xlu1 %v852_v53 }
 0x47f   : > { %v833_v55 = vpop.xlane.xlu0 %832 }
 0x483   : > { %v836_v54 = vpop.xlane.xlu1 %835 }
 0x484   : > { %3490 = vrcp.f32 %v836_v54 }
 0x485   : > { %1171 = vrot.lane.b32.xlu1 %v3795_v15, %s3622_s14  ;;  %3492 = vrcp.f32 %v833_v55  ;;  %v3049_v55 = vld [vmem:[%s4364_s3 + $0x18] sm:$0xff] }
 0x489   : > { %1222 = vrot.lane.b32.xlu1 %v3798_v17, %s3622_s14  ;;  %s3628_s14 = smov 72  }
 0x48b   : > { %v848_v29 = vpop.xlane.xlu1 %847 }
 0x48c   : > { %3494 = vrcp.f32 %v848_v29 }
 0x48d   : > { %1220 = vrot.lane.b32.xlu1 %v3798_v17, %s3623_s15  ;;  %s3629_s15 = smov 104  }
 0x48f   : > { %v845_v38 = vpop.xlane.xlu0 %844  ;;  %v923_v56 = vpop.permute.xlu1 %922 }
 0x490   : > { %3496 = vrcp.f32 %v845_v38  ;;  %3228 = vmatpush3.bf16.msra.mxu1 %v923_v56 }
 0x491   : > { %3239 = vmatprep.subr.bf16.mxu1 %v3618_v48  ;;  %v3491_v57 = vpop.eup %3490 }
 0x492   : > { %v3493_v59 = vpop.eup %3492  ;;  %v858_v60 = vmul.f32 %v3491_v57, %v3477_v31 }
 0x493   : > { %v839_v58 = vpop.xlane.xlu0 %838  ;;  %v856_v39 = vmul.f32 %v3493_v59, %v3845_v25  ;;  %v970_v63 = vpop.permute.xlu1 %969 }
 0x494   : > { %3498 = vrcp.f32 %v839_v58 }
 0x495   : > { %v871_v62 = vpack.c.bf16 %v858_v60, %v856_v39 }
 0x497   : > { %v876_v61 = vpop.permute.xlu0 %875  ;;  %v1017_v4 = vpop.permute.xlu1 %1016 }
 0x498   : > { %3222 = vmatpush3.bf16.msra.mxu0 %v876_v61 }
 0x499   : > { %3233 = vmatprep.subr.bf16.mxu0 %v3618_v48  ;;  %v3495_v49 = vpop.eup %3494 }
 0x49a   : > { %v866_v2 = vmul.f32 %v3495_v49, %v3850_v33 }
 0x49b   : > { %3224 = vmatmul.mubr.msk.bf16.vlgmr.msra.gmra.mxu0 %vm782_vm3, %v871_v62 }
 0x49c   : > { %3234 = vmatpush3.bf16.msra.mxu0 %v970_v63  ;;  %3235 = vmatprep.mubr.msk.bf16.mxu0 %vm3619_vm1, %v3618_v48 }
 0x49d   : > { %v3497_v0 = vpop.eup %3496  ;;  %3245 = vmatprep.subr.bf16.mxu0 %v3618_v48 }
 0x49e   : > { %v864_v1 = vmul.f32 %v3497_v0, %v3854_v35 }
 0x4a0   : > { %v873_v3 = vpack.c.bf16 %v866_v2, %v864_v1 }
 0x4a1   : > { %v3499_v12 = vpop.eup %3498 }
 0x4a2   : > { %v860_v14 = vmul.f32 %v3499_v12, %v3858_v37 }
 0x4a3   : > { %3236 = vmatmul.mubr.msk.bf16.vlgmr.msra.gmra.mxu0 %vm782_vm3, %v873_v3 }
 0x4a4   : > { %3247 = vmatprep.mubr.msk.bf16.mxu0 %vm3619_vm1, %v3618_v48 }
 0x4c8   : > { %v851_v6 = vpop.xlane.xlu0 %850  ;;  %v842_v7 = vpop.xlane.xlu1 %841 }
 0x4c9   : > { %3500 = vrcp.f32 %v842_v7 }
 0x4ca   : > { %3502 = vrcp.f32 %v851_v6 }
 0x4cc   : > { %v1070_v9 = vpop.permute.xlu0 %1069  ;;  %v1121_v19 = vpop.permute.xlu1 %1120 }
 0x4cd   : > { %v1075_v10 = vsel %vm566_vm2, %v1070_v9, 0  ;;  %v1126_v34 = vsel %vm566_vm2, %v1121_v19, 0 }
 0x4ce   : > { %3246 = vmatpush3.bf16.xpose.msra.mxu0 %v1075_v10 }
 0x4cf   : > { %3257 = vmatprep.subr.bf16.mxu0 %v3618_v48 }
 0x4d0   : > { %v1068_v11 = vpop.permute.xlu0 %1067 }
 0x4d4   : > { %v1119_v25 = vpop.permute.xlu0 %1118 }
 0x4d5   : > { %3248 = vmatmul.mubr.msk.bf16.vlgmr.msra.gmra.mxu0 %vm566_vm2, %v1068_v11 }
 0x4d6   : > { %3259 = vmatprep.mubr.msk.bf16.mxu0 %vm3619_vm1, %v3618_v48  ;;  %v3501_v13 = vpop.eup %3500 }
 0x4d7   : > { %v862_v16 = vmul.f32 %v3501_v13, %v3867_v45  ;;  %v3503_v26 = vpop.eup %3502 }
 0x4d8   : > { %v1170_v27 = vpop.permute.xlu0 %1169  ;;  %v868_v31 = vmul.f32 %v3503_v26, %v3869_v28 }
 0x4d9   : > { %v872_v18 = vpack.c.bf16 %v862_v16, %v860_v14 }
 0x4db   : > { %3230 = vmatmul.mubr.msk.bf16.vlgmr.msra.gmra.mxu1 %vm782_vm3, %v872_v18 }
 0x4dc   : > { %3240 = vmatpush3.bf16.msra.mxu1 %v1017_v4  ;;  %3241 = vmatprep.mubr.msk.bf16.mxu1 %vm3619_vm1, %v3618_v48 }
 0x4dd   : > { %3251 = vmatprep.subr.bf16.mxu1 %v3618_v48 }
 0x4fd   : > { %v854_v22 = vpop.xlane.xlu1 %853 }
 0x4fe   : > { %3504 = vrcp.f32 %v854_v22 }
 0x501   : > { %v1172_v23 = vpop.permute.xlu1 %1171 }
 0x502   : > { %v1177_v24 = vsel %vm566_vm2, %v1172_v23, 0 }
 0x503   : > { %3258 = vmatpush3.bf16.xpose.msra.mxu0 %v1177_v24 }
 0x504   : > { %3269 = vmatprep.subr.bf16.mxu0 %v3618_v48 }
 0x505   : > { %v1223_v35 = vpop.permute.xlu1 %1222 }
 0x506   : > { %v1228_v36 = vsel %vm566_vm2, %v1223_v35, 0 }
 0x509   : > { %v1221_v37 = vpop.permute.xlu1 %1220 }
 0x50a   : > { %3260 = vmatmul.mubr.msk.bf16.vlgmr.msra.gmra.mxu0 %vm566_vm2, %v1170_v27 }
 0x50b   : > { %v3505_v30 = vpop.eup %3504  ;;  %3271 = vmatprep.mubr.msk.bf16.mxu0 %vm3619_vm1, %v3618_v48 }
 0x50c   : > { %v870_v32 = vmul.f32 %v3505_v30, %v3881_v52 }
 0x50e   : > { %v874_v33 = vpack.c.bf16 %v870_v32, %v868_v31 }
 0x510   : > { %3242 = vmatmul.mubr.msk.bf16.vlgmr.msra.gmra.mxu1 %vm782_vm3, %v874_v33 }
 0x511   : > { %3252 = vmatpush3.bf16.xpose.msra.mxu1 %v1126_v34  ;;  %3253 = vmatprep.mubr.msk.bf16.mxu1 %vm3619_vm1, %v3618_v48 }
 0x512   : > { %3263 = vmatprep.subr.bf16.mxu1 %v3618_v48 }
 0x518   : > { %3254 = vmatmul.mubr.msk.bf16.vlgmr.msra.gmra.mxu1 %vm566_vm2, %v1119_v25 }
 0x519   : > { %3264 = vmatpush3.bf16.xpose.msra.mxu1 %v1228_v36  ;;  %3265 = vmatprep.mubr.msk.bf16.mxu1 %vm3619_vm1, %v3618_v48 }
 0x51a   : > { %3275 = vmatprep.subr.bf16.mxu1 %v3618_v48 }
 0x520   : > { %3266 = vmatmul.mubr.msk.bf16.vlgmr.msra.gmra.mxu1 %vm566_vm2, %v1221_v37 }
 0x521   : > { %3277 = vmatprep.mubr.msk.bf16.mxu1 %vm3619_vm1, %v3618_v48 }
 0x55b   : > { %v3931_v20 = vpop.f32.mrf.mxu0 }
 0x55d   : > { %v3225_v40 = vpop.f32.mrf.mxu0 }
 0x55f   : > { %v3933_v41 = vpop.f32.mrf.mxu0 }
 0x560   : > { %v1063_v42 = vpack.c.bf16 %v3933_v41, %v3931_v20 }
 0x561   : > { %v3226_v43 = vpop.f32.mrf.mxu0 }
 0x563   : > { %v3937_v44 = vpop.f32.mrf.mxu0 }
 0x565   : > { %v3237_v45 = vpop.f32.mrf.mxu0 }
 0x567   : > { %v3939_v28 = vpop.f32.mrf.mxu0 }
 0x568   : > { %v1065_v46 = vpack.c.bf16 %v3939_v28, %v3937_v44 }
 0x569   : > { %v3238_v47 = vpop.f32.mrf.mxu0 }
 0x595   : > { %v1111_v50 = vpop.f32.mrf.mxu0 }
 0x596   : > { %v1271_v51 = vmul.f32 0.35355338, %v1111_v50 }
 0x597   : > { %v3249_v52 = vpop.f32.mrf.mxu0 }
 0x598   : > { %v1282_v53 = vadd.f32 %v3048_v21, %v1271_v51 }
 0x599   : > { %v1114_v54 = vpop.f32.mrf.mxu0 }
 0x59a   : > { %v1272_v29 = vmul.f32 0.35355338, %v1114_v54  ;;  %v1290_v38 = vsel %vm782_vm3, %v1282_v53, -inf }
 0x59b   : > { %1291 = vmax.xlane.f32.xlu0 %v1290_v38  ;;  %v3250_v56 = vpop.f32.mrf.mxu0  ;;  %v3950_v57 = vpop.f32.mrf.mxu1 }
 0x59c   : > { %v1283_v58 = vadd.f32 %v3049_v55, %v1272_v29 }
 0x59d   : > { %v3231_v59 = vpop.f32.mrf.mxu1 }
 0x59e   : > { %v1293_v60 = vsel %vm782_vm3, %v1283_v58, -inf }
 0x59f   : > { %1294 = vmax.xlane.f32.xlu1 %v1293_v60  ;;  %v3953_v61 = vpop.f32.mrf.mxu1 }
 0x5a0   : > { %v1064_v39 = vpack.c.bf16 %v3953_v61, %v3950_v57 }
 0x5a1   : > { %v3232_v62 = vpop.f32.mrf.mxu1 }
 0x5ca   : > { %v1213_v49 = vpop.f32.mrf.mxu0 }
 0x5cb   : > { %v1275_v19 = vmul.f32 0.35355338, %v1213_v49 }
 0x5cc   : > { %v3261_v63 = vpop.f32.mrf.mxu0 }
 0x5cd   : > { %v1286_v31 = vadd.f32 %v3048_v21, %v1275_v19 }
 0x5ce   : > { %v1216_v0 = vpop.f32.mrf.mxu0 }
 0x5cf   : > { %v1276_v1 = vmul.f32 0.35355338, %v1216_v0  ;;  %v1302_v35 = vsel %vm782_vm3, %v1286_v31, -inf }
 0x5d0   : > { %v3957_v2 = vpop.f32.mrf.mxu1  ;;  %v3262_v3 = vpop.f32.mrf.mxu0 }
 0x5d1   : > { %v1287_v4 = vadd.f32 %v3049_v55, %v1276_v1 }
 0x5d2   : > { %v3243_v6 = vpop.f32.mrf.mxu1 }
 0x5d3   : > { %v1305_v7 = vsel %vm782_vm3, %v1287_v4, -inf }
 0x5d4   : > { %1306 = vmax.xlane.f32.xlu1 %v1305_v7  ;;  %v3960_v9 = vpop.f32.mrf.mxu1 }
 0x5d5   : > { %v1066_v10 = vpack.c.bf16 %v3960_v9, %v3957_v2 }
 0x5d6   : > { %v3244_v11 = vpop.f32.mrf.mxu1 }
 0x5d8   : > { %v1162_v12 = vpop.f32.mrf.mxu1 }
 0x5d9   : > { %v1273_v13 = vmul.f32 0.35355338, %v1162_v12 }
 0x5da   : > { %v3255_v14 = vpop.f32.mrf.mxu1 }
 0x5db   : > { %v1284_v16 = vadd.f32 %v3048_v21, %v1273_v13 }
 0x5dc   : > { %v1165_v18 = vpop.f32.mrf.mxu1 }
 0x5dd   : > { %v1274_v22 = vmul.f32 0.35355338, %v1165_v18  ;;  %v1296_v23 = vsel %vm782_vm3, %v1284_v16, -inf }
 0x5de   : > { %1297 = vmax.xlane.f32.xlu0 %v1296_v23  ;;  %v3256_v24 = vpop.f32.mrf.mxu1 }
 0x5df   : > { %v1285_v25 = vadd.f32 %v3049_v55, %v1274_v22 }
 0x5e0   : > { %v1264_v26 = vpop.f32.mrf.mxu1 }
 0x5e1   : > { %v1277_v27 = vmul.f32 0.35355338, %v1264_v26  ;;  %v1299_v30 = vsel %vm782_vm3, %v1285_v25, -inf }
 0x5e2   : > { %1300 = vmax.xlane.f32.xlu0 %v1299_v30  ;;  %v3267_v32 = vpop.f32.mrf.mxu1 }
 0x5e3   : > { %v1288_v36 = vadd.f32 %v3048_v21, %v1277_v27 }
 0x5e4   : > { %v1267_v33 = vpop.f32.mrf.mxu1 }
 0x5e5   : > { %v1278_v34 = vmul.f32 0.35355338, %v1267_v33  ;;  %v1308_v43 = vsel %vm782_vm3, %v1288_v36, -inf }
 0x5e6   : > { %1303 = vmax.xlane.f32.xlu0 %v1302_v35  ;;  %v3268_v37 = vpop.f32.mrf.mxu1 }
 0x5e7   : > { %v3967_v40 = vadd.f32 %v3049_v55, %v1278_v34 }
 0x5e9   : > { %v1311_v45 = vsel %vm782_vm3, %v3967_v40, -inf }
 0x5ea   : > { %1309 = vmax.xlane.f32.xlu0 %v1308_v43  ;;  %1312 = vmax.xlane.f32.xlu1 %v1311_v45 }
 0x624   : > { %v1292_v47 = vpop.xlane.xlu0 %1291 }
 0x625   : > { %v1314_v50 = vsub.f32 %v1282_v53, %v1292_v47 }
 0x627   : > { %v1322_v51 = vmul.f32 1.442695, %v1314_v50 }
 0x628   : > { %v1295_v52 = vpop.xlane.xlu1 %1294 }
 0x629   : > { %3506 = vpow2.f32 %v1322_v51  ;;  %v1315_v54 = vsub.f32 %v1283_v58, %v1295_v52 }
 0x62b   : > { %v1324_v29 = vmul.f32 1.442695, %v1315_v54 }
 0x62d   : > { %3508 = vpow2.f32 %v1324_v29 }
 0x636   : > { %v3972_v21 = vpop.eup %3506 }
 0x637   : > { %v1338_v55 = vsel %vm782_vm3, %v3972_v21, 0.0 }
 0x638   : > { %1339 = vadd.xlane.f32.xlu0 %v1338_v55 }
 0x63a   : > { %v3976_v38 = vpop.eup %3508 }
 0x63b   : > { %v1341_v56 = vsel %vm782_vm3, %v3976_v38, 0.0 }
 0x63c   : > { %1342 = vadd.xlane.f32.xlu1 %v1341_v56 }
 0x65d   : > { %v1307_v59 = vpop.xlane.xlu1 %1306 }
 0x65e   : > { %v1319_v62 = vsub.f32 %v1287_v4, %v1307_v59 }
 0x660   : > { %v1332_v0 = vmul.f32 1.442695, %v1319_v62 }
 0x667   : > { %v1298_v53 = vpop.xlane.xlu0 %1297 }
 0x668   : > { %v1316_v60 = vsub.f32 %v1284_v16, %v1298_v53 }
 0x66a   : > { %v1326_v49 = vmul.f32 1.442695, %v1316_v60 }
 0x66b   : > { %v1301_v58 = vpop.xlane.xlu0 %1300 }
 0x66c   : > { %3510 = vpow2.f32 %v1326_v49  ;;  %v1317_v63 = vsub.f32 %v1285_v25, %v1301_v58 }
 0x66e   : > { %v1328_v1 = vmul.f32 1.442695, %v1317_v63 }
 0x66f   : > { %v1304_v3 = vpop.xlane.xlu0 %1303 }
 0x670   : > { %3512 = vpow2.f32 %v1328_v1  ;;  %v1318_v6 = vsub.f32 %v1286_v31, %v1304_v3  ;;  %v553_v1 = vld [vmem:[%s4367_s6] sm:$0xff]  ;;  %v554_v3 = vld [vmem:[%s4367_s6 + $0x8] sm:$0xff] }
 0x671   : > { %3514 = vpow2.f32 %v1332_v0 }
 0x672   : > { %v1330_v7 = vmul.f32 1.442695, %v1318_v6 }
 0x673   : > { %v1310_v11 = vpop.xlane.xlu0 %1309  ;;  %v1313_v27 = vpop.xlane.xlu1 %1312 }
 0x674   : > { %3516 = vpow2.f32 %v1330_v7  ;;  %v1320_v12 = vsub.f32 %v1288_v36, %v1310_v11  ;;  %v1321_v30 = vsub.f32 %v3967_v40, %v1313_v27  ;;  %v557_v7 = vpack.c.bf16 %v554_v3, %v553_v1 }
 0x676   : > { %v1334_v13 = vmul.f32 1.442695, %v1320_v12  ;;  %v1336_v31 = vmul.f32 1.442695, %v1321_v30 }
 0x678   : > { %3518 = vpow2.f32 %v1334_v13 }
 0x679   : > { %v3980_v14 = vpop.eup %3510  ;;  %3520 = vpow2.f32 %v1336_v31 }
 0x67a   : > { %v1344_v4 = vsel %vm782_vm3, %v3980_v14, 0.0 }
 0x67b   : > { %1345 = vadd.xlane.f32.xlu0 %v1344_v4 }
 0x67d   : > { %v3513_v16 = vpop.eup %3512 }
 0x67e   : > { %v1347_v18 = vsel %vm782_vm3, %v3513_v16, 0.0  ;;  %v3985_v19 = vpop.eup %3514 }
 0x67f   : > { %1348 = vadd.xlane.f32.xlu1 %v1347_v18  ;;  %v1353_v24 = vsel %vm782_vm3, %v3985_v19, 0.0  ;;  %v1670_v18 = vsel %vm1588_vm4, %v557_v7, 0 }
 0x681   : > { %v3987_v22 = vpop.eup %3516 }
 0x682   : > { %v1350_v23 = vsel %vm782_vm3, %v3987_v22, 0.0 }
 0x683   : > { %1351 = vadd.xlane.f32.xlu0 %v1350_v23  ;;  %1354 = vadd.xlane.f32.xlu1 %v1353_v24 }
 0x685   : > { %v3993_v25 = vpop.eup %3518 }
 0x686   : > { %v1356_v26 = vsel %vm782_vm3, %v3993_v25, 0.0  ;;  %v3521_v32 = vpop.eup %3520 }
 0x687   : > { %1357 = vadd.xlane.f32.xlu0 %v1356_v26  ;;  %v1359_v33 = vsel %vm782_vm3, %v3521_v32, 0.0 }
 0x694   : > { %1429 = vrot.lane.b32.xlu1 %v3789_v5, %s3624_s20 }
 0x698   : > { %1476 = vrot.lane.b32.xlu1 %v3795_v15, %s3624_s20 }
 0x69d   : > { %1382 = vrot.lane.b32.xlu0 %v3791_v8, %s3624_s20 }
 0x6a1   : > { %1739 = vrot.lane.b32.xlu0 %v3791_v8, %s3625_s21 }
 0x6a5   : > { %1737 = vrot.lane.b32.xlu0 %v3791_v8, %s3626_s22 }
 0x6a9   : > { %1788 = vrot.lane.b32.xlu0 %v3789_v5, %s3626_s22 }
 0x6ad   : > { %1839 = vrot.lane.b32.xlu0 %v3795_v15, %s3626_s22 }
 0x6bc   : > { %1360 = vadd.xlane.f32.xlu1 %v1359_v33 }
 0x6c1   : > { %v1340_v35 = vpop.xlane.xlu0 %1339 }
 0x6c5   : > { %v1343_v34 = vpop.xlane.xlu1 %1342 }
 0x6c6   : > { %3522 = vrcp.f32 %v1343_v34 }
 0x6c7   : > { %3524 = vrcp.f32 %v1340_v35 }
 0x6cd   : > { %1523 = vrot.lane.b32.xlu1 %v3798_v17, %s3624_s20 }
 0x6d1   : > { %1790 = vrot.lane.b32.xlu1 %v3789_v5, %s3625_s21 }
 0x6d3   : > { %v3523_v45 = vpop.eup %3522 }
 0x6d4   : > { %v3525_v51 = vpop.eup %3524  ;;  %v1365_v52 = vmul.f32 %v3523_v45, %v3976_v38 }
 0x6d5   : > { %1841 = vrot.lane.b32.xlu1 %v3795_v15, %s3625_s21  ;;  %v1363_v55 = vmul.f32 %v3525_v51, %v3972_v21 }
 0x6d7   : > { %v1378_v59 = vpack.c.bf16 %v1365_v52, %v1363_v55 }
 0x6d9   : > { %1892 = vrot.lane.b32.xlu1 %v3798_v17, %s3625_s21 }
 0x6dd   : > { %1890 = vrot.lane.b32.xlu1 %v3798_v17, %s3626_s22 }
 0x704   : > { %v1346_v36 = vpop.xlane.xlu0 %1345 }
 0x705   : > { %3526 = vrcp.f32 %v1346_v36 }
 0x708   : > { %v1349_v37 = vpop.xlane.xlu1 %1348 }
 0x709   : > { %3528 = vrcp.f32 %v1349_v37 }
 0x70c   : > { %v1352_v40 = vpop.xlane.xlu0 %1351  ;;  %v1355_v43 = vpop.xlane.xlu1 %1354 }
 0x70d   : > { %3530 = vrcp.f32 %v1352_v40 }
 0x70e   : > { %3532 = vrcp.f32 %v1355_v43 }
 0x710   : > { %v1358_v47 = vpop.xlane.xlu0 %1357  ;;  %v1430_v50 = vpop.permute.xlu1 %1429 }
 0x711   : > { %3276 = vmatpush3.bf16.msra.mxu1 %v1430_v50  ;;  %3534 = vrcp.f32 %v1358_v47 }
 0x712   : > { %3287 = vmatprep.subr.bf16.mxu1 %v3618_v48  ;;  %v3527_v54 = vpop.eup %3526 }
 0x713   : > { %v1367_v53 = vmul.f32 %v3527_v54, %v3980_v14 }
 0x714   : > { %v1383_v29 = vpop.permute.xlu0 %1382  ;;  %v1477_v62 = vpop.permute.xlu1 %1476 }
 0x715   : > { %3270 = vmatpush3.bf16.msra.mxu0 %v1383_v29 }
 0x716   : > { %v3529_v56 = vpop.eup %3528  ;;  %3281 = vmatprep.subr.bf16.mxu0 %v3618_v48 }
 0x717   : > { %v1369_v60 = vmul.f32 %v3529_v56, %v3513_v16 }
 0x718   : > { %3272 = vmatmul.mubr.msk.bf16.vlgmr.msra.gmra.mxu0 %vm782_vm3, %v1378_v59  ;;  %v1740_v20 = vpop.permute.xlu0 %1739 }
 0x719   : > { %3282 = vmatpush3.bf16.msra.mxu0 %v1477_v62  ;;  %v1379_v49 = vpack.c.bf16 %v1369_v60, %v1367_v53  ;;  %3283 = vmatprep.mubr.msk.bf16.mxu0 %vm3619_vm1, %v3618_v48  ;;  %v1745_v33 = vsel %vm566_vm2, %v1740_v20, 0 }
 0x71a   : > { %v3531_v38 = vpop.eup %3530 }
 0x71b   : > { %v3533_v58 = vpop.eup %3532  ;;  %3278 = vmatmul.mubr.msk.bf16.vlgmr.msra.gmra.mxu1 %vm782_vm3, %v1379_v49  ;;  %v1371_v21 = vmul.f32 %v3531_v38, %v3987_v22  ;;  %v1575_v22 = vrot.slane %v557_v7, 4 }
 0x71c   : > { %v1373_v63 = vmul.f32 %v3533_v58, %v3985_v19  ;;  %3289 = vmatprep.mubr.msk.bf16.mxu1 %vm3619_vm1, %v3618_v48 }
 0x71d   : > { %3433 = vmatprep.subr.msk.bf16.mxu0 %vm1588_vm4, %v1575_v22  ;;  %v1590_v23 = vsel %vm1588_vm4, %v1575_v22, 0 }
 0x71e   : > { %v1380_v0 = vpack.c.bf16 %v1373_v63, %v1371_v21  ;;  %v3535_v12 = vpop.eup %3534 }
 0x71f   : > { %v1375_v14 = vmul.f32 %v3535_v12, %v3993_v25 }
 0x720   : > { %3284 = vmatmul.mubr.msk.bf16.vlgmr.msra.gmra.mxu0 %vm782_vm3, %v1380_v0 }
 0x721   : > { %3294 = vmatpush3.bf16.msra.mxu0 %v1590_v23 }
 0x722   : > { %3313 = vmatprep.subr.bf16.mxu0 %v3618_v48 }
 0x745   : > { %v1361_v6 = vpop.xlane.xlu1 %1360 }
 0x746   : > { %3536 = vrcp.f32 %v1361_v6 }
 0x749   : > { %v1524_v11 = vpop.permute.xlu1 %1523 }
 0x74a   : > { %3288 = vmatpush3.bf16.msra.mxu1 %v1524_v11 }
 0x74b   : > { %3434 = vmatprep.subr.msk.bf16.mxu1 %vm1588_vm4, %v557_v7 }
 0x74d   : > { %v1791_v19 = vpop.permute.xlu1 %1790 }
 0x74e   : > { %v1796_v24 = vsel %vm566_vm2, %v1791_v19, 0 }
 0x751   : > { %v1842_v41 = vpop.permute.xlu1 %1841 }
 0x752   : > { %v1847_v55 = vsel %vm566_vm2, %v1842_v41, 0 }
 0x753   : > { %v3537_v13 = vpop.eup %3536 }
 0x754   : > { %v1377_v4 = vmul.f32 %v3537_v13, %v3521_v32 }
 0x755   : > { %v1893_v57 = vpop.permute.xlu1 %1892 }
 0x756   : > { %v1381_v16 = vpack.c.bf16 %v1377_v4, %v1375_v14  ;;  %v1898_v44 = vsel %vm566_vm2, %v1893_v57, 0 }
 0x758   : > { %3290 = vmatmul.mubr.msk.bf16.vlgmr.msra.gmra.mxu1 %vm782_vm3, %v1381_v16 }
 0x759   : > { %3305 = vmatprep.mubr.msk.bf16.mxu1 %vm566_vm2, %v1063_v42  ;;  %3304 = vmatpush3.bf16.msra.mxu1 %v1670_v18  ;;  %v1738_v42 = vpop.permute.xlu0 %1737  ;;  %v1891_v28 = vpop.permute.xlu1 %1890 }
 0x75a   : > { %3319 = vmatprep.subr.bf16.mxu1 %v3618_v48 }
 0x75d   : > { %v1789_v61 = vpop.permute.xlu0 %1788 }
 0x760   : > { %3306 = vmatmul.mubr.msk.bf16.vlgmr.msra.gmra.mxu1 %vm566_vm2, %v1064_v39 }
 0x761   : > { %3320 = vmatpush3.bf16.xpose.msra.mxu1 %v1796_v24  ;;  %3309 = vmatprep.mubr.msk.bf16.mxu1 %vm566_vm2, %v1065_v46  ;;  %v1840_v60 = vpop.permute.xlu0 %1839  ;;  %v3066_v24 = vld [vmem:[%s4364_s3 + $0x20] sm:$0xff] }
 0x762   : > { %3331 = vmatprep.subr.bf16.mxu1 %v3618_v48 }
 0x768   : > { %3310 = vmatmul.mubr.msk.bf16.gmra.mxu1 %vm566_vm2, %v1066_v10 }
 0x769   : > { %3321 = vmatprep.mubr.msk.bf16.mxu1 %vm3619_vm1, %v3618_v48 }
 0x770   : > { %3322 = vmatmul.mubr.msk.bf16.vlgmr.msra.gmra.mxu1 %vm566_vm2, %v1789_v61 }
 0x771   : > { %3332 = vmatpush3.bf16.xpose.msra.mxu1 %v1898_v44  ;;  %3333 = vmatprep.mubr.msk.bf16.mxu1 %vm3619_vm1, %v3618_v48 }
 0x772   : > { %3343 = vmatprep.subr.bf16.mxu1 %v3618_v48 }
 0x778   : > { %3334 = vmatmul.mubr.msk.bf16.vlgmr.msra.gmra.mxu1 %vm566_vm2, %v1891_v28 }
 0x779   : > { %3345 = vmatprep.mubr.msk.bf16.mxu1 %vm3619_vm1, %v3618_v48 }
 0x7d8   : > { %v1422_v46 = vpop.f32.mrf.mxu0 }
 0x7da   : > { %v3273_v39 = vpop.f32.mrf.mxu0 }
 0x7db   : > { %v1469_v2 = vpop.f32.mrf.mxu1 }
 0x7dc   : > { %v1425_v9 = vpop.f32.mrf.mxu0 }
 0x7dd   : > { %v1570_v10 = vpack.c.bf16 %v1425_v9, %v1422_v46  ;;  %v3279_v25 = vpop.f32.mrf.mxu1  ;;  %v3067_v46 = vld [vmem:[%s4364_s3 + $0x28] sm:$0xff] }
 0x7de   : > { %v3274_v26 = vpop.f32.mrf.mxu0 }
 0x7df   : > { %v1472_v27 = vpop.f32.mrf.mxu1  ;;  %3295 = vmatprep.mubr.msk.bf16.mxu0 %vm566_vm2, %v1570_v10 }
 0x7e0   : > { %v1571_v30 = vpack.c.bf16 %v1472_v27, %v1469_v2  ;;  %v1516_v31 = vpop.f32.mrf.mxu0 }
 0x7e1   : > { %v3280_v32 = vpop.f32.mrf.mxu1 }
 0x7e2   : > { %v3285_v34 = vpop.f32.mrf.mxu0  ;;  %3296 = vmatmul.mubr.msk.bf16.vlgmr.msra.gmra.mxu0 %vm566_vm2, %v1571_v30 }
 0x7e3   : > { %3314 = vmatpush3.bf16.xpose.msra.mxu0 %v1745_v33 }
 0x7e4   : > { %v1519_v35 = vpop.f32.mrf.mxu0  ;;  %3325 = vmatprep.subr.bf16.mxu0 %v3618_v48 }
 0x7e5   : > { %v1572_v36 = vpack.c.bf16 %v1519_v35, %v1516_v31 }
 0x7e6   : > { %v3286_v37 = vpop.f32.mrf.mxu0 }
 0x7e7   : > { %3299 = vmatprep.mubr.msk.bf16.mxu0 %vm566_vm2, %v1572_v36 }
 0x818   : > { %v1563_v40 = vpop.f32.mrf.mxu1 }
 0x81a   : > { %v3291_v43 = vpop.f32.mrf.mxu1 }
 0x81c   : > { %v1566_v45 = vpop.f32.mrf.mxu1 }
 0x81d   : > { %v1573_v47 = vpack.c.bf16 %v1566_v45, %v1563_v40 }
 0x81e   : > { %v3292_v50 = vpop.f32.mrf.mxu1 }
 0x81f   : > { %3300 = vmatmul.mubr.msk.bf16.gmra.mxu0 %vm566_vm2, %v1573_v47 }
 0x820   : > { %v4073_v51 = vpop.f32.mrf.mxu1  ;;  %3315 = vmatprep.mubr.msk.bf16.mxu0 %vm3619_vm1, %v3618_v48 }
 0x822   : > { %v4077_v52 = vpop.f32.mrf.mxu1 }
 0x824   : > { %v4079_v54 = vpop.f32.mrf.mxu1 }
 0x826   : > { %v4081_v29 = vpop.f32.mrf.mxu1 }
 0x827   : > { %3316 = vmatmul.mubr.msk.bf16.vlgmr.msra.gmra.mxu0 %vm566_vm2, %v1738_v42 }
 0x828   : > { %3326 = vmatpush3.bf16.xpose.msra.mxu0 %v1847_v55  ;;  %v4085_v56 = vpop.f32.mrf.mxu1  ;;  %3327 = vmatprep.mubr.msk.bf16.mxu0 %vm3619_vm1, %v3618_v48 }
 0x829   : > { %3337 = vmatprep.subr.bf16.mxu0 %v3618_v48 }
 0x82a   : > { %v4090_v59 = vpop.f32.mrf.mxu1 }
 0x82c   : > { %v4092_v53 = vpop.f32.mrf.mxu1 }
 0x82e   : > { %v4094_v62 = vpop.f32.mrf.mxu1 }
 0x82f   : > { %3328 = vmatmul.mubr.msk.bf16.vlgmr.msra.gmra.mxu0 %vm566_vm2, %v1840_v60 }
 0x830   : > { %v1832_v49 = vpop.f32.mrf.mxu1  ;;  %3339 = vmatprep.mubr.msk.bf16.mxu0 %vm3619_vm1, %v3618_v48 }
 0x831   : > { %v1943_v19 = vmul.f32 0.35355338, %v1832_v49 }
 0x832   : > { %v3323_v38 = vpop.f32.mrf.mxu1 }
 0x833   : > { %v1954_v44 = vadd.f32 %v3066_v24, %v1943_v19 }
 0x834   : > { %v1835_v58 = vpop.f32.mrf.mxu1 }
 0x835   : > { %v1944_v42 = vmul.f32 0.35355338, %v1835_v58  ;;  %v1966_v25 = vsel %vm782_vm3, %v1954_v44, -inf }
 0x836   : > { %v3324_v21 = vpop.f32.mrf.mxu1 }
 0x837   : > { %v1955_v26 = vadd.f32 %v3067_v46, %v1944_v42 }
 0x838   : > { %v1934_v63 = vpop.f32.mrf.mxu1 }
 0x839   : > { %v1947_v30 = vmul.f32 0.35355338, %v1934_v63  ;;  %v1969_v34 = vsel %vm782_vm3, %v1955_v26, -inf }
 0x83a   : > { %v3335_v0 = vpop.f32.mrf.mxu1 }
 0x83b   : > { %v1958_v45 = vadd.f32 %v3066_v24, %v1947_v30 }
 0x83c   : > { %v1937_v1 = vpop.f32.mrf.mxu1 }
 0x83d   : > { %v1948_v32 = vmul.f32 0.35355338, %v1937_v1  ;;  %v1978_v50 = vsel %vm782_vm3, %v1958_v45, -inf }
 0x83e   : > { %v3336_v3 = vpop.f32.mrf.mxu1 }
 0x83f   : > { %v1959_v47 = vadd.f32 %v3067_v46, %v1948_v32 }
 0x841   : > { %v1981_v55 = vsel %vm782_vm3, %v1959_v47, -inf }
 0x8a2   : > { %v4099_v6 = vpop.f32.mrf.mxu0 }
 0x8a4   : > { %v4101_v7 = vpop.f32.mrf.mxu0 }
 0x8a6   : > { %v4103_v11 = vpop.f32.mrf.mxu0 }
 0x8a8   : > { %v4105_v12 = vpop.f32.mrf.mxu0 }
 0x8df   : > { %v4107_v13 = vpop.f32.mrf.mxu0 }
 0x8e1   : > { %v4109_v14 = vpop.f32.mrf.mxu0 }
 0x8e3   : > { %v4111_v4 = vpop.f32.mrf.mxu0 }
 0x8e5   : > { %v4113_v16 = vpop.f32.mrf.mxu0 }
 0x8e7   : > { %v1781_v18 = vpop.f32.mrf.mxu0 }
 0x8e8   : > { %v1941_v22 = vmul.f32 0.35355338, %v1781_v18 }
 0x8e9   : > { %v3317_v23 = vpop.f32.mrf.mxu0 }
 0x8ea   : > { %v1952_v20 = vadd.f32 %v3066_v24, %v1941_v22 }
 0x8eb   : > { %v1784_v41 = vpop.f32.mrf.mxu0 }
 0x8ec   : > { %v1942_v57 = vmul.f32 0.35355338, %v1784_v41  ;;  %v1960_v61 = vsel %vm782_vm3, %v1952_v20, -inf }
 0x8ed   : > { %1961 = vmax.xlane.f32.xlu0 %v1960_v61  ;;  %v3318_v28 = vpop.f32.mrf.mxu0 }
 0x8ee   : > { %v1953_v39 = vadd.f32 %v3067_v46, %v1942_v57 }
 0x8ef   : > { %v1883_v2 = vpop.f32.mrf.mxu0 }
 0x8f0   : > { %v1945_v9 = vmul.f32 0.35355338, %v1883_v2  ;;  %v1963_v10 = vsel %vm782_vm3, %v1953_v39, -inf }
 0x8f1   : > { %1964 = vmax.xlane.f32.xlu1 %v1963_v10  ;;  %v3329_v27 = vpop.f32.mrf.mxu0  ;;  %1967 = vmax.xlane.f32.xlu0 %v1966_v25 }
 0x8f2   : > { %v1956_v35 = vadd.f32 %v3066_v24, %v1945_v9 }
 0x8f3   : > { %v1886_v31 = vpop.f32.mrf.mxu0 }
 0x8f4   : > { %v1946_v33 = vmul.f32 0.35355338, %v1886_v31  ;;  %v1972_v43 = vsel %vm782_vm3, %v1956_v35, -inf }
 0x8f5   : > { %v3330_v36 = vpop.f32.mrf.mxu0  ;;  %1970 = vmax.xlane.f32.xlu0 %v1969_v34 }
 0x8f6   : > { %v4125_v37 = vadd.f32 %v3067_v46, %v1946_v33 }
 0x8f8   : > { %v1975_v40 = vsel %vm782_vm3, %v4125_v37, -inf }
 0x8f9   : > { %1976 = vmax.xlane.f32.xlu1 %v1975_v40  ;;  %1973 = vmax.xlane.f32.xlu0 %v1972_v43 }
 0x8fd   : > { %1979 = vmax.xlane.f32.xlu0 %v1978_v50  ;;  %1982 = vmax.xlane.f32.xlu1 %v1981_v55 }
 0x976   : > { %v1962_v60 = vpop.xlane.xlu0 %1961 }
 0x977   : > { %v1984_v19 = vsub.f32 %v1952_v20, %v1962_v60 }
 0x979   : > { %v1992_v57 = vmul.f32 1.442695, %v1984_v19 }
 0x97a   : > { %v1968_v49 = vpop.xlane.xlu0 %1967  ;;  %v1965_v21 = vpop.xlane.xlu1 %1964 }
 0x97b   : > { %v1986_v38 = vsub.f32 %v1954_v44, %v1968_v49  ;;  %v1985_v22 = vsub.f32 %v1953_v39, %v1965_v21 }
 0x97d   : > { %v1996_v58 = vmul.f32 1.442695, %v1986_v38  ;;  %v1994_v44 = vmul.f32 1.442695, %v1985_v22 }
 0x97e   : > { %v1971_v63 = vpop.xlane.xlu0 %1970 }
 0x97f   : > { %v1987_v0 = vsub.f32 %v1955_v26, %v1971_v63  ;;  %3538 = vpow2.f32 %v1996_v58 }
 0x981   : > { %v1998_v1 = vmul.f32 1.442695, %v1987_v0 }
 0x982   : > { %v1977_v3 = vpop.xlane.xlu1 %1976  ;;  %v1974_v18 = vpop.xlane.xlu0 %1973 }
 0x983   : > { %3540 = vpow2.f32 %v1998_v1  ;;  %v1988_v61 = vsub.f32 %v1956_v35, %v1974_v18  ;;  %v1989_v40 = vsub.f32 %v4125_v37, %v1977_v3 }
 0x985   : > { %v2000_v9 = vmul.f32 1.442695, %v1988_v61  ;;  %v2002_v43 = vmul.f32 1.442695, %v1989_v40 }
 0x986   : > { %v1980_v23 = vpop.xlane.xlu0 %1979  ;;  %v1983_v24 = vpop.xlane.xlu1 %1982 }
 0x987   : > { %v1990_v41 = vsub.f32 %v1958_v45, %v1980_v23  ;;  %v1991_v42 = vsub.f32 %v1959_v47, %v1983_v24 }
 0x989   : > { %v2004_v28 = vmul.f32 1.442695, %v1990_v41  ;;  %v2006_v46 = vmul.f32 1.442695, %v1991_v42 }
 0x98b   : > { %3542 = vpow2.f32 %v2004_v28 }
 0x98c   : > { %3544 = vpow2.f32 %v2006_v46  ;;  %v3539_v2 = vpop.eup %3538 }
 0x98d   : > { %3546 = vpow2.f32 %v1992_v57  ;;  %v2014_v10 = vsel %vm782_vm3, %v3539_v2, 0.0 }
 0x98e   : > { %3548 = vpow2.f32 %v1994_v44  ;;  %2015 = vadd.xlane.f32.xlu0 %v2014_v10 }
 0x98f   : > { %3550 = vpow2.f32 %v2000_v9 }
 0x990   : > { %v3541_v20 = vpop.eup %3540  ;;  %3552 = vpow2.f32 %v2002_v43 }
 0x991   : > { %v2017_v39 = vsel %vm782_vm3, %v3541_v20, 0.0 }
 0x992   : > { %2018 = vadd.xlane.f32.xlu1 %v2017_v39 }
 0x998   : > { %v4134_v25 = vpop.eup %3542 }
 0x999   : > { %v4136_v26 = vpop.eup %3544  ;;  %v2026_v27 = vsel %vm782_vm3, %v4134_v25, 0.0 }
 0x99a   : > { %v3547_v30 = vpop.eup %3546  ;;  %2027 = vadd.xlane.f32.xlu0 %v2026_v27  ;;  %v2029_v31 = vsel %vm782_vm3, %v4136_v26, 0.0 }
 0x99b   : > { %v3549_v32 = vpop.eup %3548  ;;  %2030 = vadd.xlane.f32.xlu1 %v2029_v31  ;;  %v2008_v33 = vsel %vm782_vm3, %v3547_v30, 0.0 }
 0x99c   : > { %v4143_v34 = vpop.eup %3550  ;;  %v2011_v35 = vsel %vm782_vm3, %v3549_v32, 0.0 }
 0x99d   : > { %v2020_v36 = vsel %vm782_vm3, %v4143_v34, 0.0  ;;  %v4156_v45 = vpop.eup %3552 }
 0x99e   : > { %2009 = vadd.xlane.f32.xlu0 %v2008_v33  ;;  %v2023_v47 = vsel %vm782_vm3, %v4156_v45, 0.0 }
 0x99f   : > { %2012 = vadd.xlane.f32.xlu1 %v2011_v35 }
 0x9a2   : > { %2021 = vadd.xlane.f32.xlu0 %v2020_v36 }
 0x9b0   : > { %2099 = vrot.lane.b32.xlu1 %v3789_v5, %s3627_s13 }
 0x9b4   : > { %2146 = vrot.lane.b32.xlu1 %v3795_v15, %s3627_s13 }
 0x9b8   : > { %2052 = vrot.lane.b32.xlu0 %v3791_v8, %s3627_s13 }
 0x9bc   : > { %2334 = vrot.lane.b32.xlu0 %v3791_v8, %s3628_s14 }
 0x9c0   : > { %2385 = vrot.lane.b32.xlu0 %v3789_v5, %s3628_s14 }
 0x9c4   : > { %2383 = vrot.lane.b32.xlu0 %v3789_v5, %s3629_s15 }
 0x9c8   : > { %2434 = vrot.lane.b32.xlu0 %v3795_v15, %s3629_s15 }
 0x9d8   : > { %2024 = vadd.xlane.f32.xlu1 %v2023_v47 }
 0x9e9   : > { %2193 = vrot.lane.b32.xlu1 %v3798_v17, %s3627_s13 }
 0x9ed   : > { %2332 = vrot.lane.b32.xlu1 %v3791_v8, %s3629_s15 }
 0x9f1   : > { %2436 = vrot.lane.b32.xlu1 %v3795_v15, %s3628_s14 }
 0x9f5   : > { %2487 = vrot.lane.b32.xlu1 %v3798_v17, %s3628_s14 }
 0x9f9   : > { %2485 = vrot.lane.b32.xlu1 %v3798_v17, %s3629_s15 }
 0xa17   : > { %v2016_v37 = vpop.xlane.xlu0 %2015 }
 0xa18   : > { %3554 = vrcp.f32 %v2016_v37 }
 0xa1b   : > { %v2019_v50 = vpop.xlane.xlu1 %2018 }
 0xa1c   : > { %3556 = vrcp.f32 %v2019_v50 }
 0xa23   : > { %v2028_v55 = vpop.xlane.xlu0 %2027 }
 0xa24   : > { %v2031_v60 = vpop.xlane.xlu1 %2030 }
 0xa25   : > { %v3555_v49 = vpop.eup %3554 }
 0xa26   : > { %v2037_v63 = vmul.f32 %v3555_v49, %v3539_v2 }
 0xa27   : > { %v2010_v38 = vpop.xlane.xlu0 %2009 }
 0xa28   : > { %3558 = vrcp.f32 %v2010_v38  ;;  %v2013_v58 = vpop.xlane.xlu1 %2012 }
 0xa29   : > { %v3557_v21 = vpop.eup %3556  ;;  %3560 = vrcp.f32 %v2013_v58 }
 0xa2a   : > { %v2039_v0 = vmul.f32 %v3557_v21, %v3541_v20  ;;  %3562 = vrcp.f32 %v2028_v55 }
 0xa2b   : > { %v2022_v1 = vpop.xlane.xlu0 %2021  ;;  %3564 = vrcp.f32 %v2031_v60 }
 0xa2c   : > { %v2100_v3 = vpop.permute.xlu1 %2099  ;;  %v2049_v18 = vpack.c.bf16 %v2039_v0, %v2037_v63  ;;  %3566 = vrcp.f32 %v2022_v1 }
 0xa2d   : > { %3344 = vmatpush3.bf16.msra.mxu1 %v2100_v3 }
 0xa2e   : > { %3355 = vmatprep.subr.bf16.mxu1 %v3618_v48 }
 0xa2f   : > { %v2053_v19 = vpop.permute.xlu0 %2052 }
 0xa30   : > { %3346 = vmatmul.mubr.msk.bf16.vlgmr.msra.gmra.mxu1 %vm782_vm3, %v2049_v18  ;;  %3338 = vmatpush3.bf16.msra.mxu0 %v2053_v19  ;;  %v2147_v57 = vpop.permute.xlu1 %2146 }
 0xa31   : > { %3349 = vmatprep.subr.bf16.mxu0 %v3618_v48  ;;  %3357 = vmatprep.mubr.msk.bf16.mxu1 %vm3619_vm1, %v3618_v48 }
 0xa33   : > { %v2335_v10 = vpop.permute.xlu0 %2334 }
 0xa34   : > { %v2340_v39 = vsel %vm566_vm2, %v2335_v10, 0 }
 0xa35   : > { %v3559_v22 = vpop.eup %3558 }
 0xa36   : > { %v3561_v23 = vpop.eup %3560  ;;  %v2033_v24 = vmul.f32 %v3559_v22, %v3547_v30 }
 0xa37   : > { %v2035_v41 = vmul.f32 %v3561_v23, %v3549_v32  ;;  %v3563_v61 = vpop.eup %3562  ;;  %v2386_v30 = vpop.permute.xlu0 %2385 }
 0xa38   : > { %v3565_v28 = vpop.eup %3564  ;;  %v2045_v44 = vmul.f32 %v3563_v61, %v4134_v25  ;;  %v2391_v35 = vsel %vm566_vm2, %v2386_v30, 0 }
 0xa39   : > { %v2048_v42 = vpack.c.bf16 %v2035_v41, %v2033_v24  ;;  %v2047_v2 = vmul.f32 %v3565_v28, %v4136_v26  ;;  %v3567_v25 = vpop.eup %3566 }
 0xa3a   : > { %v2041_v32 = vmul.f32 %v3567_v25, %v4143_v34  ;;  %v555_v34 = vld [vmem:[%s4367_s6 + $0x10] sm:$0xff] }
 0xa3b   : > { %3340 = vmatmul.mubr.msk.bf16.vlgmr.msra.gmra.mxu0 %vm782_vm3, %v2048_v42  ;;  %v2051_v20 = vpack.c.bf16 %v2047_v2, %v2045_v44  ;;  %v2384_v43 = vpop.permute.xlu0 %2383 }
 0xa3c   : > { %3350 = vmatpush3.bf16.msra.mxu0 %v2147_v57  ;;  %3351 = vmatprep.mubr.msk.bf16.mxu0 %vm3619_vm1, %v3618_v48  ;;  %v4217_v57 = vld [vmem:[%s4364_s3 + $0x30] sm:$0xff] }
 0xa61   : > { %v2025_v46 = vpop.xlane.xlu1 %2024 }
 0xa62   : > { %3568 = vrcp.f32 %v2025_v46 }
 0xa65   : > { %v2194_v9 = vpop.permute.xlu1 %2193 }
 0xa66   : > { %3356 = vmatpush3.bf16.msra.mxu1 %v2194_v9  ;;  %v4223_v9 = vld [vmem:[%s4364_s3 + $0x38] sm:$0xff] }
 0xa67   : > { %3371 = vmatprep.subr.bf16.mxu1 %v3618_v48 }
 0xa69   : > { %3358 = vmatmul.mubr.msk.bf16.vlgmr.msra.gmra.mxu1 %vm782_vm3, %v2051_v20  ;;  %v2333_v27 = vpop.permute.xlu1 %2332 }
 0xa6a   : > { %3372 = vmatpush3.bf16.xpose.msra.mxu1 %v2340_v39  ;;  %3373 = vmatprep.mubr.msk.bf16.mxu1 %vm3619_vm1, %v3618_v48 }
 0xa6b   : > { %3377 = vmatprep.subr.bf16.mxu1 %v3618_v48 }
 0xa6d   : > { %v2437_v31 = vpop.permute.xlu1 %2436 }
 0xa6e   : > { %v2442_v19 = vsel %vm566_vm2, %v2437_v31, 0 }
 0xa6f   : > { %v3569_v26 = vpop.eup %3568 }
 0xa70   : > { %v2043_v33 = vmul.f32 %v3569_v26, %v4156_v45  ;;  %v556_v45 = vld [vmem:[%s4367_s6 + $0x18] sm:$0xff] }
 0xa71   : > { %3374 = vmatmul.mubr.msk.bf16.vlgmr.msra.gmra.mxu1 %vm566_vm2, %v2333_v27  ;;  %v2488_v40 = vpop.permute.xlu1 %2487  ;;  %v4200_v37 = vpack.c.bf16 %v556_v45, %v555_v34 }
 0xa72   : > { %3378 = vmatpush3.bf16.xpose.msra.mxu1 %v2391_v35  ;;  %v2050_v36 = vpack.c.bf16 %v2043_v33, %v2041_v32  ;;  %3379 = vmatprep.mubr.msk.bf16.mxu1 %vm3619_vm1, %v3618_v48  ;;  %v2493_v47 = vsel %vm566_vm2, %v2488_v40, 0 }
 0xa73   : > { %3389 = vmatprep.subr.bf16.mxu1 %v3618_v48  ;;  %3435 = vmatprep.subr.msk.bf16.mxu0 %vm1588_vm4, %v4200_v37  ;;  %v2257_v50 = vsel %vm1588_vm4, %v4200_v37, 0 }
 0xa74   : > { %3352 = vmatmul.mubr.msk.bf16.vlgmr.msra.gmra.mxu0 %vm782_vm3, %v2050_v36 }
 0xa75   : > { %v2486_v55 = vpop.permute.xlu1 %2485  ;;  %3362 = vmatpush3.bf16.msra.mxu0 %v2257_v50 }
 0xa76   : > { %3383 = vmatprep.subr.bf16.mxu0 %v3618_v48 }
 0xa79   : > { %3380 = vmatmul.mubr.msk.bf16.vlgmr.msra.gmra.mxu1 %vm566_vm2, %v2384_v43 }
 0xa7a   : > { %3390 = vmatpush3.bf16.xpose.msra.mxu1 %v2493_v47  ;;  %3391 = vmatprep.mubr.msk.bf16.mxu1 %vm3619_vm1, %v3618_v48 }
 0xa7b   : > { %3401 = vmatprep.subr.bf16.mxu1 %v3618_v48 }
 0xa81   : > { %3392 = vmatmul.mubr.msk.bf16.vlgmr.msra.gmra.mxu1 %vm566_vm2, %v2486_v55 }
 0xa82   : > { %3403 = vmatprep.mubr.msk.bf16.mxu1 %vm3619_vm1, %v3618_v48 }
 0xaf0   : > { %v2139_v60 = vpop.f32.mrf.mxu1 }
 0xaf2   : > { %v3347_v49 = vpop.f32.mrf.mxu1 }
 0xaf4   : > { %v2142_v38 = vpop.f32.mrf.mxu1 }
 0xaf5   : > { %v2241_v3 = vpack.c.bf16 %v2142_v38, %v2139_v60  ;;  %v2435_v38 = vpop.permute.xlu0 %2434 }
 0xaf6   : > { %v3348_v58 = vpop.f32.mrf.mxu1 }
 0xafb   : > { %v2092_v21 = vpop.f32.mrf.mxu0 }
 0xafd   : > { %v3341_v63 = vpop.f32.mrf.mxu0 }
 0xaff   : > { %v2095_v0 = vpop.f32.mrf.mxu0 }
 0xb00   : > { %v2240_v1 = vpack.c.bf16 %v2095_v0, %v2092_v21  ;;  %v1715_v0 = vadd.f32 %v4073_v51, %v4099_v6 }
 0xb01   : > { %v3342_v18 = vpop.f32.mrf.mxu0 }
 0xb02   : > { %3363 = vmatprep.mubr.msk.bf16.mxu0 %vm566_vm2, %v2240_v1 }
 0xb03   : > { %3364 = vmatmul.mubr.msk.bf16.vlgmr.msra.gmra.mxu0 %vm566_vm2, %v2241_v3  ;;  %v1707_v3 = vadd.f32 %v4077_v52, %v4101_v7 }
 0xb04   : > { %3384 = vmatpush3.bf16.xpose.msra.mxu0 %v2442_v19 }
 0xb05   : > { %3395 = vmatprep.subr.bf16.mxu0 %v3618_v48 }
 0xb29   : > { %v2233_v22 = vpop.f32.mrf.mxu1 }
 0xb2b   : > { %v3359_v23 = vpop.f32.mrf.mxu1 }
 0xb2d   : > { %v2236_v24 = vpop.f32.mrf.mxu1 }
 0xb2e   : > { %v2243_v32 = vpack.c.bf16 %v2236_v24, %v2233_v22  ;;  %v1718_v22 = vadd.f32 %v4079_v54, %v4103_v11  ;;  %v1723_v11 = vadd.f32 %v4090_v59, %v4109_v14 }
 0xb2f   : > { %v3360_v41 = vpop.f32.mrf.mxu1 }
 0xb30   : > { %v1710_v41 = vadd.f32 %v4081_v29, %v4105_v12 }
 0xb31   : > { %v2376_v42 = vpop.f32.mrf.mxu1 }
 0xb32   : > { %v2536_v61 = vmul.f32 0.35355338, %v2376_v42 }
 0xb33   : > { %v3375_v28 = vpop.f32.mrf.mxu1 }
 0xb34   : > { %v2547_v46 = vadd.f32 %v4217_v57, %v2536_v61  ;;  %v2186_v44 = vpop.f32.mrf.mxu0 }
 0xb35   : > { %v2379_v2 = vpop.f32.mrf.mxu1 }
 0xb36   : > { %v2537_v10 = vmul.f32 0.35355338, %v2379_v2  ;;  %v3353_v20 = vpop.f32.mrf.mxu0  ;;  %v2555_v39 = vsel %vm782_vm3, %v2547_v46, -inf }
 0xb37   : > { %2556 = vmax.xlane.f32.xlu0 %v2555_v39  ;;  %v3376_v27 = vpop.f32.mrf.mxu1 }
 0xb38   : > { %v2548_v25 = vadd.f32 %v4223_v9, %v2537_v10  ;;  %v2189_v30 = vpop.f32.mrf.mxu0  ;;  %v1734_v27 = vadd.f32 %v4092_v53, %v4111_v4 }
 0xb39   : > { %v2242_v26 = vpack.c.bf16 %v2189_v30, %v2186_v44  ;;  %v2427_v31 = vpop.f32.mrf.mxu1  ;;  %v1731_v44 = vadd.f32 %v4085_v56, %v4107_v13 }
 0xb3a   : > { %v2538_v33 = vmul.f32 0.35355338, %v2427_v31  ;;  %v3354_v35 = vpop.f32.mrf.mxu0  ;;  %v2558_v36 = vsel %vm782_vm3, %v2548_v25, -inf }
 0xb3b   : > { %3367 = vmatprep.mubr.msk.bf16.mxu0 %vm566_vm2, %v2242_v26  ;;  %2559 = vmax.xlane.f32.xlu1 %v2558_v36  ;;  %v3381_v40 = vpop.f32.mrf.mxu1 }
 0xb3c   : > { %v2549_v43 = vadd.f32 %v4217_v57, %v2538_v33  ;;  %3368 = vmatmul.mubr.msk.bf16.gmra.mxu0 %vm566_vm2, %v2243_v32 }
 0xb3d   : > { %v2430_v47 = vpop.f32.mrf.mxu1  ;;  %3385 = vmatprep.mubr.msk.bf16.mxu0 %vm3619_vm1, %v3618_v48 }
 0xb3e   : > { %v2539_v34 = vmul.f32 0.35355338, %v2430_v47  ;;  %v2561_v45 = vsel %vm782_vm3, %v2549_v43, -inf }
 0xb3f   : > { %2562 = vmax.xlane.f32.xlu0 %v2561_v45  ;;  %v3382_v50 = vpop.f32.mrf.mxu1 }
 0xb40   : > { %v2550_v55 = vadd.f32 %v4223_v9, %v2539_v34 }
 0xb41   : > { %v2529_v60 = vpop.f32.mrf.mxu1 }
 0xb42   : > { %v2564_v49 = vsel %vm782_vm3, %v2550_v55, -inf  ;;  %v2542_v32 = vmul.f32 0.35355338, %v2529_v60 }
 0xb43   : > { %2565 = vmax.xlane.f32.xlu0 %v2564_v49  ;;  %v3393_v58 = vpop.f32.mrf.mxu1 }
 0xb44   : > { %3386 = vmatmul.mubr.msk.bf16.vlgmr.msra.gmra.mxu0 %vm566_vm2, %v2435_v38 }
 0xb45   : > { %v2532_v21 = vpop.f32.mrf.mxu1  ;;  %3397 = vmatprep.mubr.msk.bf16.mxu0 %vm3619_vm1, %v3618_v48 }
 0xb46   : > { %v2543_v40 = vmul.f32 0.35355338, %v2532_v21 }
 0xb47   : > { %v3394_v63 = vpop.f32.mrf.mxu1 }
 0xb48   : > { %v2554_v50 = vadd.f32 %v4223_v9, %v2543_v40 }
 0xb4a   : > { %v2576_v58 = vsel %vm782_vm3, %v2554_v50, -inf }
 0xbc0   : > { %v2557_v6 = vpop.xlane.xlu0 %2556 }
 0xbc1   : > { %v2579_v52 = vsub.f32 %v2547_v46, %v2557_v6  ;;  %v1726_v46 = vadd.f32 %v4094_v62, %v4113_v16  ;;  %v2553_v62 = vadd.f32 %v4217_v57, %v2542_v32 }
 0xbc3   : > { %v3365_v1 = vpop.f32.mrf.mxu0  ;;  %v2587_v10 = vmul.f32 1.442695, %v2579_v52  ;;  %v2573_v60 = vsel %vm782_vm3, %v2553_v62, -inf }
 0xbc4   : > { %v4243_v18 = vadd.f32 %v3365_v1, %v1715_v0  ;;  %v2560_v7 = vpop.xlane.xlu1 %2559 }
 0xbc5   : > { %v2293_v19 = vpop.f32.mrf.mxu0  ;;  %v2580_v2 = vsub.f32 %v2548_v25, %v2560_v7  ;;  %3570 = vpow2.f32 %v2587_v10 }
 0xbc6   : > { %v4247_v23 = vadd.f32 %v2293_v19, %v1707_v3 }
 0xbc7   : > { %v3366_v24 = vpop.f32.mrf.mxu0  ;;  %v2589_v56 = vmul.f32 1.442695, %v2580_v2 }
 0xbc8   : > { %v4251_v42 = vadd.f32 %v3366_v24, %v1718_v22  ;;  %v2563_v28 = vpop.xlane.xlu0 %2562 }
 0xbc9   : > { %v2296_v61 = vpop.f32.mrf.mxu0  ;;  %v2581_v20 = vsub.f32 %v2549_v43, %v2563_v28  ;;  %3572 = vpow2.f32 %v2589_v56 }
 0xbca   : > { %v4253_v51 = vadd.f32 %v2296_v61, %v1710_v41 }
 0xbcb   : > { %v2591_v25 = vmul.f32 1.442695, %v2581_v20 }
 0xbcc   : > { %v2566_v12 = vpop.xlane.xlu0 %2565 }
 0xbcd   : > { %v2582_v26 = vsub.f32 %v2550_v55, %v2566_v12  ;;  %3574 = vpow2.f32 %v2591_v25 }
 0xbcf   : > { %v2593_v53 = vmul.f32 1.442695, %v2582_v26 }
 0xbd1   : > { %3576 = vpow2.f32 %v2593_v53 }
 0xbd2   : > { %v4278_v49 = vpop.eup %3570 }
 0xbd3   : > { %v2603_v38 = vsel %vm782_vm3, %v4278_v49, 0.0 }
 0xbfc   : > { %v3369_v54 = vpop.f32.mrf.mxu0 }
 0xbfd   : > { %v4259_v29 = vadd.f32 %v3369_v54, %v1731_v44 }
 0xbfe   : > { %v2309_v39 = vpop.f32.mrf.mxu0 }
 0xbff   : > { %v4263_v30 = vadd.f32 %v2309_v39, %v1723_v11 }
 0xc00   : > { %v3370_v13 = vpop.f32.mrf.mxu0 }
 0xc01   : > { %v4267_v59 = vadd.f32 %v3370_v13, %v1734_v27 }
 0xc02   : > { %v2312_v14 = vpop.f32.mrf.mxu0 }
 0xc03   : > { %v4269_v31 = vadd.f32 %v2312_v14, %v1726_v46 }
 0xc04   : > { %v2478_v33 = vpop.f32.mrf.mxu0 }
 0xc05   : > { %v2540_v4 = vmul.f32 0.35355338, %v2478_v33 }
 0xc06   : > { %v3387_v35 = vpop.f32.mrf.mxu0 }
 0xc07   : > { %v2551_v36 = vadd.f32 %v4217_v57, %v2540_v4  ;;  %v3573_v57 = vpop.eup %3572 }
 0xc08   : > { %v2481_v16 = vpop.f32.mrf.mxu0  ;;  %v3575_v21 = vpop.eup %3574 }
 0xc09   : > { %v2541_v43 = vmul.f32 0.35355338, %v2481_v16  ;;  %v2567_v47 = vsel %vm782_vm3, %v2551_v36, -inf  ;;  %v2609_v63 = vsel %vm782_vm3, %v3575_v21, 0.0  ;;  %v3577_v0 = vpop.eup %3576 }
 0xc0a   : > { %v3388_v34 = vpop.f32.mrf.mxu0  ;;  %2568 = vmax.xlane.f32.xlu0 %v2567_v47  ;;  %v2612_v1 = vsel %vm782_vm3, %v3577_v0, 0.0 }
 0xc0b   : > { %v2552_v45 = vadd.f32 %v4223_v9, %v2541_v43  ;;  %v2606_v9 = vsel %vm782_vm3, %v3573_v57, 0.0 }
 0xc0d   : > { %v2570_v55 = vsel %vm782_vm3, %v2552_v45, -inf }
 0xc0e   : > { %2571 = vmax.xlane.f32.xlu1 %v2570_v55  ;;  %2574 = vmax.xlane.f32.xlu0 %v2573_v60 }
 0xc12   : > { %2604 = vadd.xlane.f32.xlu0 %v2603_v38  ;;  %2577 = vmax.xlane.f32.xlu1 %v2576_v58 }
 0xc16   : > { %2610 = vadd.xlane.f32.xlu0 %v2609_v63  ;;  %2607 = vadd.xlane.f32.xlu1 %v2606_v9  ;;  %v2840_v9 = vrot.slane %v4200_v37, 4 }
 0xc1a   : > { %2613 = vadd.xlane.f32.xlu1 %v2612_v1 }
 0xc93   : > { %v2569_v3 = vpop.xlane.xlu0 %2568 }
 0xc94   : > { %v2583_v19 = vsub.f32 %v2551_v36, %v2569_v3 }
 0xc96   : > { %v2595_v6 = vmul.f32 1.442695, %v2583_v19 }
 0xc97   : > { %v2572_v22 = vpop.xlane.xlu1 %2571  ;;  %v2575_v24 = vpop.xlane.xlu0 %2574 }
 0xc98   : > { %v2585_v41 = vsub.f32 %v2553_v62, %v2575_v24  ;;  %v2584_v12 = vsub.f32 %v2552_v45, %v2572_v22 }
 0xc9a   : > { %v2599_v61 = vmul.f32 1.442695, %v2585_v41  ;;  %v2597_v39 = vmul.f32 1.442695, %v2584_v12 }
 0xc9b   : > { %v2578_v28 = vpop.xlane.xlu1 %2577  ;;  %v2605_v13 = vpop.xlane.xlu0 %2604 }
 0xc9c   : > { %v2586_v52 = vsub.f32 %v2554_v50, %v2578_v28  ;;  %3578 = vpow2.f32 %v2599_v61 }
 0xc9d   : > { %3580 = vpow2.f32 %v2595_v6 }
 0xc9e   : > { %v2601_v7 = vmul.f32 1.442695, %v2586_v52 }
 0xc9f   : > { %v2608_v56 = vpop.xlane.xlu1 %2607  ;;  %v2611_v26 = vpop.xlane.xlu0 %2610 }
 0xca0   : > { %3582 = vpow2.f32 %v2601_v7 }
 0xca1   : > { %3584 = vpow2.f32 %v2597_v39 }
 0xca3   : > { %v2614_v25 = vpop.xlane.xlu1 %2613 }
 0xca4   : > { %3586 = vrcp.f32 %v2614_v25 }
 0xca5   : > { %3588 = vrcp.f32 %v2608_v56  ;;  %v3090_v56 = vld [vmem:[%s4368_s7] ss:$0 sm:$0xff] }
 0xca6   : > { %3590 = vrcp.f32 %v2611_v26 }
 0xca7   : > { %3592 = vrcp.f32 %v2605_v13 }
 0xca9   : > { %v3579_v44 = vpop.eup %3578 }
 0xcaa   : > { %v2621_v2 = vsel %vm782_vm3, %v3579_v44, 0.0  ;;  %v4287_v54 = vpop.eup %3580 }
 0xcab   : > { %2622 = vadd.xlane.f32.xlu0 %v2621_v2  ;;  %v2615_v20 = vsel %vm782_vm3, %v4287_v54, 0.0 }
 0xcad   : > { %v3583_v11 = vpop.eup %3582 }
 0xcae   : > { %v2624_v10 = vsel %vm782_vm3, %v3583_v11, 0.0  ;;  %v3585_v27 = vpop.eup %3584 }
 0xcaf   : > { %2625 = vadd.xlane.f32.xlu1 %v2624_v10  ;;  %2616 = vadd.xlane.f32.xlu0 %v2615_v20  ;;  %v2618_v46 = vsel %vm782_vm3, %v3585_v27, 0.0 }
 0xcc0   : > { %2694 = vrot.lane.b32.xlu1 %v3789_v5, %s3630_s24 }
 0xcc4   : > { %2741 = vrot.lane.b32.xlu1 %v3795_v15, %s3630_s24  ;;  %v3587_v15 = vpop.eup %3586 }
 0xcc5   : > { %2647 = vrot.lane.b32.xlu0 %v3791_v8, %s3630_s24  ;;  %v3589_v8 = vpop.eup %3588  ;;  %v2634_v4 = vmul.f32 %v3587_v15, %v3577_v0  ;;  %v2854_v0 = vsel %vm1588_vm4, %v2840_v9, 0 }
 0xcc6   : > { %v3591_v32 = vpop.eup %3590  ;;  %v2630_v35 = vmul.f32 %v3589_v8, %v3573_v57 }
 0xcc7   : > { %v3593_v53 = vpop.eup %3592  ;;  %v2632_v62 = vmul.f32 %v3591_v32, %v3575_v21 }
 0xcc8   : > { %v2628_v16 = vmul.f32 %v3593_v53, %v4278_v49 }
 0xcc9   : > { %v2644_v40 = vpack.c.bf16 %v2634_v4, %v2632_v62  ;;  %v3605_v62 = vld [vmem:[%s3692_s11 + $0x18] sm:$0xff] }
 0xcca   : > { %v2643_v43 = vpack.c.bf16 %v2630_v35, %v2628_v16  ;;  %v3604_v35 = vld [vmem:[%s3692_s11 + $0x8] sm:$0xff] }
 0xce8   : > { %2619 = vadd.xlane.f32.xlu1 %v2618_v46 }
 0xcf9   : > { %2788 = vrot.lane.b32.xlu1 %v3798_v17, %s3630_s24 }
 0xd34   : > { %v2623_v5 = vpop.xlane.xlu0 %2622 }
 0xd38   : > { %v2626_v14 = vpop.xlane.xlu1 %2625  ;;  %v2617_v33 = vpop.xlane.xlu0 %2616 }
 0xd39   : > { %3594 = vrcp.f32 %v2626_v14  ;;  %v3602_v14 = vld [vmem:[%s3692_s11] sm:$0xff] }
 0xd3a   : > { %3596 = vrcp.f32 %v2623_v5 }
 0xd3b   : > { %3598 = vrcp.f32 %v2617_v33  ;;  %v3603_v33 = vld [vmem:[%s3692_s11 + $0x10] sm:$0xff] }
 0xd3c   : > { %v2695_v36 = vpop.permute.xlu1 %2694  ;;  %v2648_v17 = vpop.permute.xlu0 %2647 }
 0xd3d   : > { %3402 = vmatpush3.bf16.msra.mxu1 %v2695_v36  ;;  %3396 = vmatpush3.bf16.msra.mxu0 %v2648_v17 }
 0xd3e   : > { %3413 = vmatprep.subr.bf16.mxu1 %v3618_v48  ;;  %3407 = vmatprep.subr.bf16.mxu0 %v3618_v48 }
 0xd40   : > { %3404 = vmatmul.mubr.msk.bf16.vlgmr.msra.gmra.mxu1 %vm782_vm3, %v2644_v40  ;;  %v2742_v47 = vpop.permute.xlu1 %2741  ;;  %3398 = vmatmul.mubr.msk.bf16.vlgmr.msra.gmra.mxu0 %vm782_vm3, %v2643_v43 }
 0xd41   : > { %3415 = vmatprep.mubr.msk.bf16.mxu1 %vm3619_vm1, %v3618_v48  ;;  %3408 = vmatpush3.bf16.msra.mxu0 %v2742_v47 }
 0xd42   : > { %3409 = vmatprep.mubr.msk.bf16.mxu0 %vm3619_vm1, %v3618_v48  ;;  %3436 = vmatprep.subr.msk.bf16.mxu0 %vm1588_vm4, %v2840_v9 }
 0xd46   : > { %v3595_v34 = vpop.eup %3594 }
 0xd47   : > { %v3597_v50 = vpop.eup %3596  ;;  %v2642_v55 = vmul.f32 %v3595_v34, %v3583_v11 }
 0xd48   : > { %v2640_v49 = vmul.f32 %v3597_v50, %v3579_v44  ;;  %v3599_v38 = vpop.eup %3598 }
 0xd49   : > { %v2636_v21 = vmul.f32 %v3599_v38, %v4287_v54  ;;  %v3607_v38 = vld [vmem:[%s3692_s11 + $0x30] sm:$0xff] }
 0xd4a   : > { %v2646_v57 = vpack.c.bf16 %v2642_v55, %v2640_v49 }
 0xd71   : > { %v2620_v45 = vpop.xlane.xlu1 %2619 }
 0xd72   : > { %3600 = vrcp.f32 %v2620_v45 }
 0xd75   : > { %v2789_v60 = vpop.permute.xlu1 %2788 }
 0xd76   : > { %3414 = vmatpush3.bf16.msra.mxu1 %v2789_v60  ;;  %v3606_v60 = vld [vmem:[%s3692_s11 + $0x20] sm:$0xff] }
 0xd79   : > { %3416 = vmatmul.mubr.msk.bf16.vlgmr.msra.gmra.mxu1 %vm782_vm3, %v2646_v57 }
 0xd7f   : > { %v3601_v58 = vpop.eup %3600 }
 0xd80   : > { %v2638_v63 = vmul.f32 %v3601_v58, %v3585_v27 }
 0xd82   : > { %v2645_v48 = vpack.c.bf16 %v2638_v63, %v2636_v21 }
 0xd84   : > { %3410 = vmatmul.mubr.msk.bf16.vlgmr.msra.gmra.mxu0 %vm782_vm3, %v2645_v48  ;;  %v3609_v48 = vld [vmem:[%s3692_s11 + $0x38] sm:$0xff] }
 0xd85   : > { %3420 = vmatpush3.bf16.msra.mxu0 %v2854_v0 }
 0xe00   : > { %v2734_v1 = vpop.f32.mrf.mxu1  ;;  %v2687_v3 = vpop.f32.mrf.mxu0 }
 0xe02   : > { %v3405_v19 = vpop.f32.mrf.mxu1  ;;  %v3399_v22 = vpop.f32.mrf.mxu0 }
 0xe04   : > { %v2737_v24 = vpop.f32.mrf.mxu1  ;;  %v2690_v41 = vpop.f32.mrf.mxu0 }
 0xe05   : > { %v2836_v61 = vpack.c.bf16 %v2737_v24, %v2734_v1  ;;  %v2835_v6 = vpack.c.bf16 %v2690_v41, %v2687_v3 }
 0xe06   : > { %v3406_v28 = vpop.f32.mrf.mxu1  ;;  %v3400_v52 = vpop.f32.mrf.mxu0 }
 0xe07   : > { %3421 = vmatprep.mubr.msk.bf16.mxu0 %vm566_vm2, %v2835_v6 }
 0xe08   : > { %3422 = vmatmul.mubr.msk.bf16.vlgmr.msra.gmra.mxu0 %vm566_vm2, %v2836_v61 }
 0xe39   : > { %v2828_v37 = vpop.f32.mrf.mxu1 }
 0xe3b   : > { %v3417_v7 = vpop.f32.mrf.mxu1 }
 0xe3d   : > { %v2831_v44 = vpop.f32.mrf.mxu1 }
 0xe3e   : > { %v2838_v12 = vpack.c.bf16 %v2831_v44, %v2828_v37 }
 0xe3f   : > { %v3418_v2 = vpop.f32.mrf.mxu1 }
 0xe44   : > { %v2781_v54 = vpop.f32.mrf.mxu0 }
 0xe46   : > { %v3411_v11 = vpop.f32.mrf.mxu0 }
 0xe48   : > { %v2784_v10 = vpop.f32.mrf.mxu0 }
 0xe49   : > { %v2837_v20 = vpack.c.bf16 %v2784_v10, %v2781_v54 }
 0xe4a   : > { %v3412_v39 = vpop.f32.mrf.mxu0 }
 0xe4b   : > { %3425 = vmatprep.mubr.msk.bf16.mxu0 %vm566_vm2, %v2837_v20 }
 0xe4c   : > { %3426 = vmatmul.mubr.msk.bf16.gmra.mxu0 %vm566_vm2, %v2838_v12 }
 0xec8   : > { %v3423_v27 = vpop.f32.mrf.mxu0 }
 0xec9   : > { %v2923_v46 = vadd.f32 %v3423_v27, %v4243_v18 }
 0xeca   : > { %v2890_v13 = vpop.f32.mrf.mxu0 }
 0xecb   : > { %v2921_v25 = vadd.f32 %v2890_v13, %v4247_v23  ;;  %v2938_v26 = vadd.f32 %v3090_v56, %v2923_v46 }
 0xecc   : > { %v3424_v5 = vpop.f32.mrf.mxu0 }
 0xecd   : > { %v2936_v15 = vadd.f32 %v3090_v56, %v2921_v25  ;;  %v2924_v8 = vadd.f32 %v3424_v5, %v4251_v42  ;;  %v2946_v53 = vadd.f32 %v3603_v33, %v2938_v26 }
 0xece   : > { %v2893_v18 = vpop.f32.mrf.mxu0 }
 0xecf   : > { %v2944_v23 = vadd.f32 %v3602_v14, %v2936_v15  ;;  %v2922_v32 = vadd.f32 %v2893_v18, %v4253_v51  ;;  %v2939_v4 = vadd.f32 %v3090_v56, %v2924_v8  ;;  %2954 = vst.msk [vmem:[%s4327_s10 + $0x10] sm:$0xff] %vm323_vm0, %v2946_v53 }
 0xed1   : > { %2952 = vst.msk [vmem:[%s4327_s10] sm:$0xff] %vm323_vm0, %v2944_v23  ;;  %v2937_v42 = vadd.f32 %v3090_v56, %v2922_v32  ;;  %v2947_v17 = vadd.f32 %v3605_v62, %v2939_v4 }
 0xed3   : > { %v2945_v36 = vadd.f32 %v3604_v35, %v2937_v42  ;;  %2955 = vst.msk [vmem:[%s4327_s10 + $0x18] sm:$0xff] %vm323_vm0, %v2947_v17 }
 0xed5   : > { %2953 = vst.msk [vmem:[%s4327_s10 + $0x8] sm:$0xff] %vm323_vm0, %v2945_v36 }
 0xf0c   : > { %v3427_v51 = vpop.f32.mrf.mxu0 }
 0xf0d   : > { %v2927_v16 = vadd.f32 %v3427_v51, %v4259_v29 }
 0xf0e   : > { %v2906_v40 = vpop.f32.mrf.mxu0 }
 0xf0f   : > { %v2925_v43 = vadd.f32 %v2906_v40, %v4263_v30  ;;  %v2942_v47 = vadd.f32 %v3090_v56, %v2927_v16  ;;  %v3608_v30 = vld [vmem:[%s3692_s11 + $0x28] sm:$0xff] }
 0xf10   : > { %v3428_v34 = vpop.f32.mrf.mxu0 }
 0xf11   : > { %v2940_v45 = vadd.f32 %v3090_v56, %v2925_v43  ;;  %v2928_v50 = vadd.f32 %v3428_v34, %v4267_v59  ;;  %v2950_v29 = vadd.f32 %v3607_v38, %v2942_v47 }
 0xf12   : > { %v2909_v55 = vpop.f32.mrf.mxu0 }
 0xf13   : > { %v2948_v49 = vadd.f32 %v3606_v60, %v2940_v45  ;;  %v2926_v57 = vadd.f32 %v2909_v55, %v4269_v31  ;;  %v2943_v58 = vadd.f32 %v3090_v56, %v2928_v50  ;;  %2958 = vst.msk [vmem:[%s4327_s10 + $0x30] sm:$0xff] %vm323_vm0, %v2950_v29 }
 0xf15   : > { %2956 = vst.msk [vmem:[%s4327_s10 + $0x20] sm:$0xff] %vm323_vm0, %v2948_v49  ;;  %v2941_v21 = vadd.f32 %v3090_v56, %v2926_v57  ;;  %v2951_v9 = vadd.f32 %v3609_v48, %v2943_v58 }
 0xf17   : > { %v2949_v63 = vadd.f32 %v3608_v30, %v2941_v21  ;;  %2959 = vst.msk [vmem:[%s4327_s10 + $0x38] sm:$0xff] %vm323_vm0, %v2951_v9 }
 0xf19   : > { %2957 = vst.msk [vmem:[%s4327_s10 + $0x28] sm:$0xff] %vm323_vm0, %v2949_v63 }
 0xf1a PF: > { %s18_s27 = sadd.s32 1, %s3616_s27  }
 0xf1b   : > { %p15_p4 = scmp.ge.s32.totalorder %s18_s27, 4  }
 0xf1d   :  { %17 = sbr.rel (!%p15_p4) target bundleno = 1 (0x1), region = 85 }

// kernel: _basic_layer_up.9
= control target key start
LH: loop header
LB: loop body
LE: loop exit
PB: predicated region body
PF: predicated region fallthrough
CT: control target
= control target key end

     0   :  { %s1280_s15 = smov 0   ;;  %s1878_s0 = inlined_call_operand.vmem [shape: f32[2,64,32], index: 0, kind: input, shape index: {}]   ;;  %s1879_s1 = inlined_call_operand.vmem [shape: f32[32,64], index: 1, kind: input, shape index: {}]   ;;  %s1880_s2 = inlined_call_operand.vmem [shape: f32[1,16], index: 2, kind: input, shape index: {}]   ;;  %s1881_s3 = inlined_call_operand.vmem [shape: f32[1,16], index: 3, kind: input, shape index: {}]   ;;  %s1882_s4 = inlined_call_operand.vmem [shape: f32[2,8,2,8,32], index: 4, kind: output, shape index: {}]  }
   0x1 LB: > { %s1114_s16 = sadd.s32 4294967295, %s1247_s15   ;;  %p1118_p0 = scmp.ge.s32.totalorder %s1247_s15, 1  ;;  %s1247_s15 = sphi %s1280_s15, %s14_s15  }
   0x2   : > { %p162_p1 = scmp.lt.s32.totalorder %s1247_s15, 3 }
   0x4   : > { %p163_p2 = pnand %p1118_p0, %p162_p1 }
   0x6   : > { %166 = sbr.rel (%p163_p2) target bundleno = 1097 (0x449), region = 36 }
   0xb   : > { %v213_v0 = vld [vmem:[%s1879_s1 + $0x10] sm:$0xff]  ;;  %v214_v1 = vld [vmem:[%s1879_s1 + $0x18] sm:$0xff]  ;;  %v211_v2 = vld [vmem:[%s1879_s1] sm:$0xff]  ;;  %p188_p3 = scmp.lt.s32.totalorder %s1114_s16, 1  ;;  %vm217_vm0 = vcmask 261120   ;;  %s1249_s29 = smov 112  }
   0xc   : > { %v216_v3 = vpack.c.bf16 %v214_v1, %v213_v0  ;;  %v212_v4 = vld [vmem:[%s1879_s1 + $0x8] sm:$0xff]  ;;  %s1250_s30 = smov 96   ;;  %s1251_s5 = smov 80   ;;  %vm295_vm1 = vcmask 130048   ;;  %vm1001_vm2 = vcmask 392192  }
   0xd   : > { %v215_v5 = vpack.c.bf16 %v212_v4, %v211_v2  ;;  %s1902_s16 = smov (!%p188_p3, %s1114_s16), 1  ;;  %s1252_s8 = smov 32  }
   0xe   : > { %1147 = vmatprep.subr.bf16.mxu0 %v216_v3  ;;  %1159 = vmatprep.subr.bf16.mxu1 %v216_v3  ;;  %s1139_s25 = sshll.u32 %s1902_s16, 6  ;;  %s1253_s11 = smov 16  }
   0xf   : > { %1148 = vmatpush3.bf16.msra.mxu0 %v216_v3  ;;  %1161 = vmatpush3.bf16.msra.mxu1 %v216_v3  ;;  %s192_s28 = scalar_lea.vmem %s1878_s0, %s1139_s25  ;;  %s1254_s12 = smov 48  }
  0x10   : > { %1149 = vmatprep.subr.bf16.mxu0 %v215_v5  ;;  %1160 = vmatprep.subr.bf16.mxu1 %v215_v5  ;;  %v199_v6 = vld [vmem:[%s192_s28] sm:$0xff]  ;;  %v200_v7 = vld [vmem:[%s192_s28 + $0x8] sm:$0xff]  ;;  %v201_v11 = vld [vmem:[%s192_s28 + $0x10] sm:$0xff]  ;;  %s1140_s13 = sshll.u32 %s1902_s16, 7 }
  0x11   : > { %v203_v8 = vld [vmem:[%s192_s28 + $0x20] sm:$0xff]  ;;  %v207_v9 = vpack.c.bf16 %v200_v7, %v199_v6  ;;  %v204_v10 = vld [vmem:[%s192_s28 + $0x28] sm:$0xff]  ;;  %v202_v12 = vld [vmem:[%s192_s28 + $0x18] sm:$0xff]  ;;  %s1787_s17 = scalar_lea.vmem %s1882_s4, %s1140_s13 }
  0x12   : > { %v209_v13 = vpack.c.bf16 %v204_v10, %v203_v8  ;;  %v208_v14 = vpack.c.bf16 %v202_v12, %v201_v11  ;;  %v205_v15 = vld [vmem:[%s192_s28 + $0x30] sm:$0xff]  ;;  %v206_v16 = vld [vmem:[%s192_s28 + $0x38] sm:$0xff] }
  0x13   : > { %1150 = vmatpush3.bf16.msra.mxu0 %v215_v5  ;;  %1162 = vmatpush3.bf16.msra.mxu1 %v215_v5  ;;  %v210_v17 = vpack.c.bf16 %v206_v16, %v205_v15 }
  0x14   : > { %1151 = vmatprep.mubr.msk.bf16.mxu0 %vm217_vm0, %v207_v9  ;;  %1155 = vmatprep.mubr.msk.bf16.mxu1 %vm217_vm0, %v209_v13 }
  0x16   : > { %1152 = vmatmul.mubr.msk.bf16.vlgmr.msra.gmra.mxu0 %vm217_vm0, %v208_v14  ;;  %1156 = vmatmul.mubr.msk.bf16.vlgmr.msra.gmra.mxu1 %vm217_vm0, %v210_v17 }
  0xd6   : > { %v1310_v18 = vpop.f32.mrf.mxu0  ;;  %v1312_v19 = vpop.f32.mrf.mxu1 }
  0xd7   : > { %451 = vrot.lane.b32.xlu0 %v1312_v19, %s1249_s29  ;;  %443 = vrot.lane.b32.xlu1 %v1310_v18, %s1249_s29  ;;  %v302_v20 = vsel %vm295_vm1, %v1310_v18, 0.0  ;;  %v314_v21 = vsel %vm295_vm1, %v1312_v19, 0.0 }
  0xd8   : > { %v1330_v22 = vpop.f32.mrf.mxu0  ;;  %v1334_v24 = vpop.f32.mrf.mxu1 }
  0xd9   : > { %v296_v28 = vsel %vm295_vm1, %v1330_v22, 0.0  ;;  %v308_v29 = vsel %vm295_vm1, %v1334_v24, 0.0 }
  0xda   : > { %v1332_v23 = vpop.f32.mrf.mxu0  ;;  %v1338_v25 = vpop.f32.mrf.mxu1 }
  0xdb   : > { %625 = vrot.lane.b32.xlu0 %v1310_v18, %s1250_s30  ;;  %v305_v26 = vsel %vm295_vm1, %v1332_v23, 0.0  ;;  %v317_v27 = vsel %vm295_vm1, %v1338_v25, 0.0 }
  0xdc   : > { %v1370_v30 = vpop.f32.mrf.mxu0  ;;  %v1377_v36 = vpop.f32.mrf.mxu1 }
  0xdd   : > { %v299_v32 = vsel %vm295_vm1, %v1370_v30, 0.0  ;;  %v311_v50 = vsel %vm295_vm1, %v1377_v36, 0.0 }
  0xdf   : > { %633 = vrot.lane.b32.xlu0 %v1312_v19, %s1250_s30 }
  0xe3   : > { %807 = vrot.lane.b32.xlu0 %v1310_v18, %s1251_s5 }
  0xe7   : > { %815 = vrot.lane.b32.xlu0 %v1312_v19, %s1251_s5 }
  0xfb   : > { %303 = vadd.xlane.f32.xlu1 %v302_v20 }
 0x106   : > { %315 = vadd.xlane.f32.xlu0 %v314_v21 }
 0x10c   : > { %445 = vrot.lane.b32.xlu1 %v1332_v23, %s1249_s29 }
 0x110   : > { %453 = vrot.lane.b32.xlu1 %v1338_v25, %s1249_s29 }
 0x114   : > { %627 = vrot.lane.b32.xlu1 %v1332_v23, %s1250_s30 }
 0x118   : > { %635 = vrot.lane.b32.xlu1 %v1338_v25, %s1250_s30 }
 0x11c   : > { %439 = vrot.lane.b32.xlu0 %v1330_v22, %s1249_s29  ;;  %809 = vrot.lane.b32.xlu1 %v1332_v23, %s1251_s5 }
 0x120   : > { %447 = vrot.lane.b32.xlu0 %v1334_v24, %s1249_s29  ;;  %817 = vrot.lane.b32.xlu1 %v1338_v25, %s1251_s5 }
 0x124   : > { %621 = vrot.lane.b32.xlu0 %v1330_v22, %s1250_s30 }
 0x128   : > { %629 = vrot.lane.b32.xlu0 %v1334_v24, %s1250_s30 }
 0x12c   : > { %803 = vrot.lane.b32.xlu0 %v1330_v22, %s1251_s5 }
 0x130   : > { %811 = vrot.lane.b32.xlu0 %v1334_v24, %s1251_s5 }
 0x144   : > { %306 = vadd.xlane.f32.xlu1 %v305_v26 }
 0x148   : > { %318 = vadd.xlane.f32.xlu1 %v317_v27 }
 0x149   : > { %v452_v31 = vpop.permute.xlu0 %451  ;;  %v444_v33 = vpop.permute.xlu1 %443 }
 0x14a   : > { %v469_v34 = vsel %vm295_vm1, %v444_v33, 0.0  ;;  %v481_v37 = vsel %vm295_vm1, %v452_v31, 0.0 }
 0x14d   : > { %v626_v35 = vpop.permute.xlu0 %625 }
 0x14e   : > { %v651_v39 = vsel %vm295_vm1, %v626_v35, 0.0 }
 0x14f   : > { %297 = vadd.xlane.f32.xlu0 %v296_v28 }
 0x151   : > { %v634_v38 = vpop.permute.xlu0 %633 }
 0x152   : > { %v663_v40 = vsel %vm295_vm1, %v634_v38, 0.0 }
 0x153   : > { %309 = vadd.xlane.f32.xlu0 %v308_v29 }
 0x155   : > { %v808_v41 = vpop.permute.xlu0 %807 }
 0x156   : > { %v833_v42 = vsel %vm295_vm1, %v808_v41, 0.0 }
 0x157   : > { %300 = vadd.xlane.f32.xlu0 %v299_v32 }
 0x159   : > { %441 = vrot.lane.b32.xlu1 %v1370_v30, %s1249_s29  ;;  %v816_v43 = vpop.permute.xlu0 %815 }
 0x15a   : > { %v845_v44 = vsel %vm295_vm1, %v816_v43, 0.0 }
 0x15b   : > { %470 = vadd.xlane.f32.xlu0 %v469_v34 }
 0x15d   : > { %449 = vrot.lane.b32.xlu1 %v1377_v36, %s1249_s29 }
 0x15f   : > { %482 = vadd.xlane.f32.xlu0 %v481_v37 }
 0x161   : > { %623 = vrot.lane.b32.xlu1 %v1370_v30, %s1250_s30 }
 0x163   : > { %652 = vadd.xlane.f32.xlu0 %v651_v39 }
 0x165   : > { %631 = vrot.lane.b32.xlu1 %v1377_v36, %s1250_s30 }
 0x167   : > { %664 = vadd.xlane.f32.xlu0 %v663_v40 }
 0x169   : > { %805 = vrot.lane.b32.xlu1 %v1370_v30, %s1251_s5 }
 0x16b   : > { %834 = vadd.xlane.f32.xlu0 %v833_v42 }
 0x16d   : > { %813 = vrot.lane.b32.xlu1 %v1377_v36, %s1251_s5 }
 0x16f   : > { %846 = vadd.xlane.f32.xlu0 %v845_v44 }
 0x184   : > { %v304_v45 = vpop.xlane.xlu1 %303 }
 0x185   : > { %v323_v3 = vmul.f32 0.0625, %v304_v45 }
 0x187   : > { %v1407_v7 = vsub.f32 %v1310_v18, %v323_v3 }
 0x188   : > { %v446_v46 = vpop.permute.xlu1 %445 }
 0x189   : > { %v472_v11 = vsel %vm295_vm1, %v446_v46, 0.0  ;;  %v339_v12 = vmul.f32 %v1407_v7, %v1407_v7 }
 0x18b   : > { %v351_v13 = vsel %vm295_vm1, %v339_v12, 0.0 }
 0x18c   : > { %v454_v47 = vpop.permute.xlu1 %453 }
 0x18d   : > { %v484_v52 = vsel %vm295_vm1, %v454_v47, 0.0 }
 0x18f   : > { %v316_v48 = vpop.xlane.xlu0 %315 }
 0x190   : > { %v628_v49 = vpop.permute.xlu1 %627  ;;  %v327_v8 = vmul.f32 0.0625, %v316_v48 }
 0x191   : > { %312 = vadd.xlane.f32.xlu1 %v311_v50  ;;  %v654_v56 = vsel %vm295_vm1, %v628_v49, 0.0 }
 0x192   : > { %v1411_v10 = vsub.f32 %v1312_v19, %v327_v8 }
 0x193   : > { %v440_v51 = vpop.permute.xlu0 %439 }
 0x194   : > { %v463_v53 = vsel %vm295_vm1, %v440_v51, 0.0  ;;  %v636_v54 = vpop.permute.xlu1 %635  ;;  %v343_v14 = vmul.f32 %v1411_v10, %v1411_v10 }
 0x195   : > { %485 = vadd.xlane.f32.xlu1 %v484_v52  ;;  %464 = vadd.xlane.f32.xlu0 %v463_v53  ;;  %v666_v60 = vsel %vm295_vm1, %v636_v54, 0.0 }
 0x196   : > { %v363_v15 = vsel %vm295_vm1, %v343_v14, 0.0 }
 0x197   : > { %v448_v55 = vpop.permute.xlu0 %447 }
 0x198   : > { %v475_v57 = vsel %vm295_vm1, %v448_v55, 0.0  ;;  %v810_v58 = vpop.permute.xlu1 %809 }
 0x199   : > { %655 = vadd.xlane.f32.xlu1 %v654_v56  ;;  %476 = vadd.xlane.f32.xlu0 %v475_v57  ;;  %v836_v63 = vsel %vm295_vm1, %v810_v58, 0.0 }
 0x19b   : > { %v622_v59 = vpop.permute.xlu0 %621 }
 0x19c   : > { %v645_v61 = vsel %vm295_vm1, %v622_v59, 0.0  ;;  %v818_v1 = vpop.permute.xlu1 %817 }
 0x19d   : > { %667 = vadd.xlane.f32.xlu1 %v666_v60  ;;  %646 = vadd.xlane.f32.xlu0 %v645_v61  ;;  %v848_v4 = vsel %vm295_vm1, %v818_v1, 0.0 }
 0x19f   : > { %v630_v62 = vpop.permute.xlu0 %629 }
 0x1a0   : > { %v657_v0 = vsel %vm295_vm1, %v630_v62, 0.0 }
 0x1a1   : > { %837 = vadd.xlane.f32.xlu1 %v836_v63  ;;  %658 = vadd.xlane.f32.xlu0 %v657_v0 }
 0x1a3   : > { %v804_v2 = vpop.permute.xlu0 %803 }
 0x1a4   : > { %v827_v5 = vsel %vm295_vm1, %v804_v2, 0.0 }
 0x1a5   : > { %849 = vadd.xlane.f32.xlu1 %v848_v4  ;;  %828 = vadd.xlane.f32.xlu0 %v827_v5 }
 0x1a7   : > { %v812_v6 = vpop.permute.xlu0 %811 }
 0x1a8   : > { %v839_v9 = vsel %vm295_vm1, %v812_v6, 0.0 }
 0x1a9   : > { %840 = vadd.xlane.f32.xlu0 %v839_v9 }
 0x1ad   : > { %473 = vadd.xlane.f32.xlu0 %v472_v11 }
 0x1b1   : > { %352 = vadd.xlane.f32.xlu0 %v351_v13 }
 0x1b5   : > { %364 = vadd.xlane.f32.xlu0 %v363_v15 }
 0x1cd   : > { %v307_v16 = vpop.xlane.xlu1 %306 }
 0x1ce   : > { %v324_v43 = vmul.f32 0.0625, %v307_v16 }
 0x1d0   : > { %v1437_v48 = vsub.f32 %v1332_v23, %v324_v43 }
 0x1d1   : > { %v319_v17 = vpop.xlane.xlu1 %318 }
 0x1d2   : > { %v328_v49 = vmul.f32 0.0625, %v319_v17  ;;  %v340_v56 = vmul.f32 %v1437_v48, %v1437_v48 }
 0x1d4   : > { %v1441_v53 = vsub.f32 %v1338_v25, %v328_v49  ;;  %v354_v59 = vsel %vm295_vm1, %v340_v56, 0.0 }
 0x1d5   : > { %v442_v20 = vpop.permute.xlu1 %441 }
 0x1d6   : > { %v466_v21 = vsel %vm295_vm1, %v442_v20, 0.0  ;;  %v344_v60 = vmul.f32 %v1441_v53, %v1441_v53 }
 0x1d7   : > { %467 = vadd.xlane.f32.xlu1 %v466_v21 }
 0x1d8   : > { %v298_v26 = vpop.xlane.xlu0 %297  ;;  %v366_v63 = vsel %vm295_vm1, %v344_v60, 0.0 }
 0x1d9   : > { %v321_v27 = vmul.f32 0.0625, %v298_v26  ;;  %v450_v28 = vpop.permute.xlu1 %449 }
 0x1da   : > { %v478_v29 = vsel %vm295_vm1, %v450_v28, 0.0 }
 0x1db   : > { %v1423_v31 = vsub.f32 %v1330_v22, %v321_v27  ;;  %479 = vadd.xlane.f32.xlu1 %v478_v29 }
 0x1dc   : > { %v310_v32 = vpop.xlane.xlu0 %309 }
 0x1dd   : > { %v325_v33 = vmul.f32 0.0625, %v310_v32  ;;  %v624_v34 = vpop.permute.xlu1 %623  ;;  %v337_v35 = vmul.f32 %v1423_v31, %v1423_v31 }
 0x1de   : > { %v648_v37 = vsel %vm295_vm1, %v624_v34, 0.0 }
 0x1df   : > { %v1429_v38 = vsub.f32 %v1334_v24, %v325_v33  ;;  %649 = vadd.xlane.f32.xlu1 %v648_v37  ;;  %v345_v39 = vsel %vm295_vm1, %v337_v35, 0.0 }
 0x1e0   : > { %346 = vadd.xlane.f32.xlu0 %v345_v39  ;;  %v301_v40 = vpop.xlane.xlu0 %300 }
 0x1e1   : > { %v632_v41 = vpop.permute.xlu1 %631  ;;  %v341_v42 = vmul.f32 %v1429_v38, %v1429_v38  ;;  %v322_v54 = vmul.f32 0.0625, %v301_v40 }
 0x1e2   : > { %v660_v44 = vsel %vm295_vm1, %v632_v41, 0.0 }
 0x1e3   : > { %661 = vadd.xlane.f32.xlu1 %v660_v44  ;;  %v357_v45 = vsel %vm295_vm1, %v341_v42, 0.0  ;;  %v1447_v58 = vsub.f32 %v1370_v30, %v322_v54 }
 0x1e4   : > { %358 = vadd.xlane.f32.xlu0 %v357_v45  ;;  %v471_v46 = vpop.xlane.xlu0 %470 }
 0x1e5   : > { %v806_v47 = vpop.permute.xlu1 %805  ;;  %v338_v0 = vmul.f32 %v1447_v58, %v1447_v58  ;;  %v489_v37 = vmul.f32 0.0625, %v471_v46 }
 0x1e6   : > { %v830_v50 = vsel %vm295_vm1, %v806_v47, 0.0 }
 0x1e7   : > { %831 = vadd.xlane.f32.xlu1 %v830_v50  ;;  %v348_v3 = vsel %vm295_vm1, %v338_v0, 0.0  ;;  %v1492_v41 = vsub.f32 %v1310_v18, %v489_v37 }
 0x1e8   : > { %v483_v51 = vpop.xlane.xlu0 %482 }
 0x1e9   : > { %v814_v52 = vpop.permute.xlu1 %813  ;;  %v493_v61 = vmul.f32 0.0625, %v483_v51  ;;  %v505_v46 = vmul.f32 %v1492_v41, %v1492_v41 }
 0x1ea   : > { %v842_v55 = vsel %vm295_vm1, %v814_v52, 0.0 }
 0x1eb   : > { %843 = vadd.xlane.f32.xlu1 %v842_v55  ;;  %v1456_v1 = vsub.f32 %v1312_v19, %v493_v61 }
 0x1ec   : > { %v653_v57 = vpop.xlane.xlu0 %652 }
 0x1ed   : > { %v509_v5 = vmul.f32 %v1456_v1, %v1456_v1  ;;  %v671_v42 = vmul.f32 0.0625, %v653_v57 }
 0x1ef   : > { %355 = vadd.xlane.f32.xlu1 %v354_v59  ;;  %v1496_v44 = vsub.f32 %v1310_v18, %v671_v42 }
 0x1f0   : > { %v665_v62 = vpop.xlane.xlu0 %664 }
 0x1f1   : > { %v675_v45 = vmul.f32 0.0625, %v665_v62  ;;  %v687_v51 = vmul.f32 %v1496_v44, %v1496_v44 }
 0x1f3   : > { %367 = vadd.xlane.f32.xlu1 %v366_v63  ;;  %v1502_v49 = vsub.f32 %v1312_v19, %v675_v45 }
 0x1f4   : > { %v835_v2 = vpop.xlane.xlu0 %834 }
 0x1f5   : > { %v853_v50 = vmul.f32 0.0625, %v835_v2  ;;  %v691_v55 = vmul.f32 %v1502_v49, %v1502_v49 }
 0x1f7   : > { %349 = vadd.xlane.f32.xlu1 %v348_v3  ;;  %v1508_v52 = vsub.f32 %v1310_v18, %v853_v50 }
 0x1f8   : > { %v847_v4 = vpop.xlane.xlu0 %846 }
 0x1f9   : > { %v857_v6 = vmul.f32 0.0625, %v847_v4  ;;  %v869_v59 = vmul.f32 %v1508_v52, %v1508_v52 }
 0x1fa   : > { %531 = vrot.lane.b32.xlu0 %v509_v5, %s1249_s29 }
 0x1fb   : > { %v1463_v8 = vsub.f32 %v1312_v19, %v857_v6 }
 0x1fd   : > { %v873_v9 = vmul.f32 %v1463_v8, %v1463_v8 }
 0x1ff   : > { %895 = vrot.lane.b32.xlu0 %v873_v9, %s1251_s5 }
 0x21a   : > { %v313_v11 = vpop.xlane.xlu1 %312 }
 0x21b   : > { %v326_v12 = vmul.f32 0.0625, %v313_v11 }
 0x21d   : > { %v1469_v13 = vsub.f32 %v1377_v36, %v326_v12 }
 0x21e   : > { %v486_v14 = vpop.xlane.xlu1 %485  ;;  %v465_v15 = vpop.xlane.xlu0 %464 }
 0x21f   : > { %1889 = vst [vmem:[#allocation2_spill] sm:$0xff] %v1469_v13  ;;  %v487_v16 = vmul.f32 0.0625, %v465_v15  ;;  %v342_v17 = vmul.f32 %v1469_v13, %v1469_v13  ;;  %v494_v9 = vmul.f32 0.0625, %v486_v14 }
 0x221   : > { %v1474_v20 = vsub.f32 %v1330_v22, %v487_v16  ;;  %v360_v21 = vsel %vm295_vm1, %v342_v17, 0.0  ;;  %v1544_v15 = vsub.f32 %v1338_v25, %v494_v9 }
 0x222   : > { %v656_v26 = vpop.xlane.xlu1 %655  ;;  %361 = vadd.xlane.f32.xlu1 %v360_v21  ;;  %v477_v27 = vpop.xlane.xlu0 %476 }
 0x223   : > { %v491_v28 = vmul.f32 0.0625, %v477_v27  ;;  %v503_v29 = vmul.f32 %v1474_v20, %v1474_v20  ;;  %v510_v21 = vmul.f32 %v1544_v15, %v1544_v15 }
 0x225   : > { %v1480_v32 = vsub.f32 %v1334_v24, %v491_v28  ;;  %519 = vrot.lane.b32.xlu0 %v503_v29, %s1249_s29 }
 0x226   : > { %v668_v33 = vpop.xlane.xlu1 %667  ;;  %v647_v43 = vpop.xlane.xlu0 %646 }
 0x227   : > { %v676_v34 = vmul.f32 0.0625, %v668_v33  ;;  %v507_v35 = vmul.f32 %v1480_v32, %v1480_v32  ;;  %v669_v54 = vmul.f32 0.0625, %v647_v43 }
 0x229   : > { %v1486_v39 = vsub.f32 %v1338_v25, %v676_v34  ;;  %527 = vrot.lane.b32.xlu0 %v507_v35, %s1249_s29  ;;  %v1514_v57 = vsub.f32 %v1330_v22, %v669_v54 }
 0x22a   : > { %v659_v47 = vpop.xlane.xlu0 %658  ;;  %v838_v12 = vpop.xlane.xlu1 %837 }
 0x22b   : > { %v692_v40 = vmul.f32 %v1486_v39, %v1486_v39  ;;  %v673_v19 = vmul.f32 0.0625, %v659_v47  ;;  %v685_v62 = vmul.f32 %v1514_v57, %v1514_v57  ;;  %v854_v17 = vmul.f32 0.0625, %v838_v12 }
 0x22d   : > { %715 = vrot.lane.b32.xlu0 %v692_v40, %s1250_s30  ;;  %v1520_v18 = vsub.f32 %v1334_v24, %v673_v19  ;;  %v1556_v28 = vsub.f32 %v1332_v23, %v854_v17 }
 0x22e   : > { %v829_v56 = vpop.xlane.xlu0 %828  ;;  %v850_v27 = vpop.xlane.xlu1 %849 }
 0x22f   : > { %v851_v61 = vmul.f32 0.0625, %v829_v56  ;;  %v689_v2 = vmul.f32 %v1520_v18, %v1520_v18  ;;  %v858_v29 = vmul.f32 0.0625, %v850_v27  ;;  %v870_v34 = vmul.f32 %v1556_v28, %v1556_v28 }
 0x231   : > { %v1526_v63 = vsub.f32 %v1330_v22, %v851_v61  ;;  %v1562_v33 = vsub.f32 %v1338_v25, %v858_v29 }
 0x232   : > { %v841_v60 = vpop.xlane.xlu0 %840 }
 0x233   : > { %523 = vrot.lane.b32.xlu1 %v505_v46, %s1249_s29  ;;  %v855_v0 = vmul.f32 0.0625, %v841_v60  ;;  %v867_v6 = vmul.f32 %v1526_v63, %v1526_v63 }
 0x235   : > { %v1532_v4 = vsub.f32 %v1334_v24, %v855_v0  ;;  %v672_v24 = vmul.f32 0.0625, %v656_v26 }
 0x236   : > { %v474_v3 = vpop.xlane.xlu0 %473 }
 0x237   : > { %705 = vrot.lane.b32.xlu1 %v687_v51, %s1250_s30  ;;  %v490_v5 = vmul.f32 0.0625, %v474_v3  ;;  %v871_v11 = vmul.f32 %v1532_v4, %v1532_v4  ;;  %v1550_v14 = vsub.f32 %v1332_v23, %v672_v24 }
 0x239   : > { %v1538_v22 = vsub.f32 %v1332_v23, %v490_v5  ;;  %v688_v26 = vmul.f32 %v1550_v14, %v1550_v14  ;;  %v874_v23 = vmul.f32 %v1562_v33, %v1562_v33 }
 0x23a   : > { %v1566_v35 = vpop.xlane.xlu0 %352 }
 0x23b   : > { %713 = vrot.lane.b32.xlu1 %v691_v55, %s1250_s30  ;;  %v506_v16 = vmul.f32 %v1538_v22, %v1538_v22 }
 0x23e   : > { %v1575_v25 = vpop.xlane.xlu0 %364 }
 0x23f   : > { %887 = vrot.lane.b32.xlu1 %v869_v59, %s1251_s5 }
 0x243   : > { %701 = vrot.lane.b32.xlu1 %v685_v62, %s1250_s30 }
 0x247   : > { %709 = vrot.lane.b32.xlu1 %v689_v2, %s1250_s30 }
 0x24b   : > { %883 = vrot.lane.b32.xlu1 %v867_v6, %s1251_s5 }
 0x24f   : > { %891 = vrot.lane.b32.xlu1 %v871_v11, %s1251_s5 }
 0x253   : > { %525 = vrot.lane.b32.xlu1 %v506_v16, %s1249_s29 }
 0x257   : > { %533 = vrot.lane.b32.xlu1 %v510_v21, %s1249_s29 }
 0x25b   : > { %707 = vrot.lane.b32.xlu1 %v688_v26, %s1250_s30 }
 0x25f   : > { %889 = vrot.lane.b32.xlu1 %v870_v34, %s1251_s5 }
 0x260   : > { %v468_v37 = vpop.xlane.xlu1 %467 }
 0x261   : > { %v488_v40 = vmul.f32 0.0625, %v468_v37 }
 0x263   : > { %v1572_v42 = vsub.f32 %v1370_v30, %v488_v40  ;;  %897 = vrot.lane.b32.xlu1 %v874_v23, %s1251_s5 }
 0x264   : > { %v480_v43 = vpop.xlane.xlu1 %479 }
 0x265   : > { %v492_v45 = vmul.f32 0.0625, %v480_v43  ;;  %v504_v46 = vmul.f32 %v1572_v42, %v1572_v42 }
 0x267   : > { %v1580_v47 = vsub.f32 %v1377_v36, %v492_v45  ;;  %521 = vrot.lane.b32.xlu1 %v504_v46, %s1249_s29 }
 0x268   : > { %v650_v50 = vpop.xlane.xlu1 %649 }
 0x269   : > { %1890 = vst [vmem:[#allocation3_spill] sm:$0xff] %v1580_v47  ;;  %v670_v51 = vmul.f32 0.0625, %v650_v50  ;;  %v1583_v54 = vpop.xlane.xlu0 %346  ;;  %v508_v55 = vmul.f32 %v1580_v47, %v1580_v47 }
 0x26b   : > { %v1588_v56 = vsub.f32 %v1370_v30, %v670_v51  ;;  %529 = vrot.lane.b32.xlu1 %v508_v55, %s1249_s29 }
 0x26c   : > { %v662_v19 = vpop.xlane.xlu1 %661 }
 0x26d   : > { %1891 = vst [vmem:[#allocation4_spill] sm:$0xff] %v1588_v56  ;;  %v674_v59 = vmul.f32 0.0625, %v662_v19  ;;  %v1591_v60 = vpop.xlane.xlu0 %358  ;;  %v686_v61 = vmul.f32 %v1588_v56, %v1588_v56 }
 0x26f   : > { %v1596_v62 = vsub.f32 %v1377_v36, %v674_v59  ;;  %703 = vrot.lane.b32.xlu1 %v686_v61, %s1250_s30 }
 0x270   : > { %v832_v0 = vpop.xlane.xlu1 %831 }
 0x271   : > { %1892 = vst [vmem:[#allocation5_spill] sm:$0xff] %v1596_v62  ;;  %v852_v2 = vmul.f32 0.0625, %v832_v0  ;;  %v532_v3 = vpop.permute.xlu0 %531  ;;  %v690_v5 = vmul.f32 %v1596_v62, %v1596_v62 }
 0x272   : > { %v561_v6 = vsel %vm295_vm1, %v532_v3, 0.0 }
 0x273   : > { %v1603_v9 = vsub.f32 %v1370_v30, %v852_v2  ;;  %711 = vrot.lane.b32.xlu1 %v690_v5, %s1250_s30  ;;  %562 = vadd.xlane.f32.xlu0 %v561_v6 }
 0x274   : > { %v844_v11 = vpop.xlane.xlu1 %843 }
 0x275   : > { %1893 = vst [vmem:[#allocation6_spill] sm:$0xff] %v1603_v9  ;;  %v868_v12 = vmul.f32 %v1603_v9, %v1603_v9  ;;  %v856_v24 = vmul.f32 0.0625, %v844_v11  ;;  %v896_v43 = vpop.permute.xlu0 %895 }
 0x276   : > { %v925_v55 = vsel %vm295_vm1, %v896_v43, 0.0 }
 0x277   : > { %v1609_v16 = vsub.f32 %v1377_v36, %v856_v24  ;;  %885 = vrot.lane.b32.xlu1 %v868_v12, %s1251_s5 }
 0x278   : > { %v1615_v30 = vpop.xlane.xlu1 %355 }
 0x279   : > { %1894 = vst [vmem:[#allocation7_spill] sm:$0xff] %v1609_v16  ;;  %v872_v17 = vmul.f32 %v1609_v16, %v1609_v16 }
 0x27b   : > { %893 = vrot.lane.b32.xlu1 %v872_v17, %s1251_s5 }
 0x27c   : > { %v1617_v21 = vpop.xlane.xlu1 %367 }
 0x280   : > { %v1619_v27 = vpop.xlane.xlu1 %349 }
 0x281   : > { %v370_v16 = vmul.f32 0.0625, %v1619_v27 }
 0x297   : > { %v520_v50 = vpop.permute.xlu0 %519 }
 0x298   : > { %v543_v59 = vsel %vm295_vm1, %v520_v50, 0.0 }
 0x29b   : > { %v528_v61 = vpop.permute.xlu0 %527 }
 0x29c   : > { %v555_v2 = vsel %vm295_vm1, %v528_v61, 0.0 }
 0x2ab   : > { %v1621_v29 = vpop.xlane.xlu1 %361 }
 0x2af   : > { %v524_v26 = vpop.permute.xlu1 %523 }
 0x2b0   : > { %v549_v34 = vsel %vm295_vm1, %v524_v26, 0.0 }
 0x2b1   : > { %550 = vadd.xlane.f32.xlu1 %v549_v34 }
 0x2b3   : > { %v706_v36 = vpop.permute.xlu1 %705 }
 0x2b4   : > { %v731_v37 = vsel %vm295_vm1, %v706_v36, 0.0 }
 0x2b5   : > { %732 = vadd.xlane.f32.xlu0 %v731_v37  ;;  %v716_v37 = vpop.permute.xlu0 %715 }
 0x2b7   : > { %v714_v40 = vpop.permute.xlu1 %713 }
 0x2b8   : > { %v743_v23 = vsel %vm295_vm1, %v714_v40, 0.0 }
 0x2b9   : > { %744 = vadd.xlane.f32.xlu0 %v743_v23  ;;  %v746_v23 = vsel %vm295_vm1, %v716_v37, 0.0 }
 0x2bb   : > { %v888_v45 = vpop.permute.xlu1 %887 }
 0x2bc   : > { %v913_v46 = vsel %vm295_vm1, %v888_v45, 0.0 }
 0x2bd   : > { %914 = vadd.xlane.f32.xlu0 %v913_v46 }
 0x2bf   : > { %v702_v51 = vpop.permute.xlu1 %701 }
 0x2c0   : > { %v725_v5 = vsel %vm295_vm1, %v702_v51, 0.0 }
 0x2c1   : > { %926 = vadd.xlane.f32.xlu0 %v925_v55 }
 0x2c3   : > { %v710_v19 = vpop.permute.xlu1 %709 }
 0x2c4   : > { %v737_v11 = vsel %vm295_vm1, %v710_v19, 0.0  ;;  %v1644_v19 = vld [vmem:[%s1880_s2] ss:$0 sm:$0xff] }
 0x2c5   : > { %544 = vadd.xlane.f32.xlu0 %v543_v59  ;;  %v1650_v59 = vld [vmem:[%s1881_s3] ss:$0 sm:$0xff] }
 0x2c7   : > { %v884_v0 = vpop.permute.xlu1 %883 }
 0x2c8   : > { %v907_v17 = vsel %vm295_vm1, %v884_v0, 0.0 }
 0x2c9   : > { %556 = vadd.xlane.f32.xlu0 %v555_v2 }
 0x2cb   : > { %v892_v3 = vpop.permute.xlu1 %891 }
 0x2cc   : > { %v919_v36 = vsel %vm295_vm1, %v892_v3, 0.0 }
 0x2cd   : > { %726 = vadd.xlane.f32.xlu0 %v725_v5 }
 0x2cf   : > { %v526_v6 = vpop.permute.xlu1 %525 }
 0x2d0   : > { %v552_v43 = vsel %vm295_vm1, %v526_v6, 0.0 }
 0x2d1   : > { %738 = vadd.xlane.f32.xlu0 %v737_v11 }
 0x2d3   : > { %v534_v12 = vpop.permute.xlu1 %533 }
 0x2d4   : > { %v564_v24 = vsel %vm295_vm1, %v534_v12, 0.0 }
 0x2d5   : > { %565 = vadd.xlane.f32.xlu1 %v564_v24  ;;  %908 = vadd.xlane.f32.xlu0 %v907_v17 }
 0x2d7   : > { %v708_v26 = vpop.permute.xlu1 %707 }
 0x2d8   : > { %v734_v34 = vsel %vm295_vm1, %v708_v26, 0.0 }
 0x2d9   : > { %735 = vadd.xlane.f32.xlu1 %v734_v34  ;;  %920 = vadd.xlane.f32.xlu0 %v919_v36 }
 0x2db   : > { %v890_v40 = vpop.permute.xlu1 %889 }
 0x2dc   : > { %v916_v46 = vsel %vm295_vm1, %v890_v40, 0.0 }
 0x2dd   : > { %553 = vadd.xlane.f32.xlu0 %v552_v43  ;;  %747 = vadd.xlane.f32.xlu1 %v746_v23 }
 0x2df   : > { %v898_v45 = vpop.permute.xlu1 %897 }
 0x2e0   : > { %v928_v51 = vsel %vm295_vm1, %v898_v45, 0.0 }
 0x2e1   : > { %917 = vadd.xlane.f32.xlu1 %v916_v46 }
 0x2e3   : > { %v522_v50 = vpop.permute.xlu1 %521 }
 0x2e4   : > { %v546_v55 = vsel %vm295_vm1, %v522_v50, 0.0 }
 0x2e5   : > { %547 = vadd.xlane.f32.xlu0 %v546_v55  ;;  %929 = vadd.xlane.f32.xlu1 %v928_v51  ;;  %v371_v55 = vmul.f32 0.0625, %v1566_v35 }
 0x2e7   : > { %v530_v61 = vpop.permute.xlu1 %529 }
 0x2e8   : > { %v558_v2 = vsel %vm295_vm1, %v530_v61, 0.0  ;;  %v375_v61 = vmul.f32 0.0625, %v1575_v25 }
 0x2eb   : > { %v704_v0 = vpop.permute.xlu1 %703 }
 0x2ec   : > { %v728_v5 = vsel %vm295_vm1, %v704_v0, 0.0 }
 0x2ef   : > { %v712_v3 = vpop.permute.xlu1 %711 }
 0x2f0   : > { %v740_v11 = vsel %vm295_vm1, %v712_v3, 0.0  ;;  %v373_v3 = vmul.f32 0.0625, %v1591_v60 }
 0x2f2   : > { %v381_v9 = vadd.f32 1e-05, %v373_v3 }
 0x2f3   : > { %v886_v6 = vpop.permute.xlu1 %885 }
 0x2f4   : > { %v910_v12 = vsel %vm295_vm1, %v886_v6, 0.0  ;;  %v372_v6 = vmul.f32 0.0625, %v1615_v30 }
 0x2f6   : > { %781 = vrot.lane.b32.xlu1 %v1644_v19, %s1252_s8  ;;  %v380_v25 = vadd.f32 1e-05, %v372_v6 }
 0x2f7   : > { %v894_v24 = vpop.permute.xlu1 %893 }
 0x2f8   : > { %v922_v17 = vsel %vm295_vm1, %v894_v24, 0.0  ;;  %v376_v24 = vmul.f32 0.0625, %v1617_v21 }
 0x2fa   : > { %610 = vrot.lane.b32.xlu1 %v1650_v59, %s1253_s11 }
 0x2fb   : > { %599 = vrot.lane.b32.xlu0 %v1644_v19, %s1253_s11 }
 0x2fc   : > { %v563_v26 = vpop.xlane.xlu0 %562 }
 0x2fd   : > { %v573_v13 = vmul.f32 0.0625, %v563_v26 }
 0x2ff   : > { %963 = vrot.lane.b32.xlu0 %v1644_v19, %s1254_s12 }
 0x303   : > { %974 = vrot.lane.b32.xlu0 %v1650_v59, %s1254_s12 }
 0x31e   : > { %559 = vadd.xlane.f32.xlu1 %v558_v2  ;;  %v369_v2 = vmul.f32 0.0625, %v1583_v54  ;;  %v384_v54 = vadd.f32 1e-05, %v376_v24 }
 0x322   : > { %729 = vadd.xlane.f32.xlu1 %v728_v5  ;;  %v379_v5 = vadd.f32 1e-05, %v371_v55  ;;  %v378_v55 = vadd.f32 1e-05, %v370_v16 }
 0x324   : > { %1177 = vrsqrt.f32 %v379_v5 }
 0x326   : > { %741 = vadd.xlane.f32.xlu1 %v740_v11 }
 0x32a   : > { %911 = vadd.xlane.f32.xlu1 %v910_v12  ;;  %v383_v12 = vadd.f32 1e-05, %v375_v61  ;;  %v581_v61 = vadd.f32 1e-05, %v573_v13 }
 0x32c   : > { %1179 = vrsqrt.f32 %v383_v12 }
 0x32e   : > { %923 = vadd.xlane.f32.xlu1 %v922_v17  ;;  %v377_v17 = vadd.f32 1e-05, %v369_v2 }
 0x330   : > { %1181 = vrsqrt.f32 %v377_v17 }
 0x331   : > { %1183 = vrsqrt.f32 %v381_v9 }
 0x332   : > { %1185 = vrsqrt.f32 %v380_v25  ;;  %v1178_v25 = vpop.eup %1177 }
 0x333   : > { %1187 = vrsqrt.f32 %v384_v54 }
 0x334   : > { %1189 = vrsqrt.f32 %v378_v55 }
 0x335   : > { %1191 = vrsqrt.f32 %v581_v61 }
 0x339   : > { %v1180_v54 = vpop.eup %1179 }
 0x33a   : > { %v551_v45 = vpop.xlane.xlu1 %550 }
 0x33b   : > { %v569_v62 = vmul.f32 0.0625, %v551_v45 }
 0x33d   : > { %v577_v2 = vadd.f32 1e-05, %v569_v62  ;;  %v1182_v55 = vpop.eup %1181 }
 0x33e   : > { %v733_v34 = vpop.xlane.xlu0 %732  ;;  %v1184_v61 = vpop.eup %1183 }
 0x33f   : > { %792 = vrot.lane.b32.xlu1 %v1650_v59, %s1252_s8  ;;  %v751_v60 = vmul.f32 0.0625, %v733_v34  ;;  %1193 = vrsqrt.f32 %v577_v2 }
 0x341   : > { %v759_v26 = vadd.f32 1e-05, %v751_v60 }
 0x342   : > { %v745_v36 = vpop.xlane.xlu0 %744 }
 0x343   : > { %v755_v30 = vmul.f32 0.0625, %v745_v36  ;;  %1195 = vrsqrt.f32 %v759_v26 }
 0x345   : > { %v763_v5 = vadd.f32 1e-05, %v755_v30 }
 0x346   : > { %v915_v37 = vpop.xlane.xlu0 %914 }
 0x347   : > { %v933_v21 = vmul.f32 0.0625, %v915_v37  ;;  %1197 = vrsqrt.f32 %v763_v5 }
 0x349   : > { %v941_v6 = vadd.f32 1e-05, %v933_v21  ;;  %v1186_v21 = vpop.eup %1185 }
 0x34a   : > { %v927_v40 = vpop.xlane.xlu0 %926 }
 0x34b   : > { %v937_v27 = vmul.f32 0.0625, %v927_v40  ;;  %1199 = vrsqrt.f32 %v941_v6  ;;  %v395_v6 = vmul.f32 %v1178_v25, %v1407_v7 }
 0x34d   : > { %v945_v16 = vadd.f32 1e-05, %v937_v27  ;;  %v1188_v27 = vpop.eup %1187 }
 0x34e   : > { %v545_v23 = vpop.xlane.xlu0 %544 }
 0x34f   : > { %v567_v3 = vmul.f32 0.0625, %v545_v23  ;;  %1201 = vrsqrt.f32 %v945_v16  ;;  %v393_v16 = vmul.f32 %v1182_v55, %v1423_v31  ;;  %v410_v31 = vmul.f32 %v1644_v19, %v395_v6 }
 0x351   : > { %v575_v13 = vadd.f32 1e-05, %v567_v3  ;;  %v1190_v3 = vpop.eup %1189  ;;  %v1690_v55 = vadd.f32 %v1650_v59, %v410_v31 }
 0x352   : > { %v557_v43 = vpop.xlane.xlu0 %556 }
 0x353   : > { %v571_v45 = vmul.f32 0.0625, %v557_v43  ;;  %1203 = vrsqrt.f32 %v575_v13  ;;  %v396_v13 = vmul.f32 %v1186_v21, %v1437_v48 }
 0x355   : > { %v579_v62 = vadd.f32 1e-05, %v571_v45  ;;  %v1192_v45 = vpop.eup %1191  ;;  %v411_v25 = vmul.f32 %v1644_v19, %v396_v13 }
 0x356   : > { %v727_v46 = vpop.xlane.xlu0 %726 }
 0x357   : > { %v749_v34 = vmul.f32 0.0625, %v727_v46  ;;  %1205 = vrsqrt.f32 %v579_v62 }
 0x359   : > { %v757_v40 = vadd.f32 1e-05, %v749_v34  ;;  %v399_v34 = vmul.f32 %v1180_v54, %v1411_v10 }
 0x35a   : > { %v739_v51 = vpop.xlane.xlu0 %738 }
 0x35b   : > { %v753_v36 = vmul.f32 0.0625, %v739_v51  ;;  %1207 = vrsqrt.f32 %v757_v40  ;;  %v374_v40 = vmul.f32 0.0625, %v1621_v29 }
 0x35d   : > { %v761_v17 = vadd.f32 1e-05, %v753_v36  ;;  %v397_v36 = vmul.f32 %v1184_v61, %v1429_v38  ;;  %v382_v54 = vadd.f32 1e-05, %v374_v40 }
 0x35e   : > { %v566_v50 = vpop.xlane.xlu1 %565  ;;  %v909_v11 = vpop.xlane.xlu0 %908 }
 0x35f   : > { %v574_v9 = vmul.f32 0.0625, %v566_v50  ;;  %v931_v37 = vmul.f32 0.0625, %v909_v11  ;;  %1209 = vrsqrt.f32 %v761_v17  ;;  %v408_v17 = vmul.f32 %v1644_v19, %v393_v16 }
 0x360   : > { %v412_v48 = vmul.f32 %v1644_v19, %v397_v36  ;;  %v597_v16 = vmul.f32 %v1192_v45, %v1456_v1 }
 0x361   : > { %v582_v46 = vadd.f32 1e-05, %v574_v9  ;;  %v939_v51 = vadd.f32 1e-05, %v931_v37  ;;  %v1693_v61 = vadd.f32 %v1650_v59, %v408_v17 }
 0x362   : > { %v736_v0 = vpop.xlane.xlu1 %735  ;;  %v921_v47 = vpop.xlane.xlu0 %920 }
 0x363   : > { %v752_v43 = vmul.f32 0.0625, %v736_v0  ;;  %v935_v60 = vmul.f32 0.0625, %v921_v47  ;;  %1211 = vrsqrt.f32 %v582_v46 }
 0x364   : > { %1213 = vrsqrt.f32 %v939_v51 }
 0x365   : > { %v760_v11 = vadd.f32 1e-05, %v752_v43  ;;  %v943_v0 = vadd.f32 1e-05, %v935_v60 }
 0x366   : > { %v1669_v35 = vpop.xlane.xlu1 %747  ;;  %v554_v12 = vpop.xlane.xlu0 %553 }
 0x367   : > { %v570_v23 = vmul.f32 0.0625, %v554_v12  ;;  %v756_v26 = vmul.f32 0.0625, %v1669_v35  ;;  %v400_v35 = vmul.f32 %v1188_v27, %v1441_v53  ;;  %v414_v53 = vmul.f32 %v1644_v19, %v399_v34 }
 0x369   : > { %v578_v50 = vadd.f32 1e-05, %v570_v23  ;;  %v764_v9 = vadd.f32 1e-05, %v756_v26  ;;  %v415_v29 = vmul.f32 %v1644_v19, %v400_v35  ;;  %v1699_v21 = vadd.f32 %v1650_v59, %v414_v53 }
 0x36a   : > { %v918_v56 = vpop.xlane.xlu1 %917 }
 0x36b   : > { %v934_v30 = vmul.f32 0.0625, %v918_v56  ;;  %1215 = vrsqrt.f32 %v578_v50  ;;  %v1194_v56 = vpop.eup %1193  ;;  %v1710_v6 = vadd.f32 %v1650_v59, %v415_v29 }
 0x36c   : > { %1217 = vrsqrt.f32 %v760_v11  ;;  %v1196_v12 = vpop.eup %1195  ;;  %v1696_v11 = vadd.f32 %v1650_v59, %v412_v48  ;;  %v593_v36 = vmul.f32 %v1194_v56, %v1492_v41 }
 0x36d   : > { %v942_v5 = vadd.f32 1e-05, %v934_v30  ;;  %1219 = vrsqrt.f32 %v943_v0  ;;  %v1198_v37 = vpop.eup %1197  ;;  %v1702_v0 = vmul.f32 %v1190_v3, %v1447_v58  ;;  %v775_v35 = vmul.f32 %v1196_v12, %v1496_v44 }
 0x36e   : > { %v930_v24 = vpop.xlane.xlu1 %929  ;;  %v548_v62 = vpop.xlane.xlu0 %547 }
 0x36f   : > { %v938_v47 = vmul.f32 0.0625, %v930_v24  ;;  %1221 = vrsqrt.f32 %v942_v5  ;;  %v1200_v10 = vpop.eup %1199  ;;  %v568_v38 = vmul.f32 0.0625, %v548_v62  ;;  %v779_v62 = vmul.f32 %v1198_v37, %v1502_v49 }
 0x370   : > { %v1202_v24 = vpop.eup %1201  ;;  %1223 = vrsqrt.f32 %v764_v9  ;;  %v957_v9 = vmul.f32 %v1200_v10, %v1508_v52 }
 0x371   : > { %v946_v7 = vadd.f32 1e-05, %v938_v47  ;;  %v1204_v43 = vpop.eup %1203  ;;  %v576_v30 = vadd.f32 1e-05, %v568_v38  ;;  %v1707_v47 = vadd.f32 %v1650_v59, %v411_v25  ;;  %v961_v40 = vmul.f32 %v1202_v24, %v1463_v8 }
 0x372   : > { %v1671_v2 = vpop.permute.xlu1 %781  ;;  %v1206_v46 = vpop.eup %1205  ;;  %v591_v31 = vmul.f32 %v1204_v43, %v1474_v20 }
 0x373   : > { %1225 = vrsqrt.f32 %v946_v7  ;;  %v1208_v60 = vpop.eup %1207  ;;  %v1704_v26 = vpop.permute.xlu0 %599  ;;  %v595_v38 = vmul.f32 %v1206_v46, %v1480_v32  ;;  %v1726_v37 = vmul.f32 %v1671_v2, %v775_v35 }
 0x374   : > { %v1210_v50 = vpop.eup %1209  ;;  %1227 = vrsqrt.f32 %v382_v54  ;;  %v773_v1 = vmul.f32 %v1208_v60, %v1514_v57  ;;  %v604_v8 = vmul.f32 %v1704_v26, %v593_v36  ;;  %v608_v48 = vmul.f32 %v1704_v26, %v597_v16 }
 0x375   : > { %v1212_v27 = vpop.eup %1211  ;;  %1229 = vrsqrt.f32 %v576_v30  ;;  %v777_v56 = vmul.f32 %v1210_v50, %v1520_v18  ;;  %v602_v18 = vmul.f32 %v1704_v26, %v591_v31  ;;  %v790_v54 = vmul.f32 %v1671_v2, %v779_v62 }
 0x376   : > { %v1681_v23 = vpop.permute.xlu1 %610  ;;  %v1214_v34 = vpop.eup %1213  ;;  %v598_v41 = vmul.f32 %v1212_v27, %v1544_v15  ;;  %v784_v24 = vmul.f32 %v1671_v2, %v773_v1 }
 0x377   : > { %v955_v20 = vmul.f32 %v1214_v34, %v1526_v63  ;;  %v1729_v10 = vpop.permute.xlu0 %963  ;;  %v788_v17 = vmul.f32 %v1671_v2, %v777_v56  ;;  %v615_v63 = vadd.f32 %v1681_v23, %v604_v8  ;;  %v613_v27 = vadd.f32 %v1681_v23, %v602_v18 }
 0x378   : > { %v1216_v58 = vpop.eup %1215 }
 0x379   : > { %v1218_v7 = vpop.eup %1217  ;;  %v594_v52 = vmul.f32 %v1216_v58, %v1538_v22  ;;  %v606_v22 = vmul.f32 %v1704_v26, %v595_v38 }
 0x37a   : > { %v1220_v12 = vpop.eup %1219  ;;  %v776_v15 = vmul.f32 %v1218_v7, %v1550_v14 }
 0x37b   : > { %v959_v43 = vmul.f32 %v1220_v12, %v1532_v4  ;;  %v605_v14 = vmul.f32 %v1704_v26, %v594_v52  ;;  %v968_v4 = vmul.f32 %v1729_v10, %v957_v9  ;;  %v617_v34 = vadd.f32 %v1681_v23, %v606_v22  ;;  %v1749_v16 = vpop.permute.xlu0 %974 }
 0x37c   : > { %v1222_v32 = vpop.eup %1221  ;;  %v787_v30 = vmul.f32 %v1671_v2, %v776_v15 }
 0x37d   : > { %v1224_v25 = vpop.eup %1223  ;;  %v958_v46 = vmul.f32 %v1222_v32, %v1556_v28  ;;  %v619_v28 = vadd.f32 %v1681_v23, %v608_v48  ;;  %v970_v35 = vmul.f32 %v1729_v10, %v959_v43  ;;  %v616_v9 = vadd.f32 %v1681_v23, %v605_v14 }
 0x37e   : > { %v780_v58 = vmul.f32 %v1224_v25, %v1486_v39  ;;  %v979_v39 = vadd.f32 %v1749_v16, %v968_v4 }
 0x37f   : > { %v969_v62 = vmul.f32 %v1729_v10, %v958_v46  ;;  %v991_v56 = vsel %vm295_vm1, %v1699_v21, %v619_v28  ;;  %v981_v52 = vadd.f32 %v1749_v16, %v970_v35  ;;  %v1898_v35 = vld [vmem:[#allocation2_spill] sm:$0xff] }
 0x380   : > { %v1226_v60 = vpop.eup %1225 }
 0x381   : > { %v962_v31 = vmul.f32 %v1226_v60, %v1562_v33  ;;  %v1228_v38 = vpop.eup %1227  ;;  %v980_v8 = vadd.f32 %v1749_v16, %v969_v62 }
 0x382   : > { %v1230_v12 = vpop.eup %1229 }
 0x3a7   : > { %v560_v51 = vpop.xlane.xlu1 %559 }
 0x3a8   : > { %v572_v5 = vmul.f32 0.0625, %v560_v51  ;;  %v609_v51 = vmul.f32 %v1704_v26, %v598_v41  ;;  %v972_v41 = vmul.f32 %v1729_v10, %v961_v40 }
 0x3aa   : > { %v580_v45 = vadd.f32 1e-05, %v572_v5  ;;  %v966_v5 = vmul.f32 %v1729_v10, %v955_v20  ;;  %v620_v7 = vadd.f32 %v1681_v23, %v609_v51  ;;  %v988_v20 = vsel %vm295_vm1, %v1707_v47, %v616_v9 }
 0x3ab   : > { %v730_v13 = vpop.xlane.xlu1 %729  ;;  %v592_v47 = vmul.f32 %v1230_v12, %v1572_v42  ;;  %v1900_v12 = vld [vmem:[#allocation7_spill] sm:$0xff] }
 0x3ac   : > { %v750_v3 = vmul.f32 0.0625, %v730_v13  ;;  %v987_v13 = vsel %vm295_vm1, %v1690_v55, %v615_v63  ;;  %v985_v55 = vsel %vm295_vm1, %v1693_v61, %v613_v27  ;;  %v791_v61 = vmul.f32 %v1671_v2, %v780_v58  ;;  %v1895_v63 = vld [vmem:[#allocation4_spill] sm:$0xff]  ;;  %v1896_v27 = vld [vmem:[#allocation3_spill] sm:$0xff] }
 0x3ad   : > { %v992_v21 = vsel %vm295_vm1, %v1710_v6, %v620_v7  ;;  %v398_v58 = vmul.f32 %v1228_v38, %v1898_v35  ;;  %v1899_v7 = vld [vmem:[#allocation6_spill] sm:$0xff] }
 0x3ae   : > { %v758_v44 = vadd.f32 1e-05, %v750_v3 }
 0x3af   : > { %v742_v49 = vpop.xlane.xlu1 %741 }
 0x3b0   : > { %1231 = vrsqrt.f32 %v758_v44  ;;  %v754_v57 = vmul.f32 0.0625, %v742_v49  ;;  %v989_v44 = vsel %vm295_vm1, %v1696_v11, %v617_v34  ;;  %v983_v49 = vadd.f32 %v1749_v16, %v972_v41 }
 0x3b1   : > { %1233 = vrsqrt.f32 %v580_v45  ;;  %v977_v45 = vadd.f32 %v1749_v16, %v966_v5  ;;  %v973_v11 = vmul.f32 %v1729_v10, %v962_v31  ;;  %v603_v5 = vmul.f32 %v1704_v26, %v592_v47 }
 0x3b2   : > { %v762_v53 = vadd.f32 1e-05, %v754_v57 }
 0x3b3   : > { %v912_v29 = vpop.xlane.xlu1 %911  ;;  %v984_v51 = vadd.f32 %v1749_v16, %v973_v11  ;;  %v614_v62 = vadd.f32 %v1681_v23, %v603_v5 }
 0x3b4   : > { %1235 = vrsqrt.f32 %v762_v53  ;;  %v932_v50 = vmul.f32 0.0625, %v912_v29 }
 0x3b6   : > { %v940_v36 = vadd.f32 1e-05, %v932_v50 }
 0x3b7   : > { %v924_v3 = vpop.xlane.xlu1 %923 }
 0x3b8   : > { %1237 = vrsqrt.f32 %v940_v36  ;;  %v936_v1 = vmul.f32 0.0625, %v924_v3  ;;  %v1897_v36 = vld [vmem:[#allocation5_spill] sm:$0xff]  ;;  %v409_v3 = vmul.f32 %v1644_v19, %v1702_v0  ;;  %v413_v0 = vmul.f32 %v1644_v19, %v398_v58 }
 0x3ba   : > { %v944_v33 = vadd.f32 1e-05, %v936_v1  ;;  %v424_v38 = vadd.f32 %v1650_v59, %v409_v3 }
 0x3bb   : > { %v1772_v40 = vpop.permute.xlu1 %792 }
 0x3bc   : > { %1239 = vrsqrt.f32 %v944_v33  ;;  %v798_v32 = vadd.f32 %v1772_v40, %v787_v30  ;;  %v797_v57 = vadd.f32 %v1772_v40, %v1726_v37  ;;  %v795_v15 = vadd.f32 %v1772_v40, %v784_v24 }
 0x3bd   : > { %v1232_v18 = vpop.eup %1231  ;;  %v799_v6 = vadd.f32 %v1772_v40, %v788_v17  ;;  %v801_v22 = vadd.f32 %v1772_v40, %v790_v54  ;;  %v802_v48 = vadd.f32 %v1772_v40, %v791_v61 }
 0x3be   : > { %v996_v37 = vsel %vm217_vm0, %v988_v20, %v798_v32  ;;  %v995_v24 = vsel %vm217_vm0, %v987_v13, %v797_v57  ;;  %v993_v53 = vsel %vm217_vm0, %v985_v55, %v795_v15  ;;  %v774_v43 = vmul.f32 %v1232_v18, %v1895_v63  ;;  %v1234_v25 = vpop.eup %1233 }
 0x3bf   : > { %v1005_v42 = vsel %vm1001_vm2, %v996_v37, %v980_v8  ;;  %v1004_v29 = vsel %vm1001_vm2, %v995_v24, %v979_v39  ;;  %v1002_v17 = vsel %vm1001_vm2, %v993_v53, %v977_v45  ;;  %v997_v14 = vsel %vm217_vm0, %v989_v44, %v799_v6 }
 0x3c0   : > { %1032 = vrot.lane.b32.xlu0 %v1005_v42, %s1250_s30  ;;  %1013 = vst.msk [vmem:[%s1787_s17 + $0x30] sm:$0xff] %vm217_vm0, %v1005_v42  ;;  %1030 = vrot.lane.b32.xlu1 %v1004_v29, %s1250_s30  ;;  %1012 = vst.msk [vmem:[%s1787_s17 + $0x20] sm:$0xff] %vm217_vm0, %v1004_v29  ;;  %v1006_v46 = vsel %vm1001_vm2, %v997_v14, %v981_v52  ;;  %v999_v54 = vsel %vm217_vm0, %v991_v56, %v801_v22 }
 0x3c1   : > { %1010 = vst.msk [vmem:[%s1787_s17] sm:$0xff] %vm217_vm0, %v1002_v17  ;;  %v1236_v60 = vpop.eup %1235  ;;  %1014 = vst.msk [vmem:[%s1787_s17 + $0x40] sm:$0xff] %vm217_vm0, %v1006_v46  ;;  %v1008_v50 = vsel %vm1001_vm2, %v999_v54, %v983_v49  ;;  %v1000_v30 = vsel %vm217_vm0, %v992_v21, %v802_v48  ;;  %v596_v4 = vmul.f32 %v1234_v25, %v1896_v27 }
 0x3c2   : > { %1016 = vst.msk [vmem:[%s1787_s17 + $0x60] sm:$0xff] %vm217_vm0, %v1008_v50  ;;  %v1009_v34 = vsel %vm1001_vm2, %v1000_v30, %v984_v51  ;;  %v785_v28 = vmul.f32 %v1671_v2, %v774_v43  ;;  %v778_v13 = vmul.f32 %v1236_v60, %v1897_v36  ;;  %v986_v56 = vsel %vm295_vm1, %v424_v38, %v614_v62 }
 0x3c3   : > { %1017 = vst.msk [vmem:[%s1787_s17 + $0x70] sm:$0xff] %vm217_vm0, %v1009_v34  ;;  %v607_v1 = vmul.f32 %v1704_v26, %v596_v4  ;;  %v428_v49 = vadd.f32 %v1650_v59, %v413_v0 }
 0x3c4   : > { %1026 = vrot.lane.b32.xlu1 %v1002_v17, %s1250_s30  ;;  %v796_v55 = vadd.f32 %v1772_v40, %v785_v28  ;;  %v789_v41 = vmul.f32 %v1671_v2, %v778_v13 }
 0x3c5   : > { %v1238_v9 = vpop.eup %1237  ;;  %v618_v26 = vadd.f32 %v1681_v23, %v607_v1 }
 0x3c6   : > { %v956_v31 = vmul.f32 %v1238_v9, %v1899_v7  ;;  %v994_v2 = vsel %vm217_vm0, %v986_v56, %v796_v55  ;;  %v800_v52 = vadd.f32 %v1772_v40, %v789_v41 }
 0x3c7   : > { %v990_v40 = vsel %vm295_vm1, %v428_v49, %v618_v26 }
 0x3c8   : > { %1034 = vrot.lane.b32.xlu1 %v1006_v46, %s1250_s30  ;;  %v967_v39 = vmul.f32 %v1729_v10, %v956_v31  ;;  %v998_v8 = vsel %vm217_vm0, %v990_v40, %v800_v52 }
 0x3c9   : > { %v1240_v45 = vpop.eup %1239 }
 0x3ca   : > { %v978_v44 = vadd.f32 %v1749_v16, %v967_v39  ;;  %v960_v33 = vmul.f32 %v1240_v45, %v1900_v12 }
 0x3cc   : > { %1038 = vrot.lane.b32.xlu1 %v1008_v50, %s1250_s30  ;;  %v1003_v19 = vsel %vm1001_vm2, %v994_v2, %v978_v44  ;;  %v971_v61 = vmul.f32 %v1729_v10, %v960_v33 }
 0x3cd   : > { %1028 = vrot.lane.b32.xlu0 %v1003_v19, %s1250_s30  ;;  %1011 = vst.msk [vmem:[%s1787_s17 + $0x10] sm:$0xff] %vm217_vm0, %v1003_v19 }
 0x3ce   : > { %v982_v23 = vadd.f32 %v1749_v16, %v971_v61 }
 0x3d0   : > { %v1007_v20 = vsel %vm1001_vm2, %v998_v8, %v982_v23 }
 0x3d1   : > { %1015 = vst.msk [vmem:[%s1787_s17 + $0x50] sm:$0xff] %vm217_vm0, %v1007_v20  ;;  %1036 = vrot.lane.b32.xlu0 %v1007_v20, %s1250_s30 }
 0x3d5   : > { %1040 = vrot.lane.b32.xlu0 %v1009_v34, %s1250_s30 }
 0x432   : > { %v1033_v59 = vpop.permute.xlu0 %1032  ;;  %v1031_v10 = vpop.permute.xlu1 %1030 }
 0x433   : > { %1132 = vst.msk [vmem:[%s1787_s17 + $0x38] sm:$0xff] %vm217_vm0, %v1033_v59  ;;  %1131 = vst.msk [vmem:[%s1787_s17 + $0x28] sm:$0xff] %vm217_vm0, %v1031_v10 }
 0x436   : > { %v1027_v16 = vpop.permute.xlu1 %1026 }
 0x437   : > { %1129 = vst.msk [vmem:[%s1787_s17 + $0x8] sm:$0xff] %vm217_vm0, %v1027_v16 }
 0x43a   : > { %v1035_v11 = vpop.permute.xlu1 %1034 }
 0x43b   : > { %1133 = vst.msk [vmem:[%s1787_s17 + $0x48] sm:$0xff] %vm217_vm0, %v1035_v11 }
 0x43e   : > { %v1039_v21 = vpop.permute.xlu1 %1038 }
 0x43f   : > { %1135 = vst.msk [vmem:[%s1787_s17 + $0x68] sm:$0xff] %vm217_vm0, %v1039_v21  ;;  %v1029_v32 = vpop.permute.xlu0 %1028 }
 0x440   : > { %1130 = vst.msk [vmem:[%s1787_s17 + $0x18] sm:$0xff] %vm217_vm0, %v1029_v32 }
 0x443   : > { %v1037_v57 = vpop.permute.xlu0 %1036 }
 0x444   : > { %1134 = vst.msk [vmem:[%s1787_s17 + $0x58] sm:$0xff] %vm217_vm0, %v1037_v57 }
 0x447   : > { %v1041_v15 = vpop.permute.xlu0 %1040 }
 0x448   : > { %1136 = vst.msk [vmem:[%s1787_s17 + $0x78] sm:$0xff] %vm217_vm0, %v1041_v15 }
 0x449 PF: > { %s14_s15 = sadd.s32 1, %s1247_s15  }
 0x44a   : > { %p11_p4 = scmp.ge.s32.totalorder %s14_s15, 4  }
 0x44c   :  { %13 = sbr.rel (!%p11_p4) target bundleno = 1 (0x1), region = 67 }

// kernel: _basic_layer_up.7
= control target key start
LH: loop header
LB: loop body
LE: loop exit
PB: predicated region body
PF: predicated region fallthrough
CT: control target
= control target key end

     0   :  { %s3756_s30 = smov 0   ;;  %s4541_s0 = inlined_call_operand.vmem [shape: f32[8,16,32], index: 0, kind: input, shape index: {}]   ;;  %s4542_s1 = inlined_call_operand.vmem [shape: f32[1,32], index: 1, kind: input, shape index: {}]   ;;  %s4543_s2 = inlined_call_operand.vmem [shape: f32[1,32], index: 2, kind: input, shape index: {}]   ;;  %s4544_s3 = inlined_call_operand.vmem [shape: f32[4,16,16], index: 3, kind: input, shape index: {}]   ;;  %s4545_s4 = inlined_call_operand.vmem [shape: f32[32,96], index: 4, kind: input, shape index: {}]   ;;  %s4546_s5 = inlined_call_operand.vmem [shape: f32[1,96], index: 5, kind: input, shape index: {}]   ;;  %s4547_s6 = inlined_call_operand.vmem [shape: f32[32,32], index: 6, kind: input, shape index: {}]   ;;  %s4548_s7 = inlined_call_operand.vmem [shape: f32[1,32], index: 7, kind: input, shape index: {}]   ;;  %s4549_s8 = inlined_call_operand.vmem [shape: f32[4,16,16], index: 8, kind: input, shape index: {}]   ;;  %s4550_s9 = inlined_call_operand.vmem [shape: f32[8,16,32], index: 9, kind: output, shape index: {}]  }
   0x1 LB: > { %s3085_s10 = sadd.s32 4294967295, %s3691_s30   ;;  %p3089_p0 = scmp.ge.s32.totalorder %s3691_s30, 1  ;;  %s3691_s30 = sphi %s3756_s30, %s19_s30  }
   0x2   : > { %p289_p1 = scmp.lt.s32.totalorder %s3691_s30, 3 }
   0x4   : > { %p290_p2 = pnand %p3089_p0, %p289_p1 }
   0x5   : > { %s3090_s11 = sshll.u32 (!%p290_p2), %s3085_s10, 2  ;;  %s3695_s10 = smov (!%p290_p2), 96  }
   0x6   : > { %293 = sbr.rel (%p290_p2) target bundleno = 3874 (0xf22), region = 56  ;;  %p328_p3 = scmp.lt.s32.totalorder (!%p290_p2), %s3090_s11, 7 }
   0x7   : > { %s3696_s17 = smov (!%p290_p2), 64   ;;  %s3697_s18 = smov (!%p290_p2), 88  }
   0x8   : > { %s3698_s19 = smov (!%p290_p2), 120   ;;  %s3699_s24 = smov (!%p290_p2), 56  }
   0x9   : > { %s3700_s25 = smov (!%p290_p2), 80   ;;  %s3701_s26 = smov (!%p290_p2), 112  }
   0xa   : > { %s3703_s27 = smov (!%p290_p2), 72   ;;  %s3704_s28 = smov (!%p290_p2), 104  }
   0xb   : > { %s4552_s11 = smov (!%p328_p3, %s3090_s11), 7  ;;  %vm350_vm0 = vcmask 261120   ;;  %v492_v56 = vld [vmem:[%s4545_s4 + $0x10] sm:$0xff]  ;;  %v493_v57 = vld [vmem:[%s4545_s4 + $0x18] sm:$0xff]  ;;  %v490_v58 = vld [vmem:[%s4545_s4] sm:$0xff]  ;;  %vm3694_vm1 = vmmov 0  }
   0xc   : > { %s3160_s12 = sshll.u32 %s4552_s11, 4  ;;  %v495_v59 = vpack.c.bf16 %v493_v57, %v492_v56  ;;  %v491_v60 = vld [vmem:[%s4545_s4 + $0x8] sm:$0xff]  ;;  %vm601_vm2 = vcmask 64512   ;;  %vm825_vm3 = vcmask 130048   ;;  %vm1639_vm4 = vcmask 1043456  }
   0xd   : > { %s3772_s15 = scalar_lea.vmem %s4541_s0, %s3160_s12  ;;  %v494_v61 = vpack.c.bf16 %v491_v60, %v490_v58  ;;  %s4507_s16 = scalar_lea.vmem %s4550_s9, %s3160_s12 }
   0xe   : > { %v342_v0 = vld [vmem:[%s3772_s15] sm:$0xff]  ;;  %v344_v1 = vld [vmem:[%s3772_s15 + $0x10] sm:$0xff]  ;;  %v343_v2 = vld [vmem:[%s3772_s15 + $0x8] sm:$0xff]  ;;  %3252 = vmatprep.subr.bf16.mxu0 %v495_v59  ;;  %3496 = vmatprep.subr.bf16.mxu1 %v495_v59 }
   0xf   : > { %v351_v3 = vsel %vm350_vm0, %v342_v0, 0.0  ;;  %v357_v4 = vsel %vm350_vm0, %v344_v1, 0.0  ;;  %v345_v5 = vld [vmem:[%s3772_s15 + $0x18] sm:$0xff]  ;;  %v354_v6 = vsel %vm350_vm0, %v343_v2, 0.0  ;;  %v346_v8 = vld [vmem:[%s3772_s15 + $0x20] sm:$0xff]  ;;  %v347_v9 = vld [vmem:[%s3772_s15 + $0x28] sm:$0xff]  ;;  %3253 = vmatpush3.bf16.msra.mxu0 %v495_v59  ;;  %3498 = vmatpush3.bf16.msra.mxu1 %v495_v59 }
  0x10   : > { %352 = vadd.xlane.f32.xlu0 %v351_v3  ;;  %358 = vadd.xlane.f32.xlu1 %v357_v4  ;;  %v360_v7 = vsel %vm350_vm0, %v345_v5, 0.0  ;;  %v363_v10 = vsel %vm350_vm0, %v346_v8, 0.0  ;;  %v366_v11 = vsel %vm350_vm0, %v347_v9, 0.0  ;;  %v348_v12 = vld [vmem:[%s3772_s15 + $0x30] sm:$0xff]  ;;  %v349_v13 = vld [vmem:[%s3772_s15 + $0x38] sm:$0xff] }
  0x11   : > { %v369_v14 = vsel %vm350_vm0, %v348_v12, 0.0  ;;  %v372_v15 = vsel %vm350_vm0, %v349_v13, 0.0  ;;  %3254 = vmatprep.subr.bf16.mxu0 %v494_v61  ;;  %3497 = vmatprep.subr.bf16.mxu1 %v494_v61 }
  0x13   : > { %3255 = vmatpush3.bf16.msra.mxu0 %v494_v61  ;;  %3499 = vmatpush3.bf16.msra.mxu1 %v494_v61 }
  0x14   : > { %355 = vadd.xlane.f32.xlu0 %v354_v6  ;;  %361 = vadd.xlane.f32.xlu1 %v360_v7 }
  0x18   : > { %364 = vadd.xlane.f32.xlu0 %v363_v10  ;;  %367 = vadd.xlane.f32.xlu1 %v366_v11 }
  0x1c   : > { %370 = vadd.xlane.f32.xlu0 %v369_v14  ;;  %373 = vadd.xlane.f32.xlu1 %v372_v15 }
  0x99   : > { %v353_v16 = vpop.xlane.xlu0 %352  ;;  %v359_v17 = vpop.xlane.xlu1 %358 }
  0x9a   : > { %v376_v18 = vmul.f32 0.03125, %v353_v16  ;;  %v378_v19 = vmul.f32 0.03125, %v359_v17 }
  0x9c   : > { %v3790_v20 = vsub.f32 %v342_v0, %v376_v18  ;;  %v3792_v21 = vsub.f32 %v344_v1, %v378_v19 }
  0x9d   : > { %v356_v22 = vpop.xlane.xlu0 %355  ;;  %v362_v23 = vpop.xlane.xlu1 %361 }
  0x9e   : > { %v377_v24 = vmul.f32 0.03125, %v356_v22  ;;  %v379_v25 = vmul.f32 0.03125, %v362_v23  ;;  %v392_v26 = vmul.f32 %v3790_v20, %v3790_v20  ;;  %v394_v27 = vmul.f32 %v3792_v21, %v3792_v21 }
  0xa0   : > { %v3798_v28 = vsub.f32 %v343_v2, %v377_v24  ;;  %v3800_v29 = vsub.f32 %v345_v5, %v379_v25  ;;  %v400_v30 = vsel %vm350_vm0, %v392_v26, 0.0  ;;  %v406_v33 = vsel %vm350_vm0, %v394_v27, 0.0  ;;  %v3096_v26 = vld [vmem:[%s4542_s1] ss:$0 sm:$0xff] }
  0xa1   : > { %401 = vadd.xlane.f32.xlu0 %v400_v30  ;;  %v365_v31 = vpop.xlane.xlu0 %364  ;;  %v368_v32 = vpop.xlane.xlu1 %367 }
  0xa2   : > { %v380_v34 = vmul.f32 0.03125, %v365_v31  ;;  %v381_v35 = vmul.f32 0.03125, %v368_v32  ;;  %v393_v36 = vmul.f32 %v3798_v28, %v3798_v28  ;;  %v395_v37 = vmul.f32 %v3800_v29, %v3800_v29 }
  0xa4   : > { %v3808_v38 = vsub.f32 %v346_v8, %v380_v34  ;;  %v3810_v39 = vsub.f32 %v347_v9, %v381_v35  ;;  %v403_v40 = vsel %vm350_vm0, %v393_v36, 0.0  ;;  %v409_v43 = vsel %vm350_vm0, %v395_v37, 0.0 }
  0xa5   : > { %407 = vadd.xlane.f32.xlu0 %v406_v33  ;;  %404 = vadd.xlane.f32.xlu1 %v403_v40  ;;  %v371_v41 = vpop.xlane.xlu0 %370  ;;  %v374_v42 = vpop.xlane.xlu1 %373  ;;  %v3097_v33 = vld [vmem:[%s4543_s2] ss:$0 sm:$0xff] }
  0xa6   : > { %v382_v44 = vmul.f32 0.03125, %v371_v41  ;;  %v383_v45 = vmul.f32 0.03125, %v374_v42  ;;  %v396_v46 = vmul.f32 %v3808_v38, %v3808_v38  ;;  %v397_v47 = vmul.f32 %v3810_v39, %v3810_v39 }
  0xa8   : > { %v3818_v48 = vsub.f32 %v348_v12, %v382_v44  ;;  %v3820_v49 = vsub.f32 %v349_v13, %v383_v45  ;;  %v412_v50 = vsel %vm350_vm0, %v396_v46, 0.0  ;;  %v415_v51 = vsel %vm350_vm0, %v397_v47, 0.0 }
  0xa9   : > { %410 = vadd.xlane.f32.xlu1 %v409_v43  ;;  %413 = vadd.xlane.f32.xlu0 %v412_v50 }
  0xaa   : > { %v398_v52 = vmul.f32 %v3818_v48, %v3818_v48  ;;  %v399_v53 = vmul.f32 %v3820_v49, %v3820_v49 }
  0xac   : > { %v418_v54 = vsel %vm350_vm0, %v398_v52, 0.0  ;;  %v421_v55 = vsel %vm350_vm0, %v399_v53, 0.0 }
  0xad   : > { %416 = vadd.xlane.f32.xlu1 %v415_v51  ;;  %419 = vadd.xlane.f32.xlu0 %v418_v54 }
  0xb1   : > { %422 = vadd.xlane.f32.xlu1 %v421_v55 }
 0x12a   : > { %v402_v62 = vpop.xlane.xlu0 %401 }
 0x12b   : > { %v424_v63 = vmul.f32 0.03125, %v402_v62 }
 0x12d   : > { %v432_v0 = vadd.f32 1e-05, %v424_v63 }
 0x12e   : > { %v405_v1 = vpop.xlane.xlu1 %404  ;;  %v408_v2 = vpop.xlane.xlu0 %407 }
 0x12f   : > { %3525 = vrsqrt.f32 %v432_v0  ;;  %v425_v3 = vmul.f32 0.03125, %v405_v1  ;;  %v426_v4 = vmul.f32 0.03125, %v408_v2 }
 0x131   : > { %v433_v5 = vadd.f32 1e-05, %v425_v3  ;;  %v434_v6 = vadd.f32 1e-05, %v426_v4 }
 0x132   : > { %v411_v7 = vpop.xlane.xlu1 %410  ;;  %v414_v8 = vpop.xlane.xlu0 %413 }
 0x133   : > { %3527 = vrsqrt.f32 %v433_v5  ;;  %v427_v9 = vmul.f32 0.03125, %v411_v7  ;;  %v428_v10 = vmul.f32 0.03125, %v414_v8 }
 0x134   : > { %3529 = vrsqrt.f32 %v434_v6 }
 0x135   : > { %v435_v11 = vadd.f32 1e-05, %v427_v9  ;;  %v436_v12 = vadd.f32 1e-05, %v428_v10 }
 0x136   : > { %v417_v13 = vpop.xlane.xlu1 %416  ;;  %v420_v14 = vpop.xlane.xlu0 %419 }
 0x137   : > { %3531 = vrsqrt.f32 %v435_v11  ;;  %v429_v15 = vmul.f32 0.03125, %v417_v13  ;;  %v430_v16 = vmul.f32 0.03125, %v420_v14 }
 0x138   : > { %3533 = vrsqrt.f32 %v436_v12 }
 0x139   : > { %v437_v17 = vadd.f32 1e-05, %v429_v15  ;;  %v438_v18 = vadd.f32 1e-05, %v430_v16 }
 0x13a   : > { %v423_v19 = vpop.xlane.xlu1 %422 }
 0x13b   : > { %3535 = vrsqrt.f32 %v437_v17  ;;  %v431_v22 = vmul.f32 0.03125, %v423_v19 }
 0x13c   : > { %v3526_v23 = vpop.eup %3525  ;;  %3537 = vrsqrt.f32 %v438_v18 }
 0x13d   : > { %v439_v24 = vadd.f32 1e-05, %v431_v22  ;;  %v448_v25 = vmul.f32 %v3526_v23, %v3790_v20 }
 0x13f   : > { %3539 = vrsqrt.f32 %v439_v24  ;;  %v463_v32 = vmul.f32 %v3096_v26, %v448_v25 }
 0x140   : > { %v3528_v27 = vpop.eup %3527 }
 0x141   : > { %v3530_v30 = vpop.eup %3529  ;;  %v449_v31 = vmul.f32 %v3528_v27, %v3798_v28  ;;  %v478_v20 = vadd.f32 %v3097_v33, %v463_v32 }
 0x142   : > { %v450_v34 = vmul.f32 %v3530_v30, %v3792_v21 }
 0x143   : > { %v464_v35 = vmul.f32 %v3096_v26, %v449_v31  ;;  %v807_v31 = vld [vmem:[%s4544_s3] sm:$0xff] }
 0x144   : > { %v3532_v36 = vpop.eup %3531  ;;  %v465_v42 = vmul.f32 %v3096_v26, %v450_v34  ;;  %v3911_v34 = vld [vmem:[%s4549_s8] sm:$0xff] }
 0x145   : > { %v3534_v37 = vpop.eup %3533  ;;  %v479_v40 = vadd.f32 %v3097_v33, %v464_v35  ;;  %v451_v41 = vmul.f32 %v3532_v36, %v3800_v29 }
 0x146   : > { %v452_v43 = vmul.f32 %v3534_v37, %v3808_v38  ;;  %v480_v47 = vadd.f32 %v3097_v33, %v465_v42  ;;  %v808_v37 = vld [vmem:[%s4544_s3 + $0x8] sm:$0xff] }
 0x147   : > { %v486_v44 = vpack.c.bf16 %v479_v40, %v478_v20  ;;  %v466_v45 = vmul.f32 %v3096_v26, %v451_v41  ;;  %v3920_v42 = vld [vmem:[%s4549_s8 + $0x8] sm:$0xff] }
 0x148   : > { %v3536_v28 = vpop.eup %3535  ;;  %v467_v51 = vmul.f32 %v3096_v26, %v452_v43 }
 0x149   : > { %v3538_v46 = vpop.eup %3537  ;;  %3256 = vmatprep.mubr.msk.bf16.mxu0 %vm350_vm0, %v486_v44  ;;  %v481_v50 = vadd.f32 %v3097_v33, %v466_v45  ;;  %v453_v21 = vmul.f32 %v3536_v28, %v3810_v39 }
 0x14a   : > { %v454_v52 = vmul.f32 %v3538_v46, %v3818_v48  ;;  %v482_v29 = vadd.f32 %v3097_v33, %v467_v51  ;;  %v3693_v48 = vmov 0.0   ;;  %v3927_v51 = vld [vmem:[%s4549_s8 + $0x10] sm:$0xff] }
 0x14b   : > { %v487_v53 = vpack.c.bf16 %v481_v50, %v480_v47  ;;  %v468_v54 = vmul.f32 %v3096_v26, %v453_v21  ;;  %3264 = vmatprep.subr.bf16.mxu1 %v3693_v48  ;;  %3276 = vmatprep.subr.bf16.mxu0 %v3693_v48 }
 0x14c   : > { %v3540_v55 = vpop.eup %3539  ;;  %v469_v57 = vmul.f32 %v3096_v26, %v454_v52 }
 0x14d   : > { %3257 = vmatmul.mubr.msk.bf16.vlgmr.msra.gmra.mxu0 %vm350_vm0, %v487_v53  ;;  %v483_v38 = vadd.f32 %v3097_v33, %v468_v54  ;;  %v455_v56 = vmul.f32 %v3540_v55, %v3820_v49  ;;  %v3098_v49 = vld [vmem:[%s4546_s5] ss:$0 sm:$0xff] }
 0x14e   : > { %v484_v60 = vadd.f32 %v3097_v33, %v469_v57  ;;  %3278 = vmatprep.mubr.msk.bf16.mxu0 %vm3694_vm1, %v3693_v48 }
 0x14f   : > { %v488_v58 = vpack.c.bf16 %v483_v38, %v482_v29  ;;  %v470_v59 = vmul.f32 %v3096_v26, %v455_v56 }
 0x151   : > { %3260 = vmatprep.mubr.msk.bf16.mxu1 %vm350_vm0, %v488_v58  ;;  %v485_v61 = vadd.f32 %v3097_v33, %v470_v59 }
 0x153   : > { %v489_v39 = vpack.c.bf16 %v485_v61, %v484_v60  ;;  %v3934_v60 = vld [vmem:[%s4549_s8 + $0x28] sm:$0xff]  ;;  %v3939_v61 = vld [vmem:[%s4549_s8 + $0x18] sm:$0xff] }
 0x155   : > { %3261 = vmatmul.mubr.msk.bf16.vlgmr.msra.gmra.mxu1 %vm350_vm0, %v489_v39 }
 0x156   : > { %3266 = vmatprep.mubr.msk.bf16.mxu1 %vm3694_vm1, %v3693_v48 }
 0x20d   : > { %v3258_v62 = vpop.f32.mrf.mxu0 }
 0x20e   : > { %v558_v1 = vadd.f32 %v3258_v62, %v3098_v49 }
 0x20f   : > { %v549_v63 = vpop.f32.mrf.mxu0 }
 0x210   : > { %v550_v4 = vadd.f32 %v3098_v49, %v549_v63 }
 0x211   : > { %v3259_v0 = vpop.f32.mrf.mxu0 }
 0x212   : > { %v561_v2 = vadd.f32 %v3259_v0, %v3098_v49 }
 0x213   : > { %v552_v3 = vpop.f32.mrf.mxu0 }
 0x214   : > { %v3869_v5 = vpack.c.bf16 %v561_v2, %v558_v1  ;;  %v553_v6 = vadd.f32 %v3098_v49, %v552_v3  ;;  %v3945_v1 = vld [vmem:[%s4549_s8 + $0x20] sm:$0xff] }
 0x215   : > { %v3262_v7 = vpop.f32.mrf.mxu1 }
 0x216   : > { %v3871_v8 = vpack.c.bf16 %v553_v6, %v550_v4  ;;  %650 = vrot.lane.b32.xlu1 %v3869_v5, %s3695_s10  ;;  %v574_v16 = vadd.f32 %v3262_v7, %v3098_v49 }
 0x217   : > { %v565_v9 = vpop.f32.mrf.mxu1 }
 0x218   : > { %599 = vrot.lane.b32.xlu0 %v3871_v8, %s3695_s10  ;;  %v566_v12 = vadd.f32 %v3098_v49, %v565_v9 }
 0x219   : > { %v3263_v10 = vpop.f32.mrf.mxu1 }
 0x21a   : > { %v577_v14 = vadd.f32 %v3263_v10, %v3098_v49 }
 0x21b   : > { %v568_v11 = vpop.f32.mrf.mxu1 }
 0x21c   : > { %v569_v13 = vadd.f32 %v3098_v49, %v568_v11  ;;  %v3878_v17 = vpack.c.bf16 %v577_v14, %v574_v16 }
 0x21e   : > { %v3875_v15 = vpack.c.bf16 %v569_v13, %v566_v12  ;;  %v3958_v13 = vld [vmem:[%s4549_s8 + $0x30] sm:$0xff] }
 0x220   : > { %700 = vrot.lane.b32.xlu1 %v3875_v15, %s3695_s10 }
 0x224   : > { %750 = vrot.lane.b32.xlu1 %v3878_v17, %s3695_s10 }
 0x288   : > { %v651_v22 = vpop.permute.xlu1 %650 }
 0x289   : > { %v656_v24 = vsel %vm601_vm2, %v651_v22, 0 }
 0x28a   : > { %v600_v18 = vpop.permute.xlu0 %599 }
 0x28b   : > { %v606_v19 = vsel %vm601_vm2, %v600_v18, 0  ;;  %v3963_v18 = vld [vmem:[%s4549_s8 + $0x38] sm:$0xff] }
 0x28c   : > { %3265 = vmatpush3.bf16.xpose.msra.mxu1 %v606_v19 }
 0x28d   : > { %3270 = vmatprep.subr.bf16.mxu1 %v3693_v48 }
 0x292   : > { %v701_v23 = vpop.permute.xlu1 %700 }
 0x293   : > { %v706_v25 = vsel %vm601_vm2, %v701_v23, 0  ;;  %3267 = vmatmul.mubr.msk.bf16.vlgmr.msra.gmra.mxu1 %vm601_vm2, %v3871_v8 }
 0x294   : > { %3271 = vmatpush3.bf16.xpose.msra.mxu1 %v656_v24  ;;  %3277 = vmatpush3.bf16.xpose.msra.mxu0 %v706_v25 }
 0x295   : > { %3272 = vmatprep.mubr.msk.bf16.mxu1 %vm3694_vm1, %v3693_v48  ;;  %3282 = vmatprep.subr.bf16.mxu1 %v3693_v48 }
 0x296   : > { %3288 = vmatprep.subr.bf16.mxu0 %v3693_v48  ;;  %v751_v26 = vpop.permute.xlu1 %750 }
 0x297   : > { %v756_v27 = vsel %vm601_vm2, %v751_v26, 0 }
 0x29b   : > { %3273 = vmatmul.mubr.msk.bf16.vlgmr.msra.gmra.mxu1 %vm601_vm2, %v3869_v5  ;;  %3279 = vmatmul.mubr.msk.bf16.vlgmr.msra.gmra.mxu0 %vm601_vm2, %v3875_v15 }
 0x29c   : > { %3283 = vmatpush3.bf16.xpose.msra.mxu1 %v756_v27  ;;  %3284 = vmatprep.mubr.msk.bf16.mxu1 %vm3694_vm1, %v3693_v48 }
 0x29d   : > { %3294 = vmatprep.subr.bf16.mxu1 %v3693_v48  ;;  %3290 = vmatprep.mubr.msk.bf16.mxu0 %vm3694_vm1, %v3693_v48 }
 0x2a3   : > { %3285 = vmatmul.mubr.msk.bf16.vlgmr.msra.gmra.mxu1 %vm601_vm2, %v3878_v17 }
 0x2a4   : > { %3296 = vmatprep.mubr.msk.bf16.mxu1 %vm3694_vm1, %v3693_v48 }
 0x353   : > { %v642_v30 = vpop.f32.mrf.mxu1 }
 0x354   : > { %v799_v32 = vmul.f32 0.35355338, %v642_v30 }
 0x355   : > { %v3268_v33 = vpop.f32.mrf.mxu1 }
 0x356   : > { %v809_v35 = vadd.f32 %v807_v31, %v799_v32 }
 0x357   : > { %v645_v36 = vpop.f32.mrf.mxu1 }
 0x358   : > { %v800_v20 = vmul.f32 0.35355338, %v645_v36  ;;  %v817_v40 = vadd.f32 %v809_v35, %v3911_v34 }
 0x359   : > { %v3269_v41 = vpop.f32.mrf.mxu1 }
 0x35a   : > { %v810_v43 = vadd.f32 %v808_v37, %v800_v20  ;;  %v826_v44 = vsel %vm825_vm3, %v817_v40, -inf }
 0x35b   : > { %v742_v45 = vpop.f32.mrf.mxu0  ;;  %827 = vmax.xlane.f32.xlu0 %v826_v44  ;;  %v692_v28 = vpop.f32.mrf.mxu1 }
 0x35c   : > { %v801_v46 = vmul.f32 0.35355338, %v692_v28  ;;  %v818_v47 = vadd.f32 %v810_v43, %v3920_v42  ;;  %v803_v52 = vmul.f32 0.35355338, %v742_v45 }
 0x35d   : > { %v3274_v50 = vpop.f32.mrf.mxu1  ;;  %v3280_v21 = vpop.f32.mrf.mxu0 }
 0x35e   : > { %v811_v53 = vadd.f32 %v807_v31, %v801_v46  ;;  %v829_v54 = vsel %vm825_vm3, %v818_v47, -inf  ;;  %v813_v39 = vadd.f32 %v807_v31, %v803_v52 }
 0x35f   : > { %v745_v55 = vpop.f32.mrf.mxu0  ;;  %830 = vmax.xlane.f32.xlu1 %v829_v54  ;;  %v695_v29 = vpop.f32.mrf.mxu1 }
 0x360   : > { %v804_v38 = vmul.f32 0.35355338, %v745_v55  ;;  %v802_v56 = vmul.f32 0.35355338, %v695_v29  ;;  %v819_v57 = vadd.f32 %v811_v53, %v3927_v51  ;;  %v821_v11 = vadd.f32 %v813_v39, %v3945_v1 }
 0x361   : > { %v3275_v58 = vpop.f32.mrf.mxu1  ;;  %v3281_v59 = vpop.f32.mrf.mxu0 }
 0x362   : > { %v814_v62 = vadd.f32 %v808_v37, %v804_v38  ;;  %v812_v49 = vadd.f32 %v808_v37, %v802_v56  ;;  %v832_v63 = vsel %vm825_vm3, %v819_v57, -inf  ;;  %v838_v22 = vsel %vm825_vm3, %v821_v11, -inf }
 0x363   : > { %833 = vmax.xlane.f32.xlu0 %v832_v63  ;;  %v792_v0 = vpop.f32.mrf.mxu1 }
 0x364   : > { %v805_v2 = vmul.f32 0.35355338, %v792_v0  ;;  %v822_v3 = vadd.f32 %v814_v62, %v3934_v60  ;;  %v3949_v4 = vadd.f32 %v812_v49, %v3939_v61 }
 0x365   : > { %v3286_v6 = vpop.f32.mrf.mxu1 }
 0x366   : > { %v815_v7 = vadd.f32 %v807_v31, %v805_v2  ;;  %v841_v9 = vsel %vm825_vm3, %v822_v3, -inf  ;;  %v835_v10 = vsel %vm825_vm3, %v3949_v4, -inf }
 0x367   : > { %842 = vmax.xlane.f32.xlu1 %v841_v9  ;;  %836 = vmax.xlane.f32.xlu0 %v835_v10  ;;  %v795_v12 = vpop.f32.mrf.mxu1 }
 0x368   : > { %v806_v14 = vmul.f32 0.35355338, %v795_v12  ;;  %v823_v23 = vadd.f32 %v815_v7, %v3958_v13 }
 0x369   : > { %v3287_v16 = vpop.f32.mrf.mxu1 }
 0x36a   : > { %v816_v19 = vadd.f32 %v808_v37, %v806_v14  ;;  %v844_v25 = vsel %vm825_vm3, %v823_v23, -inf }
 0x36b   : > { %839 = vmax.xlane.f32.xlu0 %v838_v22 }
 0x36c   : > { %v3968_v24 = vadd.f32 %v816_v19, %v3963_v18 }
 0x36e   : > { %v847_v26 = vsel %vm825_vm3, %v3968_v24, -inf }
 0x36f   : > { %845 = vmax.xlane.f32.xlu0 %v844_v25  ;;  %848 = vmax.xlane.f32.xlu1 %v847_v26 }
 0x3e4   : > { %v828_v27 = vpop.xlane.xlu0 %827 }
 0x3e5   : > { %v850_v30 = vsub.f32 %v817_v40, %v828_v27 }
 0x3e7   : > { %v858_v31 = vmul.f32 1.442695, %v850_v30 }
 0x3e8   : > { %v831_v32 = vpop.xlane.xlu1 %830 }
 0x3e9   : > { %3541 = vpow2.f32 %v858_v31  ;;  %v851_v33 = vsub.f32 %v818_v47, %v831_v32 }
 0x3eb   : > { %v860_v35 = vmul.f32 1.442695, %v851_v33 }
 0x3ec   : > { %v834_v36 = vpop.xlane.xlu0 %833 }
 0x3ed   : > { %3543 = vpow2.f32 %v860_v35  ;;  %v852_v43 = vsub.f32 %v819_v57, %v834_v36 }
 0x3ef   : > { %v862_v50 = vmul.f32 1.442695, %v852_v43 }
 0x3f0   : > { %v843_v37 = vpop.xlane.xlu1 %842  ;;  %v837_v20 = vpop.xlane.xlu0 %836 }
 0x3f1   : > { %v855_v41 = vsub.f32 %v822_v3, %v843_v37  ;;  %v853_v58 = vsub.f32 %v3949_v4, %v837_v20 }
 0x3f3   : > { %v868_v44 = vmul.f32 1.442695, %v855_v41  ;;  %v864_v39 = vmul.f32 1.442695, %v853_v58 }
 0x3f4   : > { %v840_v45 = vpop.xlane.xlu0 %839 }
 0x3f5   : > { %3545 = vpow2.f32 %v868_v44  ;;  %v854_v28 = vsub.f32 %v821_v11, %v840_v45 }
 0x3f6   : > { %v3973_v46 = vpop.eup %3541 }
 0x3f7   : > { %v866_v21 = vmul.f32 1.442695, %v854_v28  ;;  %v874_v40 = vsel %vm825_vm3, %v3973_v46, 0.0 }
 0x3f8   : > { %875 = vadd.xlane.f32.xlu0 %v874_v40  ;;  %v846_v57 = vpop.xlane.xlu0 %845  ;;  %v849_v3 = vpop.xlane.xlu1 %848 }
 0x3f9   : > { %3547 = vpow2.f32 %v866_v21  ;;  %v856_v59 = vsub.f32 %v823_v23, %v846_v57  ;;  %v857_v4 = vsub.f32 %v3968_v24, %v849_v3 }
 0x3fa   : > { %v3544_v47 = vpop.eup %3543  ;;  %3549 = vpow2.f32 %v862_v50 }
 0x3fb   : > { %v877_v52 = vsel %vm825_vm3, %v3544_v47, 0.0  ;;  %v870_v62 = vmul.f32 1.442695, %v856_v59  ;;  %3551 = vpow2.f32 %v864_v39  ;;  %v872_v6 = vmul.f32 1.442695, %v857_v4 }
 0x3fc   : > { %878 = vadd.xlane.f32.xlu1 %v877_v52 }
 0x3fd   : > { %3553 = vpow2.f32 %v870_v62 }
 0x3fe   : > { %3555 = vpow2.f32 %v872_v6 }
 0x402   : > { %v3978_v53 = vpop.eup %3545 }
 0x403   : > { %v889_v54 = vsel %vm825_vm3, %v3978_v53, 0.0 }
 0x404   : > { %890 = vadd.xlane.f32.xlu1 %v889_v54 }
 0x406   : > { %v3982_v55 = vpop.eup %3547 }
 0x407   : > { %v886_v29 = vsel %vm825_vm3, %v3982_v55, 0.0  ;;  %v3986_v38 = vpop.eup %3549 }
 0x408   : > { %887 = vadd.xlane.f32.xlu0 %v886_v29  ;;  %v880_v56 = vsel %vm825_vm3, %v3986_v38, 0.0  ;;  %v3995_v49 = vpop.eup %3551 }
 0x409   : > { %v883_v2 = vsel %vm825_vm3, %v3995_v49, 0.0 }
 0x40a   : > { %v3997_v63 = vpop.eup %3553 }
 0x40b   : > { %v892_v0 = vsel %vm825_vm3, %v3997_v63, 0.0  ;;  %v4009_v7 = vpop.eup %3555 }
 0x40c   : > { %881 = vadd.xlane.f32.xlu0 %v880_v56  ;;  %v895_v9 = vsel %vm825_vm3, %v4009_v7, 0.0 }
 0x415   : > { %965 = vrot.lane.b32.xlu1 %v3869_v5, %s3696_s17 }
 0x419   : > { %1012 = vrot.lane.b32.xlu1 %v3875_v15, %s3696_s17 }
 0x41d   : > { %1059 = vrot.lane.b32.xlu1 %v3878_v17, %s3696_s17 }
 0x422   : > { %918 = vrot.lane.b32.xlu0 %v3871_v8, %s3696_s17 }
 0x441   : > { %893 = vadd.xlane.f32.xlu0 %v892_v0  ;;  %884 = vadd.xlane.f32.xlu1 %v883_v2 }
 0x452   : > { %1163 = vrot.lane.b32.xlu1 %v3869_v5, %s3697_s18 }
 0x457   : > { %1112 = vrot.lane.b32.xlu0 %v3871_v8, %s3697_s18 }
 0x45b   : > { %1110 = vrot.lane.b32.xlu0 %v3871_v8, %s3698_s19 }
 0x45f   : > { %1161 = vrot.lane.b32.xlu0 %v3869_v5, %s3698_s19 }
 0x463   : > { %1212 = vrot.lane.b32.xlu0 %v3875_v15, %s3698_s19 }
 0x476   : > { %896 = vadd.xlane.f32.xlu1 %v895_v9 }
 0x481   : > { %v876_v11 = vpop.xlane.xlu0 %875 }
 0x485   : > { %v879_v10 = vpop.xlane.xlu1 %878 }
 0x486   : > { %3557 = vrcp.f32 %v879_v10 }
 0x487   : > { %1214 = vrot.lane.b32.xlu1 %v3875_v15, %s3697_s18  ;;  %3559 = vrcp.f32 %v876_v11 }
 0x48b   : > { %1265 = vrot.lane.b32.xlu1 %v3878_v17, %s3697_s18 }
 0x48d   : > { %v891_v12 = vpop.xlane.xlu1 %890 }
 0x48e   : > { %3561 = vrcp.f32 %v891_v12 }
 0x48f   : > { %1263 = vrot.lane.b32.xlu1 %v3878_v17, %s3698_s19 }
 0x491   : > { %v888_v14 = vpop.xlane.xlu0 %887  ;;  %v966_v16 = vpop.permute.xlu1 %965 }
 0x492   : > { %3563 = vrcp.f32 %v888_v14  ;;  %3295 = vmatpush3.bf16.msra.mxu1 %v966_v16  ;;  %v3115_v16 = vld [vmem:[%s4544_s3 + $0x10] sm:$0xff] }
 0x493   : > { %3306 = vmatprep.subr.bf16.mxu1 %v3693_v48  ;;  %v3558_v19 = vpop.eup %3557 }
 0x494   : > { %v3560_v23 = vpop.eup %3559  ;;  %v901_v24 = vmul.f32 %v3558_v19, %v3544_v47 }
 0x495   : > { %v882_v22 = vpop.xlane.xlu0 %881  ;;  %v899_v26 = vmul.f32 %v3560_v23, %v3973_v46  ;;  %v1013_v31 = vpop.permute.xlu1 %1012 }
 0x496   : > { %3565 = vrcp.f32 %v882_v22 }
 0x497   : > { %v914_v27 = vpack.c.bf16 %v901_v24, %v899_v26 }
 0x499   : > { %v919_v25 = vpop.permute.xlu0 %918  ;;  %v1060_v37 = vpop.permute.xlu1 %1059 }
 0x49a   : > { %3289 = vmatpush3.bf16.msra.mxu0 %v919_v25  ;;  %v3116_v25 = vld [vmem:[%s4544_s3 + $0x18] sm:$0xff] }
 0x49b   : > { %3300 = vmatprep.subr.bf16.mxu0 %v3693_v48  ;;  %v3562_v30 = vpop.eup %3561 }
 0x49c   : > { %v909_v35 = vmul.f32 %v3562_v30, %v3978_v53 }
 0x49d   : > { %3291 = vmatmul.mubr.msk.bf16.vlgmr.msra.gmra.mxu0 %vm825_vm3, %v914_v27 }
 0x49e   : > { %3301 = vmatpush3.bf16.msra.mxu0 %v1013_v31  ;;  %3302 = vmatprep.mubr.msk.bf16.mxu0 %vm3694_vm1, %v3693_v48 }
 0x49f   : > { %v3564_v32 = vpop.eup %3563  ;;  %3312 = vmatprep.subr.bf16.mxu0 %v3693_v48 }
 0x4a0   : > { %v907_v33 = vmul.f32 %v3564_v32, %v3982_v55 }
 0x4a2   : > { %v916_v36 = vpack.c.bf16 %v909_v35, %v907_v33 }
 0x4a3   : > { %v3566_v28 = vpop.eup %3565 }
 0x4a4   : > { %v903_v50 = vmul.f32 %v3566_v28, %v3986_v38 }
 0x4a5   : > { %3303 = vmatmul.mubr.msk.bf16.vlgmr.msra.gmra.mxu0 %vm825_vm3, %v916_v36 }
 0x4a6   : > { %3314 = vmatprep.mubr.msk.bf16.mxu0 %vm3694_vm1, %v3693_v48 }
 0x4ca   : > { %v894_v20 = vpop.xlane.xlu0 %893  ;;  %v885_v41 = vpop.xlane.xlu1 %884 }
 0x4cb   : > { %3567 = vrcp.f32 %v885_v41 }
 0x4cc   : > { %3569 = vrcp.f32 %v894_v20 }
 0x4ce   : > { %v1113_v43 = vpop.permute.xlu0 %1112  ;;  %v1164_v47 = vpop.permute.xlu1 %1163 }
 0x4cf   : > { %v1118_v44 = vsel %vm601_vm2, %v1113_v43, 0  ;;  %v1169_v39 = vsel %vm601_vm2, %v1164_v47, 0 }
 0x4d0   : > { %3313 = vmatpush3.bf16.xpose.msra.mxu0 %v1118_v44 }
 0x4d1   : > { %3324 = vmatprep.subr.bf16.mxu0 %v3693_v48 }
 0x4d2   : > { %v1111_v45 = vpop.permute.xlu0 %1110 }
 0x4d6   : > { %v1162_v55 = vpop.permute.xlu0 %1161 }
 0x4d7   : > { %3315 = vmatmul.mubr.msk.bf16.vlgmr.msra.gmra.mxu0 %vm601_vm2, %v1111_v45 }
 0x4d8   : > { %3326 = vmatprep.mubr.msk.bf16.mxu0 %vm3694_vm1, %v3693_v48  ;;  %v3568_v46 = vpop.eup %3567 }
 0x4d9   : > { %v905_v21 = vmul.f32 %v3568_v46, %v3995_v49  ;;  %v3570_v29 = vpop.eup %3569 }
 0x4da   : > { %v1213_v38 = vpop.permute.xlu0 %1212  ;;  %v911_v57 = vmul.f32 %v3570_v29, %v3997_v63 }
 0x4db   : > { %v915_v40 = vpack.c.bf16 %v905_v21, %v903_v50 }
 0x4dd   : > { %3297 = vmatmul.mubr.msk.bf16.vlgmr.msra.gmra.mxu1 %vm825_vm3, %v915_v40 }
 0x4de   : > { %3307 = vmatpush3.bf16.msra.mxu1 %v1060_v37  ;;  %3308 = vmatprep.mubr.msk.bf16.mxu1 %vm3694_vm1, %v3693_v48 }
 0x4df   : > { %3318 = vmatprep.subr.bf16.mxu1 %v3693_v48 }
 0x4ff   : > { %v897_v52 = vpop.xlane.xlu1 %896 }
 0x500   : > { %3571 = vrcp.f32 %v897_v52 }
 0x503   : > { %v1215_v53 = vpop.permute.xlu1 %1214 }
 0x504   : > { %v1220_v54 = vsel %vm601_vm2, %v1215_v53, 0 }
 0x505   : > { %3325 = vmatpush3.bf16.xpose.msra.mxu0 %v1220_v54 }
 0x506   : > { %3336 = vmatprep.subr.bf16.mxu0 %v3693_v48 }
 0x507   : > { %v1266_v62 = vpop.permute.xlu1 %1265 }
 0x508   : > { %v1271_v49 = vsel %vm601_vm2, %v1266_v62, 0 }
 0x50b   : > { %v1264_v63 = vpop.permute.xlu1 %1263 }
 0x50c   : > { %3327 = vmatmul.mubr.msk.bf16.vlgmr.msra.gmra.mxu0 %vm601_vm2, %v1213_v38 }
 0x50d   : > { %v3572_v56 = vpop.eup %3571  ;;  %3338 = vmatprep.mubr.msk.bf16.mxu0 %vm3694_vm1, %v3693_v48 }
 0x50e   : > { %v913_v58 = vmul.f32 %v3572_v56, %v4009_v7 }
 0x510   : > { %v917_v59 = vpack.c.bf16 %v913_v58, %v911_v57 }
 0x512   : > { %3309 = vmatmul.mubr.msk.bf16.vlgmr.msra.gmra.mxu1 %vm825_vm3, %v917_v59 }
 0x513   : > { %3319 = vmatpush3.bf16.xpose.msra.mxu1 %v1169_v39  ;;  %3320 = vmatprep.mubr.msk.bf16.mxu1 %vm3694_vm1, %v3693_v48 }
 0x514   : > { %3330 = vmatprep.subr.bf16.mxu1 %v3693_v48 }
 0x51a   : > { %3321 = vmatmul.mubr.msk.bf16.vlgmr.msra.gmra.mxu1 %vm601_vm2, %v1162_v55 }
 0x51b   : > { %3331 = vmatpush3.bf16.xpose.msra.mxu1 %v1271_v49  ;;  %3332 = vmatprep.mubr.msk.bf16.mxu1 %vm3694_vm1, %v3693_v48 }
 0x51c   : > { %3342 = vmatprep.subr.bf16.mxu1 %v3693_v48 }
 0x522   : > { %3333 = vmatmul.mubr.msk.bf16.vlgmr.msra.gmra.mxu1 %vm601_vm2, %v1264_v63 }
 0x523   : > { %3344 = vmatprep.mubr.msk.bf16.mxu1 %vm3694_vm1, %v3693_v48 }
 0x55d   : > { %v4059_v0 = vpop.f32.mrf.mxu0 }
 0x55f   : > { %v3292_v2 = vpop.f32.mrf.mxu0 }
 0x561   : > { %v4061_v3 = vpop.f32.mrf.mxu0 }
 0x562   : > { %v1106_v4 = vpack.c.bf16 %v4061_v3, %v4059_v0 }
 0x563   : > { %v3293_v6 = vpop.f32.mrf.mxu0 }
 0x565   : > { %v4065_v7 = vpop.f32.mrf.mxu0 }
 0x567   : > { %v3304_v9 = vpop.f32.mrf.mxu0 }
 0x569   : > { %v4067_v10 = vpop.f32.mrf.mxu0 }
 0x56a   : > { %v1108_v11 = vpack.c.bf16 %v4067_v10, %v4065_v7 }
 0x56b   : > { %v3305_v12 = vpop.f32.mrf.mxu0 }
 0x597   : > { %v1154_v14 = vpop.f32.mrf.mxu0 }
 0x598   : > { %v1314_v19 = vmul.f32 0.35355338, %v1154_v14 }
 0x599   : > { %v3316_v22 = vpop.f32.mrf.mxu0 }
 0x59a   : > { %v1325_v23 = vadd.f32 %v3115_v16, %v1314_v19 }
 0x59b   : > { %v1157_v24 = vpop.f32.mrf.mxu0 }
 0x59c   : > { %v1315_v26 = vmul.f32 0.35355338, %v1157_v24  ;;  %v1333_v27 = vadd.f32 %v1325_v23, %v3911_v34 }
 0x59d   : > { %v3317_v30 = vpop.f32.mrf.mxu0  ;;  %v4078_v32 = vpop.f32.mrf.mxu1 }
 0x59e   : > { %v1326_v31 = vadd.f32 %v3116_v25, %v1315_v26  ;;  %v1341_v33 = vsel %vm825_vm3, %v1333_v27, -inf }
 0x59f   : > { %1342 = vmax.xlane.f32.xlu0 %v1341_v33  ;;  %v3298_v35 = vpop.f32.mrf.mxu1 }
 0x5a0   : > { %v1334_v36 = vadd.f32 %v1326_v31, %v3920_v42 }
 0x5a1   : > { %v4082_v37 = vpop.f32.mrf.mxu1 }
 0x5a2   : > { %v1344_v20 = vsel %vm825_vm3, %v1334_v36, -inf  ;;  %v1107_v41 = vpack.c.bf16 %v4082_v37, %v4078_v32 }
 0x5a3   : > { %1345 = vmax.xlane.f32.xlu1 %v1344_v20  ;;  %v3299_v43 = vpop.f32.mrf.mxu1 }
 0x5cc   : > { %v1256_v34 = vpop.f32.mrf.mxu0 }
 0x5cd   : > { %v1318_v56 = vmul.f32 0.35355338, %v1256_v34 }
 0x5ce   : > { %v3328_v44 = vpop.f32.mrf.mxu0 }
 0x5d0   : > { %v1259_v45 = vpop.f32.mrf.mxu0 }
 0x5d1   : > { %v1319_v28 = vmul.f32 0.35355338, %v1259_v45 }
 0x5d2   : > { %v4087_v46 = vpop.f32.mrf.mxu1  ;;  %v3329_v50 = vpop.f32.mrf.mxu0 }
 0x5d3   : > { %v1330_v21 = vadd.f32 %v3116_v25, %v1319_v28 }
 0x5d4   : > { %v3310_v40 = vpop.f32.mrf.mxu1 }
 0x5d5   : > { %v1338_v42 = vadd.f32 %v1330_v21, %v3934_v60  ;;  %v1329_v60 = vadd.f32 %v3115_v16, %v1318_v56 }
 0x5d6   : > { %v4090_v47 = vpop.f32.mrf.mxu1 }
 0x5d7   : > { %v1109_v52 = vpack.c.bf16 %v4090_v47, %v4087_v46  ;;  %v1356_v53 = vsel %vm825_vm3, %v1338_v42, -inf  ;;  %v1337_v22 = vadd.f32 %v1329_v60, %v3945_v1 }
 0x5d8   : > { %1357 = vmax.xlane.f32.xlu1 %v1356_v53  ;;  %v3311_v54 = vpop.f32.mrf.mxu1 }
 0x5d9   : > { %v1353_v31 = vsel %vm825_vm3, %v1337_v22, -inf }
 0x5da   : > { %v1205_v55 = vpop.f32.mrf.mxu1 }
 0x5db   : > { %v1316_v29 = vmul.f32 0.35355338, %v1205_v55 }
 0x5dc   : > { %v3322_v38 = vpop.f32.mrf.mxu1 }
 0x5dd   : > { %v1327_v57 = vadd.f32 %v3115_v16, %v1316_v29 }
 0x5de   : > { %v1208_v58 = vpop.f32.mrf.mxu1 }
 0x5df   : > { %v1317_v59 = vmul.f32 0.35355338, %v1208_v58  ;;  %v1335_v39 = vadd.f32 %v1327_v57, %v3927_v51 }
 0x5e0   : > { %v3323_v62 = vpop.f32.mrf.mxu1 }
 0x5e1   : > { %v1328_v49 = vadd.f32 %v3116_v25, %v1317_v59  ;;  %v1347_v63 = vsel %vm825_vm3, %v1335_v39, -inf }
 0x5e2   : > { %1348 = vmax.xlane.f32.xlu0 %v1347_v63  ;;  %v1307_v2 = vpop.f32.mrf.mxu1 }
 0x5e3   : > { %v1320_v6 = vmul.f32 0.35355338, %v1307_v2  ;;  %v1336_v9 = vadd.f32 %v1328_v49, %v3939_v61 }
 0x5e4   : > { %v3334_v12 = vpop.f32.mrf.mxu1 }
 0x5e5   : > { %v1331_v14 = vadd.f32 %v3115_v16, %v1320_v6  ;;  %v1350_v19 = vsel %vm825_vm3, %v1336_v9, -inf }
 0x5e6   : > { %1351 = vmax.xlane.f32.xlu0 %v1350_v19  ;;  %v1310_v23 = vpop.f32.mrf.mxu1 }
 0x5e7   : > { %v1321_v24 = vmul.f32 0.35355338, %v1310_v23  ;;  %v1339_v33 = vadd.f32 %v1331_v14, %v3958_v13 }
 0x5e8   : > { %v3335_v26 = vpop.f32.mrf.mxu1 }
 0x5e9   : > { %v1332_v30 = vadd.f32 %v3116_v25, %v1321_v24  ;;  %v1359_v20 = vsel %vm825_vm3, %v1339_v33, -inf }
 0x5ea   : > { %1354 = vmax.xlane.f32.xlu0 %v1353_v31 }
 0x5eb   : > { %v4103_v35 = vadd.f32 %v1332_v30, %v3963_v18 }
 0x5ed   : > { %v1362_v16 = vsel %vm825_vm3, %v4103_v35, -inf }
 0x5ee   : > { %1360 = vmax.xlane.f32.xlu0 %v1359_v20  ;;  %1363 = vmax.xlane.f32.xlu1 %v1362_v16 }
 0x628   : > { %v1343_v1 = vpop.xlane.xlu0 %1342 }
 0x629   : > { %v1365_v43 = vsub.f32 %v1333_v27, %v1343_v1 }
 0x62b   : > { %v1373_v34 = vmul.f32 1.442695, %v1365_v43 }
 0x62c   : > { %v1346_v44 = vpop.xlane.xlu1 %1345 }
 0x62d   : > { %3573 = vpow2.f32 %v1373_v34  ;;  %v1366_v25 = vsub.f32 %v1334_v36, %v1346_v44 }
 0x62f   : > { %v1375_v45 = vmul.f32 1.442695, %v1366_v25 }
 0x631   : > { %3575 = vpow2.f32 %v1375_v45 }
 0x63a   : > { %v4108_v28 = vpop.eup %3573 }
 0x63b   : > { %v1389_v50 = vsel %vm825_vm3, %v4108_v28, 0.0 }
 0x63c   : > { %1390 = vadd.xlane.f32.xlu0 %v1389_v50 }
 0x63e   : > { %v4112_v21 = vpop.eup %3575 }
 0x63f   : > { %v1392_v40 = vsel %vm825_vm3, %v4112_v21, 0.0 }
 0x640   : > { %1393 = vadd.xlane.f32.xlu1 %v1392_v40 }
 0x661   : > { %v1358_v53 = vpop.xlane.xlu1 %1357 }
 0x662   : > { %v1370_v55 = vsub.f32 %v1338_v42, %v1358_v53 }
 0x664   : > { %v1383_v56 = vmul.f32 1.442695, %v1370_v55 }
 0x66b   : > { %v1349_v27 = vpop.xlane.xlu0 %1348 }
 0x66c   : > { %v1367_v54 = vsub.f32 %v1335_v39, %v1349_v27 }
 0x66e   : > { %v1377_v29 = vmul.f32 1.442695, %v1367_v54 }
 0x66f   : > { %v1352_v36 = vpop.xlane.xlu0 %1351 }
 0x670   : > { %3577 = vpow2.f32 %v1377_v29  ;;  %v1368_v38 = vsub.f32 %v1336_v9, %v1352_v36 }
 0x672   : > { %v1379_v57 = vmul.f32 1.442695, %v1368_v38 }
 0x673   : > { %v1355_v58 = vpop.xlane.xlu0 %1354 }
 0x674   : > { %3579 = vpow2.f32 %v1379_v57  ;;  %v1369_v59 = vsub.f32 %v1337_v22, %v1355_v58 }
 0x675   : > { %3581 = vpow2.f32 %v1383_v56 }
 0x676   : > { %v1381_v62 = vmul.f32 1.442695, %v1369_v59 }
 0x677   : > { %v1361_v60 = vpop.xlane.xlu0 %1360  ;;  %v1364_v24 = vpop.xlane.xlu1 %1363 }
 0x678   : > { %3583 = vpow2.f32 %v1381_v62  ;;  %v1371_v49 = vsub.f32 %v1339_v33, %v1361_v60  ;;  %v1372_v26 = vsub.f32 %v4103_v35, %v1364_v24  ;;  %v588_v60 = vld [vmem:[%s4547_s6] sm:$0xff] }
 0x67a   : > { %v1385_v63 = vmul.f32 1.442695, %v1371_v49  ;;  %v1387_v30 = vmul.f32 1.442695, %v1372_v26  ;;  %v589_v49 = vld [vmem:[%s4547_s6 + $0x8] sm:$0xff] }
 0x67c   : > { %3585 = vpow2.f32 %v1385_v63 }
 0x67d   : > { %v4116_v2 = vpop.eup %3577  ;;  %3587 = vpow2.f32 %v1387_v30 }
 0x67e   : > { %v1395_v42 = vsel %vm825_vm3, %v4116_v2, 0.0 }
 0x67f   : > { %1396 = vadd.xlane.f32.xlu0 %v1395_v42 }
 0x681   : > { %v3580_v39 = vpop.eup %3579 }
 0x682   : > { %v1398_v6 = vsel %vm825_vm3, %v3580_v39, 0.0  ;;  %v4121_v9 = vpop.eup %3581 }
 0x683   : > { %1399 = vadd.xlane.f32.xlu1 %v1398_v6  ;;  %v1404_v19 = vsel %vm825_vm3, %v4121_v9, 0.0 }
 0x685   : > { %v4123_v12 = vpop.eup %3583 }
 0x686   : > { %v1401_v14 = vsel %vm825_vm3, %v4123_v12, 0.0 }
 0x687   : > { %1402 = vadd.xlane.f32.xlu0 %v1401_v14  ;;  %1405 = vadd.xlane.f32.xlu1 %v1404_v19 }
 0x689   : > { %v4129_v22 = vpop.eup %3585 }
 0x68a   : > { %v1407_v23 = vsel %vm825_vm3, %v4129_v22, 0.0  ;;  %v3588_v31 = vpop.eup %3587 }
 0x68b   : > { %1408 = vadd.xlane.f32.xlu0 %v1407_v23  ;;  %v1410_v33 = vsel %vm825_vm3, %v3588_v31, 0.0 }
 0x698   : > { %1480 = vrot.lane.b32.xlu1 %v3869_v5, %s3699_s24 }
 0x69c   : > { %1527 = vrot.lane.b32.xlu1 %v3875_v15, %s3699_s24 }
 0x6a1   : > { %1433 = vrot.lane.b32.xlu0 %v3871_v8, %s3699_s24 }
 0x6a5   : > { %1790 = vrot.lane.b32.xlu0 %v3871_v8, %s3700_s25 }
 0x6a9   : > { %1788 = vrot.lane.b32.xlu0 %v3871_v8, %s3701_s26 }
 0x6ad   : > { %1839 = vrot.lane.b32.xlu0 %v3869_v5, %s3701_s26 }
 0x6b1   : > { %1890 = vrot.lane.b32.xlu0 %v3875_v15, %s3701_s26 }
 0x6c0   : > { %1411 = vadd.xlane.f32.xlu1 %v1410_v33 }
 0x6c5   : > { %v1391_v20 = vpop.xlane.xlu0 %1390 }
 0x6c9   : > { %v1394_v35 = vpop.xlane.xlu1 %1393 }
 0x6ca   : > { %3589 = vrcp.f32 %v1394_v35 }
 0x6cb   : > { %3591 = vrcp.f32 %v1391_v20 }
 0x6d1   : > { %1574 = vrot.lane.b32.xlu1 %v3878_v17, %s3699_s24 }
 0x6d5   : > { %1841 = vrot.lane.b32.xlu1 %v3869_v5, %s3700_s25 }
 0x6d7   : > { %v3590_v44 = vpop.eup %3589 }
 0x6d8   : > { %v3592_v50 = vpop.eup %3591  ;;  %v1416_v40 = vmul.f32 %v3590_v44, %v4112_v21 }
 0x6d9   : > { %1892 = vrot.lane.b32.xlu1 %v3875_v15, %s3700_s25  ;;  %v1414_v54 = vmul.f32 %v3592_v50, %v4108_v28 }
 0x6db   : > { %v1429_v29 = vpack.c.bf16 %v1416_v40, %v1414_v54 }
 0x6dd   : > { %1943 = vrot.lane.b32.xlu1 %v3878_v17, %s3700_s25 }
 0x6e1   : > { %1941 = vrot.lane.b32.xlu1 %v3878_v17, %s3701_s26  ;;  %s3702_s26 = smov 48  }
 0x708   : > { %v1397_v16 = vpop.xlane.xlu0 %1396 }
 0x709   : > { %3593 = vrcp.f32 %v1397_v16 }
 0x70c   : > { %v1400_v1 = vpop.xlane.xlu1 %1399 }
 0x70d   : > { %3595 = vrcp.f32 %v1400_v1 }
 0x710   : > { %v1403_v43 = vpop.xlane.xlu0 %1402  ;;  %v1406_v34 = vpop.xlane.xlu1 %1405 }
 0x711   : > { %3597 = vrcp.f32 %v1403_v43 }
 0x712   : > { %3599 = vrcp.f32 %v1406_v34 }
 0x714   : > { %v1409_v25 = vpop.xlane.xlu0 %1408  ;;  %v1481_v45 = vpop.permute.xlu1 %1480 }
 0x715   : > { %3343 = vmatpush3.bf16.msra.mxu1 %v1481_v45  ;;  %3601 = vrcp.f32 %v1409_v25 }
 0x716   : > { %3354 = vmatprep.subr.bf16.mxu1 %v3693_v48  ;;  %v3594_v53 = vpop.eup %3593 }
 0x717   : > { %v1418_v36 = vmul.f32 %v3594_v53, %v4116_v2  ;;  %v592_v2 = vpack.c.bf16 %v589_v49, %v588_v60 }
 0x718   : > { %v1434_v27 = vpop.permute.xlu0 %1433  ;;  %v1528_v56 = vpop.permute.xlu1 %1527 }
 0x719   : > { %3337 = vmatpush3.bf16.msra.mxu0 %v1434_v27  ;;  %v1721_v19 = vsel %vm1639_vm4, %v592_v2, 0  ;;  %v1626_v24 = vrot.slane %v592_v2, 4 }
 0x71a   : > { %v3596_v55 = vpop.eup %3595  ;;  %3348 = vmatprep.subr.bf16.mxu0 %v3693_v48 }
 0x71b   : > { %v1420_v38 = vmul.f32 %v3596_v55, %v3580_v39 }
 0x71c   : > { %3339 = vmatmul.mubr.msk.bf16.vlgmr.msra.gmra.mxu0 %vm825_vm3, %v1429_v29  ;;  %v1791_v0 = vpop.permute.xlu0 %1790 }
 0x71d   : > { %3349 = vmatpush3.bf16.msra.mxu0 %v1528_v56  ;;  %v1430_v57 = vpack.c.bf16 %v1420_v38, %v1418_v36  ;;  %3350 = vmatprep.mubr.msk.bf16.mxu0 %vm3694_vm1, %v3693_v48  ;;  %v1796_v1 = vsel %vm601_vm2, %v1791_v0, 0  ;;  %v3133_v0 = vld [vmem:[%s4544_s3 + $0x20] sm:$0xff] }
 0x71e   : > { %v3598_v21 = vpop.eup %3597  ;;  %3500 = vmatprep.subr.msk.bf16.mxu0 %vm1639_vm4, %v1626_v24 }
 0x71f   : > { %v3600_v58 = vpop.eup %3599  ;;  %3345 = vmatmul.mubr.msk.bf16.vlgmr.msra.gmra.mxu1 %vm825_vm3, %v1430_v57  ;;  %v1422_v28 = vmul.f32 %v3598_v21, %v4123_v12 }
 0x720   : > { %v1424_v59 = vmul.f32 %v3600_v58, %v4121_v9  ;;  %3356 = vmatprep.mubr.msk.bf16.mxu1 %vm3694_vm1, %v3693_v48 }
 0x722   : > { %v1431_v62 = vpack.c.bf16 %v1424_v59, %v1422_v28  ;;  %v3602_v39 = vpop.eup %3601 }
 0x723   : > { %v1426_v9 = vmul.f32 %v3602_v39, %v4129_v22  ;;  %v1641_v22 = vsel %vm1639_vm4, %v1626_v24, 0 }
 0x724   : > { %3351 = vmatmul.mubr.msk.bf16.vlgmr.msra.gmra.mxu0 %vm825_vm3, %v1431_v62 }
 0x725   : > { %3361 = vmatpush3.bf16.msra.mxu0 %v1641_v22 }
 0x726   : > { %3380 = vmatprep.subr.bf16.mxu0 %v3693_v48 }
 0x749   : > { %v1412_v63 = vpop.xlane.xlu1 %1411 }
 0x74a   : > { %3603 = vrcp.f32 %v1412_v63 }
 0x74d   : > { %v1575_v42 = vpop.permute.xlu1 %1574 }
 0x74e   : > { %3355 = vmatpush3.bf16.msra.mxu1 %v1575_v42 }
 0x74f   : > { %3501 = vmatprep.subr.msk.bf16.mxu1 %vm1639_vm4, %v592_v2 }
 0x751   : > { %v1842_v23 = vpop.permute.xlu1 %1841 }
 0x752   : > { %v1847_v26 = vsel %vm601_vm2, %v1842_v23, 0 }
 0x755   : > { %v1893_v3 = vpop.permute.xlu1 %1892 }
 0x756   : > { %v1898_v38 = vsel %vm601_vm2, %v1893_v3, 0 }
 0x757   : > { %v3604_v6 = vpop.eup %3603 }
 0x758   : > { %v1428_v12 = vmul.f32 %v3604_v6, %v3588_v31 }
 0x759   : > { %v1944_v32 = vpop.permute.xlu1 %1943 }
 0x75a   : > { %v1432_v14 = vpack.c.bf16 %v1428_v12, %v1426_v9  ;;  %v1949_v7 = vsel %vm601_vm2, %v1944_v32, 0 }
 0x75c   : > { %3357 = vmatmul.mubr.msk.bf16.vlgmr.msra.gmra.mxu1 %vm825_vm3, %v1432_v14 }
 0x75d   : > { %3372 = vmatprep.mubr.msk.bf16.mxu1 %vm601_vm2, %v1106_v4  ;;  %3371 = vmatpush3.bf16.msra.mxu1 %v1721_v19  ;;  %v1789_v4 = vpop.permute.xlu0 %1788  ;;  %v1942_v10 = vpop.permute.xlu1 %1941 }
 0x75e   : > { %3386 = vmatprep.subr.bf16.mxu1 %v3693_v48 }
 0x761   : > { %v1840_v37 = vpop.permute.xlu0 %1839 }
 0x764   : > { %3373 = vmatmul.mubr.msk.bf16.vlgmr.msra.gmra.mxu1 %vm601_vm2, %v1107_v41 }
 0x765   : > { %3387 = vmatpush3.bf16.xpose.msra.mxu1 %v1847_v26  ;;  %3376 = vmatprep.mubr.msk.bf16.mxu1 %vm601_vm2, %v1108_v11  ;;  %v1891_v58 = vpop.permute.xlu0 %1890 }
 0x766   : > { %3398 = vmatprep.subr.bf16.mxu1 %v3693_v48 }
 0x76c   : > { %3377 = vmatmul.mubr.msk.bf16.gmra.mxu1 %vm601_vm2, %v1109_v52 }
 0x76d   : > { %3388 = vmatprep.mubr.msk.bf16.mxu1 %vm3694_vm1, %v3693_v48 }
 0x774   : > { %3389 = vmatmul.mubr.msk.bf16.vlgmr.msra.gmra.mxu1 %vm601_vm2, %v1840_v37 }
 0x775   : > { %3399 = vmatpush3.bf16.xpose.msra.mxu1 %v1949_v7  ;;  %3400 = vmatprep.mubr.msk.bf16.mxu1 %vm3694_vm1, %v3693_v48 }
 0x776   : > { %3410 = vmatprep.subr.bf16.mxu1 %v3693_v48 }
 0x77c   : > { %3401 = vmatmul.mubr.msk.bf16.vlgmr.msra.gmra.mxu1 %vm601_vm2, %v1942_v10 }
 0x77d   : > { %3412 = vmatprep.mubr.msk.bf16.mxu1 %vm3694_vm1, %v3693_v48 }
 0x7dc   : > { %v1473_v11 = vpop.f32.mrf.mxu0 }
 0x7de   : > { %v3340_v41 = vpop.f32.mrf.mxu0 }
 0x7df   : > { %v1520_v46 = vpop.f32.mrf.mxu1 }
 0x7e0   : > { %v1476_v47 = vpop.f32.mrf.mxu0 }
 0x7e1   : > { %v1621_v52 = vpack.c.bf16 %v1476_v47, %v1473_v11  ;;  %v3346_v30 = vpop.f32.mrf.mxu1  ;;  %v3134_v11 = vld [vmem:[%s4544_s3 + $0x28] sm:$0xff]  ;;  %v4260_v47 = vld [vmem:[%s4549_s8] sm:$0xff] }
 0x7e2   : > { %v3341_v31 = vpop.f32.mrf.mxu0 }
 0x7e3   : > { %v1523_v33 = vpop.f32.mrf.mxu1  ;;  %3362 = vmatprep.mubr.msk.bf16.mxu0 %vm601_vm2, %v1621_v52 }
 0x7e4   : > { %v1622_v35 = vpack.c.bf16 %v1523_v33, %v1520_v46  ;;  %v1567_v20 = vpop.f32.mrf.mxu0 }
 0x7e5   : > { %v3347_v16 = vpop.f32.mrf.mxu1 }
 0x7e6   : > { %v3352_v43 = vpop.f32.mrf.mxu0  ;;  %3363 = vmatmul.mubr.msk.bf16.vlgmr.msra.gmra.mxu0 %vm601_vm2, %v1622_v35 }
 0x7e7   : > { %3381 = vmatpush3.bf16.xpose.msra.mxu0 %v1796_v1  ;;  %v4268_v43 = vld [vmem:[%s4549_s8 + $0x8] sm:$0xff] }
 0x7e8   : > { %v1570_v34 = vpop.f32.mrf.mxu0  ;;  %3392 = vmatprep.subr.bf16.mxu0 %v3693_v48 }
 0x7e9   : > { %v1623_v44 = vpack.c.bf16 %v1570_v34, %v1567_v20 }
 0x7ea   : > { %v3353_v25 = vpop.f32.mrf.mxu0 }
 0x7eb   : > { %3366 = vmatprep.mubr.msk.bf16.mxu0 %vm601_vm2, %v1623_v44 }
 0x81c   : > { %v1614_v45 = vpop.f32.mrf.mxu1 }
 0x81e   : > { %v3358_v50 = vpop.f32.mrf.mxu1 }
 0x820   : > { %v1617_v40 = vpop.f32.mrf.mxu1 }
 0x821   : > { %v1624_v53 = vpack.c.bf16 %v1617_v40, %v1614_v45 }
 0x822   : > { %v3359_v27 = vpop.f32.mrf.mxu1 }
 0x823   : > { %3367 = vmatmul.mubr.msk.bf16.gmra.mxu0 %vm601_vm2, %v1624_v53 }
 0x824   : > { %v4209_v54 = vpop.f32.mrf.mxu1  ;;  %3382 = vmatprep.mubr.msk.bf16.mxu0 %vm3694_vm1, %v3693_v48 }
 0x826   : > { %v4213_v55 = vpop.f32.mrf.mxu1 }
 0x828   : > { %v4215_v29 = vpop.f32.mrf.mxu1 }
 0x82a   : > { %v4217_v36 = vpop.f32.mrf.mxu1 }
 0x82b   : > { %3383 = vmatmul.mubr.msk.bf16.vlgmr.msra.gmra.mxu0 %vm601_vm2, %v1789_v4 }
 0x82c   : > { %3393 = vmatpush3.bf16.xpose.msra.mxu0 %v1898_v38  ;;  %v4221_v56 = vpop.f32.mrf.mxu1  ;;  %3394 = vmatprep.mubr.msk.bf16.mxu0 %vm3694_vm1, %v3693_v48 }
 0x82d   : > { %3404 = vmatprep.subr.bf16.mxu0 %v3693_v48 }
 0x82e   : > { %v4226_v57 = vpop.f32.mrf.mxu1 }
 0x830   : > { %v4228_v21 = vpop.f32.mrf.mxu1 }
 0x832   : > { %v4230_v28 = vpop.f32.mrf.mxu1 }
 0x833   : > { %3395 = vmatmul.mubr.msk.bf16.vlgmr.msra.gmra.mxu0 %vm601_vm2, %v1891_v58 }
 0x834   : > { %v1883_v59 = vpop.f32.mrf.mxu1  ;;  %3406 = vmatprep.mubr.msk.bf16.mxu0 %vm3694_vm1, %v3693_v48 }
 0x835   : > { %v1994_v22 = vmul.f32 0.35355338, %v1883_v59 }
 0x836   : > { %v3390_v62 = vpop.f32.mrf.mxu1 }
 0x837   : > { %v2005_v32 = vadd.f32 %v3133_v0, %v1994_v22 }
 0x838   : > { %v1886_v60 = vpop.f32.mrf.mxu1 }
 0x839   : > { %v1995_v7 = vmul.f32 0.35355338, %v1886_v60  ;;  %v2013_v31 = vadd.f32 %v2005_v32, %v3927_v51 }
 0x83a   : > { %v3391_v49 = vpop.f32.mrf.mxu1 }
 0x83b   : > { %v2006_v33 = vadd.f32 %v3134_v11, %v1995_v7  ;;  %v2025_v45 = vsel %vm825_vm3, %v2013_v31, -inf }
 0x83c   : > { %v1985_v63 = vpop.f32.mrf.mxu1 }
 0x83d   : > { %v1998_v44 = vmul.f32 0.35355338, %v1985_v63  ;;  %v2014_v53 = vadd.f32 %v2006_v33, %v3939_v61  ;;  %v4278_v63 = vld [vmem:[%s4549_s8 + $0x20] sm:$0xff]  ;;  %v4284_v61 = vld [vmem:[%s4549_s8 + $0x28] sm:$0xff] }
 0x83e   : > { %v3402_v2 = vpop.f32.mrf.mxu1 }
 0x83f   : > { %v2009_v58 = vadd.f32 %v3133_v0, %v1998_v44  ;;  %v2028_v49 = vsel %vm825_vm3, %v2014_v53, -inf }
 0x840   : > { %v1988_v42 = vpop.f32.mrf.mxu1 }
 0x841   : > { %v1999_v50 = vmul.f32 0.35355338, %v1988_v42 }
 0x842   : > { %v3403_v39 = vpop.f32.mrf.mxu1 }
 0x843   : > { %v2010_v62 = vadd.f32 %v3134_v11, %v1999_v50 }
 0x8a6   : > { %v4235_v6 = vpop.f32.mrf.mxu0 }
 0x8a8   : > { %v4237_v9 = vpop.f32.mrf.mxu0 }
 0x8aa   : > { %v4239_v12 = vpop.f32.mrf.mxu0 }
 0x8ac   : > { %v4241_v14 = vpop.f32.mrf.mxu0 }
 0x8e3   : > { %v4243_v19 = vpop.f32.mrf.mxu0 }
 0x8e5   : > { %v4245_v23 = vpop.f32.mrf.mxu0 }
 0x8e7   : > { %v4247_v24 = vpop.f32.mrf.mxu0 }
 0x8e9   : > { %v4249_v26 = vpop.f32.mrf.mxu0 }
 0x8eb   : > { %v1832_v3 = vpop.f32.mrf.mxu0 }
 0x8ec   : > { %v1992_v4 = vmul.f32 0.35355338, %v1832_v3  ;;  %v2018_v3 = vadd.f32 %v2010_v62, %v3963_v18 }
 0x8ed   : > { %v3384_v37 = vpop.f32.mrf.mxu0 }
 0x8ee   : > { %v2003_v10 = vadd.f32 %v3133_v0, %v1992_v4  ;;  %v2040_v32 = vsel %vm825_vm3, %v2018_v3, -inf }
 0x8ef   : > { %v1835_v41 = vpop.f32.mrf.mxu0 }
 0x8f0   : > { %v1993_v46 = vmul.f32 0.35355338, %v1835_v41  ;;  %v2011_v52 = vadd.f32 %v4260_v47, %v2003_v10 }
 0x8f1   : > { %v3385_v30 = vpop.f32.mrf.mxu0 }
 0x8f2   : > { %v2004_v35 = vadd.f32 %v3134_v11, %v1993_v46  ;;  %v2019_v20 = vsel %vm825_vm3, %v2011_v52, -inf }
 0x8f3   : > { %2020 = vmax.xlane.f32.xlu0 %v2019_v20  ;;  %v1934_v16 = vpop.f32.mrf.mxu0 }
 0x8f4   : > { %v1996_v1 = vmul.f32 0.35355338, %v1934_v16  ;;  %v2012_v34 = vadd.f32 %v4268_v43, %v2004_v35 }
 0x8f5   : > { %v3396_v25 = vpop.f32.mrf.mxu0 }
 0x8f6   : > { %v2007_v51 = vadd.f32 %v3133_v0, %v1996_v1  ;;  %v2022_v40 = vsel %vm825_vm3, %v2012_v34, -inf  ;;  %v2017_v0 = vadd.f32 %v2009_v58, %v3958_v13 }
 0x8f7   : > { %2023 = vmax.xlane.f32.xlu1 %v2022_v40  ;;  %v1937_v27 = vpop.f32.mrf.mxu0  ;;  %2026 = vmax.xlane.f32.xlu0 %v2025_v45 }
 0x8f8   : > { %v1997_v38 = vmul.f32 0.35355338, %v1937_v27  ;;  %v2015_v2 = vadd.f32 %v4278_v63, %v2007_v51  ;;  %v2037_v4 = vsel %vm825_vm3, %v2017_v0, -inf }
 0x8f9   : > { %v3397_v59 = vpop.f32.mrf.mxu0 }
 0x8fa   : > { %v2008_v60 = vadd.f32 %v3134_v11, %v1997_v38  ;;  %v2031_v22 = vsel %vm825_vm3, %v2015_v2, -inf }
 0x8fb   : > { %2029 = vmax.xlane.f32.xlu0 %v2028_v49 }
 0x8fc   : > { %v4287_v42 = vadd.f32 %v4284_v61, %v2008_v60 }
 0x8fe   : > { %v2034_v39 = vsel %vm825_vm3, %v4287_v42, -inf }
 0x8ff   : > { %2035 = vmax.xlane.f32.xlu1 %v2034_v39  ;;  %2032 = vmax.xlane.f32.xlu0 %v2031_v22 }
 0x903   : > { %2038 = vmax.xlane.f32.xlu0 %v2037_v4  ;;  %2041 = vmax.xlane.f32.xlu1 %v2040_v32 }
 0x97c   : > { %v2021_v37 = vpop.xlane.xlu0 %2020 }
 0x97d   : > { %v2043_v18 = vsub.f32 %v2011_v52, %v2021_v37 }
 0x97f   : > { %v2051_v45 = vmul.f32 1.442695, %v2043_v18 }
 0x980   : > { %v2027_v7 = vpop.xlane.xlu0 %2026  ;;  %v2024_v41 = vpop.xlane.xlu1 %2023 }
 0x981   : > { %v2045_v10 = vsub.f32 %v2013_v31, %v2027_v7  ;;  %v2044_v20 = vsub.f32 %v2012_v34, %v2024_v41 }
 0x983   : > { %v2055_v11 = vmul.f32 1.442695, %v2045_v10  ;;  %v2053_v31 = vmul.f32 1.442695, %v2044_v20 }
 0x984   : > { %v2030_v46 = vpop.xlane.xlu0 %2029 }
 0x985   : > { %v2046_v30 = vsub.f32 %v2014_v53, %v2030_v46  ;;  %3605 = vpow2.f32 %v2055_v11 }
 0x987   : > { %v2057_v33 = vmul.f32 1.442695, %v2046_v30 }
 0x988   : > { %v2036_v13 = vpop.xlane.xlu1 %2035  ;;  %v2033_v35 = vpop.xlane.xlu0 %2032 }
 0x989   : > { %3607 = vpow2.f32 %v2057_v33  ;;  %v2047_v50 = vsub.f32 %v2015_v2, %v2033_v35  ;;  %v2048_v4 = vsub.f32 %v4287_v42, %v2036_v13 }
 0x98b   : > { %v2059_v53 = vmul.f32 1.442695, %v2047_v50  ;;  %v2061_v32 = vmul.f32 1.442695, %v2048_v4 }
 0x98c   : > { %v2039_v16 = vpop.xlane.xlu0 %2038  ;;  %v2042_v1 = vpop.xlane.xlu1 %2041 }
 0x98d   : > { %v2049_v44 = vsub.f32 %v2017_v0, %v2039_v16  ;;  %v2050_v25 = vsub.f32 %v2018_v3, %v2042_v1 }
 0x98f   : > { %v2063_v51 = vmul.f32 1.442695, %v2049_v44  ;;  %v2065_v40 = vmul.f32 1.442695, %v2050_v25 }
 0x991   : > { %3609 = vpow2.f32 %v2063_v51 }
 0x992   : > { %3611 = vpow2.f32 %v2065_v40  ;;  %v3606_v27 = vpop.eup %3605 }
 0x993   : > { %3613 = vpow2.f32 %v2051_v45  ;;  %v2073_v38 = vsel %vm825_vm3, %v3606_v27, 0.0 }
 0x994   : > { %3615 = vpow2.f32 %v2053_v31  ;;  %2074 = vadd.xlane.f32.xlu0 %v2073_v38 }
 0x995   : > { %3617 = vpow2.f32 %v2059_v53 }
 0x996   : > { %v3608_v52 = vpop.eup %3607  ;;  %3619 = vpow2.f32 %v2061_v32 }
 0x997   : > { %v2076_v34 = vsel %vm825_vm3, %v3608_v52, 0.0 }
 0x998   : > { %2077 = vadd.xlane.f32.xlu1 %v2076_v34 }
 0x99e   : > { %v4298_v58 = vpop.eup %3609 }
 0x99f   : > { %v4300_v59 = vpop.eup %3611  ;;  %v2085_v62 = vsel %vm825_vm3, %v4298_v58, 0.0 }
 0x9a0   : > { %v3614_v60 = vpop.eup %3613  ;;  %2086 = vadd.xlane.f32.xlu0 %v2085_v62  ;;  %v2088_v49 = vsel %vm825_vm3, %v4300_v59, 0.0 }
 0x9a1   : > { %v3616_v2 = vpop.eup %3615  ;;  %2089 = vadd.xlane.f32.xlu1 %v2088_v49  ;;  %v2067_v39 = vsel %vm825_vm3, %v3614_v60, 0.0 }
 0x9a2   : > { %v4307_v22 = vpop.eup %3617  ;;  %v2070_v0 = vsel %vm825_vm3, %v3616_v2, 0.0 }
 0x9a3   : > { %v2079_v3 = vsel %vm825_vm3, %v4307_v22, 0.0  ;;  %v4320_v37 = vpop.eup %3619 }
 0x9a4   : > { %2068 = vadd.xlane.f32.xlu0 %v2067_v39  ;;  %v2082_v7 = vsel %vm825_vm3, %v4320_v37, 0.0 }
 0x9a5   : > { %2071 = vadd.xlane.f32.xlu1 %v2070_v0 }
 0x9a8   : > { %2080 = vadd.xlane.f32.xlu0 %v2079_v3 }
 0x9b6   : > { %2158 = vrot.lane.b32.xlu1 %v3869_v5, %s3702_s26 }
 0x9ba   : > { %2205 = vrot.lane.b32.xlu1 %v3875_v15, %s3702_s26 }
 0x9be   : > { %2111 = vrot.lane.b32.xlu0 %v3871_v8, %s3702_s26 }
 0x9c2   : > { %2393 = vrot.lane.b32.xlu0 %v3871_v8, %s3703_s27 }
 0x9c6   : > { %2444 = vrot.lane.b32.xlu0 %v3869_v5, %s3703_s27 }
 0x9ca   : > { %2442 = vrot.lane.b32.xlu0 %v3869_v5, %s3704_s28 }
 0x9ce   : > { %2493 = vrot.lane.b32.xlu0 %v3875_v15, %s3704_s28 }
 0x9de   : > { %2083 = vadd.xlane.f32.xlu1 %v2082_v7 }
 0x9ef   : > { %2252 = vrot.lane.b32.xlu1 %v3878_v17, %s3702_s26 }
 0x9f3   : > { %2391 = vrot.lane.b32.xlu1 %v3871_v8, %s3704_s28 }
 0x9f7   : > { %2495 = vrot.lane.b32.xlu1 %v3875_v15, %s3703_s27 }
 0x9fb   : > { %2546 = vrot.lane.b32.xlu1 %v3878_v17, %s3703_s27 }
 0x9ff   : > { %2544 = vrot.lane.b32.xlu1 %v3878_v17, %s3704_s28  ;;  %s3705_s28 = smov 40  }
 0xa1d   : > { %v2075_v42 = vpop.xlane.xlu0 %2074 }
 0xa1e   : > { %3621 = vrcp.f32 %v2075_v42 }
 0xa21   : > { %v2078_v10 = vpop.xlane.xlu1 %2077 }
 0xa22   : > { %3623 = vrcp.f32 %v2078_v10 }
 0xa29   : > { %v2087_v11 = vpop.xlane.xlu0 %2086 }
 0xa2a   : > { %v2090_v41 = vpop.xlane.xlu1 %2089 }
 0xa2b   : > { %v3622_v46 = vpop.eup %3621 }
 0xa2c   : > { %v2096_v35 = vmul.f32 %v3622_v46, %v3606_v27 }
 0xa2d   : > { %v2069_v30 = vpop.xlane.xlu0 %2068 }
 0xa2e   : > { %3625 = vrcp.f32 %v2069_v30  ;;  %v2072_v33 = vpop.xlane.xlu1 %2071 }
 0xa2f   : > { %v3624_v13 = vpop.eup %3623  ;;  %3627 = vrcp.f32 %v2072_v33 }
 0xa30   : > { %v2098_v18 = vmul.f32 %v3624_v13, %v3608_v52  ;;  %3629 = vrcp.f32 %v2087_v11 }
 0xa31   : > { %v2081_v20 = vpop.xlane.xlu0 %2080  ;;  %3631 = vrcp.f32 %v2090_v41 }
 0xa32   : > { %v2159_v16 = vpop.permute.xlu1 %2158  ;;  %v2108_v1 = vpack.c.bf16 %v2098_v18, %v2096_v35  ;;  %3633 = vrcp.f32 %v2081_v20 }
 0xa33   : > { %3411 = vmatpush3.bf16.msra.mxu1 %v2159_v16 }
 0xa34   : > { %3422 = vmatprep.subr.bf16.mxu1 %v3693_v48 }
 0xa35   : > { %v2112_v44 = vpop.permute.xlu0 %2111 }
 0xa36   : > { %3413 = vmatmul.mubr.msk.bf16.vlgmr.msra.gmra.mxu1 %vm825_vm3, %v2108_v1  ;;  %3405 = vmatpush3.bf16.msra.mxu0 %v2112_v44  ;;  %v2206_v31 = vpop.permute.xlu1 %2205 }
 0xa37   : > { %3416 = vmatprep.subr.bf16.mxu0 %v3693_v48  ;;  %3424 = vmatprep.mubr.msk.bf16.mxu1 %vm3694_vm1, %v3693_v48 }
 0xa3b   : > { %v3626_v25 = vpop.eup %3625 }
 0xa3c   : > { %v3628_v45 = vpop.eup %3627  ;;  %v2092_v50 = vmul.f32 %v3626_v25, %v3614_v60  ;;  %v2394_v60 = vpop.permute.xlu0 %2393 }
 0xa3d   : > { %v2094_v51 = vmul.f32 %v3628_v45, %v3616_v2  ;;  %v3630_v27 = vpop.eup %3629  ;;  %v2399_v2 = vsel %vm601_vm2, %v2394_v60, 0 }
 0xa3e   : > { %v3632_v53 = vpop.eup %3631  ;;  %v2104_v52 = vmul.f32 %v3630_v27, %v4298_v58 }
 0xa3f   : > { %v2107_v40 = vpack.c.bf16 %v2094_v51, %v2092_v50  ;;  %v2106_v34 = vmul.f32 %v3632_v53, %v4300_v59  ;;  %v3634_v58 = vpop.eup %3633 }
 0xa40   : > { %v2445_v0 = vpop.permute.xlu0 %2444  ;;  %v2100_v4 = vmul.f32 %v3634_v58, %v4307_v22  ;;  %v590_v22 = vld [vmem:[%s4547_s6 + $0x10] sm:$0xff] }
 0xa41   : > { %3407 = vmatmul.mubr.msk.bf16.vlgmr.msra.gmra.mxu0 %vm825_vm3, %v2107_v40  ;;  %v2110_v49 = vpack.c.bf16 %v2106_v34, %v2104_v52  ;;  %v2450_v7 = vsel %vm601_vm2, %v2445_v0, 0  ;;  %v4381_v52 = vld [vmem:[%s4544_s3 + $0x30] sm:$0xff] }
 0xa42   : > { %3417 = vmatpush3.bf16.msra.mxu0 %v2206_v31  ;;  %3418 = vmatprep.mubr.msk.bf16.mxu0 %vm3694_vm1, %v3693_v48 }
 0xa44   : > { %v2443_v11 = vpop.permute.xlu0 %2442 }
 0xa67   : > { %v2084_v38 = vpop.xlane.xlu1 %2083 }
 0xa68   : > { %3635 = vrcp.f32 %v2084_v38 }
 0xa6b   : > { %v2253_v62 = vpop.permute.xlu1 %2252 }
 0xa6c   : > { %3423 = vmatpush3.bf16.msra.mxu1 %v2253_v62 }
 0xa6d   : > { %3438 = vmatprep.subr.bf16.mxu1 %v3693_v48 }
 0xa6f   : > { %3425 = vmatmul.mubr.msk.bf16.vlgmr.msra.gmra.mxu1 %vm825_vm3, %v2110_v49  ;;  %v2392_v39 = vpop.permute.xlu1 %2391 }
 0xa70   : > { %3439 = vmatpush3.bf16.xpose.msra.mxu1 %v2399_v2  ;;  %3440 = vmatprep.mubr.msk.bf16.mxu1 %vm3694_vm1, %v3693_v48 }
 0xa71   : > { %3444 = vmatprep.subr.bf16.mxu1 %v3693_v48 }
 0xa73   : > { %v2496_v3 = vpop.permute.xlu1 %2495 }
 0xa74   : > { %v2501_v51 = vsel %vm601_vm2, %v2496_v3, 0 }
 0xa75   : > { %v3636_v59 = vpop.eup %3635 }
 0xa76   : > { %v2102_v32 = vmul.f32 %v3636_v59, %v4320_v37  ;;  %v591_v37 = vld [vmem:[%s4547_s6 + $0x18] sm:$0xff] }
 0xa77   : > { %3441 = vmatmul.mubr.msk.bf16.vlgmr.msra.gmra.mxu1 %vm601_vm2, %v2392_v39  ;;  %v2547_v10 = vpop.permute.xlu1 %2546  ;;  %v4364_v46 = vpack.c.bf16 %v591_v37, %v590_v22  ;;  %v4387_v39 = vld [vmem:[%s4544_s3 + $0x38] sm:$0xff] }
 0xa78   : > { %3445 = vmatpush3.bf16.xpose.msra.mxu1 %v2450_v7  ;;  %v2109_v42 = vpack.c.bf16 %v2102_v32, %v2100_v4  ;;  %3446 = vmatprep.mubr.msk.bf16.mxu1 %vm3694_vm1, %v3693_v48  ;;  %v2552_v41 = vsel %vm601_vm2, %v2547_v10, 0 }
 0xa79   : > { %3456 = vmatprep.subr.bf16.mxu1 %v3693_v48  ;;  %3502 = vmatprep.subr.msk.bf16.mxu0 %vm1639_vm4, %v4364_v46  ;;  %v2316_v30 = vsel %vm1639_vm4, %v4364_v46, 0 }
 0xa7a   : > { %3419 = vmatmul.mubr.msk.bf16.vlgmr.msra.gmra.mxu0 %vm825_vm3, %v2109_v42 }
 0xa7b   : > { %v2545_v33 = vpop.permute.xlu1 %2544  ;;  %3429 = vmatpush3.bf16.msra.mxu0 %v2316_v30 }
 0xa7c   : > { %3450 = vmatprep.subr.bf16.mxu0 %v3693_v48 }
 0xa7f   : > { %3447 = vmatmul.mubr.msk.bf16.vlgmr.msra.gmra.mxu1 %vm601_vm2, %v2443_v11 }
 0xa80   : > { %3457 = vmatpush3.bf16.xpose.msra.mxu1 %v2552_v41  ;;  %3458 = vmatprep.mubr.msk.bf16.mxu1 %vm3694_vm1, %v3693_v48 }
 0xa81   : > { %3468 = vmatprep.subr.bf16.mxu1 %v3693_v48 }
 0xa87   : > { %3459 = vmatmul.mubr.msk.bf16.vlgmr.msra.gmra.mxu1 %vm601_vm2, %v2545_v33 }
 0xa88   : > { %3470 = vmatprep.mubr.msk.bf16.mxu1 %vm3694_vm1, %v3693_v48 }
 0xaf6   : > { %v2198_v13 = vpop.f32.mrf.mxu1 }
 0xaf8   : > { %v3414_v35 = vpop.f32.mrf.mxu1 }
 0xafa   : > { %v2201_v18 = vpop.f32.mrf.mxu1 }
 0xafb   : > { %v2300_v45 = vpack.c.bf16 %v2201_v18, %v2198_v13  ;;  %v3673_v18 = vld [vmem:[%s4549_s8 + $0x10] sm:$0xff] }
 0xafc   : > { %v3415_v20 = vpop.f32.mrf.mxu1 }
 0xb01   : > { %v2151_v16 = vpop.f32.mrf.mxu0 }
 0xb03   : > { %v3408_v1 = vpop.f32.mrf.mxu0 }
 0xb05   : > { %v2154_v44 = vpop.f32.mrf.mxu0 }
 0xb06   : > { %v2299_v25 = vpack.c.bf16 %v2154_v44, %v2151_v16 }
 0xb07   : > { %v3409_v50 = vpop.f32.mrf.mxu0 }
 0xb08   : > { %3430 = vmatprep.mubr.msk.bf16.mxu0 %vm601_vm2, %v2299_v25  ;;  %v3674_v25 = vld [vmem:[%s4549_s8 + $0x18] sm:$0xff]  ;;  %v2494_v50 = vpop.permute.xlu0 %2493 }
 0xb09   : > { %3431 = vmatmul.mubr.msk.bf16.vlgmr.msra.gmra.mxu0 %vm601_vm2, %v2300_v45 }
 0xb0a   : > { %3451 = vmatpush3.bf16.xpose.msra.mxu0 %v2501_v51 }
 0xb0b   : > { %3462 = vmatprep.subr.bf16.mxu0 %v3693_v48 }
 0xb2f   : > { %v2292_v40 = vpop.f32.mrf.mxu1 }
 0xb31   : > { %v3426_v31 = vpop.f32.mrf.mxu1 }
 0xb33   : > { %v2295_v27 = vpop.f32.mrf.mxu1 }
 0xb34   : > { %v2302_v11 = vpack.c.bf16 %v2295_v27, %v2292_v40 }
 0xb35   : > { %v3427_v53 = vpop.f32.mrf.mxu1 }
 0xb36   : > { %v1766_v53 = vadd.f32 %v4209_v54, %v4235_v6 }
 0xb37   : > { %v2435_v38 = vpop.f32.mrf.mxu1 }
 0xb38   : > { %v2595_v34 = vmul.f32 0.35355338, %v2435_v38 }
 0xb39   : > { %v3442_v62 = vpop.f32.mrf.mxu1 }
 0xb3a   : > { %v2606_v60 = vadd.f32 %v4381_v52, %v2595_v34  ;;  %v2245_v49 = vpop.f32.mrf.mxu0  ;;  %v1758_v34 = vadd.f32 %v4213_v55, %v4237_v9  ;;  %v1782_v55 = vadd.f32 %v4221_v56, %v4243_v19  ;;  %v1777_v56 = vadd.f32 %v4230_v28, %v4249_v26 }
 0xb3b   : > { %v2438_v2 = vpop.f32.mrf.mxu1 }
 0xb3c   : > { %v2596_v58 = vmul.f32 0.35355338, %v2438_v2  ;;  %v3420_v0 = vpop.f32.mrf.mxu0  ;;  %v2614_v59 = vadd.f32 %v4260_v47, %v2606_v60 }
 0xb3d   : > { %v3443_v3 = vpop.f32.mrf.mxu1  ;;  %v1761_v0 = vadd.f32 %v4217_v36, %v4241_v14  ;;  %v1785_v14 = vadd.f32 %v4228_v21, %v4247_v24 }
 0xb3e   : > { %v2607_v4 = vadd.f32 %v4387_v39, %v2596_v58  ;;  %v2248_v32 = vpop.f32.mrf.mxu0  ;;  %v2622_v7 = vsel %vm825_vm3, %v2614_v59, -inf }
 0xb3f   : > { %v2301_v42 = vpack.c.bf16 %v2248_v32, %v2245_v49  ;;  %2623 = vmax.xlane.f32.xlu0 %v2622_v7  ;;  %v2486_v10 = vpop.f32.mrf.mxu1  ;;  %v1769_v49 = vadd.f32 %v4215_v29, %v4239_v12  ;;  %v1774_v29 = vadd.f32 %v4226_v57, %v4245_v23 }
 0xb40   : > { %v2597_v41 = vmul.f32 0.35355338, %v2486_v10  ;;  %v3421_v22 = vpop.f32.mrf.mxu0  ;;  %v2615_v37 = vadd.f32 %v4268_v43, %v2607_v4 }
 0xb41   : > { %3434 = vmatprep.mubr.msk.bf16.mxu0 %vm601_vm2, %v2301_v42  ;;  %v3448_v30 = vpop.f32.mrf.mxu1 }
 0xb42   : > { %v2608_v33 = vadd.f32 %v4381_v52, %v2597_v41  ;;  %3435 = vmatmul.mubr.msk.bf16.gmra.mxu0 %vm601_vm2, %v2302_v11  ;;  %v2625_v47 = vsel %vm825_vm3, %v2615_v37, -inf }
 0xb43   : > { %2626 = vmax.xlane.f32.xlu1 %v2625_v47  ;;  %v2489_v13 = vpop.f32.mrf.mxu1  ;;  %3452 = vmatprep.mubr.msk.bf16.mxu0 %vm3694_vm1, %v3693_v48 }
 0xb44   : > { %v2598_v35 = vmul.f32 0.35355338, %v2489_v13  ;;  %v2616_v43 = vadd.f32 %v3673_v18, %v2608_v33 }
 0xb45   : > { %v3449_v20 = vpop.f32.mrf.mxu1 }
 0xb46   : > { %v2609_v16 = vadd.f32 %v4387_v39, %v2598_v35  ;;  %v2628_v1 = vsel %vm825_vm3, %v2616_v43, -inf }
 0xb47   : > { %2629 = vmax.xlane.f32.xlu0 %v2628_v1  ;;  %v2588_v44 = vpop.f32.mrf.mxu1 }
 0xb48   : > { %v2617_v45 = vadd.f32 %v3674_v25, %v2609_v16  ;;  %v3675_v25 = vld [vmem:[%s4549_s8 + $0x30] sm:$0xff] }
 0xb49   : > { %v3460_v51 = vpop.f32.mrf.mxu1 }
 0xb4a   : > { %3453 = vmatmul.mubr.msk.bf16.vlgmr.msra.gmra.mxu0 %vm601_vm2, %v2494_v50  ;;  %v2631_v40 = vsel %vm825_vm3, %v2617_v45, -inf }
 0xb4b   : > { %2632 = vmax.xlane.f32.xlu0 %v2631_v40  ;;  %v2591_v31 = vpop.f32.mrf.mxu1  ;;  %3464 = vmatprep.mubr.msk.bf16.mxu0 %vm3694_vm1, %v3693_v48 }
 0xb4d   : > { %v3461_v27 = vpop.f32.mrf.mxu1 }
 0xb4e   : > { %v3676_v27 = vld [vmem:[%s4549_s8 + $0x38] sm:$0xff] }
 0xbc8   : > { %v2624_v6 = vpop.xlane.xlu0 %2623 }
 0xbc9   : > { %v3432_v38 = vpop.f32.mrf.mxu0  ;;  %v2646_v9 = vsub.f32 %v2614_v59, %v2624_v6  ;;  %v2601_v59 = vmul.f32 0.35355338, %v2588_v44 }
 0xbca   : > { %v4415_v62 = vadd.f32 %v3432_v38, %v1766_v53 }
 0xbcb   : > { %v2352_v60 = vpop.f32.mrf.mxu0  ;;  %v2654_v11 = vmul.f32 1.442695, %v2646_v9  ;;  %v2612_v35 = vadd.f32 %v4381_v52, %v2601_v59 }
 0xbcc   : > { %v4419_v2 = vadd.f32 %v2352_v60, %v1758_v34  ;;  %v2627_v7 = vpop.xlane.xlu1 %2626 }
 0xbcd   : > { %v3433_v58 = vpop.f32.mrf.mxu0  ;;  %v2647_v10 = vsub.f32 %v2615_v37, %v2627_v7  ;;  %3637 = vpow2.f32 %v2654_v11 }
 0xbce   : > { %v4423_v3 = vadd.f32 %v3433_v58, %v1769_v49 }
 0xbcf   : > { %v2355_v4 = vpop.f32.mrf.mxu0  ;;  %v2656_v57 = vmul.f32 1.442695, %v2647_v10 }
 0xbd0   : > { %v4425_v54 = vadd.f32 %v2355_v4, %v1761_v0  ;;  %v2630_v32 = vpop.xlane.xlu0 %2629 }
 0xbd1   : > { %v2648_v41 = vsub.f32 %v2616_v43, %v2630_v32  ;;  %3639 = vpow2.f32 %v2656_v57  ;;  %v2602_v43 = vmul.f32 0.35355338, %v2591_v31 }
 0xbd3   : > { %v2658_v37 = vmul.f32 1.442695, %v2648_v41  ;;  %v2613_v50 = vadd.f32 %v4387_v39, %v2602_v43 }
 0xbd4   : > { %v2633_v30 = vpop.xlane.xlu0 %2632 }
 0xbd5   : > { %v2649_v47 = vsub.f32 %v2617_v45, %v2633_v30  ;;  %3641 = vpow2.f32 %v2658_v37  ;;  %v2620_v45 = vadd.f32 %v3675_v25, %v2612_v35  ;;  %v2621_v53 = vadd.f32 %v3676_v27, %v2613_v50 }
 0xbd7   : > { %v2660_v20 = vmul.f32 1.442695, %v2649_v47  ;;  %v2643_v60 = vsel %vm825_vm3, %v2621_v53, -inf }
 0xbd9   : > { %3643 = vpow2.f32 %v2660_v20 }
 0xbda   : > { %v4458_v38 = vpop.eup %3637 }
 0xbde   : > { %v3640_v34 = vpop.eup %3639 }
 0xbdf   : > { %v2673_v58 = vsel %vm825_vm3, %v3640_v34, 0.0 }
 0xc02   : > { %v3436_v42 = vpop.f32.mrf.mxu0 }
 0xc03   : > { %v4431_v12 = vadd.f32 %v3436_v42, %v1782_v55 }
 0xc04   : > { %v2368_v36 = vpop.f32.mrf.mxu0 }
 0xc05   : > { %v4435_v22 = vadd.f32 %v2368_v36, %v1774_v29 }
 0xc06   : > { %v3437_v33 = vpop.f32.mrf.mxu0 }
 0xc07   : > { %v4439_v19 = vadd.f32 %v3437_v33, %v1785_v14 }
 0xc08   : > { %v2371_v23 = vpop.f32.mrf.mxu0 }
 0xc09   : > { %v4441_v13 = vadd.f32 %v2371_v23, %v1777_v56 }
 0xc0a   : > { %v2537_v21 = vpop.f32.mrf.mxu0 }
 0xc0b   : > { %v2599_v24 = vmul.f32 0.35355338, %v2537_v21 }
 0xc0c   : > { %v3454_v18 = vpop.f32.mrf.mxu0 }
 0xc0d   : > { %v2610_v28 = vadd.f32 %v4381_v52, %v2599_v24 }
 0xc0e   : > { %v2540_v26 = vpop.f32.mrf.mxu0 }
 0xc0f   : > { %v2600_v16 = vmul.f32 0.35355338, %v2540_v26  ;;  %v2618_v1 = vadd.f32 %v4278_v63, %v2610_v28  ;;  %v2640_v63 = vsel %vm825_vm3, %v2620_v45, -inf }
 0xc10   : > { %v3455_v44 = vpop.f32.mrf.mxu0 }
 0xc11   : > { %v2611_v51 = vadd.f32 %v4387_v39, %v2600_v16  ;;  %v2634_v40 = vsel %vm825_vm3, %v2618_v1, -inf  ;;  %v2670_v39 = vsel %vm825_vm3, %v4458_v38, 0.0 }
 0xc12   : > { %2635 = vmax.xlane.f32.xlu0 %v2634_v40 }
 0xc13   : > { %v2619_v52 = vadd.f32 %v4284_v61, %v2611_v51  ;;  %v3642_v61 = vpop.eup %3641 }
 0xc14   : > { %v2676_v49 = vsel %vm825_vm3, %v3642_v61, 0.0  ;;  %v3644_v0 = vpop.eup %3643 }
 0xc15   : > { %v2637_v31 = vsel %vm825_vm3, %v2619_v52, -inf  ;;  %v2679_v4 = vsel %vm825_vm3, %v3644_v0, 0.0 }
 0xc16   : > { %2638 = vmax.xlane.f32.xlu1 %v2637_v31  ;;  %2641 = vmax.xlane.f32.xlu0 %v2640_v63 }
 0xc1a   : > { %2671 = vadd.xlane.f32.xlu0 %v2670_v39  ;;  %2644 = vmax.xlane.f32.xlu1 %v2643_v60 }
 0xc1e   : > { %2677 = vadd.xlane.f32.xlu0 %v2676_v49  ;;  %2674 = vadd.xlane.f32.xlu1 %v2673_v58  ;;  %v2907_v58 = vrot.slane %v4364_v46, 4 }
 0xc22   : > { %2680 = vadd.xlane.f32.xlu1 %v2679_v4 }
 0xc9b   : > { %v2636_v6 = vpop.xlane.xlu0 %2635 }
 0xc9c   : > { %v2650_v32 = vsub.f32 %v2618_v1, %v2636_v6 }
 0xc9e   : > { %v2662_v29 = vmul.f32 1.442695, %v2650_v32 }
 0xc9f   : > { %v2639_v55 = vpop.xlane.xlu1 %2638  ;;  %v2642_v9 = vpop.xlane.xlu0 %2641 }
 0xca0   : > { %v2652_v7 = vsub.f32 %v2620_v45, %v2642_v9  ;;  %v2651_v57 = vsub.f32 %v2619_v52, %v2639_v55 }
 0xca2   : > { %v2666_v42 = vmul.f32 1.442695, %v2652_v7  ;;  %v2664_v23 = vmul.f32 1.442695, %v2651_v57 }
 0xca3   : > { %v2645_v10 = vpop.xlane.xlu1 %2644  ;;  %v2672_v24 = vpop.xlane.xlu0 %2671 }
 0xca4   : > { %v2653_v36 = vsub.f32 %v2621_v53, %v2645_v10  ;;  %3645 = vpow2.f32 %v2666_v42 }
 0xca5   : > { %3647 = vpow2.f32 %v2662_v29 }
 0xca6   : > { %v2668_v14 = vmul.f32 1.442695, %v2653_v36 }
 0xca7   : > { %v2675_v21 = vpop.xlane.xlu1 %2674  ;;  %v2678_v18 = vpop.xlane.xlu0 %2677 }
 0xca8   : > { %3649 = vpow2.f32 %v2668_v14 }
 0xca9   : > { %3651 = vpow2.f32 %v2664_v23 }
 0xcab   : > { %v2681_v35 = vpop.xlane.xlu1 %2680 }
 0xcac   : > { %3653 = vrcp.f32 %v2681_v35 }
 0xcad   : > { %3655 = vrcp.f32 %v2675_v21  ;;  %v3157_v21 = vld [vmem:[%s4548_s7] ss:$0 sm:$0xff] }
 0xcae   : > { %3657 = vrcp.f32 %v2678_v18 }
 0xcaf   : > { %3659 = vrcp.f32 %v2672_v24 }
 0xcb1   : > { %v3646_v11 = vpop.eup %3645 }
 0xcb2   : > { %v2688_v41 = vsel %vm825_vm3, %v3646_v11, 0.0  ;;  %v4467_v30 = vpop.eup %3647 }
 0xcb3   : > { %2689 = vadd.xlane.f32.xlu0 %v2688_v41  ;;  %v2682_v59 = vsel %vm825_vm3, %v4467_v30, 0.0 }
 0xcb5   : > { %v3650_v33 = vpop.eup %3649 }
 0xcb6   : > { %v2691_v56 = vsel %vm825_vm3, %v3650_v33, 0.0  ;;  %v3652_v37 = vpop.eup %3651 }
 0xcb7   : > { %2692 = vadd.xlane.f32.xlu1 %v2691_v56  ;;  %2683 = vadd.xlane.f32.xlu0 %v2682_v59  ;;  %v2685_v47 = vsel %vm825_vm3, %v3652_v37, 0.0 }
 0xcc8   : > { %2761 = vrot.lane.b32.xlu1 %v3869_v5, %s3705_s28 }
 0xccc   : > { %2808 = vrot.lane.b32.xlu1 %v3875_v15, %s3705_s28  ;;  %v3654_v15 = vpop.eup %3653 }
 0xccd   : > { %2714 = vrot.lane.b32.xlu0 %v3871_v8, %s3705_s28  ;;  %v3656_v8 = vpop.eup %3655  ;;  %v2701_v16 = vmul.f32 %v3654_v15, %v3644_v0  ;;  %v2921_v0 = vsel %vm1639_vm4, %v2907_v58, 0 }
 0xcce   : > { %v3658_v20 = vpop.eup %3657  ;;  %v2697_v1 = vmul.f32 %v3656_v8, %v3640_v34 }
 0xccf   : > { %v3660_v26 = vpop.eup %3659  ;;  %v2699_v25 = vmul.f32 %v3658_v20, %v3642_v61 }
 0xcd0   : > { %v2695_v45 = vmul.f32 %v3660_v26, %v4458_v38 }
 0xcd1   : > { %v2711_v50 = vpack.c.bf16 %v2701_v16, %v2699_v25  ;;  %v3680_v25 = vld [vmem:[%s3772_s15 + $0x18] sm:$0xff] }
 0xcd2   : > { %v2710_v51 = vpack.c.bf16 %v2697_v1, %v2695_v45  ;;  %v3679_v1 = vld [vmem:[%s3772_s15 + $0x8] sm:$0xff] }
 0xcf0   : > { %2686 = vadd.xlane.f32.xlu1 %v2685_v47 }
 0xd01   : > { %2855 = vrot.lane.b32.xlu1 %v3878_v17, %s3705_s28 }
 0xd3c   : > { %v2690_v5 = vpop.xlane.xlu0 %2689 }
 0xd40   : > { %v2693_v43 = vpop.xlane.xlu1 %2692  ;;  %v2684_v28 = vpop.xlane.xlu0 %2683 }
 0xd41   : > { %3661 = vrcp.f32 %v2693_v43  ;;  %v3677_v43 = vld [vmem:[%s3772_s15] sm:$0xff] }
 0xd42   : > { %3663 = vrcp.f32 %v2690_v5 }
 0xd43   : > { %3665 = vrcp.f32 %v2684_v28  ;;  %v3678_v28 = vld [vmem:[%s3772_s15 + $0x10] sm:$0xff] }
 0xd44   : > { %v2762_v44 = vpop.permute.xlu1 %2761  ;;  %v2715_v17 = vpop.permute.xlu0 %2714 }
 0xd45   : > { %3469 = vmatpush3.bf16.msra.mxu1 %v2762_v44  ;;  %3463 = vmatpush3.bf16.msra.mxu0 %v2715_v17 }
 0xd46   : > { %3480 = vmatprep.subr.bf16.mxu1 %v3693_v48  ;;  %3474 = vmatprep.subr.bf16.mxu0 %v3693_v48 }
 0xd48   : > { %3471 = vmatmul.mubr.msk.bf16.vlgmr.msra.gmra.mxu1 %vm825_vm3, %v2711_v50  ;;  %v2809_v40 = vpop.permute.xlu1 %2808  ;;  %3465 = vmatmul.mubr.msk.bf16.vlgmr.msra.gmra.mxu0 %vm825_vm3, %v2710_v51 }
 0xd49   : > { %3482 = vmatprep.mubr.msk.bf16.mxu1 %vm3694_vm1, %v3693_v48  ;;  %3475 = vmatpush3.bf16.msra.mxu0 %v2809_v40 }
 0xd4a   : > { %3476 = vmatprep.mubr.msk.bf16.mxu0 %vm3694_vm1, %v3693_v48  ;;  %3503 = vmatprep.subr.msk.bf16.mxu0 %vm1639_vm4, %v2907_v58 }
 0xd4e   : > { %v3662_v52 = vpop.eup %3661 }
 0xd4f   : > { %v3664_v63 = vpop.eup %3663  ;;  %v2709_v27 = vmul.f32 %v3662_v52, %v3650_v33 }
 0xd50   : > { %v2707_v38 = vmul.f32 %v3664_v63, %v3646_v11  ;;  %v3666_v39 = vpop.eup %3665 }
 0xd51   : > { %v2703_v61 = vmul.f32 %v3666_v39, %v4467_v30  ;;  %v3682_v39 = vld [vmem:[%s3772_s15 + $0x30] sm:$0xff] }
 0xd52   : > { %v2713_v34 = vpack.c.bf16 %v2709_v27, %v2707_v38 }
 0xd79   : > { %v2687_v31 = vpop.xlane.xlu1 %2686 }
 0xd7a   : > { %3667 = vrcp.f32 %v2687_v31 }
 0xd7d   : > { %v2856_v53 = vpop.permute.xlu1 %2855 }
 0xd7e   : > { %3481 = vmatpush3.bf16.msra.mxu1 %v2856_v53  ;;  %v3681_v53 = vld [vmem:[%s3772_s15 + $0x20] sm:$0xff] }
 0xd81   : > { %3483 = vmatmul.mubr.msk.bf16.vlgmr.msra.gmra.mxu1 %vm825_vm3, %v2713_v34 }
 0xd87   : > { %v3668_v60 = vpop.eup %3667 }
 0xd88   : > { %v2705_v49 = vmul.f32 %v3668_v60, %v3652_v37 }
 0xd8a   : > { %v2712_v48 = vpack.c.bf16 %v2705_v49, %v2703_v61 }
 0xd8c   : > { %3477 = vmatmul.mubr.msk.bf16.vlgmr.msra.gmra.mxu0 %vm825_vm3, %v2712_v48  ;;  %v3684_v48 = vld [vmem:[%s3772_s15 + $0x38] sm:$0xff] }
 0xd8d   : > { %3487 = vmatpush3.bf16.msra.mxu0 %v2921_v0 }
 0xe08   : > { %v2801_v4 = vpop.f32.mrf.mxu1  ;;  %v2754_v6 = vpop.f32.mrf.mxu0 }
 0xe0a   : > { %v3472_v32 = vpop.f32.mrf.mxu1  ;;  %v3466_v55 = vpop.f32.mrf.mxu0 }
 0xe0c   : > { %v2804_v9 = vpop.f32.mrf.mxu1  ;;  %v2757_v7 = vpop.f32.mrf.mxu0 }
 0xe0d   : > { %v2903_v42 = vpack.c.bf16 %v2804_v9, %v2801_v4  ;;  %v2902_v29 = vpack.c.bf16 %v2757_v7, %v2754_v6 }
 0xe0e   : > { %v3473_v10 = vpop.f32.mrf.mxu1  ;;  %v3467_v36 = vpop.f32.mrf.mxu0 }
 0xe0f   : > { %3488 = vmatprep.mubr.msk.bf16.mxu0 %vm601_vm2, %v2902_v29 }
 0xe10   : > { %3489 = vmatmul.mubr.msk.bf16.vlgmr.msra.gmra.mxu0 %vm601_vm2, %v2903_v42 }
 0xe41   : > { %v2895_v46 = vpop.f32.mrf.mxu1 }
 0xe43   : > { %v3484_v14 = vpop.f32.mrf.mxu1 }
 0xe45   : > { %v2898_v11 = vpop.f32.mrf.mxu1 }
 0xe46   : > { %v2905_v57 = vpack.c.bf16 %v2898_v11, %v2895_v46 }
 0xe47   : > { %v3485_v41 = vpop.f32.mrf.mxu1 }
 0xe4c   : > { %v2848_v30 = vpop.f32.mrf.mxu0 }
 0xe4e   : > { %v3478_v33 = vpop.f32.mrf.mxu0 }
 0xe50   : > { %v2851_v56 = vpop.f32.mrf.mxu0 }
 0xe51   : > { %v2904_v59 = vpack.c.bf16 %v2851_v56, %v2848_v30 }
 0xe52   : > { %v3479_v23 = vpop.f32.mrf.mxu0 }
 0xe53   : > { %3492 = vmatprep.mubr.msk.bf16.mxu0 %vm601_vm2, %v2904_v59 }
 0xe54   : > { %3493 = vmatmul.mubr.msk.bf16.gmra.mxu0 %vm601_vm2, %v2905_v57 }
 0xed0   : > { %v3490_v37 = vpop.f32.mrf.mxu0 }
 0xed1   : > { %v2990_v47 = vadd.f32 %v3490_v37, %v4415_v62 }
 0xed2   : > { %v2957_v24 = vpop.f32.mrf.mxu0 }
 0xed3   : > { %v2988_v35 = vadd.f32 %v2957_v24, %v4419_v2  ;;  %v3005_v18 = vadd.f32 %v3157_v21, %v2990_v47 }
 0xed4   : > { %v3491_v5 = vpop.f32.mrf.mxu0 }
 0xed5   : > { %v3003_v15 = vadd.f32 %v3157_v21, %v2988_v35  ;;  %v2991_v8 = vadd.f32 %v3491_v5, %v4423_v3  ;;  %v3013_v26 = vadd.f32 %v3678_v28, %v3005_v18 }
 0xed6   : > { %v2960_v62 = vpop.f32.mrf.mxu0 }
 0xed7   : > { %v3011_v2 = vadd.f32 %v3677_v43, %v3003_v15  ;;  %v2989_v20 = vadd.f32 %v2960_v62, %v4425_v54  ;;  %v3006_v16 = vadd.f32 %v3157_v21, %v2991_v8  ;;  %3021 = vst.msk [vmem:[%s4507_s16 + $0x10] sm:$0xff] %vm350_vm0, %v3013_v26 }
 0xed9   : > { %3019 = vst.msk [vmem:[%s4507_s16] sm:$0xff] %vm350_vm0, %v3011_v2  ;;  %v3004_v3 = vadd.f32 %v3157_v21, %v2989_v20  ;;  %v3014_v17 = vadd.f32 %v3680_v25, %v3006_v16 }
 0xedb   : > { %v3012_v44 = vadd.f32 %v3679_v1, %v3004_v3  ;;  %3022 = vst.msk [vmem:[%s4507_s16 + $0x18] sm:$0xff] %vm350_vm0, %v3014_v17 }
 0xedd   : > { %3020 = vst.msk [vmem:[%s4507_s16 + $0x8] sm:$0xff] %vm350_vm0, %v3012_v44 }
 0xf14   : > { %v3494_v54 = vpop.f32.mrf.mxu0 }
 0xf15   : > { %v2994_v45 = vadd.f32 %v3494_v54, %v4431_v12 }
 0xf16   : > { %v2973_v50 = vpop.f32.mrf.mxu0 }
 0xf17   : > { %v2992_v51 = vadd.f32 %v2973_v50, %v4435_v22  ;;  %v3009_v40 = vadd.f32 %v3157_v21, %v2994_v45  ;;  %v3683_v22 = vld [vmem:[%s3772_s15 + $0x28] sm:$0xff] }
 0xf18   : > { %v3495_v52 = vpop.f32.mrf.mxu0 }
 0xf19   : > { %v3007_v31 = vadd.f32 %v3157_v21, %v2992_v51  ;;  %v2995_v63 = vadd.f32 %v3495_v52, %v4439_v19  ;;  %v3017_v12 = vadd.f32 %v3682_v39, %v3009_v40 }
 0xf1a   : > { %v2976_v27 = vpop.f32.mrf.mxu0 }
 0xf1b   : > { %v3015_v38 = vadd.f32 %v3681_v53, %v3007_v31  ;;  %v2993_v34 = vadd.f32 %v2976_v27, %v4441_v13  ;;  %v3010_v60 = vadd.f32 %v3157_v21, %v2995_v63  ;;  %3025 = vst.msk [vmem:[%s4507_s16 + $0x30] sm:$0xff] %vm350_vm0, %v3017_v12 }
 0xf1d   : > { %3023 = vst.msk [vmem:[%s4507_s16 + $0x20] sm:$0xff] %vm350_vm0, %v3015_v38  ;;  %v3008_v61 = vadd.f32 %v3157_v21, %v2993_v34  ;;  %v3018_v58 = vadd.f32 %v3684_v48, %v3010_v60 }
 0xf1f   : > { %v3016_v49 = vadd.f32 %v3683_v22, %v3008_v61  ;;  %3026 = vst.msk [vmem:[%s4507_s16 + $0x38] sm:$0xff] %vm350_vm0, %v3018_v58 }
 0xf21   : > { %3024 = vst.msk [vmem:[%s4507_s16 + $0x28] sm:$0xff] %vm350_vm0, %v3016_v49 }
 0xf22 PF: > { %s19_s30 = sadd.s32 1, %s3691_s30  }
 0xf23   : > { %p16_p4 = scmp.ge.s32.totalorder %s19_s30, 4  }
 0xf25   :  { %18 = sbr.rel (!%p16_p4) target bundleno = 1 (0x1), region = 89 }

</bundles_post_ra>
